<compile_context>
chip_gen: v5e
topology: v5e:2x2
jax: 0.10.0
libtpu: 0.0.40
codegen_flags: <defaults>
</compile_context>

<pallas_src>
import functools

import numpy as np
import jax
import jax.numpy as jnp
from jax import lax
from jax.experimental import pallas as pl
from jax.experimental.pallas import tpu as pltpu


# ---------------------------------------------------------------------------
# helpers
# ---------------------------------------------------------------------------
def _round_up(x, m):
    return (x + m - 1) // m * m


def _key_stream(key):
    while True:
        key, sub = jax.random.split(key)
        yield sub


def _conv_select_matrix(hi, wi, ho, wo, kh, kw, stride, ph, pw):
    """0/1 gather matrix S of shape (kh*kw*ho*wo, hi*wi).

    Row k*Mo + o is the one-hot of the input pixel feeding tap k of output o
    (all-zero if the tap falls in the zero padding), so  S @ x_flat  yields the
    kh*kw shifted/strided tap images stacked along rows.  Built once on host.
    """
    mo, mi = ho * wo, hi * wi
    s = np.zeros((kh * kw * mo, mi), np.float32)
    for dh in range(kh):
        for dw in range(kw):
            k = dh * kw + dw
            for oh in range(ho):
                ih = stride * oh + dh - ph
                if not (0 <= ih < hi):
                    continue
                for ow in range(wo):
                    iw = stride * ow + dw - pw
                    if 0 <= iw < wi:
                        s[k * mo + oh * wo + ow, ih * wi + iw] = 1.0
    return s


# ---------------------------------------------------------------------------
# the fused whole-network Pallas kernel
# ---------------------------------------------------------------------------
def _fifnet_kernel(patches_ref, stem_w_ref, bias_ref, w1_ref, wd_ref, wdw_ref,
                   *tail, spatial, hid_b):
    """One batch element per grid step; all activations stay in VMEM/vregs.

    tail = (s_gc_0, s_sp_0, s_gc_1, s_sp_1, ..., wcls, out)
    spatial: tuple of (Mi, Mo) flat spatial sizes per FiFModule.
    hid_b:   hid_channels // 2 (channel count of each lo/hi half).
    """
    n_mod = len(spatial)
    sel_refs = tail[:2 * n_mod]
    wcls_ref = tail[2 * n_mod]
    out_ref = tail[2 * n_mod + 1]

    dot = functools.partial(jnp.dot, preferred_element_type=jnp.float32)
    relu = lambda v: jnp.maximum(v, 0.0)
    ht03 = lambda v: jnp.clip(v, 0.0, 3.0)

    # --- static consumption counters (mirror the wrapper packing order) ----
    ctr = {"bias": 0, "w1": 0, "wd": 0, "dw": 0}

    def bias():                                   # next (1, hid_b) bias row
        r = ctr["bias"]; ctr["bias"] += 1
        return bias_ref[pl.ds(r, 1), :]

    def w1x1():                                   # next (2*hid_b, hid_b) weight
        i = ctr["w1"]; ctr["w1"] += 1
        w = w1_ref[i]
        return w[:hid_b], w[hid_b:]

    def wdense_idx():                             # next dense (3,hid_b,hid_b)
        i = ctr["wd"]; ctr["wd"] += 1
        return i

    def wdw(rows):                                # next depthwise weight group
        r = ctr["dw"]; ctr["dw"] += rows
        return wdw_ref[pl.ds(r, rows), :]         # (rows, hid_b), 8-aligned

    # ---- stem 3x3 dense conv (im2col patches built in the wrapper) --------
    patches = patches_ref[0]                      # (H*W, 9*Cin)
    a_lo = dot(patches, stem_w_ref[0]) + bias()   # channels [0:hid_b)
    a_hi = dot(patches, stem_w_ref[1]) + bias()   # channels [hid_b:2*hid_b)

    # ---- FiFModules --------------------------------------------------------
    for m, (mi, mo) in enumerate(spatial):
        s_gc = sel_refs[2 * m][...]               # (9*mo, mi)  3x3 stride-2 taps
        s_sp = sel_refs[2 * m + 1][...]           # (6*mo, mo)  [(1,3) ; (3,1)] taps

        wgc_lo = wdw(16); bgc_lo = bias()         # 9 taps used, padded to 16 rows
        wgc_hi = wdw(16); bgc_hi = bias()

        def dw_stride2(a, w, b):                  # depthwise 3x3, stride 2, pad 1
            taps = dot(s_gc, a)                   # (9*mo, hid_b)
            acc = taps[0:mo] * w[0:1]
            for k in range(1, 9):
                acc = acc + taps[k * mo:(k + 1) * mo] * w[k:k + 1]
            return ht03(acc + b)

        g_lo = dw_stride2(a_lo, wgc_lo, bgc_lo)
        g_hi = dw_stride2(a_hi, wgc_hi, bgc_hi)

        def fifblock(in_lo, in_hi):
            # 1x1 convs on the (lo, hi) pair = split-weight matmuls (no concat)
            wa_lo, wa_hi = w1x1(); ba = bias()    # conv_a
            wb_lo, wb_hi = w1x1(); bb = bias()    # conv_b
            x1 = relu(dot(in_lo, wa_lo) + dot(in_hi, wa_hi) + ba)
            x2 = relu(dot(in_lo, wb_lo) + dot(in_hi, wb_hi) + bb)

            # all (1,3)+(3,1) shifted taps of both branches, in-VMEM
            t1 = dot(s_sp, x1)                    # (6*mo, hid_b)
            t2 = dot(s_sp, x2)

            # depthwise (1,3) / (3,1) on x1
            w13 = wdw(8); b13 = bias()
            acc = t1[0:mo] * w13[0:1]
            for k in range(1, 3):
                acc = acc + t1[k * mo:(k + 1) * mo] * w13[k:k + 1]
            x11 = ht03(acc + b13)

            w31 = wdw(8); b31 = bias()
            acc = t1[3 * mo:4 * mo] * w31[0:1]
            for k in range(1, 3):
                acc = acc + t1[(3 + k) * mo:(4 + k) * mo] * w31[k:k + 1]
            x12 = ht03(acc + b31)

            # dense (1,3) / (3,1) on x2 (tap-accumulated matmuls)
            i13 = wdense_idx(); bd13 = bias()
            acc = dot(t2[0:mo], wd_ref[i13, 0])
            for k in range(1, 3):
                acc = acc + dot(t2[k * mo:(k + 1) * mo], wd_ref[i13, k])
            x21 = relu(acc + bd13)

            i31 = wdense_idx(); bd31 = bias()
            acc = dot(t2[3 * mo:4 * mo], wd_ref[i31, 0])
            for k in range(1, 3):
                acc = acc + dot(t2[(3 + k) * mo:(4 + k) * mo], wd_ref[i31, k])
            x22 = relu(acc + bd31)

            # 1x1 convs over the channel-concats, again via split weights
            wae_lo, wae_hi = w1x1(); bae = bias() # c_a_end
            wbe_lo, wbe_hi = w1x1(); bbe = bias() # c_b_end
            o_lo = relu(dot(x11, wae_lo) + dot(x12, wae_hi) + bae)
            o_hi = relu(dot(x21, wbe_lo) + dot(x22, wbe_hi) + bbe)
            return o_lo, o_hi

        fa_lo, fa_hi = fifblock(g_lo, g_hi)                   # fif_a
        a_lo, a_hi = fifblock(fa_lo + g_lo, fa_hi + g_hi)     # residual + fif_b

    # ---- global average pool + folded classifier ---------------------------
    w_lo = wcls_ref[pl.ds(0, hid_b), :]           # (hid_b, NP) = W1[:hid_b] @ W2pad
    w_hi = wcls_ref[pl.ds(hid_b, hid_b), :]
    b_c = wcls_ref[pl.ds(2 * hid_b, 1), :]        # (1, NP) = b1 @ W2pad + b2pad
    cls = dot(a_lo, w_lo) + dot(a_hi, w_hi)       # (M_last, NP)
    logits = jnp.sum(cls, axis=0, keepdims=True) * (1.0 / cls.shape[0]) + b_c
    out_ref[...] = jnp.broadcast_to(logits, out_ref.shape).astype(out_ref.dtype)

    # trace-time sanity: every packed operand row consumed exactly once
    assert ctr["bias"] == 2 + 18 * n_mod, ctr
    assert ctr["w1"] == 8 * n_mod, ctr
    assert ctr["wd"] == 4 * n_mod, ctr
    assert ctr["dw"] == 64 * n_mod, ctr


# ---------------------------------------------------------------------------
# forward wrapper: packs weights, builds selection matrices, one pallas_call
# ---------------------------------------------------------------------------
def fifnet_forward(params, x_nchw):
    # hocs=False path only.
    # TODO(synk): CumulantEncoder (hocs=True) is not defined in the source module.
    x = jnp.transpose(x_nchw, (0, 2, 3, 1)).astype(jnp.float32)   # NCHW -> NHWC
    n, h, w, cin = x.shape
    hid = params["c_w"].shape[1]
    hid_b = hid // 2
    classes = params["fc2_w"].shape[1]
    np_lanes = _round_up(classes, 128)            # lane-dense output slab

    # --- stem im2col patches (only network-input prep done outside) --------
    xp = jnp.pad(x, ((0, 0), (1, 1), (1, 1), (0, 0)))
    patches = jnp.concatenate(
        [xp[:, dh:dh + h, dw:dw + w, :] for dh in range(3) for dw in range(3)],
        axis=-1).reshape(n, h * w, 9 * cin)

    # --- static geometry + 0/1 selection matrices per module ---------------
    spatial, sel_arrs = [], []
    hi_, wi_ = h, w
    for _ in params["mods"]:
        ho, wo = (hi_ - 1) // 2 + 1, (wi_ - 1) // 2 + 1
        spatial.append((hi_ * wi_, ho * wo))
        s_gc = _conv_select_matrix(hi_, wi_, ho, wo, 3, 3, 2, 1, 1)
        s_13 = _conv_select_matrix(ho, wo, ho, wo, 1, 3, 1, 0, 1)
        s_31 = _conv_select_matrix(ho, wo, ho, wo, 3, 1, 1, 1, 0)
        sel_arrs += [jnp.asarray(s_gc),
                     jnp.asarray(np.concatenate([s_13, s_31], axis=0))]
        hi_, wi_ = ho, wo

    # --- pack per-layer params into a handful of dense operands -------------
    # (packing order below must mirror the kernel's consumption order)
    bias_rows = [params["c_b"][:hid_b], params["c_b"][hid_b:]]
    w1_list, wd_list, dw_rows = [], [], []
    for mp in params["mods"]:
        gw, gb = mp["gc_w"], mp["gc_b"]
        dw_rows.append(jnp.pad(gw[:, :hid_b], ((0, 7), (0, 0))))   # 9 -> 16 rows
        dw_rows.append(jnp.pad(gw[:, hid_b:], ((0, 7), (0, 0))))
        bias_rows += [gb[:hid_b], gb[hid_b:]]
        for bname in ("fif_a", "fif_b"):
            bp = mp[bname]
            w1_list += [bp["conv_a_w"], bp["conv_b_w"],
                        bp["c_a_end_w"], bp["c_b_end_w"]]
            wd_list += [bp["c13_w"].reshape(3, hid_b, hid_b),
                        bp["c31_w"].reshape(3, hid_b, hid_b)]
            dw_rows.append(jnp.pad(bp["gc13_w"], ((0, 5), (0, 0))))  # 3 -> 8 rows
            dw_rows.append(jnp.pad(bp["gc31_w"], ((0, 5), (0, 0))))
            bias_rows += [bp["conv_a_b"], bp["conv_b_b"],
                          bp["gc13_b"], bp["gc31_b"],
                          bp["c13_b"], bp["c31_b"],
                          bp["c_a_end_b"], bp["c_b_end_b"]]

    n_bias = len(bias_rows)
    biases = jnp.stack(bias_rows, axis=0)
    biases = jnp.pad(biases, ((0, _round_up(n_bias, 8) - n_bias), (0, 0)))
    w1x1 = jnp.stack(w1_list, axis=0)             # (8*n_mod, 2*hid_b, hid_b)
    wdense = jnp.stack(wd_list, axis=0)           # (4*n_mod, 3, hid_b, hid_b)
    wdw = jnp.concatenate(dw_rows, axis=0)        # (64*n_mod, hid_b)
    stem_w = jnp.stack([params["c_w"][:, :hid_b], params["c_w"][:, hid_b:]], 0)

    # --- classifier: fold Linear(hid,128) . Linear(128,classes), lane-pad ---
    w2p = jnp.pad(params["fc2_w"], ((0, 0), (0, np_lanes - classes)))
    b2p = jnp.pad(params["fc2_b"].reshape(1, -1), ((0, 0), (0, np_lanes - classes)))
    w12 = params["fc1_w"] @ w2p                               # (hid, NP)
    b12 = params["fc1_b"].reshape(1, -1) @ w2p + b2p          # (1, NP)
    wcls = jnp.concatenate([w12, b12], axis=0)                # (hid+1, NP)
    wcls = jnp.pad(wcls, ((0, _round_up(hid + 1, 8) - (hid + 1)), (0, 0)))

    const_ops = [stem_w, biases, w1x1, wdense, wdw] + sel_arrs + [wcls]

    in_specs = [pl.BlockSpec((1, h * w, 9 * cin), lambda i: (i, 0, 0))]
    for a in const_ops:
        # full-array blocks, constant index map -> DMA'd once, stay resident
        in_specs.append(pl.BlockSpec(a.shape, lambda i, nd=a.ndim: (0,) * nd))

    out = pl.pallas_call(
        functools.partial(_fifnet_kernel, spatial=tuple(spatial), hid_b=hid_b),
        out_shape=jax.ShapeDtypeStruct((n * 8, np_lanes), jnp.float32),
        grid=(n,),
        in_specs=in_specs,
        out_specs=pl.BlockSpec((8, np_lanes), lambda i: (i, 0)),
        compiler_params=pltpu.CompilerParams(dimension_semantics=("parallel",)),
    )(patches, *const_ops)
    return out.reshape(n, 8, np_lanes)[:, 0, :classes]


# ---------------------------------------------------------------------------
# deterministic synthetic parameter init (shapes follow the nn.Module __init__)
# ---------------------------------------------------------------------------
def init_fifblock(ks, cin, hid):
    def w(shape, scale=0.1):
        return scale * jax.random.normal(next(ks), shape, jnp.float32)
    return {
        "conv_a_w": w((cin, hid)), "conv_a_b": w((hid,), 0.01),
        "conv_b_w": w((cin, hid)), "conv_b_b": w((hid,), 0.01),
        "gc13_w": w((3, hid)), "gc13_b": w((hid,), 0.01),          # (1,3) depthwise
        "gc31_w": w((3, hid)), "gc31_b": w((hid,), 0.01),          # (3,1) depthwise
        "c13_w": w((3 * hid, hid)), "c13_b": w((hid,), 0.01),      # (1,3) dense
        "c31_w": w((3 * hid, hid)), "c31_b": w((hid,), 0.01),      # (3,1) dense
        "c_a_end_w": w((2 * hid, hid)), "c_a_end_b": w((hid,), 0.01),
        "c_b_end_w": w((2 * hid, hid)), "c_b_end_b": w((hid,), 0.01),
    }


def init_fifmodule(ks, hid):
    def w(shape, scale=0.1):
        return scale * jax.random.normal(next(ks), shape, jnp.float32)
    return {
        "gc_w": w((9, hid)), "gc_b": w((hid,), 0.01),               # 3x3 depthwise s2
        "fif_a": init_fifblock(ks, hid, hid // 2),
        "fif_b": init_fifblock(ks, hid, hid // 2),
    }


def init_fifnet(key, classes, in_channels=1, hid=32, n_modules=2):
    ks = _key_stream(key)
    def w(shape, scale=0.1):
        return scale * jax.random.normal(next(ks), shape, jnp.float32)
    return {
        "c_w": w((9 * in_channels, hid)), "c_b": w((hid,), 0.01),   # 3x3 dense stem
        "mods": [init_fifmodule(ks, hid) for _ in range(n_modules)],
        "fc1_w": w((hid, 128)), "fc1_b": w((128,), 0.01),
        "fc2_w": w((128, classes)), "fc2_b": w((classes,), 0.01),
    }


# ---------------------------------------------------------------------------
# pure-JAX reference (lax.conv) for correctness checking
# ---------------------------------------------------------------------------
def _ref_conv(x, w_flat, b, kh, kw, stride=(1, 1), padding=((0, 0), (0, 0))):
    C = x.shape[-1]
    cout = w_flat.shape[1]
    w = w_flat.reshape(kh, kw, C, cout)
    y = lax.conv_general_dilated(x, w, stride, padding,
                                 dimension_numbers=("NHWC", "HWIO", "NHWC"),
                                 precision=lax.Precision.HIGHEST)
    return y + b


def _ref_dwconv(x, w_flat, b, kh, kw, stride=(1, 1), padding=((0, 0), (0, 0))):
    C = x.shape[-1]
    w = w_flat.reshape(kh, kw, 1, C)
    y = lax.conv_general_dilated(x, w, stride, padding,
                                 dimension_numbers=("NHWC", "HWIO", "NHWC"),
                                 feature_group_count=C,
                                 precision=lax.Precision.HIGHEST)
    return y + b


def _ref_fifblock(p, x):
    relu = lambda v: jnp.maximum(v, 0.0)
    ht = lambda v: jnp.clip(v, 0.0, 3.0)
    x1 = relu(_ref_conv(x, p["conv_a_w"], p["conv_a_b"], 1, 1))
    x2 = relu(_ref_conv(x, p["conv_b_w"], p["conv_b_b"], 1, 1))
    x11 = ht(_ref_dwconv(x1, p["gc13_w"], p["gc13_b"], 1, 3, padding=((0, 0), (1, 1))))
    x12 = ht(_ref_dwconv(x1, p["gc31_w"], p["gc31_b"], 3, 1, padding=((1, 1), (0, 0))))
    x1c = jnp.concatenate([x11, x12], axis=-1)
    x21 = relu(_ref_conv(x2, p["c13_w"], p["c13_b"], 1, 3, padding=((0, 0), (1, 1))))
    x22 = relu(_ref_conv(x2, p["c31_w"], p["c31_b"], 3, 1, padding=((1, 1), (0, 0))))
    x2c = jnp.concatenate([x21, x22], axis=-1)
    x1o = relu(_ref_conv(x1c, p["c_a_end_w"], p["c_a_end_b"], 1, 1))
    x2o = relu(_ref_conv(x2c, p["c_b_end_w"], p["c_b_end_b"], 1, 1))
    return jnp.concatenate([x1o, x2o], axis=-1)


def _ref_fifmodule(p, x):
    x = jnp.clip(_ref_dwconv(x, p["gc_w"], p["gc_b"], 3, 3,
                             stride=(2, 2), padding=((1, 1), (1, 1))), 0.0, 3.0)
    x = _ref_fifblock(p["fif_a"], x) + x
    return _ref_fifblock(p["fif_b"], x)


def _ref_fifnet(p, x_nchw):
    x = jnp.transpose(x_nchw, (0, 2, 3, 1))
    x = _ref_conv(x, p["c_w"], p["c_b"], 3, 3, padding=((1, 1), (1, 1)))
    for mp in p["mods"]:
        x = _ref_fifmodule(mp, x)
    feat = jnp.mean(x, axis=(1, 2))
    h = feat @ p["fc1_w"] + p["fc1_b"]
    return h @ p["fc2_w"] + p["fc2_b"]


# ---------------------------------------------------------------------------
if __name__ == "__main__":
    classes, in_ch, hid, n_mod = 4, 1, 32, 2
    key = jax.random.PRNGKey(0)
    pkey, xkey = jax.random.split(key)
    params = init_fifnet(pkey, classes, in_ch, hid, n_mod)
    x = jax.random.normal(xkey, (2, in_ch, 16, 16), jnp.float32)   # NCHW input

    fwd = jax.jit(fifnet_forward)
    out = jax.block_until_ready(fwd(params, x))

    ref = jax.block_until_ready(_ref_fifnet(params, x))
    assert out.shape == (2, classes), out.shape
    assert bool(jnp.all(jnp.isfinite(out)))
    assert bool(jnp.allclose(out, ref, atol=2e-2, rtol=2e-2)), (out, ref)
    print("KERNEL_OK")
</pallas_src>

<mosaic_0001>
module attributes {stable_mosaic.version = 11 : i64} {
  func.func @_fifnet_kernel(%arg0: i32, %arg1: memref<1x256x9xf32, #tpu.memory_space<vmem>>, %arg2: memref<2x9x16xf32, #tpu.memory_space<vmem>>, %arg3: memref<40x16xf32, #tpu.memory_space<vmem>>, %arg4: memref<16x32x16xf32, #tpu.memory_space<vmem>>, %arg5: memref<8x3x16x16xf32, #tpu.memory_space<vmem>>, %arg6: memref<128x16xf32, #tpu.memory_space<vmem>>, %arg7: memref<576x256xf32, #tpu.memory_space<vmem>>, %arg8: memref<384x64xf32, #tpu.memory_space<vmem>>, %arg9: memref<144x64xf32, #tpu.memory_space<vmem>>, %arg10: memref<96x16xf32, #tpu.memory_space<vmem>>, %arg11: memref<40x128xf32, #tpu.memory_space<vmem>>, %arg12: memref<8x128xf32, #tpu.memory_space<vmem>>) attributes {dimension_semantics = [#tpu.dimension_semantics<parallel>], iteration_bounds = array<i64: 2>, scalar_prefetch = 0 : i64, scratch_operands = 0 : i64, tpu.core_type = #tpu.core_type<tc>, window_params = [{transform_indices = @transform_0, window_bounds = array<i64: 1, 256, 9>}, {pipeline_mode = #tpu.pipeline_mode<synchronous>, transform_indices = @transform_1, window_bounds = array<i64: 2, 9, 16>}, {pipeline_mode = #tpu.pipeline_mode<synchronous>, transform_indices = @transform_2, window_bounds = array<i64: 40, 16>}, {pipeline_mode = #tpu.pipeline_mode<synchronous>, transform_indices = @transform_3, window_bounds = array<i64: 16, 32, 16>}, {pipeline_mode = #tpu.pipeline_mode<synchronous>, transform_indices = @transform_4, window_bounds = array<i64: 8, 3, 16, 16>}, {pipeline_mode = #tpu.pipeline_mode<synchronous>, transform_indices = @transform_5, window_bounds = array<i64: 128, 16>}, {pipeline_mode = #tpu.pipeline_mode<synchronous>, transform_indices = @transform_6, window_bounds = array<i64: 576, 256>}, {pipeline_mode = #tpu.pipeline_mode<synchronous>, transform_indices = @transform_7, window_bounds = array<i64: 384, 64>}, {pipeline_mode = #tpu.pipeline_mode<synchronous>, transform_indices = @transform_8, window_bounds = array<i64: 144, 64>}, {pipeline_mode = #tpu.pipeline_mode<synchronous>, transform_indices = @transform_9, window_bounds = array<i64: 96, 16>}, {pipeline_mode = #tpu.pipeline_mode<synchronous>, transform_indices = @transform_10, window_bounds = array<i64: 40, 128>}, {transform_indices = @transform_11, window_bounds = array<i64: 8, 128>}]} {
    %c0 = arith.constant 0 : index
    %c0_0 = arith.constant 0 : index
    %c0_1 = arith.constant 0 : index
    %0 = vector.load %arg1[%c0, %c0_0, %c0_1] : memref<1x256x9xf32, #tpu.memory_space<vmem>>, vector<1x256x9xf32>
    %1 = vector.shape_cast %0 : vector<1x256x9xf32> to vector<256x9xf32>
    %c0_2 = arith.constant 0 : index
    %c0_3 = arith.constant 0 : index
    %c0_4 = arith.constant 0 : index
    %2 = vector.load %arg2[%c0_2, %c0_3, %c0_4] : memref<2x9x16xf32, #tpu.memory_space<vmem>>, vector<1x9x16xf32>
    %3 = vector.shape_cast %2 : vector<1x9x16xf32> to vector<9x16xf32>
    %cst = arith.constant dense<0.000000e+00> : vector<256x16xf32>
    %4 = tpu.matmul %1, %3, %cst {dimension_numbers = #tpu.dot_dimension_numbers<[1], [0], [0], [1], [0, 0, 1, 1], [], []>} : vector<256x9xf32>, vector<9x16xf32>, vector<256x16xf32> -> vector<256x16xf32>
    %c0_5 = arith.constant 0 : index
    %c0_6 = arith.constant 0 : index
    %5 = vector.load %arg3[%c0_5, %c0_6] : memref<40x16xf32, #tpu.memory_space<vmem>>, vector<1x16xf32>
    %6 = vector.broadcast %5 : vector<1x16xf32> to vector<256x16xf32>
    %7 = arith.addf %4, %6 : vector<256x16xf32>
    %c1 = arith.constant 1 : index
    %c0_7 = arith.constant 0 : index
    %c0_8 = arith.constant 0 : index
    %8 = vector.load %arg2[%c1, %c0_7, %c0_8] : memref<2x9x16xf32, #tpu.memory_space<vmem>>, vector<1x9x16xf32>
    %9 = vector.shape_cast %8 : vector<1x9x16xf32> to vector<9x16xf32>
    %cst_9 = arith.constant dense<0.000000e+00> : vector<256x16xf32>
    %10 = tpu.matmul %1, %9, %cst_9 {dimension_numbers = #tpu.dot_dimension_numbers<[1], [0], [0], [1], [0, 0, 1, 1], [], []>} : vector<256x9xf32>, vector<9x16xf32>, vector<256x16xf32> -> vector<256x16xf32>
    %c1_10 = arith.constant 1 : index
    %c0_11 = arith.constant 0 : index
    %11 = vector.load %arg3[%c1_10, %c0_11] : memref<40x16xf32, #tpu.memory_space<vmem>>, vector<1x16xf32>
    %12 = vector.broadcast %11 : vector<1x16xf32> to vector<256x16xf32>
    %13 = arith.addf %10, %12 : vector<256x16xf32>
    %c0_12 = arith.constant 0 : index
    %c0_13 = arith.constant 0 : index
    %14 = vector.load %arg7[%c0_12, %c0_13] : memref<576x256xf32, #tpu.memory_space<vmem>>, vector<576x256xf32>
    %c0_14 = arith.constant 0 : index
    %c0_15 = arith.constant 0 : index
    %15 = vector.load %arg8[%c0_14, %c0_15] : memref<384x64xf32, #tpu.memory_space<vmem>>, vector<384x64xf32>
    %c0_16 = arith.constant 0 : index
    %c0_17 = arith.constant 0 : index
    %16 = vector.load %arg6[%c0_16, %c0_17] : memref<128x16xf32, #tpu.memory_space<vmem>>, vector<16x16xf32>
    %c2 = arith.constant 2 : index
    %c0_18 = arith.constant 0 : index
    %17 = vector.load %arg3[%c2, %c0_18] : memref<40x16xf32, #tpu.memory_space<vmem>>, vector<1x16xf32>
    %c16 = arith.constant 16 : index
    %c0_19 = arith.constant 0 : index
    %18 = vector.load %arg6[%c16, %c0_19] : memref<128x16xf32, #tpu.memory_space<vmem>>, vector<16x16xf32>
    %c3 = arith.constant 3 : index
    %c0_20 = arith.constant 0 : index
    %19 = vector.load %arg3[%c3, %c0_20] : memref<40x16xf32, #tpu.memory_space<vmem>>, vector<1x16xf32>
    %cst_21 = arith.constant dense<0.000000e+00> : vector<576x16xf32>
    %20 = tpu.matmul %14, %7, %cst_21 {dimension_numbers = #tpu.dot_dimension_numbers<[1], [0], [0], [1], [0, 0, 1, 1], [], []>} : vector<576x256xf32>, vector<256x16xf32>, vector<576x16xf32> -> vector<576x16xf32>
    %21 = vector.extract_strided_slice %20 {offsets = [0, 0], sizes = [64, 16], strides = [1, 1]} : vector<576x16xf32> to vector<64x16xf32>
    %22 = vector.extract_strided_slice %16 {offsets = [0, 0], sizes = [1, 16], strides = [1, 1]} : vector<16x16xf32> to vector<1x16xf32>
    %23 = vector.broadcast %22 : vector<1x16xf32> to vector<64x16xf32>
    %24 = arith.mulf %21, %23 : vector<64x16xf32>
    %25 = vector.extract_strided_slice %20 {offsets = [64, 0], sizes = [64, 16], strides = [1, 1]} : vector<576x16xf32> to vector<64x16xf32>
    %26 = vector.extract_strided_slice %16 {offsets = [1, 0], sizes = [1, 16], strides = [1, 1]} : vector<16x16xf32> to vector<1x16xf32>
    %27 = vector.broadcast %26 : vector<1x16xf32> to vector<64x16xf32>
    %28 = arith.mulf %25, %27 : vector<64x16xf32>
    %29 = arith.addf %24, %28 : vector<64x16xf32>
    %30 = vector.extract_strided_slice %20 {offsets = [128, 0], sizes = [64, 16], strides = [1, 1]} : vector<576x16xf32> to vector<64x16xf32>
    %31 = vector.extract_strided_slice %16 {offsets = [2, 0], sizes = [1, 16], strides = [1, 1]} : vector<16x16xf32> to vector<1x16xf32>
    %32 = vector.broadcast %31 : vector<1x16xf32> to vector<64x16xf32>
    %33 = arith.mulf %30, %32 : vector<64x16xf32>
    %34 = arith.addf %29, %33 : vector<64x16xf32>
    %35 = vector.extract_strided_slice %20 {offsets = [192, 0], sizes = [64, 16], strides = [1, 1]} : vector<576x16xf32> to vector<64x16xf32>
    %36 = vector.extract_strided_slice %16 {offsets = [3, 0], sizes = [1, 16], strides = [1, 1]} : vector<16x16xf32> to vector<1x16xf32>
    %37 = vector.broadcast %36 : vector<1x16xf32> to vector<64x16xf32>
    %38 = arith.mulf %35, %37 : vector<64x16xf32>
    %39 = arith.addf %34, %38 : vector<64x16xf32>
    %40 = vector.extract_strided_slice %20 {offsets = [256, 0], sizes = [64, 16], strides = [1, 1]} : vector<576x16xf32> to vector<64x16xf32>
    %41 = vector.extract_strided_slice %16 {offsets = [4, 0], sizes = [1, 16], strides = [1, 1]} : vector<16x16xf32> to vector<1x16xf32>
    %42 = vector.broadcast %41 : vector<1x16xf32> to vector<64x16xf32>
    %43 = arith.mulf %40, %42 : vector<64x16xf32>
    %44 = arith.addf %39, %43 : vector<64x16xf32>
    %45 = vector.extract_strided_slice %20 {offsets = [320, 0], sizes = [64, 16], strides = [1, 1]} : vector<576x16xf32> to vector<64x16xf32>
    %46 = vector.extract_strided_slice %16 {offsets = [5, 0], sizes = [1, 16], strides = [1, 1]} : vector<16x16xf32> to vector<1x16xf32>
    %47 = vector.broadcast %46 : vector<1x16xf32> to vector<64x16xf32>
    %48 = arith.mulf %45, %47 : vector<64x16xf32>
    %49 = arith.addf %44, %48 : vector<64x16xf32>
    %50 = vector.extract_strided_slice %20 {offsets = [384, 0], sizes = [64, 16], strides = [1, 1]} : vector<576x16xf32> to vector<64x16xf32>
    %51 = vector.extract_strided_slice %16 {offsets = [6, 0], sizes = [1, 16], strides = [1, 1]} : vector<16x16xf32> to vector<1x16xf32>
    %52 = vector.broadcast %51 : vector<1x16xf32> to vector<64x16xf32>
    %53 = arith.mulf %50, %52 : vector<64x16xf32>
    %54 = arith.addf %49, %53 : vector<64x16xf32>
    %55 = vector.extract_strided_slice %20 {offsets = [448, 0], sizes = [64, 16], strides = [1, 1]} : vector<576x16xf32> to vector<64x16xf32>
    %56 = vector.extract_strided_slice %16 {offsets = [7, 0], sizes = [1, 16], strides = [1, 1]} : vector<16x16xf32> to vector<1x16xf32>
    %57 = vector.broadcast %56 : vector<1x16xf32> to vector<64x16xf32>
    %58 = arith.mulf %55, %57 : vector<64x16xf32>
    %59 = arith.addf %54, %58 : vector<64x16xf32>
    %60 = vector.extract_strided_slice %20 {offsets = [512, 0], sizes = [64, 16], strides = [1, 1]} : vector<576x16xf32> to vector<64x16xf32>
    %61 = vector.extract_strided_slice %16 {offsets = [8, 0], sizes = [1, 16], strides = [1, 1]} : vector<16x16xf32> to vector<1x16xf32>
    %62 = vector.broadcast %61 : vector<1x16xf32> to vector<64x16xf32>
    %63 = arith.mulf %60, %62 : vector<64x16xf32>
    %64 = arith.addf %59, %63 : vector<64x16xf32>
    %65 = vector.broadcast %17 : vector<1x16xf32> to vector<64x16xf32>
    %66 = arith.addf %64, %65 : vector<64x16xf32>
    %cst_22 = arith.constant 0.000000e+00 : f32
    %cst_23 = arith.constant 3.000000e+00 : f32
    %67 = vector.broadcast %cst_22 : f32 to vector<64x16xf32>
    %68 = arith.maximumf %67, %66 : vector<64x16xf32>
    %69 = vector.broadcast %cst_23 : f32 to vector<64x16xf32>
    %70 = arith.minimumf %69, %68 : vector<64x16xf32>
    %cst_24 = arith.constant dense<0.000000e+00> : vector<576x16xf32>
    %71 = tpu.matmul %14, %13, %cst_24 {dimension_numbers = #tpu.dot_dimension_numbers<[1], [0], [0], [1], [0, 0, 1, 1], [], []>} : vector<576x256xf32>, vector<256x16xf32>, vector<576x16xf32> -> vector<576x16xf32>
    %72 = vector.extract_strided_slice %71 {offsets = [0, 0], sizes = [64, 16], strides = [1, 1]} : vector<576x16xf32> to vector<64x16xf32>
    %73 = vector.extract_strided_slice %18 {offsets = [0, 0], sizes = [1, 16], strides = [1, 1]} : vector<16x16xf32> to vector<1x16xf32>
    %74 = vector.broadcast %73 : vector<1x16xf32> to vector<64x16xf32>
    %75 = arith.mulf %72, %74 : vector<64x16xf32>
    %76 = vector.extract_strided_slice %71 {offsets = [64, 0], sizes = [64, 16], strides = [1, 1]} : vector<576x16xf32> to vector<64x16xf32>
    %77 = vector.extract_strided_slice %18 {offsets = [1, 0], sizes = [1, 16], strides = [1, 1]} : vector<16x16xf32> to vector<1x16xf32>
    %78 = vector.broadcast %77 : vector<1x16xf32> to vector<64x16xf32>
    %79 = arith.mulf %76, %78 : vector<64x16xf32>
    %80 = arith.addf %75, %79 : vector<64x16xf32>
    %81 = vector.extract_strided_slice %71 {offsets = [128, 0], sizes = [64, 16], strides = [1, 1]} : vector<576x16xf32> to vector<64x16xf32>
    %82 = vector.extract_strided_slice %18 {offsets = [2, 0], sizes = [1, 16], strides = [1, 1]} : vector<16x16xf32> to vector<1x16xf32>
    %83 = vector.broadcast %82 : vector<1x16xf32> to vector<64x16xf32>
    %84 = arith.mulf %81, %83 : vector<64x16xf32>
    %85 = arith.addf %80, %84 : vector<64x16xf32>
    %86 = vector.extract_strided_slice %71 {offsets = [192, 0], sizes = [64, 16], strides = [1, 1]} : vector<576x16xf32> to vector<64x16xf32>
    %87 = vector.extract_strided_slice %18 {offsets = [3, 0], sizes = [1, 16], strides = [1, 1]} : vector<16x16xf32> to vector<1x16xf32>
    %88 = vector.broadcast %87 : vector<1x16xf32> to vector<64x16xf32>
    %89 = arith.mulf %86, %88 : vector<64x16xf32>
    %90 = arith.addf %85, %89 : vector<64x16xf32>
    %91 = vector.extract_strided_slice %71 {offsets = [256, 0], sizes = [64, 16], strides = [1, 1]} : vector<576x16xf32> to vector<64x16xf32>
    %92 = vector.extract_strided_slice %18 {offsets = [4, 0], sizes = [1, 16], strides = [1, 1]} : vector<16x16xf32> to vector<1x16xf32>
    %93 = vector.broadcast %92 : vector<1x16xf32> to vector<64x16xf32>
    %94 = arith.mulf %91, %93 : vector<64x16xf32>
    %95 = arith.addf %90, %94 : vector<64x16xf32>
    %96 = vector.extract_strided_slice %71 {offsets = [320, 0], sizes = [64, 16], strides = [1, 1]} : vector<576x16xf32> to vector<64x16xf32>
    %97 = vector.extract_strided_slice %18 {offsets = [5, 0], sizes = [1, 16], strides = [1, 1]} : vector<16x16xf32> to vector<1x16xf32>
    %98 = vector.broadcast %97 : vector<1x16xf32> to vector<64x16xf32>
    %99 = arith.mulf %96, %98 : vector<64x16xf32>
    %100 = arith.addf %95, %99 : vector<64x16xf32>
    %101 = vector.extract_strided_slice %71 {offsets = [384, 0], sizes = [64, 16], strides = [1, 1]} : vector<576x16xf32> to vector<64x16xf32>
    %102 = vector.extract_strided_slice %18 {offsets = [6, 0], sizes = [1, 16], strides = [1, 1]} : vector<16x16xf32> to vector<1x16xf32>
    %103 = vector.broadcast %102 : vector<1x16xf32> to vector<64x16xf32>
    %104 = arith.mulf %101, %103 : vector<64x16xf32>
    %105 = arith.addf %100, %104 : vector<64x16xf32>
    %106 = vector.extract_strided_slice %71 {offsets = [448, 0], sizes = [64, 16], strides = [1, 1]} : vector<576x16xf32> to vector<64x16xf32>
    %107 = vector.extract_strided_slice %18 {offsets = [7, 0], sizes = [1, 16], strides = [1, 1]} : vector<16x16xf32> to vector<1x16xf32>
    %108 = vector.broadcast %107 : vector<1x16xf32> to vector<64x16xf32>
    %109 = arith.mulf %106, %108 : vector<64x16xf32>
    %110 = arith.addf %105, %109 : vector<64x16xf32>
    %111 = vector.extract_strided_slice %71 {offsets = [512, 0], sizes = [64, 16], strides = [1, 1]} : vector<576x16xf32> to vector<64x16xf32>
    %112 = vector.extract_strided_slice %18 {offsets = [8, 0], sizes = [1, 16], strides = [1, 1]} : vector<16x16xf32> to vector<1x16xf32>
    %113 = vector.broadcast %112 : vector<1x16xf32> to vector<64x16xf32>
    %114 = arith.mulf %111, %113 : vector<64x16xf32>
    %115 = arith.addf %110, %114 : vector<64x16xf32>
    %116 = vector.broadcast %19 : vector<1x16xf32> to vector<64x16xf32>
    %117 = arith.addf %115, %116 : vector<64x16xf32>
    %cst_25 = arith.constant 0.000000e+00 : f32
    %cst_26 = arith.constant 3.000000e+00 : f32
    %118 = vector.broadcast %cst_25 : f32 to vector<64x16xf32>
    %119 = arith.maximumf %118, %117 : vector<64x16xf32>
    %120 = vector.broadcast %cst_26 : f32 to vector<64x16xf32>
    %121 = arith.minimumf %120, %119 : vector<64x16xf32>
    %c0_27 = arith.constant 0 : index
    %c0_28 = arith.constant 0 : index
    %c0_29 = arith.constant 0 : index
    %122 = vector.load %arg4[%c0_27, %c0_28, %c0_29] : memref<16x32x16xf32, #tpu.memory_space<vmem>>, vector<1x32x16xf32>
    %123 = vector.shape_cast %122 : vector<1x32x16xf32> to vector<32x16xf32>
    %124 = vector.extract_strided_slice %123 {offsets = [0, 0], sizes = [16, 16], strides = [1, 1]} : vector<32x16xf32> to vector<16x16xf32>
    %125 = vector.extract_strided_slice %123 {offsets = [16, 0], sizes = [16, 16], strides = [1, 1]} : vector<32x16xf32> to vector<16x16xf32>
    %c4 = arith.constant 4 : index
    %c0_30 = arith.constant 0 : index
    %126 = vector.load %arg3[%c4, %c0_30] : memref<40x16xf32, #tpu.memory_space<vmem>>, vector<1x16xf32>
    %c1_31 = arith.constant 1 : index
    %c0_32 = arith.constant 0 : index
    %c0_33 = arith.constant 0 : index
    %127 = vector.load %arg4[%c1_31, %c0_32, %c0_33] : memref<16x32x16xf32, #tpu.memory_space<vmem>>, vector<1x32x16xf32>
    %128 = vector.shape_cast %127 : vector<1x32x16xf32> to vector<32x16xf32>
    %129 = vector.extract_strided_slice %128 {offsets = [0, 0], sizes = [16, 16], strides = [1, 1]} : vector<32x16xf32> to vector<16x16xf32>
    %130 = vector.extract_strided_slice %128 {offsets = [16, 0], sizes = [16, 16], strides = [1, 1]} : vector<32x16xf32> to vector<16x16xf32>
    %c5 = arith.constant 5 : index
    %c0_34 = arith.constant 0 : index
    %131 = vector.load %arg3[%c5, %c0_34] : memref<40x16xf32, #tpu.memory_space<vmem>>, vector<1x16xf32>
    %cst_35 = arith.constant dense<0.000000e+00> : vector<64x16xf32>
    %132 = tpu.matmul %70, %124, %cst_35 {dimension_numbers = #tpu.dot_dimension_numbers<[1], [0], [0], [1], [0, 0, 1, 1], [], []>} : vector<64x16xf32>, vector<16x16xf32>, vector<64x16xf32> -> vector<64x16xf32>
    %cst_36 = arith.constant dense<0.000000e+00> : vector<64x16xf32>
    %133 = tpu.matmul %121, %125, %cst_36 {dimension_numbers = #tpu.dot_dimension_numbers<[1], [0], [0], [1], [0, 0, 1, 1], [], []>} : vector<64x16xf32>, vector<16x16xf32>, vector<64x16xf32> -> vector<64x16xf32>
    %134 = arith.addf %132, %133 : vector<64x16xf32>
    %135 = vector.broadcast %126 : vector<1x16xf32> to vector<64x16xf32>
    %136 = arith.addf %134, %135 : vector<64x16xf32>
    %cst_37 = arith.constant 0.000000e+00 : f32
    %137 = vector.broadcast %cst_37 : f32 to vector<64x16xf32>
    %138 = arith.maximumf %136, %137 : vector<64x16xf32>
    %cst_38 = arith.constant dense<0.000000e+00> : vector<64x16xf32>
    %139 = tpu.matmul %70, %129, %cst_38 {dimension_numbers = #tpu.dot_dimension_numbers<[1], [0], [0], [1], [0, 0, 1, 1], [], []>} : vector<64x16xf32>, vector<16x16xf32>, vector<64x16xf32> -> vector<64x16xf32>
    %cst_39 = arith.constant dense<0.000000e+00> : vector<64x16xf32>
    %140 = tpu.matmul %121, %130, %cst_39 {dimension_numbers = #tpu.dot_dimension_numbers<[1], [0], [0], [1], [0, 0, 1, 1], [], []>} : vector<64x16xf32>, vector<16x16xf32>, vector<64x16xf32> -> vector<64x16xf32>
    %141 = arith.addf %139, %140 : vector<64x16xf32>
    %142 = vector.broadcast %131 : vector<1x16xf32> to vector<64x16xf32>
    %143 = arith.addf %141, %142 : vector<64x16xf32>
    %cst_40 = arith.constant 0.000000e+00 : f32
    %144 = vector.broadcast %cst_40 : f32 to vector<64x16xf32>
    %145 = arith.maximumf %143, %144 : vector<64x16xf32>
    %cst_41 = arith.constant dense<0.000000e+00> : vector<384x16xf32>
    %146 = tpu.matmul %15, %138, %cst_41 {dimension_numbers = #tpu.dot_dimension_numbers<[1], [0], [0], [1], [0, 0, 1, 1], [], []>} : vector<384x64xf32>, vector<64x16xf32>, vector<384x16xf32> -> vector<384x16xf32>
    %cst_42 = arith.constant dense<0.000000e+00> : vector<384x16xf32>
    %147 = tpu.matmul %15, %145, %cst_42 {dimension_numbers = #tpu.dot_dimension_numbers<[1], [0], [0], [1], [0, 0, 1, 1], [], []>} : vector<384x64xf32>, vector<64x16xf32>, vector<384x16xf32> -> vector<384x16xf32>
    %c32 = arith.constant 32 : index
    %c0_43 = arith.constant 0 : index
    %148 = vector.load %arg6[%c32, %c0_43] : memref<128x16xf32, #tpu.memory_space<vmem>>, vector<8x16xf32>
    %c6 = arith.constant 6 : index
    %c0_44 = arith.constant 0 : index
    %149 = vector.load %arg3[%c6, %c0_44] : memref<40x16xf32, #tpu.memory_space<vmem>>, vector<1x16xf32>
    %150 = vector.extract_strided_slice %146 {offsets = [0, 0], sizes = [64, 16], strides = [1, 1]} : vector<384x16xf32> to vector<64x16xf32>
    %151 = vector.extract_strided_slice %148 {offsets = [0, 0], sizes = [1, 16], strides = [1, 1]} : vector<8x16xf32> to vector<1x16xf32>
    %152 = vector.broadcast %151 : vector<1x16xf32> to vector<64x16xf32>
    %153 = arith.mulf %150, %152 : vector<64x16xf32>
    %154 = vector.extract_strided_slice %146 {offsets = [64, 0], sizes = [64, 16], strides = [1, 1]} : vector<384x16xf32> to vector<64x16xf32>
    %155 = vector.extract_strided_slice %148 {offsets = [1, 0], sizes = [1, 16], strides = [1, 1]} : vector<8x16xf32> to vector<1x16xf32>
    %156 = vector.broadcast %155 : vector<1x16xf32> to vector<64x16xf32>
    %157 = arith.mulf %154, %156 : vector<64x16xf32>
    %158 = arith.addf %153, %157 : vector<64x16xf32>
    %159 = vector.extract_strided_slice %146 {offsets = [128, 0], sizes = [64, 16], strides = [1, 1]} : vector<384x16xf32> to vector<64x16xf32>
    %160 = vector.extract_strided_slice %148 {offsets = [2, 0], sizes = [1, 16], strides = [1, 1]} : vector<8x16xf32> to vector<1x16xf32>
    %161 = vector.broadcast %160 : vector<1x16xf32> to vector<64x16xf32>
    %162 = arith.mulf %159, %161 : vector<64x16xf32>
    %163 = arith.addf %158, %162 : vector<64x16xf32>
    %164 = vector.broadcast %149 : vector<1x16xf32> to vector<64x16xf32>
    %165 = arith.addf %163, %164 : vector<64x16xf32>
    %cst_45 = arith.constant 0.000000e+00 : f32
    %cst_46 = arith.constant 3.000000e+00 : f32
    %166 = vector.broadcast %cst_45 : f32 to vector<64x16xf32>
    %167 = arith.maximumf %166, %165 : vector<64x16xf32>
    %168 = vector.broadcast %cst_46 : f32 to vector<64x16xf32>
    %169 = arith.minimumf %168, %167 : vector<64x16xf32>
    %c40 = arith.constant 40 : index
    %c0_47 = arith.constant 0 : index
    %170 = vector.load %arg6[%c40, %c0_47] : memref<128x16xf32, #tpu.memory_space<vmem>>, vector<8x16xf32>
    %c7 = arith.constant 7 : index
    %c0_48 = arith.constant 0 : index
    %171 = vector.load %arg3[%c7, %c0_48] : memref<40x16xf32, #tpu.memory_space<vmem>>, vector<1x16xf32>
    %172 = vector.extract_strided_slice %146 {offsets = [192, 0], sizes = [64, 16], strides = [1, 1]} : vector<384x16xf32> to vector<64x16xf32>
    %173 = vector.extract_strided_slice %170 {offsets = [0, 0], sizes = [1, 16], strides = [1, 1]} : vector<8x16xf32> to vector<1x16xf32>
    %174 = vector.broadcast %173 : vector<1x16xf32> to vector<64x16xf32>
    %175 = arith.mulf %172, %174 : vector<64x16xf32>
    %176 = vector.extract_strided_slice %146 {offsets = [256, 0], sizes = [64, 16], strides = [1, 1]} : vector<384x16xf32> to vector<64x16xf32>
    %177 = vector.extract_strided_slice %170 {offsets = [1, 0], sizes = [1, 16], strides = [1, 1]} : vector<8x16xf32> to vector<1x16xf32>
    %178 = vector.broadcast %177 : vector<1x16xf32> to vector<64x16xf32>
    %179 = arith.mulf %176, %178 : vector<64x16xf32>
    %180 = arith.addf %175, %179 : vector<64x16xf32>
    %181 = vector.extract_strided_slice %146 {offsets = [320, 0], sizes = [64, 16], strides = [1, 1]} : vector<384x16xf32> to vector<64x16xf32>
    %182 = vector.extract_strided_slice %170 {offsets = [2, 0], sizes = [1, 16], strides = [1, 1]} : vector<8x16xf32> to vector<1x16xf32>
    %183 = vector.broadcast %182 : vector<1x16xf32> to vector<64x16xf32>
    %184 = arith.mulf %181, %183 : vector<64x16xf32>
    %185 = arith.addf %180, %184 : vector<64x16xf32>
    %186 = vector.broadcast %171 : vector<1x16xf32> to vector<64x16xf32>
    %187 = arith.addf %185, %186 : vector<64x16xf32>
    %cst_49 = arith.constant 0.000000e+00 : f32
    %cst_50 = arith.constant 3.000000e+00 : f32
    %188 = vector.broadcast %cst_49 : f32 to vector<64x16xf32>
    %189 = arith.maximumf %188, %187 : vector<64x16xf32>
    %190 = vector.broadcast %cst_50 : f32 to vector<64x16xf32>
    %191 = arith.minimumf %190, %189 : vector<64x16xf32>
    %c8 = arith.constant 8 : index
    %c0_51 = arith.constant 0 : index
    %192 = vector.load %arg3[%c8, %c0_51] : memref<40x16xf32, #tpu.memory_space<vmem>>, vector<1x16xf32>
    %193 = vector.extract_strided_slice %147 {offsets = [0, 0], sizes = [64, 16], strides = [1, 1]} : vector<384x16xf32> to vector<64x16xf32>
    %c0_52 = arith.constant 0 : index
    %c0_53 = arith.constant 0 : index
    %c0_54 = arith.constant 0 : index
    %c0_55 = arith.constant 0 : index
    %194 = vector.load %arg5[%c0_52, %c0_53, %c0_54, %c0_55] : memref<8x3x16x16xf32, #tpu.memory_space<vmem>>, vector<1x1x16x16xf32>
    %195 = vector.shape_cast %194 : vector<1x1x16x16xf32> to vector<16x16xf32>
    %cst_56 = arith.constant dense<0.000000e+00> : vector<64x16xf32>
    %196 = tpu.matmul %193, %195, %cst_56 {dimension_numbers = #tpu.dot_dimension_numbers<[1], [0], [0], [1], [0, 0, 1, 1], [], []>} : vector<64x16xf32>, vector<16x16xf32>, vector<64x16xf32> -> vector<64x16xf32>
    %197 = vector.extract_strided_slice %147 {offsets = [64, 0], sizes = [64, 16], strides = [1, 1]} : vector<384x16xf32> to vector<64x16xf32>
    %c0_57 = arith.constant 0 : index
    %c1_58 = arith.constant 1 : index
    %c0_59 = arith.constant 0 : index
    %c0_60 = arith.constant 0 : index
    %198 = vector.load %arg5[%c0_57, %c1_58, %c0_59, %c0_60] : memref<8x3x16x16xf32, #tpu.memory_space<vmem>>, vector<1x1x16x16xf32>
    %199 = vector.shape_cast %198 : vector<1x1x16x16xf32> to vector<16x16xf32>
    %cst_61 = arith.constant dense<0.000000e+00> : vector<64x16xf32>
    %200 = tpu.matmul %197, %199, %cst_61 {dimension_numbers = #tpu.dot_dimension_numbers<[1], [0], [0], [1], [0, 0, 1, 1], [], []>} : vector<64x16xf32>, vector<16x16xf32>, vector<64x16xf32> -> vector<64x16xf32>
    %201 = arith.addf %196, %200 : vector<64x16xf32>
    %202 = vector.extract_strided_slice %147 {offsets = [128, 0], sizes = [64, 16], strides = [1, 1]} : vector<384x16xf32> to vector<64x16xf32>
    %c0_62 = arith.constant 0 : index
    %c2_63 = arith.constant 2 : index
    %c0_64 = arith.constant 0 : index
    %c0_65 = arith.constant 0 : index
    %203 = vector.load %arg5[%c0_62, %c2_63, %c0_64, %c0_65] : memref<8x3x16x16xf32, #tpu.memory_space<vmem>>, vector<1x1x16x16xf32>
    %204 = vector.shape_cast %203 : vector<1x1x16x16xf32> to vector<16x16xf32>
    %cst_66 = arith.constant dense<0.000000e+00> : vector<64x16xf32>
    %205 = tpu.matmul %202, %204, %cst_66 {dimension_numbers = #tpu.dot_dimension_numbers<[1], [0], [0], [1], [0, 0, 1, 1], [], []>} : vector<64x16xf32>, vector<16x16xf32>, vector<64x16xf32> -> vector<64x16xf32>
    %206 = arith.addf %201, %205 : vector<64x16xf32>
    %207 = vector.broadcast %192 : vector<1x16xf32> to vector<64x16xf32>
    %208 = arith.addf %206, %207 : vector<64x16xf32>
    %cst_67 = arith.constant 0.000000e+00 : f32
    %209 = vector.broadcast %cst_67 : f32 to vector<64x16xf32>
    %210 = arith.maximumf %208, %209 : vector<64x16xf32>
    %c9 = arith.constant 9 : index
    %c0_68 = arith.constant 0 : index
    %211 = vector.load %arg3[%c9, %c0_68] : memref<40x16xf32, #tpu.memory_space<vmem>>, vector<1x16xf32>
    %212 = vector.extract_strided_slice %147 {offsets = [192, 0], sizes = [64, 16], strides = [1, 1]} : vector<384x16xf32> to vector<64x16xf32>
    %c1_69 = arith.constant 1 : index
    %c0_70 = arith.constant 0 : index
    %c0_71 = arith.constant 0 : index
    %c0_72 = arith.constant 0 : index
    %213 = vector.load %arg5[%c1_69, %c0_70, %c0_71, %c0_72] : memref<8x3x16x16xf32, #tpu.memory_space<vmem>>, vector<1x1x16x16xf32>
    %214 = vector.shape_cast %213 : vector<1x1x16x16xf32> to vector<16x16xf32>
    %cst_73 = arith.constant dense<0.000000e+00> : vector<64x16xf32>
    %215 = tpu.matmul %212, %214, %cst_73 {dimension_numbers = #tpu.dot_dimension_numbers<[1], [0], [0], [1], [0, 0, 1, 1], [], []>} : vector<64x16xf32>, vector<16x16xf32>, vector<64x16xf32> -> vector<64x16xf32>
    %216 = vector.extract_strided_slice %147 {offsets = [256, 0], sizes = [64, 16], strides = [1, 1]} : vector<384x16xf32> to vector<64x16xf32>
    %c1_74 = arith.constant 1 : index
    %c1_75 = arith.constant 1 : index
    %c0_76 = arith.constant 0 : index
    %c0_77 = arith.constant 0 : index
    %217 = vector.load %arg5[%c1_74, %c1_75, %c0_76, %c0_77] : memref<8x3x16x16xf32, #tpu.memory_space<vmem>>, vector<1x1x16x16xf32>
    %218 = vector.shape_cast %217 : vector<1x1x16x16xf32> to vector<16x16xf32>
    %cst_78 = arith.constant dense<0.000000e+00> : vector<64x16xf32>
    %219 = tpu.matmul %216, %218, %cst_78 {dimension_numbers = #tpu.dot_dimension_numbers<[1], [0], [0], [1], [0, 0, 1, 1], [], []>} : vector<64x16xf32>, vector<16x16xf32>, vector<64x16xf32> -> vector<64x16xf32>
    %220 = arith.addf %215, %219 : vector<64x16xf32>
    %221 = vector.extract_strided_slice %147 {offsets = [320, 0], sizes = [64, 16], strides = [1, 1]} : vector<384x16xf32> to vector<64x16xf32>
    %c1_79 = arith.constant 1 : index
    %c2_80 = arith.constant 2 : index
    %c0_81 = arith.constant 0 : index
    %c0_82 = arith.constant 0 : index
    %222 = vector.load %arg5[%c1_79, %c2_80, %c0_81, %c0_82] : memref<8x3x16x16xf32, #tpu.memory_space<vmem>>, vector<1x1x16x16xf32>
    %223 = vector.shape_cast %222 : vector<1x1x16x16xf32> to vector<16x16xf32>
    %cst_83 = arith.constant dense<0.000000e+00> : vector<64x16xf32>
    %224 = tpu.matmul %221, %223, %cst_83 {dimension_numbers = #tpu.dot_dimension_numbers<[1], [0], [0], [1], [0, 0, 1, 1], [], []>} : vector<64x16xf32>, vector<16x16xf32>, vector<64x16xf32> -> vector<64x16xf32>
    %225 = arith.addf %220, %224 : vector<64x16xf32>
    %226 = vector.broadcast %211 : vector<1x16xf32> to vector<64x16xf32>
    %227 = arith.addf %225, %226 : vector<64x16xf32>
    %cst_84 = arith.constant 0.000000e+00 : f32
    %228 = vector.broadcast %cst_84 : f32 to vector<64x16xf32>
    %229 = arith.maximumf %227, %228 : vector<64x16xf32>
    %c2_85 = arith.constant 2 : index
    %c0_86 = arith.constant 0 : index
    %c0_87 = arith.constant 0 : index
    %230 = vector.load %arg4[%c2_85, %c0_86, %c0_87] : memref<16x32x16xf32, #tpu.memory_space<vmem>>, vector<1x32x16xf32>
    %231 = vector.shape_cast %230 : vector<1x32x16xf32> to vector<32x16xf32>
    %232 = vector.extract_strided_slice %231 {offsets = [0, 0], sizes = [16, 16], strides = [1, 1]} : vector<32x16xf32> to vector<16x16xf32>
    %233 = vector.extract_strided_slice %231 {offsets = [16, 0], sizes = [16, 16], strides = [1, 1]} : vector<32x16xf32> to vector<16x16xf32>
    %c10 = arith.constant 10 : index
    %c0_88 = arith.constant 0 : index
    %234 = vector.load %arg3[%c10, %c0_88] : memref<40x16xf32, #tpu.memory_space<vmem>>, vector<1x16xf32>
    %c3_89 = arith.constant 3 : index
    %c0_90 = arith.constant 0 : index
    %c0_91 = arith.constant 0 : index
    %235 = vector.load %arg4[%c3_89, %c0_90, %c0_91] : memref<16x32x16xf32, #tpu.memory_space<vmem>>, vector<1x32x16xf32>
    %236 = vector.shape_cast %235 : vector<1x32x16xf32> to vector<32x16xf32>
    %237 = vector.extract_strided_slice %236 {offsets = [0, 0], sizes = [16, 16], strides = [1, 1]} : vector<32x16xf32> to vector<16x16xf32>
    %238 = vector.extract_strided_slice %236 {offsets = [16, 0], sizes = [16, 16], strides = [1, 1]} : vector<32x16xf32> to vector<16x16xf32>
    %c11 = arith.constant 11 : index
    %c0_92 = arith.constant 0 : index
    %239 = vector.load %arg3[%c11, %c0_92] : memref<40x16xf32, #tpu.memory_space<vmem>>, vector<1x16xf32>
    %cst_93 = arith.constant dense<0.000000e+00> : vector<64x16xf32>
    %240 = tpu.matmul %169, %232, %cst_93 {dimension_numbers = #tpu.dot_dimension_numbers<[1], [0], [0], [1], [0, 0, 1, 1], [], []>} : vector<64x16xf32>, vector<16x16xf32>, vector<64x16xf32> -> vector<64x16xf32>
    %cst_94 = arith.constant dense<0.000000e+00> : vector<64x16xf32>
    %241 = tpu.matmul %191, %233, %cst_94 {dimension_numbers = #tpu.dot_dimension_numbers<[1], [0], [0], [1], [0, 0, 1, 1], [], []>} : vector<64x16xf32>, vector<16x16xf32>, vector<64x16xf32> -> vector<64x16xf32>
    %242 = arith.addf %240, %241 : vector<64x16xf32>
    %243 = vector.broadcast %234 : vector<1x16xf32> to vector<64x16xf32>
    %244 = arith.addf %242, %243 : vector<64x16xf32>
    %cst_95 = arith.constant 0.000000e+00 : f32
    %245 = vector.broadcast %cst_95 : f32 to vector<64x16xf32>
    %246 = arith.maximumf %244, %245 : vector<64x16xf32>
    %cst_96 = arith.constant dense<0.000000e+00> : vector<64x16xf32>
    %247 = tpu.matmul %210, %237, %cst_96 {dimension_numbers = #tpu.dot_dimension_numbers<[1], [0], [0], [1], [0, 0, 1, 1], [], []>} : vector<64x16xf32>, vector<16x16xf32>, vector<64x16xf32> -> vector<64x16xf32>
    %cst_97 = arith.constant dense<0.000000e+00> : vector<64x16xf32>
    %248 = tpu.matmul %229, %238, %cst_97 {dimension_numbers = #tpu.dot_dimension_numbers<[1], [0], [0], [1], [0, 0, 1, 1], [], []>} : vector<64x16xf32>, vector<16x16xf32>, vector<64x16xf32> -> vector<64x16xf32>
    %249 = arith.addf %247, %248 : vector<64x16xf32>
    %250 = vector.broadcast %239 : vector<1x16xf32> to vector<64x16xf32>
    %251 = arith.addf %249, %250 : vector<64x16xf32>
    %cst_98 = arith.constant 0.000000e+00 : f32
    %252 = vector.broadcast %cst_98 : f32 to vector<64x16xf32>
    %253 = arith.maximumf %251, %252 : vector<64x16xf32>
    %254 = arith.addf %246, %70 : vector<64x16xf32>
    %255 = arith.addf %253, %121 : vector<64x16xf32>
    %c4_99 = arith.constant 4 : index
    %c0_100 = arith.constant 0 : index
    %c0_101 = arith.constant 0 : index
    %256 = vector.load %arg4[%c4_99, %c0_100, %c0_101] : memref<16x32x16xf32, #tpu.memory_space<vmem>>, vector<1x32x16xf32>
    %257 = vector.shape_cast %256 : vector<1x32x16xf32> to vector<32x16xf32>
    %258 = vector.extract_strided_slice %257 {offsets = [0, 0], sizes = [16, 16], strides = [1, 1]} : vector<32x16xf32> to vector<16x16xf32>
    %259 = vector.extract_strided_slice %257 {offsets = [16, 0], sizes = [16, 16], strides = [1, 1]} : vector<32x16xf32> to vector<16x16xf32>
    %c12 = arith.constant 12 : index
    %c0_102 = arith.constant 0 : index
    %260 = vector.load %arg3[%c12, %c0_102] : memref<40x16xf32, #tpu.memory_space<vmem>>, vector<1x16xf32>
    %c5_103 = arith.constant 5 : index
    %c0_104 = arith.constant 0 : index
    %c0_105 = arith.constant 0 : index
    %261 = vector.load %arg4[%c5_103, %c0_104, %c0_105] : memref<16x32x16xf32, #tpu.memory_space<vmem>>, vector<1x32x16xf32>
    %262 = vector.shape_cast %261 : vector<1x32x16xf32> to vector<32x16xf32>
    %263 = vector.extract_strided_slice %262 {offsets = [0, 0], sizes = [16, 16], strides = [1, 1]} : vector<32x16xf32> to vector<16x16xf32>
    %264 = vector.extract_strided_slice %262 {offsets = [16, 0], sizes = [16, 16], strides = [1, 1]} : vector<32x16xf32> to vector<16x16xf32>
    %c13 = arith.constant 13 : index
    %c0_106 = arith.constant 0 : index
    %265 = vector.load %arg3[%c13, %c0_106] : memref<40x16xf32, #tpu.memory_space<vmem>>, vector<1x16xf32>
    %cst_107 = arith.constant dense<0.000000e+00> : vector<64x16xf32>
    %266 = tpu.matmul %254, %258, %cst_107 {dimension_numbers = #tpu.dot_dimension_numbers<[1], [0], [0], [1], [0, 0, 1, 1], [], []>} : vector<64x16xf32>, vector<16x16xf32>, vector<64x16xf32> -> vector<64x16xf32>
    %cst_108 = arith.constant dense<0.000000e+00> : vector<64x16xf32>
    %267 = tpu.matmul %255, %259, %cst_108 {dimension_numbers = #tpu.dot_dimension_numbers<[1], [0], [0], [1], [0, 0, 1, 1], [], []>} : vector<64x16xf32>, vector<16x16xf32>, vector<64x16xf32> -> vector<64x16xf32>
    %268 = arith.addf %266, %267 : vector<64x16xf32>
    %269 = vector.broadcast %260 : vector<1x16xf32> to vector<64x16xf32>
    %270 = arith.addf %268, %269 : vector<64x16xf32>
    %cst_109 = arith.constant 0.000000e+00 : f32
    %271 = vector.broadcast %cst_109 : f32 to vector<64x16xf32>
    %272 = arith.maximumf %270, %271 : vector<64x16xf32>
    %cst_110 = arith.constant dense<0.000000e+00> : vector<64x16xf32>
    %273 = tpu.matmul %254, %263, %cst_110 {dimension_numbers = #tpu.dot_dimension_numbers<[1], [0], [0], [1], [0, 0, 1, 1], [], []>} : vector<64x16xf32>, vector<16x16xf32>, vector<64x16xf32> -> vector<64x16xf32>
    %cst_111 = arith.constant dense<0.000000e+00> : vector<64x16xf32>
    %274 = tpu.matmul %255, %264, %cst_111 {dimension_numbers = #tpu.dot_dimension_numbers<[1], [0], [0], [1], [0, 0, 1, 1], [], []>} : vector<64x16xf32>, vector<16x16xf32>, vector<64x16xf32> -> vector<64x16xf32>
    %275 = arith.addf %273, %274 : vector<64x16xf32>
    %276 = vector.broadcast %265 : vector<1x16xf32> to vector<64x16xf32>
    %277 = arith.addf %275, %276 : vector<64x16xf32>
    %cst_112 = arith.constant 0.000000e+00 : f32
    %278 = vector.broadcast %cst_112 : f32 to vector<64x16xf32>
    %279 = arith.maximumf %277, %278 : vector<64x16xf32>
    %cst_113 = arith.constant dense<0.000000e+00> : vector<384x16xf32>
    %280 = tpu.matmul %15, %272, %cst_113 {dimension_numbers = #tpu.dot_dimension_numbers<[1], [0], [0], [1], [0, 0, 1, 1], [], []>} : vector<384x64xf32>, vector<64x16xf32>, vector<384x16xf32> -> vector<384x16xf32>
    %cst_114 = arith.constant dense<0.000000e+00> : vector<384x16xf32>
    %281 = tpu.matmul %15, %279, %cst_114 {dimension_numbers = #tpu.dot_dimension_numbers<[1], [0], [0], [1], [0, 0, 1, 1], [], []>} : vector<384x64xf32>, vector<64x16xf32>, vector<384x16xf32> -> vector<384x16xf32>
    %c48 = arith.constant 48 : index
    %c0_115 = arith.constant 0 : index
    %282 = vector.load %arg6[%c48, %c0_115] : memref<128x16xf32, #tpu.memory_space<vmem>>, vector<8x16xf32>
    %c14 = arith.constant 14 : index
    %c0_116 = arith.constant 0 : index
    %283 = vector.load %arg3[%c14, %c0_116] : memref<40x16xf32, #tpu.memory_space<vmem>>, vector<1x16xf32>
    %284 = vector.extract_strided_slice %280 {offsets = [0, 0], sizes = [64, 16], strides = [1, 1]} : vector<384x16xf32> to vector<64x16xf32>
    %285 = vector.extract_strided_slice %282 {offsets = [0, 0], sizes = [1, 16], strides = [1, 1]} : vector<8x16xf32> to vector<1x16xf32>
    %286 = vector.broadcast %285 : vector<1x16xf32> to vector<64x16xf32>
    %287 = arith.mulf %284, %286 : vector<64x16xf32>
    %288 = vector.extract_strided_slice %280 {offsets = [64, 0], sizes = [64, 16], strides = [1, 1]} : vector<384x16xf32> to vector<64x16xf32>
    %289 = vector.extract_strided_slice %282 {offsets = [1, 0], sizes = [1, 16], strides = [1, 1]} : vector<8x16xf32> to vector<1x16xf32>
    %290 = vector.broadcast %289 : vector<1x16xf32> to vector<64x16xf32>
    %291 = arith.mulf %288, %290 : vector<64x16xf32>
    %292 = arith.addf %287, %291 : vector<64x16xf32>
    %293 = vector.extract_strided_slice %280 {offsets = [128, 0], sizes = [64, 16], strides = [1, 1]} : vector<384x16xf32> to vector<64x16xf32>
    %294 = vector.extract_strided_slice %282 {offsets = [2, 0], sizes = [1, 16], strides = [1, 1]} : vector<8x16xf32> to vector<1x16xf32>
    %295 = vector.broadcast %294 : vector<1x16xf32> to vector<64x16xf32>
    %296 = arith.mulf %293, %295 : vector<64x16xf32>
    %297 = arith.addf %292, %296 : vector<64x16xf32>
    %298 = vector.broadcast %283 : vector<1x16xf32> to vector<64x16xf32>
    %299 = arith.addf %297, %298 : vector<64x16xf32>
    %cst_117 = arith.constant 0.000000e+00 : f32
    %cst_118 = arith.constant 3.000000e+00 : f32
    %300 = vector.broadcast %cst_117 : f32 to vector<64x16xf32>
    %301 = arith.maximumf %300, %299 : vector<64x16xf32>
    %302 = vector.broadcast %cst_118 : f32 to vector<64x16xf32>
    %303 = arith.minimumf %302, %301 : vector<64x16xf32>
    %c56 = arith.constant 56 : index
    %c0_119 = arith.constant 0 : index
    %304 = vector.load %arg6[%c56, %c0_119] : memref<128x16xf32, #tpu.memory_space<vmem>>, vector<8x16xf32>
    %c15 = arith.constant 15 : index
    %c0_120 = arith.constant 0 : index
    %305 = vector.load %arg3[%c15, %c0_120] : memref<40x16xf32, #tpu.memory_space<vmem>>, vector<1x16xf32>
    %306 = vector.extract_strided_slice %280 {offsets = [192, 0], sizes = [64, 16], strides = [1, 1]} : vector<384x16xf32> to vector<64x16xf32>
    %307 = vector.extract_strided_slice %304 {offsets = [0, 0], sizes = [1, 16], strides = [1, 1]} : vector<8x16xf32> to vector<1x16xf32>
    %308 = vector.broadcast %307 : vector<1x16xf32> to vector<64x16xf32>
    %309 = arith.mulf %306, %308 : vector<64x16xf32>
    %310 = vector.extract_strided_slice %280 {offsets = [256, 0], sizes = [64, 16], strides = [1, 1]} : vector<384x16xf32> to vector<64x16xf32>
    %311 = vector.extract_strided_slice %304 {offsets = [1, 0], sizes = [1, 16], strides = [1, 1]} : vector<8x16xf32> to vector<1x16xf32>
    %312 = vector.broadcast %311 : vector<1x16xf32> to vector<64x16xf32>
    %313 = arith.mulf %310, %312 : vector<64x16xf32>
    %314 = arith.addf %309, %313 : vector<64x16xf32>
    %315 = vector.extract_strided_slice %280 {offsets = [320, 0], sizes = [64, 16], strides = [1, 1]} : vector<384x16xf32> to vector<64x16xf32>
    %316 = vector.extract_strided_slice %304 {offsets = [2, 0], sizes = [1, 16], strides = [1, 1]} : vector<8x16xf32> to vector<1x16xf32>
    %317 = vector.broadcast %316 : vector<1x16xf32> to vector<64x16xf32>
    %318 = arith.mulf %315, %317 : vector<64x16xf32>
    %319 = arith.addf %314, %318 : vector<64x16xf32>
    %320 = vector.broadcast %305 : vector<1x16xf32> to vector<64x16xf32>
    %321 = arith.addf %319, %320 : vector<64x16xf32>
    %cst_121 = arith.constant 0.000000e+00 : f32
    %cst_122 = arith.constant 3.000000e+00 : f32
    %322 = vector.broadcast %cst_121 : f32 to vector<64x16xf32>
    %323 = arith.maximumf %322, %321 : vector<64x16xf32>
    %324 = vector.broadcast %cst_122 : f32 to vector<64x16xf32>
    %325 = arith.minimumf %324, %323 : vector<64x16xf32>
    %c16_123 = arith.constant 16 : index
    %c0_124 = arith.constant 0 : index
    %326 = vector.load %arg3[%c16_123, %c0_124] : memref<40x16xf32, #tpu.memory_space<vmem>>, vector<1x16xf32>
    %327 = vector.extract_strided_slice %281 {offsets = [0, 0], sizes = [64, 16], strides = [1, 1]} : vector<384x16xf32> to vector<64x16xf32>
    %c2_125 = arith.constant 2 : index
    %c0_126 = arith.constant 0 : index
    %c0_127 = arith.constant 0 : index
    %c0_128 = arith.constant 0 : index
    %328 = vector.load %arg5[%c2_125, %c0_126, %c0_127, %c0_128] : memref<8x3x16x16xf32, #tpu.memory_space<vmem>>, vector<1x1x16x16xf32>
    %329 = vector.shape_cast %328 : vector<1x1x16x16xf32> to vector<16x16xf32>
    %cst_129 = arith.constant dense<0.000000e+00> : vector<64x16xf32>
    %330 = tpu.matmul %327, %329, %cst_129 {dimension_numbers = #tpu.dot_dimension_numbers<[1], [0], [0], [1], [0, 0, 1, 1], [], []>} : vector<64x16xf32>, vector<16x16xf32>, vector<64x16xf32> -> vector<64x16xf32>
    %331 = vector.extract_strided_slice %281 {offsets = [64, 0], sizes = [64, 16], strides = [1, 1]} : vector<384x16xf32> to vector<64x16xf32>
    %c2_130 = arith.constant 2 : index
    %c1_131 = arith.constant 1 : index
    %c0_132 = arith.constant 0 : index
    %c0_133 = arith.constant 0 : index
    %332 = vector.load %arg5[%c2_130, %c1_131, %c0_132, %c0_133] : memref<8x3x16x16xf32, #tpu.memory_space<vmem>>, vector<1x1x16x16xf32>
    %333 = vector.shape_cast %332 : vector<1x1x16x16xf32> to vector<16x16xf32>
    %cst_134 = arith.constant dense<0.000000e+00> : vector<64x16xf32>
    %334 = tpu.matmul %331, %333, %cst_134 {dimension_numbers = #tpu.dot_dimension_numbers<[1], [0], [0], [1], [0, 0, 1, 1], [], []>} : vector<64x16xf32>, vector<16x16xf32>, vector<64x16xf32> -> vector<64x16xf32>
    %335 = arith.addf %330, %334 : vector<64x16xf32>
    %336 = vector.extract_strided_slice %281 {offsets = [128, 0], sizes = [64, 16], strides = [1, 1]} : vector<384x16xf32> to vector<64x16xf32>
    %c2_135 = arith.constant 2 : index
    %c2_136 = arith.constant 2 : index
    %c0_137 = arith.constant 0 : index
    %c0_138 = arith.constant 0 : index
    %337 = vector.load %arg5[%c2_135, %c2_136, %c0_137, %c0_138] : memref<8x3x16x16xf32, #tpu.memory_space<vmem>>, vector<1x1x16x16xf32>
    %338 = vector.shape_cast %337 : vector<1x1x16x16xf32> to vector<16x16xf32>
    %cst_139 = arith.constant dense<0.000000e+00> : vector<64x16xf32>
    %339 = tpu.matmul %336, %338, %cst_139 {dimension_numbers = #tpu.dot_dimension_numbers<[1], [0], [0], [1], [0, 0, 1, 1], [], []>} : vector<64x16xf32>, vector<16x16xf32>, vector<64x16xf32> -> vector<64x16xf32>
    %340 = arith.addf %335, %339 : vector<64x16xf32>
    %341 = vector.broadcast %326 : vector<1x16xf32> to vector<64x16xf32>
    %342 = arith.addf %340, %341 : vector<64x16xf32>
    %cst_140 = arith.constant 0.000000e+00 : f32
    %343 = vector.broadcast %cst_140 : f32 to vector<64x16xf32>
    %344 = arith.maximumf %342, %343 : vector<64x16xf32>
    %c17 = arith.constant 17 : index
    %c0_141 = arith.constant 0 : index
    %345 = vector.load %arg3[%c17, %c0_141] : memref<40x16xf32, #tpu.memory_space<vmem>>, vector<1x16xf32>
    %346 = vector.extract_strided_slice %281 {offsets = [192, 0], sizes = [64, 16], strides = [1, 1]} : vector<384x16xf32> to vector<64x16xf32>
    %c3_142 = arith.constant 3 : index
    %c0_143 = arith.constant 0 : index
    %c0_144 = arith.constant 0 : index
    %c0_145 = arith.constant 0 : index
    %347 = vector.load %arg5[%c3_142, %c0_143, %c0_144, %c0_145] : memref<8x3x16x16xf32, #tpu.memory_space<vmem>>, vector<1x1x16x16xf32>
    %348 = vector.shape_cast %347 : vector<1x1x16x16xf32> to vector<16x16xf32>
    %cst_146 = arith.constant dense<0.000000e+00> : vector<64x16xf32>
    %349 = tpu.matmul %346, %348, %cst_146 {dimension_numbers = #tpu.dot_dimension_numbers<[1], [0], [0], [1], [0, 0, 1, 1], [], []>} : vector<64x16xf32>, vector<16x16xf32>, vector<64x16xf32> -> vector<64x16xf32>
    %350 = vector.extract_strided_slice %281 {offsets = [256, 0], sizes = [64, 16], strides = [1, 1]} : vector<384x16xf32> to vector<64x16xf32>
    %c3_147 = arith.constant 3 : index
    %c1_148 = arith.constant 1 : index
    %c0_149 = arith.constant 0 : index
    %c0_150 = arith.constant 0 : index
    %351 = vector.load %arg5[%c3_147, %c1_148, %c0_149, %c0_150] : memref<8x3x16x16xf32, #tpu.memory_space<vmem>>, vector<1x1x16x16xf32>
    %352 = vector.shape_cast %351 : vector<1x1x16x16xf32> to vector<16x16xf32>
    %cst_151 = arith.constant dense<0.000000e+00> : vector<64x16xf32>
    %353 = tpu.matmul %350, %352, %cst_151 {dimension_numbers = #tpu.dot_dimension_numbers<[1], [0], [0], [1], [0, 0, 1, 1], [], []>} : vector<64x16xf32>, vector<16x16xf32>, vector<64x16xf32> -> vector<64x16xf32>
    %354 = arith.addf %349, %353 : vector<64x16xf32>
    %355 = vector.extract_strided_slice %281 {offsets = [320, 0], sizes = [64, 16], strides = [1, 1]} : vector<384x16xf32> to vector<64x16xf32>
    %c3_152 = arith.constant 3 : index
    %c2_153 = arith.constant 2 : index
    %c0_154 = arith.constant 0 : index
    %c0_155 = arith.constant 0 : index
    %356 = vector.load %arg5[%c3_152, %c2_153, %c0_154, %c0_155] : memref<8x3x16x16xf32, #tpu.memory_space<vmem>>, vector<1x1x16x16xf32>
    %357 = vector.shape_cast %356 : vector<1x1x16x16xf32> to vector<16x16xf32>
    %cst_156 = arith.constant dense<0.000000e+00> : vector<64x16xf32>
    %358 = tpu.matmul %355, %357, %cst_156 {dimension_numbers = #tpu.dot_dimension_numbers<[1], [0], [0], [1], [0, 0, 1, 1], [], []>} : vector<64x16xf32>, vector<16x16xf32>, vector<64x16xf32> -> vector<64x16xf32>
    %359 = arith.addf %354, %358 : vector<64x16xf32>
    %360 = vector.broadcast %345 : vector<1x16xf32> to vector<64x16xf32>
    %361 = arith.addf %359, %360 : vector<64x16xf32>
    %cst_157 = arith.constant 0.000000e+00 : f32
    %362 = vector.broadcast %cst_157 : f32 to vector<64x16xf32>
    %363 = arith.maximumf %361, %362 : vector<64x16xf32>
    %c6_158 = arith.constant 6 : index
    %c0_159 = arith.constant 0 : index
    %c0_160 = arith.constant 0 : index
    %364 = vector.load %arg4[%c6_158, %c0_159, %c0_160] : memref<16x32x16xf32, #tpu.memory_space<vmem>>, vector<1x32x16xf32>
    %365 = vector.shape_cast %364 : vector<1x32x16xf32> to vector<32x16xf32>
    %366 = vector.extract_strided_slice %365 {offsets = [0, 0], sizes = [16, 16], strides = [1, 1]} : vector<32x16xf32> to vector<16x16xf32>
    %367 = vector.extract_strided_slice %365 {offsets = [16, 0], sizes = [16, 16], strides = [1, 1]} : vector<32x16xf32> to vector<16x16xf32>
    %c18 = arith.constant 18 : index
    %c0_161 = arith.constant 0 : index
    %368 = vector.load %arg3[%c18, %c0_161] : memref<40x16xf32, #tpu.memory_space<vmem>>, vector<1x16xf32>
    %c7_162 = arith.constant 7 : index
    %c0_163 = arith.constant 0 : index
    %c0_164 = arith.constant 0 : index
    %369 = vector.load %arg4[%c7_162, %c0_163, %c0_164] : memref<16x32x16xf32, #tpu.memory_space<vmem>>, vector<1x32x16xf32>
    %370 = vector.shape_cast %369 : vector<1x32x16xf32> to vector<32x16xf32>
    %371 = vector.extract_strided_slice %370 {offsets = [0, 0], sizes = [16, 16], strides = [1, 1]} : vector<32x16xf32> to vector<16x16xf32>
    %372 = vector.extract_strided_slice %370 {offsets = [16, 0], sizes = [16, 16], strides = [1, 1]} : vector<32x16xf32> to vector<16x16xf32>
    %c19 = arith.constant 19 : index
    %c0_165 = arith.constant 0 : index
    %373 = vector.load %arg3[%c19, %c0_165] : memref<40x16xf32, #tpu.memory_space<vmem>>, vector<1x16xf32>
    %cst_166 = arith.constant dense<0.000000e+00> : vector<64x16xf32>
    %374 = tpu.matmul %303, %366, %cst_166 {dimension_numbers = #tpu.dot_dimension_numbers<[1], [0], [0], [1], [0, 0, 1, 1], [], []>} : vector<64x16xf32>, vector<16x16xf32>, vector<64x16xf32> -> vector<64x16xf32>
    %cst_167 = arith.constant dense<0.000000e+00> : vector<64x16xf32>
    %375 = tpu.matmul %325, %367, %cst_167 {dimension_numbers = #tpu.dot_dimension_numbers<[1], [0], [0], [1], [0, 0, 1, 1], [], []>} : vector<64x16xf32>, vector<16x16xf32>, vector<64x16xf32> -> vector<64x16xf32>
    %376 = arith.addf %374, %375 : vector<64x16xf32>
    %377 = vector.broadcast %368 : vector<1x16xf32> to vector<64x16xf32>
    %378 = arith.addf %376, %377 : vector<64x16xf32>
    %cst_168 = arith.constant 0.000000e+00 : f32
    %379 = vector.broadcast %cst_168 : f32 to vector<64x16xf32>
    %380 = arith.maximumf %378, %379 : vector<64x16xf32>
    %cst_169 = arith.constant dense<0.000000e+00> : vector<64x16xf32>
    %381 = tpu.matmul %344, %371, %cst_169 {dimension_numbers = #tpu.dot_dimension_numbers<[1], [0], [0], [1], [0, 0, 1, 1], [], []>} : vector<64x16xf32>, vector<16x16xf32>, vector<64x16xf32> -> vector<64x16xf32>
    %cst_170 = arith.constant dense<0.000000e+00> : vector<64x16xf32>
    %382 = tpu.matmul %363, %372, %cst_170 {dimension_numbers = #tpu.dot_dimension_numbers<[1], [0], [0], [1], [0, 0, 1, 1], [], []>} : vector<64x16xf32>, vector<16x16xf32>, vector<64x16xf32> -> vector<64x16xf32>
    %383 = arith.addf %381, %382 : vector<64x16xf32>
    %384 = vector.broadcast %373 : vector<1x16xf32> to vector<64x16xf32>
    %385 = arith.addf %383, %384 : vector<64x16xf32>
    %cst_171 = arith.constant 0.000000e+00 : f32
    %386 = vector.broadcast %cst_171 : f32 to vector<64x16xf32>
    %387 = arith.maximumf %385, %386 : vector<64x16xf32>
    %c0_172 = arith.constant 0 : index
    %c0_173 = arith.constant 0 : index
    %388 = vector.load %arg9[%c0_172, %c0_173] : memref<144x64xf32, #tpu.memory_space<vmem>>, vector<144x64xf32>
    %c0_174 = arith.constant 0 : index
    %c0_175 = arith.constant 0 : index
    %389 = vector.load %arg10[%c0_174, %c0_175] : memref<96x16xf32, #tpu.memory_space<vmem>>, vector<96x16xf32>
    %c64 = arith.constant 64 : index
    %c0_176 = arith.constant 0 : index
    %390 = vector.load %arg6[%c64, %c0_176] : memref<128x16xf32, #tpu.memory_space<vmem>>, vector<16x16xf32>
    %c20 = arith.constant 20 : index
    %c0_177 = arith.constant 0 : index
    %391 = vector.load %arg3[%c20, %c0_177] : memref<40x16xf32, #tpu.memory_space<vmem>>, vector<1x16xf32>
    %c80 = arith.constant 80 : index
    %c0_178 = arith.constant 0 : index
    %392 = vector.load %arg6[%c80, %c0_178] : memref<128x16xf32, #tpu.memory_space<vmem>>, vector<16x16xf32>
    %c21 = arith.constant 21 : index
    %c0_179 = arith.constant 0 : index
    %393 = vector.load %arg3[%c21, %c0_179] : memref<40x16xf32, #tpu.memory_space<vmem>>, vector<1x16xf32>
    %cst_180 = arith.constant dense<0.000000e+00> : vector<144x16xf32>
    %394 = tpu.matmul %388, %380, %cst_180 {dimension_numbers = #tpu.dot_dimension_numbers<[1], [0], [0], [1], [0, 0, 1, 1], [], []>} : vector<144x64xf32>, vector<64x16xf32>, vector<144x16xf32> -> vector<144x16xf32>
    %395 = vector.extract_strided_slice %394 {offsets = [0, 0], sizes = [16, 16], strides = [1, 1]} : vector<144x16xf32> to vector<16x16xf32>
    %396 = vector.extract_strided_slice %390 {offsets = [0, 0], sizes = [1, 16], strides = [1, 1]} : vector<16x16xf32> to vector<1x16xf32>
    %397 = vector.broadcast %396 : vector<1x16xf32> to vector<16x16xf32>
    %398 = arith.mulf %395, %397 : vector<16x16xf32>
    %399 = vector.extract_strided_slice %394 {offsets = [16, 0], sizes = [16, 16], strides = [1, 1]} : vector<144x16xf32> to vector<16x16xf32>
    %400 = vector.extract_strided_slice %390 {offsets = [1, 0], sizes = [1, 16], strides = [1, 1]} : vector<16x16xf32> to vector<1x16xf32>
    %401 = vector.broadcast %400 : vector<1x16xf32> to vector<16x16xf32>
    %402 = arith.mulf %399, %401 : vector<16x16xf32>
    %403 = arith.addf %398, %402 : vector<16x16xf32>
    %404 = vector.extract_strided_slice %394 {offsets = [32, 0], sizes = [16, 16], strides = [1, 1]} : vector<144x16xf32> to vector<16x16xf32>
    %405 = vector.extract_strided_slice %390 {offsets = [2, 0], sizes = [1, 16], strides = [1, 1]} : vector<16x16xf32> to vector<1x16xf32>
    %406 = vector.broadcast %405 : vector<1x16xf32> to vector<16x16xf32>
    %407 = arith.mulf %404, %406 : vector<16x16xf32>
    %408 = arith.addf %403, %407 : vector<16x16xf32>
    %409 = vector.extract_strided_slice %394 {offsets = [48, 0], sizes = [16, 16], strides = [1, 1]} : vector<144x16xf32> to vector<16x16xf32>
    %410 = vector.extract_strided_slice %390 {offsets = [3, 0], sizes = [1, 16], strides = [1, 1]} : vector<16x16xf32> to vector<1x16xf32>
    %411 = vector.broadcast %410 : vector<1x16xf32> to vector<16x16xf32>
    %412 = arith.mulf %409, %411 : vector<16x16xf32>
    %413 = arith.addf %408, %412 : vector<16x16xf32>
    %414 = vector.extract_strided_slice %394 {offsets = [64, 0], sizes = [16, 16], strides = [1, 1]} : vector<144x16xf32> to vector<16x16xf32>
    %415 = vector.extract_strided_slice %390 {offsets = [4, 0], sizes = [1, 16], strides = [1, 1]} : vector<16x16xf32> to vector<1x16xf32>
    %416 = vector.broadcast %415 : vector<1x16xf32> to vector<16x16xf32>
    %417 = arith.mulf %414, %416 : vector<16x16xf32>
    %418 = arith.addf %413, %417 : vector<16x16xf32>
    %419 = vector.extract_strided_slice %394 {offsets = [80, 0], sizes = [16, 16], strides = [1, 1]} : vector<144x16xf32> to vector<16x16xf32>
    %420 = vector.extract_strided_slice %390 {offsets = [5, 0], sizes = [1, 16], strides = [1, 1]} : vector<16x16xf32> to vector<1x16xf32>
    %421 = vector.broadcast %420 : vector<1x16xf32> to vector<16x16xf32>
    %422 = arith.mulf %419, %421 : vector<16x16xf32>
    %423 = arith.addf %418, %422 : vector<16x16xf32>
    %424 = vector.extract_strided_slice %394 {offsets = [96, 0], sizes = [16, 16], strides = [1, 1]} : vector<144x16xf32> to vector<16x16xf32>
    %425 = vector.extract_strided_slice %390 {offsets = [6, 0], sizes = [1, 16], strides = [1, 1]} : vector<16x16xf32> to vector<1x16xf32>
    %426 = vector.broadcast %425 : vector<1x16xf32> to vector<16x16xf32>
    %427 = arith.mulf %424, %426 : vector<16x16xf32>
    %428 = arith.addf %423, %427 : vector<16x16xf32>
    %429 = vector.extract_strided_slice %394 {offsets = [112, 0], sizes = [16, 16], strides = [1, 1]} : vector<144x16xf32> to vector<16x16xf32>
    %430 = vector.extract_strided_slice %390 {offsets = [7, 0], sizes = [1, 16], strides = [1, 1]} : vector<16x16xf32> to vector<1x16xf32>
    %431 = vector.broadcast %430 : vector<1x16xf32> to vector<16x16xf32>
    %432 = arith.mulf %429, %431 : vector<16x16xf32>
    %433 = arith.addf %428, %432 : vector<16x16xf32>
    %434 = vector.extract_strided_slice %394 {offsets = [128, 0], sizes = [16, 16], strides = [1, 1]} : vector<144x16xf32> to vector<16x16xf32>
    %435 = vector.extract_strided_slice %390 {offsets = [8, 0], sizes = [1, 16], strides = [1, 1]} : vector<16x16xf32> to vector<1x16xf32>
    %436 = vector.broadcast %435 : vector<1x16xf32> to vector<16x16xf32>
    %437 = arith.mulf %434, %436 : vector<16x16xf32>
    %438 = arith.addf %433, %437 : vector<16x16xf32>
    %439 = vector.broadcast %391 : vector<1x16xf32> to vector<16x16xf32>
    %440 = arith.addf %438, %439 : vector<16x16xf32>
    %cst_181 = arith.constant 0.000000e+00 : f32
    %cst_182 = arith.constant 3.000000e+00 : f32
    %441 = vector.broadcast %cst_181 : f32 to vector<16x16xf32>
    %442 = arith.maximumf %441, %440 : vector<16x16xf32>
    %443 = vector.broadcast %cst_182 : f32 to vector<16x16xf32>
    %444 = arith.minimumf %443, %442 : vector<16x16xf32>
    %cst_183 = arith.constant dense<0.000000e+00> : vector<144x16xf32>
    %445 = tpu.matmul %388, %387, %cst_183 {dimension_numbers = #tpu.dot_dimension_numbers<[1], [0], [0], [1], [0, 0, 1, 1], [], []>} : vector<144x64xf32>, vector<64x16xf32>, vector<144x16xf32> -> vector<144x16xf32>
    %446 = vector.extract_strided_slice %445 {offsets = [0, 0], sizes = [16, 16], strides = [1, 1]} : vector<144x16xf32> to vector<16x16xf32>
    %447 = vector.extract_strided_slice %392 {offsets = [0, 0], sizes = [1, 16], strides = [1, 1]} : vector<16x16xf32> to vector<1x16xf32>
    %448 = vector.broadcast %447 : vector<1x16xf32> to vector<16x16xf32>
    %449 = arith.mulf %446, %448 : vector<16x16xf32>
    %450 = vector.extract_strided_slice %445 {offsets = [16, 0], sizes = [16, 16], strides = [1, 1]} : vector<144x16xf32> to vector<16x16xf32>
    %451 = vector.extract_strided_slice %392 {offsets = [1, 0], sizes = [1, 16], strides = [1, 1]} : vector<16x16xf32> to vector<1x16xf32>
    %452 = vector.broadcast %451 : vector<1x16xf32> to vector<16x16xf32>
    %453 = arith.mulf %450, %452 : vector<16x16xf32>
    %454 = arith.addf %449, %453 : vector<16x16xf32>
    %455 = vector.extract_strided_slice %445 {offsets = [32, 0], sizes = [16, 16], strides = [1, 1]} : vector<144x16xf32> to vector<16x16xf32>
    %456 = vector.extract_strided_slice %392 {offsets = [2, 0], sizes = [1, 16], strides = [1, 1]} : vector<16x16xf32> to vector<1x16xf32>
    %457 = vector.broadcast %456 : vector<1x16xf32> to vector<16x16xf32>
    %458 = arith.mulf %455, %457 : vector<16x16xf32>
    %459 = arith.addf %454, %458 : vector<16x16xf32>
    %460 = vector.extract_strided_slice %445 {offsets = [48, 0], sizes = [16, 16], strides = [1, 1]} : vector<144x16xf32> to vector<16x16xf32>
    %461 = vector.extract_strided_slice %392 {offsets = [3, 0], sizes = [1, 16], strides = [1, 1]} : vector<16x16xf32> to vector<1x16xf32>
    %462 = vector.broadcast %461 : vector<1x16xf32> to vector<16x16xf32>
    %463 = arith.mulf %460, %462 : vector<16x16xf32>
    %464 = arith.addf %459, %463 : vector<16x16xf32>
    %465 = vector.extract_strided_slice %445 {offsets = [64, 0], sizes = [16, 16], strides = [1, 1]} : vector<144x16xf32> to vector<16x16xf32>
    %466 = vector.extract_strided_slice %392 {offsets = [4, 0], sizes = [1, 16], strides = [1, 1]} : vector<16x16xf32> to vector<1x16xf32>
    %467 = vector.broadcast %466 : vector<1x16xf32> to vector<16x16xf32>
    %468 = arith.mulf %465, %467 : vector<16x16xf32>
    %469 = arith.addf %464, %468 : vector<16x16xf32>
    %470 = vector.extract_strided_slice %445 {offsets = [80, 0], sizes = [16, 16], strides = [1, 1]} : vector<144x16xf32> to vector<16x16xf32>
    %471 = vector.extract_strided_slice %392 {offsets = [5, 0], sizes = [1, 16], strides = [1, 1]} : vector<16x16xf32> to vector<1x16xf32>
    %472 = vector.broadcast %471 : vector<1x16xf32> to vector<16x16xf32>
    %473 = arith.mulf %470, %472 : vector<16x16xf32>
    %474 = arith.addf %469, %473 : vector<16x16xf32>
    %475 = vector.extract_strided_slice %445 {offsets = [96, 0], sizes = [16, 16], strides = [1, 1]} : vector<144x16xf32> to vector<16x16xf32>
    %476 = vector.extract_strided_slice %392 {offsets = [6, 0], sizes = [1, 16], strides = [1, 1]} : vector<16x16xf32> to vector<1x16xf32>
    %477 = vector.broadcast %476 : vector<1x16xf32> to vector<16x16xf32>
    %478 = arith.mulf %475, %477 : vector<16x16xf32>
    %479 = arith.addf %474, %478 : vector<16x16xf32>
    %480 = vector.extract_strided_slice %445 {offsets = [112, 0], sizes = [16, 16], strides = [1, 1]} : vector<144x16xf32> to vector<16x16xf32>
    %481 = vector.extract_strided_slice %392 {offsets = [7, 0], sizes = [1, 16], strides = [1, 1]} : vector<16x16xf32> to vector<1x16xf32>
    %482 = vector.broadcast %481 : vector<1x16xf32> to vector<16x16xf32>
    %483 = arith.mulf %480, %482 : vector<16x16xf32>
    %484 = arith.addf %479, %483 : vector<16x16xf32>
    %485 = vector.extract_strided_slice %445 {offsets = [128, 0], sizes = [16, 16], strides = [1, 1]} : vector<144x16xf32> to vector<16x16xf32>
    %486 = vector.extract_strided_slice %392 {offsets = [8, 0], sizes = [1, 16], strides = [1, 1]} : vector<16x16xf32> to vector<1x16xf32>
    %487 = vector.broadcast %486 : vector<1x16xf32> to vector<16x16xf32>
    %488 = arith.mulf %485, %487 : vector<16x16xf32>
    %489 = arith.addf %484, %488 : vector<16x16xf32>
    %490 = vector.broadcast %393 : vector<1x16xf32> to vector<16x16xf32>
    %491 = arith.addf %489, %490 : vector<16x16xf32>
    %cst_184 = arith.constant 0.000000e+00 : f32
    %cst_185 = arith.constant 3.000000e+00 : f32
    %492 = vector.broadcast %cst_184 : f32 to vector<16x16xf32>
    %493 = arith.maximumf %492, %491 : vector<16x16xf32>
    %494 = vector.broadcast %cst_185 : f32 to vector<16x16xf32>
    %495 = arith.minimumf %494, %493 : vector<16x16xf32>
    %c8_186 = arith.constant 8 : index
    %c0_187 = arith.constant 0 : index
    %c0_188 = arith.constant 0 : index
    %496 = vector.load %arg4[%c8_186, %c0_187, %c0_188] : memref<16x32x16xf32, #tpu.memory_space<vmem>>, vector<1x32x16xf32>
    %497 = vector.shape_cast %496 : vector<1x32x16xf32> to vector<32x16xf32>
    %498 = vector.extract_strided_slice %497 {offsets = [0, 0], sizes = [16, 16], strides = [1, 1]} : vector<32x16xf32> to vector<16x16xf32>
    %499 = vector.extract_strided_slice %497 {offsets = [16, 0], sizes = [16, 16], strides = [1, 1]} : vector<32x16xf32> to vector<16x16xf32>
    %c22 = arith.constant 22 : index
    %c0_189 = arith.constant 0 : index
    %500 = vector.load %arg3[%c22, %c0_189] : memref<40x16xf32, #tpu.memory_space<vmem>>, vector<1x16xf32>
    %c9_190 = arith.constant 9 : index
    %c0_191 = arith.constant 0 : index
    %c0_192 = arith.constant 0 : index
    %501 = vector.load %arg4[%c9_190, %c0_191, %c0_192] : memref<16x32x16xf32, #tpu.memory_space<vmem>>, vector<1x32x16xf32>
    %502 = vector.shape_cast %501 : vector<1x32x16xf32> to vector<32x16xf32>
    %503 = vector.extract_strided_slice %502 {offsets = [0, 0], sizes = [16, 16], strides = [1, 1]} : vector<32x16xf32> to vector<16x16xf32>
    %504 = vector.extract_strided_slice %502 {offsets = [16, 0], sizes = [16, 16], strides = [1, 1]} : vector<32x16xf32> to vector<16x16xf32>
    %c23 = arith.constant 23 : index
    %c0_193 = arith.constant 0 : index
    %505 = vector.load %arg3[%c23, %c0_193] : memref<40x16xf32, #tpu.memory_space<vmem>>, vector<1x16xf32>
    %cst_194 = arith.constant dense<0.000000e+00> : vector<16x16xf32>
    %506 = tpu.matmul %444, %498, %cst_194 {dimension_numbers = #tpu.dot_dimension_numbers<[1], [0], [0], [1], [0, 0, 1, 1], [], []>} : vector<16x16xf32>, vector<16x16xf32>, vector<16x16xf32> -> vector<16x16xf32>
    %cst_195 = arith.constant dense<0.000000e+00> : vector<16x16xf32>
    %507 = tpu.matmul %495, %499, %cst_195 {dimension_numbers = #tpu.dot_dimension_numbers<[1], [0], [0], [1], [0, 0, 1, 1], [], []>} : vector<16x16xf32>, vector<16x16xf32>, vector<16x16xf32> -> vector<16x16xf32>
    %508 = arith.addf %506, %507 : vector<16x16xf32>
    %509 = vector.broadcast %500 : vector<1x16xf32> to vector<16x16xf32>
    %510 = arith.addf %508, %509 : vector<16x16xf32>
    %cst_196 = arith.constant 0.000000e+00 : f32
    %511 = vector.broadcast %cst_196 : f32 to vector<16x16xf32>
    %512 = arith.maximumf %510, %511 : vector<16x16xf32>
    %cst_197 = arith.constant dense<0.000000e+00> : vector<16x16xf32>
    %513 = tpu.matmul %444, %503, %cst_197 {dimension_numbers = #tpu.dot_dimension_numbers<[1], [0], [0], [1], [0, 0, 1, 1], [], []>} : vector<16x16xf32>, vector<16x16xf32>, vector<16x16xf32> -> vector<16x16xf32>
    %cst_198 = arith.constant dense<0.000000e+00> : vector<16x16xf32>
    %514 = tpu.matmul %495, %504, %cst_198 {dimension_numbers = #tpu.dot_dimension_numbers<[1], [0], [0], [1], [0, 0, 1, 1], [], []>} : vector<16x16xf32>, vector<16x16xf32>, vector<16x16xf32> -> vector<16x16xf32>
    %515 = arith.addf %513, %514 : vector<16x16xf32>
    %516 = vector.broadcast %505 : vector<1x16xf32> to vector<16x16xf32>
    %517 = arith.addf %515, %516 : vector<16x16xf32>
    %cst_199 = arith.constant 0.000000e+00 : f32
    %518 = vector.broadcast %cst_199 : f32 to vector<16x16xf32>
    %519 = arith.maximumf %517, %518 : vector<16x16xf32>
    %cst_200 = arith.constant dense<0.000000e+00> : vector<96x16xf32>
    %520 = tpu.matmul %389, %512, %cst_200 {dimension_numbers = #tpu.dot_dimension_numbers<[1], [0], [0], [1], [0, 0, 1, 1], [], []>} : vector<96x16xf32>, vector<16x16xf32>, vector<96x16xf32> -> vector<96x16xf32>
    %cst_201 = arith.constant dense<0.000000e+00> : vector<96x16xf32>
    %521 = tpu.matmul %389, %519, %cst_201 {dimension_numbers = #tpu.dot_dimension_numbers<[1], [0], [0], [1], [0, 0, 1, 1], [], []>} : vector<96x16xf32>, vector<16x16xf32>, vector<96x16xf32> -> vector<96x16xf32>
    %c96 = arith.constant 96 : index
    %c0_202 = arith.constant 0 : index
    %522 = vector.load %arg6[%c96, %c0_202] : memref<128x16xf32, #tpu.memory_space<vmem>>, vector<8x16xf32>
    %c24 = arith.constant 24 : index
    %c0_203 = arith.constant 0 : index
    %523 = vector.load %arg3[%c24, %c0_203] : memref<40x16xf32, #tpu.memory_space<vmem>>, vector<1x16xf32>
    %524 = vector.extract_strided_slice %520 {offsets = [0, 0], sizes = [16, 16], strides = [1, 1]} : vector<96x16xf32> to vector<16x16xf32>
    %525 = vector.extract_strided_slice %522 {offsets = [0, 0], sizes = [1, 16], strides = [1, 1]} : vector<8x16xf32> to vector<1x16xf32>
    %526 = vector.broadcast %525 : vector<1x16xf32> to vector<16x16xf32>
    %527 = arith.mulf %524, %526 : vector<16x16xf32>
    %528 = vector.extract_strided_slice %520 {offsets = [16, 0], sizes = [16, 16], strides = [1, 1]} : vector<96x16xf32> to vector<16x16xf32>
    %529 = vector.extract_strided_slice %522 {offsets = [1, 0], sizes = [1, 16], strides = [1, 1]} : vector<8x16xf32> to vector<1x16xf32>
    %530 = vector.broadcast %529 : vector<1x16xf32> to vector<16x16xf32>
    %531 = arith.mulf %528, %530 : vector<16x16xf32>
    %532 = arith.addf %527, %531 : vector<16x16xf32>
    %533 = vector.extract_strided_slice %520 {offsets = [32, 0], sizes = [16, 16], strides = [1, 1]} : vector<96x16xf32> to vector<16x16xf32>
    %534 = vector.extract_strided_slice %522 {offsets = [2, 0], sizes = [1, 16], strides = [1, 1]} : vector<8x16xf32> to vector<1x16xf32>
    %535 = vector.broadcast %534 : vector<1x16xf32> to vector<16x16xf32>
    %536 = arith.mulf %533, %535 : vector<16x16xf32>
    %537 = arith.addf %532, %536 : vector<16x16xf32>
    %538 = vector.broadcast %523 : vector<1x16xf32> to vector<16x16xf32>
    %539 = arith.addf %537, %538 : vector<16x16xf32>
    %cst_204 = arith.constant 0.000000e+00 : f32
    %cst_205 = arith.constant 3.000000e+00 : f32
    %540 = vector.broadcast %cst_204 : f32 to vector<16x16xf32>
    %541 = arith.maximumf %540, %539 : vector<16x16xf32>
    %542 = vector.broadcast %cst_205 : f32 to vector<16x16xf32>
    %543 = arith.minimumf %542, %541 : vector<16x16xf32>
    %c104 = arith.constant 104 : index
    %c0_206 = arith.constant 0 : index
    %544 = vector.load %arg6[%c104, %c0_206] : memref<128x16xf32, #tpu.memory_space<vmem>>, vector<8x16xf32>
    %c25 = arith.constant 25 : index
    %c0_207 = arith.constant 0 : index
    %545 = vector.load %arg3[%c25, %c0_207] : memref<40x16xf32, #tpu.memory_space<vmem>>, vector<1x16xf32>
    %546 = vector.extract_strided_slice %520 {offsets = [48, 0], sizes = [16, 16], strides = [1, 1]} : vector<96x16xf32> to vector<16x16xf32>
    %547 = vector.extract_strided_slice %544 {offsets = [0, 0], sizes = [1, 16], strides = [1, 1]} : vector<8x16xf32> to vector<1x16xf32>
    %548 = vector.broadcast %547 : vector<1x16xf32> to vector<16x16xf32>
    %549 = arith.mulf %546, %548 : vector<16x16xf32>
    %550 = vector.extract_strided_slice %520 {offsets = [64, 0], sizes = [16, 16], strides = [1, 1]} : vector<96x16xf32> to vector<16x16xf32>
    %551 = vector.extract_strided_slice %544 {offsets = [1, 0], sizes = [1, 16], strides = [1, 1]} : vector<8x16xf32> to vector<1x16xf32>
    %552 = vector.broadcast %551 : vector<1x16xf32> to vector<16x16xf32>
    %553 = arith.mulf %550, %552 : vector<16x16xf32>
    %554 = arith.addf %549, %553 : vector<16x16xf32>
    %555 = vector.extract_strided_slice %520 {offsets = [80, 0], sizes = [16, 16], strides = [1, 1]} : vector<96x16xf32> to vector<16x16xf32>
    %556 = vector.extract_strided_slice %544 {offsets = [2, 0], sizes = [1, 16], strides = [1, 1]} : vector<8x16xf32> to vector<1x16xf32>
    %557 = vector.broadcast %556 : vector<1x16xf32> to vector<16x16xf32>
    %558 = arith.mulf %555, %557 : vector<16x16xf32>
    %559 = arith.addf %554, %558 : vector<16x16xf32>
    %560 = vector.broadcast %545 : vector<1x16xf32> to vector<16x16xf32>
    %561 = arith.addf %559, %560 : vector<16x16xf32>
    %cst_208 = arith.constant 0.000000e+00 : f32
    %cst_209 = arith.constant 3.000000e+00 : f32
    %562 = vector.broadcast %cst_208 : f32 to vector<16x16xf32>
    %563 = arith.maximumf %562, %561 : vector<16x16xf32>
    %564 = vector.broadcast %cst_209 : f32 to vector<16x16xf32>
    %565 = arith.minimumf %564, %563 : vector<16x16xf32>
    %c26 = arith.constant 26 : index
    %c0_210 = arith.constant 0 : index
    %566 = vector.load %arg3[%c26, %c0_210] : memref<40x16xf32, #tpu.memory_space<vmem>>, vector<1x16xf32>
    %567 = vector.extract_strided_slice %521 {offsets = [0, 0], sizes = [16, 16], strides = [1, 1]} : vector<96x16xf32> to vector<16x16xf32>
    %c4_211 = arith.constant 4 : index
    %c0_212 = arith.constant 0 : index
    %c0_213 = arith.constant 0 : index
    %c0_214 = arith.constant 0 : index
    %568 = vector.load %arg5[%c4_211, %c0_212, %c0_213, %c0_214] : memref<8x3x16x16xf32, #tpu.memory_space<vmem>>, vector<1x1x16x16xf32>
    %569 = vector.shape_cast %568 : vector<1x1x16x16xf32> to vector<16x16xf32>
    %cst_215 = arith.constant dense<0.000000e+00> : vector<16x16xf32>
    %570 = tpu.matmul %567, %569, %cst_215 {dimension_numbers = #tpu.dot_dimension_numbers<[1], [0], [0], [1], [0, 0, 1, 1], [], []>} : vector<16x16xf32>, vector<16x16xf32>, vector<16x16xf32> -> vector<16x16xf32>
    %571 = vector.extract_strided_slice %521 {offsets = [16, 0], sizes = [16, 16], strides = [1, 1]} : vector<96x16xf32> to vector<16x16xf32>
    %c4_216 = arith.constant 4 : index
    %c1_217 = arith.constant 1 : index
    %c0_218 = arith.constant 0 : index
    %c0_219 = arith.constant 0 : index
    %572 = vector.load %arg5[%c4_216, %c1_217, %c0_218, %c0_219] : memref<8x3x16x16xf32, #tpu.memory_space<vmem>>, vector<1x1x16x16xf32>
    %573 = vector.shape_cast %572 : vector<1x1x16x16xf32> to vector<16x16xf32>
    %cst_220 = arith.constant dense<0.000000e+00> : vector<16x16xf32>
    %574 = tpu.matmul %571, %573, %cst_220 {dimension_numbers = #tpu.dot_dimension_numbers<[1], [0], [0], [1], [0, 0, 1, 1], [], []>} : vector<16x16xf32>, vector<16x16xf32>, vector<16x16xf32> -> vector<16x16xf32>
    %575 = arith.addf %570, %574 : vector<16x16xf32>
    %576 = vector.extract_strided_slice %521 {offsets = [32, 0], sizes = [16, 16], strides = [1, 1]} : vector<96x16xf32> to vector<16x16xf32>
    %c4_221 = arith.constant 4 : index
    %c2_222 = arith.constant 2 : index
    %c0_223 = arith.constant 0 : index
    %c0_224 = arith.constant 0 : index
    %577 = vector.load %arg5[%c4_221, %c2_222, %c0_223, %c0_224] : memref<8x3x16x16xf32, #tpu.memory_space<vmem>>, vector<1x1x16x16xf32>
    %578 = vector.shape_cast %577 : vector<1x1x16x16xf32> to vector<16x16xf32>
    %cst_225 = arith.constant dense<0.000000e+00> : vector<16x16xf32>
    %579 = tpu.matmul %576, %578, %cst_225 {dimension_numbers = #tpu.dot_dimension_numbers<[1], [0], [0], [1], [0, 0, 1, 1], [], []>} : vector<16x16xf32>, vector<16x16xf32>, vector<16x16xf32> -> vector<16x16xf32>
    %580 = arith.addf %575, %579 : vector<16x16xf32>
    %581 = vector.broadcast %566 : vector<1x16xf32> to vector<16x16xf32>
    %582 = arith.addf %580, %581 : vector<16x16xf32>
    %cst_226 = arith.constant 0.000000e+00 : f32
    %583 = vector.broadcast %cst_226 : f32 to vector<16x16xf32>
    %584 = arith.maximumf %582, %583 : vector<16x16xf32>
    %c27 = arith.constant 27 : index
    %c0_227 = arith.constant 0 : index
    %585 = vector.load %arg3[%c27, %c0_227] : memref<40x16xf32, #tpu.memory_space<vmem>>, vector<1x16xf32>
    %586 = vector.extract_strided_slice %521 {offsets = [48, 0], sizes = [16, 16], strides = [1, 1]} : vector<96x16xf32> to vector<16x16xf32>
    %c5_228 = arith.constant 5 : index
    %c0_229 = arith.constant 0 : index
    %c0_230 = arith.constant 0 : index
    %c0_231 = arith.constant 0 : index
    %587 = vector.load %arg5[%c5_228, %c0_229, %c0_230, %c0_231] : memref<8x3x16x16xf32, #tpu.memory_space<vmem>>, vector<1x1x16x16xf32>
    %588 = vector.shape_cast %587 : vector<1x1x16x16xf32> to vector<16x16xf32>
    %cst_232 = arith.constant dense<0.000000e+00> : vector<16x16xf32>
    %589 = tpu.matmul %586, %588, %cst_232 {dimension_numbers = #tpu.dot_dimension_numbers<[1], [0], [0], [1], [0, 0, 1, 1], [], []>} : vector<16x16xf32>, vector<16x16xf32>, vector<16x16xf32> -> vector<16x16xf32>
    %590 = vector.extract_strided_slice %521 {offsets = [64, 0], sizes = [16, 16], strides = [1, 1]} : vector<96x16xf32> to vector<16x16xf32>
    %c5_233 = arith.constant 5 : index
    %c1_234 = arith.constant 1 : index
    %c0_235 = arith.constant 0 : index
    %c0_236 = arith.constant 0 : index
    %591 = vector.load %arg5[%c5_233, %c1_234, %c0_235, %c0_236] : memref<8x3x16x16xf32, #tpu.memory_space<vmem>>, vector<1x1x16x16xf32>
    %592 = vector.shape_cast %591 : vector<1x1x16x16xf32> to vector<16x16xf32>
    %cst_237 = arith.constant dense<0.000000e+00> : vector<16x16xf32>
    %593 = tpu.matmul %590, %592, %cst_237 {dimension_numbers = #tpu.dot_dimension_numbers<[1], [0], [0], [1], [0, 0, 1, 1], [], []>} : vector<16x16xf32>, vector<16x16xf32>, vector<16x16xf32> -> vector<16x16xf32>
    %594 = arith.addf %589, %593 : vector<16x16xf32>
    %595 = vector.extract_strided_slice %521 {offsets = [80, 0], sizes = [16, 16], strides = [1, 1]} : vector<96x16xf32> to vector<16x16xf32>
    %c5_238 = arith.constant 5 : index
    %c2_239 = arith.constant 2 : index
    %c0_240 = arith.constant 0 : index
    %c0_241 = arith.constant 0 : index
    %596 = vector.load %arg5[%c5_238, %c2_239, %c0_240, %c0_241] : memref<8x3x16x16xf32, #tpu.memory_space<vmem>>, vector<1x1x16x16xf32>
    %597 = vector.shape_cast %596 : vector<1x1x16x16xf32> to vector<16x16xf32>
    %cst_242 = arith.constant dense<0.000000e+00> : vector<16x16xf32>
    %598 = tpu.matmul %595, %597, %cst_242 {dimension_numbers = #tpu.dot_dimension_numbers<[1], [0], [0], [1], [0, 0, 1, 1], [], []>} : vector<16x16xf32>, vector<16x16xf32>, vector<16x16xf32> -> vector<16x16xf32>
    %599 = arith.addf %594, %598 : vector<16x16xf32>
    %600 = vector.broadcast %585 : vector<1x16xf32> to vector<16x16xf32>
    %601 = arith.addf %599, %600 : vector<16x16xf32>
    %cst_243 = arith.constant 0.000000e+00 : f32
    %602 = vector.broadcast %cst_243 : f32 to vector<16x16xf32>
    %603 = arith.maximumf %601, %602 : vector<16x16xf32>
    %c10_244 = arith.constant 10 : index
    %c0_245 = arith.constant 0 : index
    %c0_246 = arith.constant 0 : index
    %604 = vector.load %arg4[%c10_244, %c0_245, %c0_246] : memref<16x32x16xf32, #tpu.memory_space<vmem>>, vector<1x32x16xf32>
    %605 = vector.shape_cast %604 : vector<1x32x16xf32> to vector<32x16xf32>
    %606 = vector.extract_strided_slice %605 {offsets = [0, 0], sizes = [16, 16], strides = [1, 1]} : vector<32x16xf32> to vector<16x16xf32>
    %607 = vector.extract_strided_slice %605 {offsets = [16, 0], sizes = [16, 16], strides = [1, 1]} : vector<32x16xf32> to vector<16x16xf32>
    %c28 = arith.constant 28 : index
    %c0_247 = arith.constant 0 : index
    %608 = vector.load %arg3[%c28, %c0_247] : memref<40x16xf32, #tpu.memory_space<vmem>>, vector<1x16xf32>
    %c11_248 = arith.constant 11 : index
    %c0_249 = arith.constant 0 : index
    %c0_250 = arith.constant 0 : index
    %609 = vector.load %arg4[%c11_248, %c0_249, %c0_250] : memref<16x32x16xf32, #tpu.memory_space<vmem>>, vector<1x32x16xf32>
    %610 = vector.shape_cast %609 : vector<1x32x16xf32> to vector<32x16xf32>
    %611 = vector.extract_strided_slice %610 {offsets = [0, 0], sizes = [16, 16], strides = [1, 1]} : vector<32x16xf32> to vector<16x16xf32>
    %612 = vector.extract_strided_slice %610 {offsets = [16, 0], sizes = [16, 16], strides = [1, 1]} : vector<32x16xf32> to vector<16x16xf32>
    %c29 = arith.constant 29 : index
    %c0_251 = arith.constant 0 : index
    %613 = vector.load %arg3[%c29, %c0_251] : memref<40x16xf32, #tpu.memory_space<vmem>>, vector<1x16xf32>
    %cst_252 = arith.constant dense<0.000000e+00> : vector<16x16xf32>
    %614 = tpu.matmul %543, %606, %cst_252 {dimension_numbers = #tpu.dot_dimension_numbers<[1], [0], [0], [1], [0, 0, 1, 1], [], []>} : vector<16x16xf32>, vector<16x16xf32>, vector<16x16xf32> -> vector<16x16xf32>
    %cst_253 = arith.constant dense<0.000000e+00> : vector<16x16xf32>
    %615 = tpu.matmul %565, %607, %cst_253 {dimension_numbers = #tpu.dot_dimension_numbers<[1], [0], [0], [1], [0, 0, 1, 1], [], []>} : vector<16x16xf32>, vector<16x16xf32>, vector<16x16xf32> -> vector<16x16xf32>
    %616 = arith.addf %614, %615 : vector<16x16xf32>
    %617 = vector.broadcast %608 : vector<1x16xf32> to vector<16x16xf32>
    %618 = arith.addf %616, %617 : vector<16x16xf32>
    %cst_254 = arith.constant 0.000000e+00 : f32
    %619 = vector.broadcast %cst_254 : f32 to vector<16x16xf32>
    %620 = arith.maximumf %618, %619 : vector<16x16xf32>
    %cst_255 = arith.constant dense<0.000000e+00> : vector<16x16xf32>
    %621 = tpu.matmul %584, %611, %cst_255 {dimension_numbers = #tpu.dot_dimension_numbers<[1], [0], [0], [1], [0, 0, 1, 1], [], []>} : vector<16x16xf32>, vector<16x16xf32>, vector<16x16xf32> -> vector<16x16xf32>
    %cst_256 = arith.constant dense<0.000000e+00> : vector<16x16xf32>
    %622 = tpu.matmul %603, %612, %cst_256 {dimension_numbers = #tpu.dot_dimension_numbers<[1], [0], [0], [1], [0, 0, 1, 1], [], []>} : vector<16x16xf32>, vector<16x16xf32>, vector<16x16xf32> -> vector<16x16xf32>
    %623 = arith.addf %621, %622 : vector<16x16xf32>
    %624 = vector.broadcast %613 : vector<1x16xf32> to vector<16x16xf32>
    %625 = arith.addf %623, %624 : vector<16x16xf32>
    %cst_257 = arith.constant 0.000000e+00 : f32
    %626 = vector.broadcast %cst_257 : f32 to vector<16x16xf32>
    %627 = arith.maximumf %625, %626 : vector<16x16xf32>
    %628 = arith.addf %620, %444 : vector<16x16xf32>
    %629 = arith.addf %627, %495 : vector<16x16xf32>
    %c12_258 = arith.constant 12 : index
    %c0_259 = arith.constant 0 : index
    %c0_260 = arith.constant 0 : index
    %630 = vector.load %arg4[%c12_258, %c0_259, %c0_260] : memref<16x32x16xf32, #tpu.memory_space<vmem>>, vector<1x32x16xf32>
    %631 = vector.shape_cast %630 : vector<1x32x16xf32> to vector<32x16xf32>
    %632 = vector.extract_strided_slice %631 {offsets = [0, 0], sizes = [16, 16], strides = [1, 1]} : vector<32x16xf32> to vector<16x16xf32>
    %633 = vector.extract_strided_slice %631 {offsets = [16, 0], sizes = [16, 16], strides = [1, 1]} : vector<32x16xf32> to vector<16x16xf32>
    %c30 = arith.constant 30 : index
    %c0_261 = arith.constant 0 : index
    %634 = vector.load %arg3[%c30, %c0_261] : memref<40x16xf32, #tpu.memory_space<vmem>>, vector<1x16xf32>
    %c13_262 = arith.constant 13 : index
    %c0_263 = arith.constant 0 : index
    %c0_264 = arith.constant 0 : index
    %635 = vector.load %arg4[%c13_262, %c0_263, %c0_264] : memref<16x32x16xf32, #tpu.memory_space<vmem>>, vector<1x32x16xf32>
    %636 = vector.shape_cast %635 : vector<1x32x16xf32> to vector<32x16xf32>
    %637 = vector.extract_strided_slice %636 {offsets = [0, 0], sizes = [16, 16], strides = [1, 1]} : vector<32x16xf32> to vector<16x16xf32>
    %638 = vector.extract_strided_slice %636 {offsets = [16, 0], sizes = [16, 16], strides = [1, 1]} : vector<32x16xf32> to vector<16x16xf32>
    %c31 = arith.constant 31 : index
    %c0_265 = arith.constant 0 : index
    %639 = vector.load %arg3[%c31, %c0_265] : memref<40x16xf32, #tpu.memory_space<vmem>>, vector<1x16xf32>
    %cst_266 = arith.constant dense<0.000000e+00> : vector<16x16xf32>
    %640 = tpu.matmul %628, %632, %cst_266 {dimension_numbers = #tpu.dot_dimension_numbers<[1], [0], [0], [1], [0, 0, 1, 1], [], []>} : vector<16x16xf32>, vector<16x16xf32>, vector<16x16xf32> -> vector<16x16xf32>
    %cst_267 = arith.constant dense<0.000000e+00> : vector<16x16xf32>
    %641 = tpu.matmul %629, %633, %cst_267 {dimension_numbers = #tpu.dot_dimension_numbers<[1], [0], [0], [1], [0, 0, 1, 1], [], []>} : vector<16x16xf32>, vector<16x16xf32>, vector<16x16xf32> -> vector<16x16xf32>
    %642 = arith.addf %640, %641 : vector<16x16xf32>
    %643 = vector.broadcast %634 : vector<1x16xf32> to vector<16x16xf32>
    %644 = arith.addf %642, %643 : vector<16x16xf32>
    %cst_268 = arith.constant 0.000000e+00 : f32
    %645 = vector.broadcast %cst_268 : f32 to vector<16x16xf32>
    %646 = arith.maximumf %644, %645 : vector<16x16xf32>
    %cst_269 = arith.constant dense<0.000000e+00> : vector<16x16xf32>
    %647 = tpu.matmul %628, %637, %cst_269 {dimension_numbers = #tpu.dot_dimension_numbers<[1], [0], [0], [1], [0, 0, 1, 1], [], []>} : vector<16x16xf32>, vector<16x16xf32>, vector<16x16xf32> -> vector<16x16xf32>
    %cst_270 = arith.constant dense<0.000000e+00> : vector<16x16xf32>
    %648 = tpu.matmul %629, %638, %cst_270 {dimension_numbers = #tpu.dot_dimension_numbers<[1], [0], [0], [1], [0, 0, 1, 1], [], []>} : vector<16x16xf32>, vector<16x16xf32>, vector<16x16xf32> -> vector<16x16xf32>
    %649 = arith.addf %647, %648 : vector<16x16xf32>
    %650 = vector.broadcast %639 : vector<1x16xf32> to vector<16x16xf32>
    %651 = arith.addf %649, %650 : vector<16x16xf32>
    %cst_271 = arith.constant 0.000000e+00 : f32
    %652 = vector.broadcast %cst_271 : f32 to vector<16x16xf32>
    %653 = arith.maximumf %651, %652 : vector<16x16xf32>
    %cst_272 = arith.constant dense<0.000000e+00> : vector<96x16xf32>
    %654 = tpu.matmul %389, %646, %cst_272 {dimension_numbers = #tpu.dot_dimension_numbers<[1], [0], [0], [1], [0, 0, 1, 1], [], []>} : vector<96x16xf32>, vector<16x16xf32>, vector<96x16xf32> -> vector<96x16xf32>
    %cst_273 = arith.constant dense<0.000000e+00> : vector<96x16xf32>
    %655 = tpu.matmul %389, %653, %cst_273 {dimension_numbers = #tpu.dot_dimension_numbers<[1], [0], [0], [1], [0, 0, 1, 1], [], []>} : vector<96x16xf32>, vector<16x16xf32>, vector<96x16xf32> -> vector<96x16xf32>
    %c112 = arith.constant 112 : index
    %c0_274 = arith.constant 0 : index
    %656 = vector.load %arg6[%c112, %c0_274] : memref<128x16xf32, #tpu.memory_space<vmem>>, vector<8x16xf32>
    %c32_275 = arith.constant 32 : index
    %c0_276 = arith.constant 0 : index
    %657 = vector.load %arg3[%c32_275, %c0_276] : memref<40x16xf32, #tpu.memory_space<vmem>>, vector<1x16xf32>
    %658 = vector.extract_strided_slice %654 {offsets = [0, 0], sizes = [16, 16], strides = [1, 1]} : vector<96x16xf32> to vector<16x16xf32>
    %659 = vector.extract_strided_slice %656 {offsets = [0, 0], sizes = [1, 16], strides = [1, 1]} : vector<8x16xf32> to vector<1x16xf32>
    %660 = vector.broadcast %659 : vector<1x16xf32> to vector<16x16xf32>
    %661 = arith.mulf %658, %660 : vector<16x16xf32>
    %662 = vector.extract_strided_slice %654 {offsets = [16, 0], sizes = [16, 16], strides = [1, 1]} : vector<96x16xf32> to vector<16x16xf32>
    %663 = vector.extract_strided_slice %656 {offsets = [1, 0], sizes = [1, 16], strides = [1, 1]} : vector<8x16xf32> to vector<1x16xf32>
    %664 = vector.broadcast %663 : vector<1x16xf32> to vector<16x16xf32>
    %665 = arith.mulf %662, %664 : vector<16x16xf32>
    %666 = arith.addf %661, %665 : vector<16x16xf32>
    %667 = vector.extract_strided_slice %654 {offsets = [32, 0], sizes = [16, 16], strides = [1, 1]} : vector<96x16xf32> to vector<16x16xf32>
    %668 = vector.extract_strided_slice %656 {offsets = [2, 0], sizes = [1, 16], strides = [1, 1]} : vector<8x16xf32> to vector<1x16xf32>
    %669 = vector.broadcast %668 : vector<1x16xf32> to vector<16x16xf32>
    %670 = arith.mulf %667, %669 : vector<16x16xf32>
    %671 = arith.addf %666, %670 : vector<16x16xf32>
    %672 = vector.broadcast %657 : vector<1x16xf32> to vector<16x16xf32>
    %673 = arith.addf %671, %672 : vector<16x16xf32>
    %cst_277 = arith.constant 0.000000e+00 : f32
    %cst_278 = arith.constant 3.000000e+00 : f32
    %674 = vector.broadcast %cst_277 : f32 to vector<16x16xf32>
    %675 = arith.maximumf %674, %673 : vector<16x16xf32>
    %676 = vector.broadcast %cst_278 : f32 to vector<16x16xf32>
    %677 = arith.minimumf %676, %675 : vector<16x16xf32>
    %c120 = arith.constant 120 : index
    %c0_279 = arith.constant 0 : index
    %678 = vector.load %arg6[%c120, %c0_279] : memref<128x16xf32, #tpu.memory_space<vmem>>, vector<8x16xf32>
    %c33 = arith.constant 33 : index
    %c0_280 = arith.constant 0 : index
    %679 = vector.load %arg3[%c33, %c0_280] : memref<40x16xf32, #tpu.memory_space<vmem>>, vector<1x16xf32>
    %680 = vector.extract_strided_slice %654 {offsets = [48, 0], sizes = [16, 16], strides = [1, 1]} : vector<96x16xf32> to vector<16x16xf32>
    %681 = vector.extract_strided_slice %678 {offsets = [0, 0], sizes = [1, 16], strides = [1, 1]} : vector<8x16xf32> to vector<1x16xf32>
    %682 = vector.broadcast %681 : vector<1x16xf32> to vector<16x16xf32>
    %683 = arith.mulf %680, %682 : vector<16x16xf32>
    %684 = vector.extract_strided_slice %654 {offsets = [64, 0], sizes = [16, 16], strides = [1, 1]} : vector<96x16xf32> to vector<16x16xf32>
    %685 = vector.extract_strided_slice %678 {offsets = [1, 0], sizes = [1, 16], strides = [1, 1]} : vector<8x16xf32> to vector<1x16xf32>
    %686 = vector.broadcast %685 : vector<1x16xf32> to vector<16x16xf32>
    %687 = arith.mulf %684, %686 : vector<16x16xf32>
    %688 = arith.addf %683, %687 : vector<16x16xf32>
    %689 = vector.extract_strided_slice %654 {offsets = [80, 0], sizes = [16, 16], strides = [1, 1]} : vector<96x16xf32> to vector<16x16xf32>
    %690 = vector.extract_strided_slice %678 {offsets = [2, 0], sizes = [1, 16], strides = [1, 1]} : vector<8x16xf32> to vector<1x16xf32>
    %691 = vector.broadcast %690 : vector<1x16xf32> to vector<16x16xf32>
    %692 = arith.mulf %689, %691 : vector<16x16xf32>
    %693 = arith.addf %688, %692 : vector<16x16xf32>
    %694 = vector.broadcast %679 : vector<1x16xf32> to vector<16x16xf32>
    %695 = arith.addf %693, %694 : vector<16x16xf32>
    %cst_281 = arith.constant 0.000000e+00 : f32
    %cst_282 = arith.constant 3.000000e+00 : f32
    %696 = vector.broadcast %cst_281 : f32 to vector<16x16xf32>
    %697 = arith.maximumf %696, %695 : vector<16x16xf32>
    %698 = vector.broadcast %cst_282 : f32 to vector<16x16xf32>
    %699 = arith.minimumf %698, %697 : vector<16x16xf32>
    %c34 = arith.constant 34 : index
    %c0_283 = arith.constant 0 : index
    %700 = vector.load %arg3[%c34, %c0_283] : memref<40x16xf32, #tpu.memory_space<vmem>>, vector<1x16xf32>
    %701 = vector.extract_strided_slice %655 {offsets = [0, 0], sizes = [16, 16], strides = [1, 1]} : vector<96x16xf32> to vector<16x16xf32>
    %c6_284 = arith.constant 6 : index
    %c0_285 = arith.constant 0 : index
    %c0_286 = arith.constant 0 : index
    %c0_287 = arith.constant 0 : index
    %702 = vector.load %arg5[%c6_284, %c0_285, %c0_286, %c0_287] : memref<8x3x16x16xf32, #tpu.memory_space<vmem>>, vector<1x1x16x16xf32>
    %703 = vector.shape_cast %702 : vector<1x1x16x16xf32> to vector<16x16xf32>
    %cst_288 = arith.constant dense<0.000000e+00> : vector<16x16xf32>
    %704 = tpu.matmul %701, %703, %cst_288 {dimension_numbers = #tpu.dot_dimension_numbers<[1], [0], [0], [1], [0, 0, 1, 1], [], []>} : vector<16x16xf32>, vector<16x16xf32>, vector<16x16xf32> -> vector<16x16xf32>
    %705 = vector.extract_strided_slice %655 {offsets = [16, 0], sizes = [16, 16], strides = [1, 1]} : vector<96x16xf32> to vector<16x16xf32>
    %c6_289 = arith.constant 6 : index
    %c1_290 = arith.constant 1 : index
    %c0_291 = arith.constant 0 : index
    %c0_292 = arith.constant 0 : index
    %706 = vector.load %arg5[%c6_289, %c1_290, %c0_291, %c0_292] : memref<8x3x16x16xf32, #tpu.memory_space<vmem>>, vector<1x1x16x16xf32>
    %707 = vector.shape_cast %706 : vector<1x1x16x16xf32> to vector<16x16xf32>
    %cst_293 = arith.constant dense<0.000000e+00> : vector<16x16xf32>
    %708 = tpu.matmul %705, %707, %cst_293 {dimension_numbers = #tpu.dot_dimension_numbers<[1], [0], [0], [1], [0, 0, 1, 1], [], []>} : vector<16x16xf32>, vector<16x16xf32>, vector<16x16xf32> -> vector<16x16xf32>
    %709 = arith.addf %704, %708 : vector<16x16xf32>
    %710 = vector.extract_strided_slice %655 {offsets = [32, 0], sizes = [16, 16], strides = [1, 1]} : vector<96x16xf32> to vector<16x16xf32>
    %c6_294 = arith.constant 6 : index
    %c2_295 = arith.constant 2 : index
    %c0_296 = arith.constant 0 : index
    %c0_297 = arith.constant 0 : index
    %711 = vector.load %arg5[%c6_294, %c2_295, %c0_296, %c0_297] : memref<8x3x16x16xf32, #tpu.memory_space<vmem>>, vector<1x1x16x16xf32>
    %712 = vector.shape_cast %711 : vector<1x1x16x16xf32> to vector<16x16xf32>
    %cst_298 = arith.constant dense<0.000000e+00> : vector<16x16xf32>
    %713 = tpu.matmul %710, %712, %cst_298 {dimension_numbers = #tpu.dot_dimension_numbers<[1], [0], [0], [1], [0, 0, 1, 1], [], []>} : vector<16x16xf32>, vector<16x16xf32>, vector<16x16xf32> -> vector<16x16xf32>
    %714 = arith.addf %709, %713 : vector<16x16xf32>
    %715 = vector.broadcast %700 : vector<1x16xf32> to vector<16x16xf32>
    %716 = arith.addf %714, %715 : vector<16x16xf32>
    %cst_299 = arith.constant 0.000000e+00 : f32
    %717 = vector.broadcast %cst_299 : f32 to vector<16x16xf32>
    %718 = arith.maximumf %716, %717 : vector<16x16xf32>
    %c35 = arith.constant 35 : index
    %c0_300 = arith.constant 0 : index
    %719 = vector.load %arg3[%c35, %c0_300] : memref<40x16xf32, #tpu.memory_space<vmem>>, vector<1x16xf32>
    %720 = vector.extract_strided_slice %655 {offsets = [48, 0], sizes = [16, 16], strides = [1, 1]} : vector<96x16xf32> to vector<16x16xf32>
    %c7_301 = arith.constant 7 : index
    %c0_302 = arith.constant 0 : index
    %c0_303 = arith.constant 0 : index
    %c0_304 = arith.constant 0 : index
    %721 = vector.load %arg5[%c7_301, %c0_302, %c0_303, %c0_304] : memref<8x3x16x16xf32, #tpu.memory_space<vmem>>, vector<1x1x16x16xf32>
    %722 = vector.shape_cast %721 : vector<1x1x16x16xf32> to vector<16x16xf32>
    %cst_305 = arith.constant dense<0.000000e+00> : vector<16x16xf32>
    %723 = tpu.matmul %720, %722, %cst_305 {dimension_numbers = #tpu.dot_dimension_numbers<[1], [0], [0], [1], [0, 0, 1, 1], [], []>} : vector<16x16xf32>, vector<16x16xf32>, vector<16x16xf32> -> vector<16x16xf32>
    %724 = vector.extract_strided_slice %655 {offsets = [64, 0], sizes = [16, 16], strides = [1, 1]} : vector<96x16xf32> to vector<16x16xf32>
    %c7_306 = arith.constant 7 : index
    %c1_307 = arith.constant 1 : index
    %c0_308 = arith.constant 0 : index
    %c0_309 = arith.constant 0 : index
    %725 = vector.load %arg5[%c7_306, %c1_307, %c0_308, %c0_309] : memref<8x3x16x16xf32, #tpu.memory_space<vmem>>, vector<1x1x16x16xf32>
    %726 = vector.shape_cast %725 : vector<1x1x16x16xf32> to vector<16x16xf32>
    %cst_310 = arith.constant dense<0.000000e+00> : vector<16x16xf32>
    %727 = tpu.matmul %724, %726, %cst_310 {dimension_numbers = #tpu.dot_dimension_numbers<[1], [0], [0], [1], [0, 0, 1, 1], [], []>} : vector<16x16xf32>, vector<16x16xf32>, vector<16x16xf32> -> vector<16x16xf32>
    %728 = arith.addf %723, %727 : vector<16x16xf32>
    %729 = vector.extract_strided_slice %655 {offsets = [80, 0], sizes = [16, 16], strides = [1, 1]} : vector<96x16xf32> to vector<16x16xf32>
    %c7_311 = arith.constant 7 : index
    %c2_312 = arith.constant 2 : index
    %c0_313 = arith.constant 0 : index
    %c0_314 = arith.constant 0 : index
    %730 = vector.load %arg5[%c7_311, %c2_312, %c0_313, %c0_314] : memref<8x3x16x16xf32, #tpu.memory_space<vmem>>, vector<1x1x16x16xf32>
    %731 = vector.shape_cast %730 : vector<1x1x16x16xf32> to vector<16x16xf32>
    %cst_315 = arith.constant dense<0.000000e+00> : vector<16x16xf32>
    %732 = tpu.matmul %729, %731, %cst_315 {dimension_numbers = #tpu.dot_dimension_numbers<[1], [0], [0], [1], [0, 0, 1, 1], [], []>} : vector<16x16xf32>, vector<16x16xf32>, vector<16x16xf32> -> vector<16x16xf32>
    %733 = arith.addf %728, %732 : vector<16x16xf32>
    %734 = vector.broadcast %719 : vector<1x16xf32> to vector<16x16xf32>
    %735 = arith.addf %733, %734 : vector<16x16xf32>
    %cst_316 = arith.constant 0.000000e+00 : f32
    %736 = vector.broadcast %cst_316 : f32 to vector<16x16xf32>
    %737 = arith.maximumf %735, %736 : vector<16x16xf32>
    %c14_317 = arith.constant 14 : index
    %c0_318 = arith.constant 0 : index
    %c0_319 = arith.constant 0 : index
    %738 = vector.load %arg4[%c14_317, %c0_318, %c0_319] : memref<16x32x16xf32, #tpu.memory_space<vmem>>, vector<1x32x16xf32>
    %739 = vector.shape_cast %738 : vector<1x32x16xf32> to vector<32x16xf32>
    %740 = vector.extract_strided_slice %739 {offsets = [0, 0], sizes = [16, 16], strides = [1, 1]} : vector<32x16xf32> to vector<16x16xf32>
    %741 = vector.extract_strided_slice %739 {offsets = [16, 0], sizes = [16, 16], strides = [1, 1]} : vector<32x16xf32> to vector<16x16xf32>
    %c36 = arith.constant 36 : index
    %c0_320 = arith.constant 0 : index
    %742 = vector.load %arg3[%c36, %c0_320] : memref<40x16xf32, #tpu.memory_space<vmem>>, vector<1x16xf32>
    %c15_321 = arith.constant 15 : index
    %c0_322 = arith.constant 0 : index
    %c0_323 = arith.constant 0 : index
    %743 = vector.load %arg4[%c15_321, %c0_322, %c0_323] : memref<16x32x16xf32, #tpu.memory_space<vmem>>, vector<1x32x16xf32>
    %744 = vector.shape_cast %743 : vector<1x32x16xf32> to vector<32x16xf32>
    %745 = vector.extract_strided_slice %744 {offsets = [0, 0], sizes = [16, 16], strides = [1, 1]} : vector<32x16xf32> to vector<16x16xf32>
    %746 = vector.extract_strided_slice %744 {offsets = [16, 0], sizes = [16, 16], strides = [1, 1]} : vector<32x16xf32> to vector<16x16xf32>
    %c37 = arith.constant 37 : index
    %c0_324 = arith.constant 0 : index
    %747 = vector.load %arg3[%c37, %c0_324] : memref<40x16xf32, #tpu.memory_space<vmem>>, vector<1x16xf32>
    %cst_325 = arith.constant dense<0.000000e+00> : vector<16x16xf32>
    %748 = tpu.matmul %677, %740, %cst_325 {dimension_numbers = #tpu.dot_dimension_numbers<[1], [0], [0], [1], [0, 0, 1, 1], [], []>} : vector<16x16xf32>, vector<16x16xf32>, vector<16x16xf32> -> vector<16x16xf32>
    %cst_326 = arith.constant dense<0.000000e+00> : vector<16x16xf32>
    %749 = tpu.matmul %699, %741, %cst_326 {dimension_numbers = #tpu.dot_dimension_numbers<[1], [0], [0], [1], [0, 0, 1, 1], [], []>} : vector<16x16xf32>, vector<16x16xf32>, vector<16x16xf32> -> vector<16x16xf32>
    %750 = arith.addf %748, %749 : vector<16x16xf32>
    %751 = vector.broadcast %742 : vector<1x16xf32> to vector<16x16xf32>
    %752 = arith.addf %750, %751 : vector<16x16xf32>
    %cst_327 = arith.constant 0.000000e+00 : f32
    %753 = vector.broadcast %cst_327 : f32 to vector<16x16xf32>
    %754 = arith.maximumf %752, %753 : vector<16x16xf32>
    %cst_328 = arith.constant dense<0.000000e+00> : vector<16x16xf32>
    %755 = tpu.matmul %718, %745, %cst_328 {dimension_numbers = #tpu.dot_dimension_numbers<[1], [0], [0], [1], [0, 0, 1, 1], [], []>} : vector<16x16xf32>, vector<16x16xf32>, vector<16x16xf32> -> vector<16x16xf32>
    %cst_329 = arith.constant dense<0.000000e+00> : vector<16x16xf32>
    %756 = tpu.matmul %737, %746, %cst_329 {dimension_numbers = #tpu.dot_dimension_numbers<[1], [0], [0], [1], [0, 0, 1, 1], [], []>} : vector<16x16xf32>, vector<16x16xf32>, vector<16x16xf32> -> vector<16x16xf32>
    %757 = arith.addf %755, %756 : vector<16x16xf32>
    %758 = vector.broadcast %747 : vector<1x16xf32> to vector<16x16xf32>
    %759 = arith.addf %757, %758 : vector<16x16xf32>
    %cst_330 = arith.constant 0.000000e+00 : f32
    %760 = vector.broadcast %cst_330 : f32 to vector<16x16xf32>
    %761 = arith.maximumf %759, %760 : vector<16x16xf32>
    %c0_331 = arith.constant 0 : index
    %c0_332 = arith.constant 0 : index
    %762 = vector.load %arg11[%c0_331, %c0_332] : memref<40x128xf32, #tpu.memory_space<vmem>>, vector<16x128xf32>
    %c16_333 = arith.constant 16 : index
    %c0_334 = arith.constant 0 : index
    %763 = vector.load %arg11[%c16_333, %c0_334] : memref<40x128xf32, #tpu.memory_space<vmem>>, vector<16x128xf32>
    %c32_335 = arith.constant 32 : index
    %c0_336 = arith.constant 0 : index
    %764 = vector.load %arg11[%c32_335, %c0_336] : memref<40x128xf32, #tpu.memory_space<vmem>>, vector<1x128xf32>
    %cst_337 = arith.constant dense<0.000000e+00> : vector<16x128xf32>
    %765 = tpu.matmul %754, %762, %cst_337 {dimension_numbers = #tpu.dot_dimension_numbers<[1], [0], [0], [1], [0, 0, 1, 1], [], []>} : vector<16x16xf32>, vector<16x128xf32>, vector<16x128xf32> -> vector<16x128xf32>
    %cst_338 = arith.constant dense<0.000000e+00> : vector<16x128xf32>
    %766 = tpu.matmul %761, %763, %cst_338 {dimension_numbers = #tpu.dot_dimension_numbers<[1], [0], [0], [1], [0, 0, 1, 1], [], []>} : vector<16x16xf32>, vector<16x128xf32>, vector<16x128xf32> -> vector<16x128xf32>
    %767 = arith.addf %765, %766 : vector<16x128xf32>
    %cst_339 = arith.constant dense<0.000000e+00> : vector<128xf32>
    %768 = vector.multi_reduction <add>, %767, %cst_339 [0] : vector<16x128xf32> to vector<128xf32>
    %769 = vector.shape_cast %768 : vector<128xf32> to vector<1x128xf32>
    %cst_340 = arith.constant 6.250000e-02 : f32
    %770 = vector.broadcast %cst_340 : f32 to vector<1x128xf32>
    %771 = arith.mulf %769, %770 : vector<1x128xf32>
    %772 = arith.addf %771, %764 : vector<1x128xf32>
    %773 = vector.shape_cast %772 : vector<1x128xf32> to vector<1x128xf32>
    %774 = vector.broadcast %773 : vector<1x128xf32> to vector<8x128xf32>
    %c0_341 = arith.constant 0 : index
    %c0_342 = arith.constant 0 : index
    %775 = vector.load %arg12[%c0_341, %c0_342] : memref<8x128xf32, #tpu.memory_space<vmem>>, vector<8x128xf32>
    tpu.vector_store %arg12[%c0_341, %c0_342], %774 {strides = array<i32>} : memref<8x128xf32, #tpu.memory_space<vmem>>, vector<8x128xf32>,
    return
  }
  func.func @transform_0(%arg0: i32) -> (i32, i32, i32) {
    %c0_i32 = arith.constant 0 : i32
    %c0_i32_0 = arith.constant 0 : i32
    %c0_i32_1 = arith.constant 0 : i32
    return %arg0, %c0_i32, %c0_i32_0 : i32, i32, i32
  }
  func.func @transform_1(%arg0: i32) -> (i32, i32, i32) {
    %c0_i32 = arith.constant 0 : i32
    %c0_i32_0 = arith.constant 0 : i32
    %c0_i32_1 = arith.constant 0 : i32
    %c0_i32_2 = arith.constant 0 : i32
    return %c0_i32, %c0_i32_0, %c0_i32_1 : i32, i32, i32
  }
  func.func @transform_2(%arg0: i32) -> (i32, i32) {
    %c0_i32 = arith.constant 0 : i32
    %c0_i32_0 = arith.constant 0 : i32
    %c0_i32_1 = arith.constant 0 : i32
    return %c0_i32, %c0_i32_0 : i32, i32
  }
  func.func @transform_3(%arg0: i32) -> (i32, i32, i32) {
    %c0_i32 = arith.constant 0 : i32
    %c0_i32_0 = arith.constant 0 : i32
    %c0_i32_1 = arith.constant 0 : i32
    %c0_i32_2 = arith.constant 0 : i32
    return %c0_i32, %c0_i32_0, %c0_i32_1 : i32, i32, i32
  }
  func.func @transform_4(%arg0: i32) -> (i32, i32, i32, i32) {
    %c0_i32 = arith.constant 0 : i32
    %c0_i32_0 = arith.constant 0 : i32
    %c0_i32_1 = arith.constant 0 : i32
    %c0_i32_2 = arith.constant 0 : i32
    %c0_i32_3 = arith.constant 0 : i32
    return %c0_i32, %c0_i32_0, %c0_i32_1, %c0_i32_2 : i32, i32, i32, i32
  }
  func.func @transform_5(%arg0: i32) -> (i32, i32) {
    %c0_i32 = arith.constant 0 : i32
    %c0_i32_0 = arith.constant 0 : i32
    %c0_i32_1 = arith.constant 0 : i32
    return %c0_i32, %c0_i32_0 : i32, i32
  }
  func.func @transform_6(%arg0: i32) -> (i32, i32) {
    %c0_i32 = arith.constant 0 : i32
    %c0_i32_0 = arith.constant 0 : i32
    %c0_i32_1 = arith.constant 0 : i32
    return %c0_i32, %c0_i32_0 : i32, i32
  }
  func.func @transform_7(%arg0: i32) -> (i32, i32) {
    %c0_i32 = arith.constant 0 : i32
    %c0_i32_0 = arith.constant 0 : i32
    %c0_i32_1 = arith.constant 0 : i32
    return %c0_i32, %c0_i32_0 : i32, i32
  }
  func.func @transform_8(%arg0: i32) -> (i32, i32) {
    %c0_i32 = arith.constant 0 : i32
    %c0_i32_0 = arith.constant 0 : i32
    %c0_i32_1 = arith.constant 0 : i32
    return %c0_i32, %c0_i32_0 : i32, i32
  }
  func.func @transform_9(%arg0: i32) -> (i32, i32) {
    %c0_i32 = arith.constant 0 : i32
    %c0_i32_0 = arith.constant 0 : i32
    %c0_i32_1 = arith.constant 0 : i32
    return %c0_i32, %c0_i32_0 : i32, i32
  }
  func.func @transform_10(%arg0: i32) -> (i32, i32) {
    %c0_i32 = arith.constant 0 : i32
    %c0_i32_0 = arith.constant 0 : i32
    %c0_i32_1 = arith.constant 0 : i32
    return %c0_i32, %c0_i32_0 : i32, i32
  }
  func.func @transform_11(%arg0: i32) -> (i32, i32) {
    %c0_i32 = arith.constant 0 : i32
    %c0_i32_0 = arith.constant 0 : i32
    return %arg0, %c0_i32 : i32, i32
  }
}

</mosaic_0001>

<bundles_post_ra>
// kernel: fifnet_forward.1
= control target key start
LH: loop header
LB: loop body
LE: loop exit
PB: predicated region body
PF: predicated region fallthrough
CT: control target
= control target key end

     0   :  { %16 = vsyncpa [#allocation3], 0  ;;  %s8091_s17 = smov 0   ;;  %s11660_s0 = inlined_call_operand.vmem [shape: f32[2,256,9], index: 0, kind: input, shape index: {}]   ;;  %s11661_s1 = inlined_call_operand.vmem [shape: f32[2,9,16], index: 1, kind: input, shape index: {}]   ;;  %s11662_s2 = inlined_call_operand.vmem [shape: f32[40,16], index: 2, kind: input, shape index: {}]   ;;  %s11663_s3 = inlined_call_operand.vmem [shape: f32[16,32,16], index: 3, kind: input, shape index: {}]   ;;  %s11664_s4 = inlined_call_operand.vmem [shape: f32[8,3,16,16], index: 4, kind: input, shape index: {}]   ;;  %s11665_s5 = inlined_call_operand.vmem [shape: f32[128,16], index: 5, kind: input, shape index: {}]   ;;  %s11666_s6 = inlined_call_operand.hbm [shape: f32[576,256], index: 6, kind: input, shape index: {}]   ;;  %s11667_s7 = inlined_call_operand.vmem [shape: f32[384,64], index: 7, kind: input, shape index: {}]   ;;  %s11668_s8 = inlined_call_operand.vmem [shape: f32[144,64], index: 8, kind: input, shape index: {}]   ;;  %s11669_s9 = inlined_call_operand.vmem [shape: f32[96,16], index: 9, kind: input, shape index: {}]   ;;  %s11670_s10 = inlined_call_operand.vmem [shape: f32[40,128], index: 10, kind: input, shape index: {}]   ;;  %s11671_s11 = inlined_call_operand.vmem [shape: f32[16,128], index: 11, kind: output, shape index: {}]  }
   0x1 LB: > { %s315_s20 = sshll.u32 %s11666_s6, 4  ;;  %s7130_s21 = sadd.s32 4294967295, %s8026_s17   ;;  %s8026_s17 = sphi %s8091_s17, %s22_s17   ;;  %s316_s20 = int_to_ptr.hbm [resolvable:$true] %s315_s20 }
   0x2   : > { %p7132_p0 = scmp.ge.s32.totalorder %s8026_s17, 1  ;;  %p289_p1 = scmp.lt.s32.totalorder %s8026_s17, 3 }
   0x3   : > { %p7885_p2 = scmp.eq.s32.totalorder %s7130_s21, 0  ;;  %s8028_s22 = smov [#allocation2]  }
   0x4   : > { %p290_p3 = pnand %p7132_p0, %p289_p1  ;;  %s317_s23 = sshll.u32 %s8028_s22, 4  ;;  %s318_s23 = int_to_ptr.vmem [resolvable:$true] %s317_s23 }
   0x5   : > { %s8029_s24 = smov 256   ;;  %s8030_s25 = smov 16  }
   0x6   : > { %p7881_p4 = pneg %p290_p3  ;;  %353 = sbr.rel (%p290_p3) target bundleno = 4745 (0x1289), region = 64 }
   0x8   : > { %p7882_p5 = pnand %p7885_p2, %p7881_p4 }
   0xa   : > { %7884 = dma.hbm_to_vmem [thread:$0]  (!%p7882_p5), %s316_s20, 18432, %s318_s23, [#allocation3], %s8029_s24, %s8029_s24, %s8030_s25  }
   0xb   : > { %8021 = dma.done.wait (%p7885_p2), [#allocation3], 18432  }
   0xc   : > { %8023 = vsyncadd (%p7885_p2), [#allocation3], 4294948864  ;;  %p393_p6 = scmp.lt.s32.totalorder %s7130_s21, 1  ;;  %vm535_vm0 = vcmask 1040384   ;;  %v435_v0 = vld [vmem:[%s11661_s1 + $0x8] sm:$0x1] }
   0xd   : > { %v7174_v1 = vld [vmem:[%s11661_s1 + $0x18] sm:$0x1]  ;;  %v434_v2 = vld [vmem:[%s11661_s1] sm:$0xff]  ;;  %7140 = vmatpush.msk.msra.mxu0 %vm535_vm0, %v435_v0  ;;  %v7173_v3 = vld [vmem:[%s11661_s1 + $0x10] sm:$0xff]  ;;  %vm438_vm1 = vcmask 72704   ;;  %vm2254_vm2 = vcmask 130048  }
   0xe   : > { %s11737_s21 = smov (!%p393_p6, %s7130_s21), 1  ;;  %7175 = vmatpush.msk.msra.mxu1 %vm535_vm0, %v7174_v1  ;;  %v8256_v1 = vld [vmem:[%s11662_s2 + $0x1] ss:$0 sm:$0xff]  ;;  %vm2501_vm3 = vcmask 523264  }
   0xf   : > { %s7876_s26 = sshll.u32 %s11737_s21, 8  ;;  %554 = vmatpush.msra.mxu0 %v434_v2  ;;  %v8261_v2 = vld [vmem:[%s11662_s2] ss:$0 sm:$0xff]  ;;  %s7139_s24 = sshll.u32 %s11737_s21, 3 }
  0x10   : > { %s8108_s29 = scalar_lea.vmem %s11660_s0, %s7876_s26  ;;  %675 = vmatpush.msra.mxu1 %v7173_v3  ;;  %s401_s27 = scalar_lea.vmem %s11671_s11, %s7139_s24 }
  0x11   : > { %v402_v4 = vld [vmem:[%s8108_s29] sm:$0xff]  ;;  %v403_v5 = vld [vmem:[%s8108_s29 + $0x8] sm:$0xff]  ;;  %v404_v6 = vld [vmem:[%s8108_s29 + $0x10] sm:$0xff] }
  0x12   : > { %7141 = vmatmul.msk.f32.vlgmr.msra.gmra.mxu0 %vm438_vm1, %v402_v4  ;;  %7176 = vmatmul.msk.f32.vlgmr.msra.gmra.mxu1 %vm438_vm1, %v402_v4  ;;  %v405_v7 = vld [vmem:[%s8108_s29 + $0x18] sm:$0xff]  ;;  %v406_v8 = vld [vmem:[%s8108_s29 + $0x20] sm:$0xff]  ;;  %v407_v9 = vld [vmem:[%s8108_s29 + $0x28] sm:$0xff] }
  0x13   : > { %v408_v10 = vld [vmem:[%s8108_s29 + $0x30] sm:$0xff]  ;;  %v409_v11 = vld [vmem:[%s8108_s29 + $0x38] sm:$0xff]  ;;  %v410_v12 = vld [vmem:[%s8108_s29 + $0x40] sm:$0xff] }
  0x14   : > { %v411_v13 = vld [vmem:[%s8108_s29 + $0x48] sm:$0xff]  ;;  %v412_v14 = vld [vmem:[%s8108_s29 + $0x50] sm:$0xff]  ;;  %v413_v15 = vld [vmem:[%s8108_s29 + $0x58] sm:$0xff] }
  0x15   : > { %v414_v16 = vld [vmem:[%s8108_s29 + $0x60] sm:$0xff]  ;;  %v415_v17 = vld [vmem:[%s8108_s29 + $0x68] sm:$0xff]  ;;  %v416_v18 = vld [vmem:[%s8108_s29 + $0x70] sm:$0xff] }
  0x16   : > { %v417_v19 = vld [vmem:[%s8108_s29 + $0x78] sm:$0xff]  ;;  %v418_v22 = vld [vmem:[%s8108_s29 + $0x80] sm:$0xff]  ;;  %v419_v25 = vld [vmem:[%s8108_s29 + $0x88] sm:$0xff] }
  0x17   : > { %v420_v28 = vld [vmem:[%s8108_s29 + $0x90] sm:$0xff]  ;;  %v421_v31 = vld [vmem:[%s8108_s29 + $0x98] sm:$0xff]  ;;  %v422_v34 = vld [vmem:[%s8108_s29 + $0xa0] sm:$0xff] }
  0x18   : > { %v423_v37 = vld [vmem:[%s8108_s29 + $0xa8] sm:$0xff]  ;;  %v424_v40 = vld [vmem:[%s8108_s29 + $0xb0] sm:$0xff]  ;;  %v425_v43 = vld [vmem:[%s8108_s29 + $0xb8] sm:$0xff] }
  0x19   : > { %v426_v46 = vld [vmem:[%s8108_s29 + $0xc0] sm:$0xff]  ;;  %v427_v49 = vld [vmem:[%s8108_s29 + $0xc8] sm:$0xff]  ;;  %v428_v52 = vld [vmem:[%s8108_s29 + $0xd0] sm:$0xff] }
  0x1a   : > { %7142 = vmatmul.msk.f32.gmra.mxu0 %vm438_vm1, %v403_v5  ;;  %7177 = vmatmul.msk.f32.gmra.mxu1 %vm438_vm1, %v403_v5  ;;  %v429_v55 = vld [vmem:[%s8108_s29 + $0xd8] sm:$0xff]  ;;  %v430_v58 = vld [vmem:[%s8108_s29 + $0xe0] sm:$0xff]  ;;  %v431_v61 = vld [vmem:[%s8108_s29 + $0xe8] sm:$0xff] }
  0x1b   : > { %v432_v0 = vld [vmem:[%s8108_s29 + $0xf0] sm:$0xff]  ;;  %v433_v5 = vld [vmem:[%s8108_s29 + $0xf8] sm:$0xff] }
  0x22   : > { %7143 = vmatmul.msk.f32.gmra.mxu0 %vm438_vm1, %v404_v6  ;;  %7178 = vmatmul.msk.f32.gmra.mxu1 %vm438_vm1, %v404_v6 }
  0x2a   : > { %7144 = vmatmul.msk.f32.gmra.mxu0 %vm438_vm1, %v405_v7  ;;  %7179 = vmatmul.msk.f32.gmra.mxu1 %vm438_vm1, %v405_v7 }
  0x32   : > { %7145 = vmatmul.msk.f32.gmra.mxu0 %vm438_vm1, %v406_v8  ;;  %7180 = vmatmul.msk.f32.gmra.mxu1 %vm438_vm1, %v406_v8 }
  0x3a   : > { %7146 = vmatmul.msk.f32.gmra.mxu0 %vm438_vm1, %v407_v9  ;;  %7181 = vmatmul.msk.f32.gmra.mxu1 %vm438_vm1, %v407_v9 }
  0x42   : > { %7147 = vmatmul.msk.f32.gmra.mxu0 %vm438_vm1, %v408_v10  ;;  %7182 = vmatmul.msk.f32.gmra.mxu1 %vm438_vm1, %v408_v10 }
  0x4a   : > { %7148 = vmatmul.msk.f32.gmra.mxu0 %vm438_vm1, %v409_v11  ;;  %7183 = vmatmul.msk.f32.gmra.mxu1 %vm438_vm1, %v409_v11 }
  0x52   : > { %7149 = vmatmul.msk.f32.gmra.mxu0 %vm438_vm1, %v410_v12  ;;  %7184 = vmatmul.msk.f32.gmra.mxu1 %vm438_vm1, %v410_v12 }
  0x5a   : > { %7150 = vmatmul.msk.f32.gmra.mxu0 %vm438_vm1, %v411_v13  ;;  %7185 = vmatmul.msk.f32.gmra.mxu1 %vm438_vm1, %v411_v13 }
  0x62   : > { %7151 = vmatmul.msk.f32.gmra.mxu0 %vm438_vm1, %v412_v14  ;;  %7186 = vmatmul.msk.f32.gmra.mxu1 %vm438_vm1, %v412_v14 }
  0x6a   : > { %7152 = vmatmul.msk.f32.gmra.mxu0 %vm438_vm1, %v413_v15  ;;  %7187 = vmatmul.msk.f32.gmra.mxu1 %vm438_vm1, %v413_v15 }
  0x72   : > { %7153 = vmatmul.msk.f32.gmra.mxu0 %vm438_vm1, %v414_v16  ;;  %7188 = vmatmul.msk.f32.gmra.mxu1 %vm438_vm1, %v414_v16 }
  0x7a   : > { %7154 = vmatmul.msk.f32.gmra.mxu0 %vm438_vm1, %v415_v17  ;;  %7189 = vmatmul.msk.f32.gmra.mxu1 %vm438_vm1, %v415_v17 }
  0x82   : > { %7155 = vmatmul.msk.f32.gmra.mxu0 %vm438_vm1, %v416_v18  ;;  %7190 = vmatmul.msk.f32.gmra.mxu1 %vm438_vm1, %v416_v18 }
  0x8a   : > { %7156 = vmatmul.msk.f32.gmra.mxu0 %vm438_vm1, %v417_v19  ;;  %7191 = vmatmul.msk.f32.gmra.mxu1 %vm438_vm1, %v417_v19 }
  0x8f   : > { %v8170_v20 = vpop.f32.mrf.mxu0  ;;  %v8172_v21 = vpop.f32.mrf.mxu1 }
  0x92   : > { %7157 = vmatmul.msk.f32.gmra.mxu0 %vm438_vm1, %v418_v22  ;;  %7192 = vmatmul.msk.f32.gmra.mxu1 %vm438_vm1, %v418_v22 }
  0x97   : > { %v8177_v23 = vpop.f32.mrf.mxu0  ;;  %v8179_v24 = vpop.f32.mrf.mxu1 }
  0x9a   : > { %7158 = vmatmul.msk.f32.gmra.mxu0 %vm438_vm1, %v419_v25  ;;  %7193 = vmatmul.msk.f32.gmra.mxu1 %vm438_vm1, %v419_v25 }
  0x9f   : > { %v8184_v26 = vpop.f32.mrf.mxu0  ;;  %v8186_v27 = vpop.f32.mrf.mxu1 }
  0xa2   : > { %7159 = vmatmul.msk.f32.gmra.mxu0 %vm438_vm1, %v420_v28  ;;  %7194 = vmatmul.msk.f32.gmra.mxu1 %vm438_vm1, %v420_v28 }
  0xa7   : > { %v8191_v29 = vpop.f32.mrf.mxu0  ;;  %v8193_v30 = vpop.f32.mrf.mxu1 }
  0xaa   : > { %7160 = vmatmul.msk.f32.gmra.mxu0 %vm438_vm1, %v421_v31  ;;  %7195 = vmatmul.msk.f32.gmra.mxu1 %vm438_vm1, %v421_v31 }
  0xaf   : > { %v8198_v32 = vpop.f32.mrf.mxu0  ;;  %v8200_v33 = vpop.f32.mrf.mxu1 }
  0xb2   : > { %7161 = vmatmul.msk.f32.gmra.mxu0 %vm438_vm1, %v422_v34  ;;  %7196 = vmatmul.msk.f32.gmra.mxu1 %vm438_vm1, %v422_v34 }
  0xb7   : > { %v8205_v35 = vpop.f32.mrf.mxu0  ;;  %v8207_v36 = vpop.f32.mrf.mxu1 }
  0xba   : > { %7162 = vmatmul.msk.f32.gmra.mxu0 %vm438_vm1, %v423_v37  ;;  %7197 = vmatmul.msk.f32.gmra.mxu1 %vm438_vm1, %v423_v37 }
  0xbf   : > { %v8212_v38 = vpop.f32.mrf.mxu0  ;;  %v8214_v39 = vpop.f32.mrf.mxu1 }
  0xc2   : > { %7163 = vmatmul.msk.f32.gmra.mxu0 %vm438_vm1, %v424_v40  ;;  %7198 = vmatmul.msk.f32.gmra.mxu1 %vm438_vm1, %v424_v40 }
  0xc7   : > { %v8219_v41 = vpop.f32.mrf.mxu0  ;;  %v8221_v42 = vpop.f32.mrf.mxu1 }
  0xc8   : > { %v699_v40 = vadd.f32 %v8256_v1, %v8221_v42  ;;  %v572_v42 = vadd.f32 %v8261_v2, %v8205_v35  ;;  %v566_v35 = vadd.f32 %v8261_v2, %v8191_v29 }
  0xca   : > { %7164 = vmatmul.msk.f32.gmra.mxu0 %vm438_vm1, %v425_v43  ;;  %7199 = vmatmul.msk.f32.gmra.mxu1 %vm438_vm1, %v425_v43  ;;  %v578_v43 = vadd.f32 %v8261_v2, %v8219_v41 }
  0xcf   : > { %v8226_v44 = vpop.f32.mrf.mxu0  ;;  %v8228_v45 = vpop.f32.mrf.mxu1 }
  0xd0   : > { %v702_v34 = vadd.f32 %v8256_v1, %v8228_v45  ;;  %v581_v37 = vadd.f32 %v8261_v2, %v8226_v44  ;;  %v575_v45 = vadd.f32 %v8261_v2, %v8212_v38  ;;  %v693_v44 = vadd.f32 %v8256_v1, %v8207_v36 }
  0xd1   : > { %v569_v38 = vadd.f32 %v8261_v2, %v8198_v32  ;;  %v687_v36 = vadd.f32 %v8256_v1, %v8193_v30  ;;  %v681_v32 = vadd.f32 %v8256_v1, %v8179_v24  ;;  %v560_v30 = vadd.f32 %v8261_v2, %v8177_v23 }
  0xd2   : > { %7165 = vmatmul.msk.f32.gmra.mxu0 %vm438_vm1, %v426_v46  ;;  %7200 = vmatmul.msk.f32.gmra.mxu1 %vm438_vm1, %v426_v46  ;;  %v696_v46 = vadd.f32 %v8256_v1, %v8214_v39  ;;  %v690_v39 = vadd.f32 %v8256_v1, %v8200_v33  ;;  %v563_v33 = vadd.f32 %v8261_v2, %v8184_v26 }
  0xd3   : > { %v557_v26 = vadd.f32 %v8261_v2, %v8170_v20 }
  0xd7   : > { %v8233_v47 = vpop.f32.mrf.mxu0  ;;  %v704_v48 = vpop.f32.mrf.mxu1 }
  0xd8   : > { %v705_v22 = vadd.f32 %v8256_v1, %v704_v48  ;;  %v584_v25 = vadd.f32 %v8261_v2, %v8233_v47  ;;  %v684_v48 = vadd.f32 %v8256_v1, %v8186_v27  ;;  %v678_v27 = vadd.f32 %v8256_v1, %v8172_v21 }
  0xda   : > { %7166 = vmatmul.msk.f32.gmra.mxu0 %vm438_vm1, %v427_v49  ;;  %7201 = vmatmul.msk.f32.gmra.mxu1 %vm438_vm1, %v427_v49 }
  0xdf   : > { %v586_v50 = vpop.f32.mrf.mxu0  ;;  %v707_v51 = vpop.f32.mrf.mxu1 }
  0xe0   : > { %v708_v18 = vadd.f32 %v8256_v1, %v707_v51  ;;  %v587_v19 = vadd.f32 %v8261_v2, %v586_v50 }
  0xe2   : > { %7167 = vmatmul.msk.f32.gmra.mxu0 %vm438_vm1, %v428_v52  ;;  %7202 = vmatmul.msk.f32.gmra.mxu1 %vm438_vm1, %v428_v52 }
  0xe7   : > { %v589_v53 = vpop.f32.mrf.mxu0  ;;  %v710_v54 = vpop.f32.mrf.mxu1 }
  0xe8   : > { %v711_v16 = vadd.f32 %v8256_v1, %v710_v54  ;;  %v590_v17 = vadd.f32 %v8261_v2, %v589_v53 }
  0xea   : > { %7168 = vmatmul.msk.f32.gmra.mxu0 %vm438_vm1, %v429_v55  ;;  %7203 = vmatmul.msk.f32.gmra.mxu1 %vm438_vm1, %v429_v55 }
  0xef   : > { %v592_v56 = vpop.f32.mrf.mxu0  ;;  %v713_v57 = vpop.f32.mrf.mxu1 }
  0xf0   : > { %v714_v14 = vadd.f32 %v8256_v1, %v713_v57  ;;  %v593_v15 = vadd.f32 %v8261_v2, %v592_v56 }
  0xf2   : > { %7169 = vmatmul.msk.f32.gmra.mxu0 %vm438_vm1, %v430_v58  ;;  %7204 = vmatmul.msk.f32.gmra.mxu1 %vm438_vm1, %v430_v58 }
  0xf7   : > { %v595_v59 = vpop.f32.mrf.mxu0  ;;  %v716_v60 = vpop.f32.mrf.mxu1 }
  0xf8   : > { %v717_v10 = vadd.f32 %v8256_v1, %v716_v60  ;;  %v596_v11 = vadd.f32 %v8261_v2, %v595_v59 }
  0xfa   : > { %7170 = vmatmul.msk.f32.gmra.mxu0 %vm438_vm1, %v431_v61  ;;  %7205 = vmatmul.msk.f32.gmra.mxu1 %vm438_vm1, %v431_v61 }
  0xff   : > { %v598_v62 = vpop.f32.mrf.mxu0  ;;  %v719_v63 = vpop.f32.mrf.mxu1 }
 0x100   : > { %v720_v8 = vadd.f32 %v8256_v1, %v719_v63  ;;  %v599_v9 = vadd.f32 %v8261_v2, %v598_v62 }
 0x102   : > { %7171 = vmatmul.msk.f32.gmra.mxu0 %vm438_vm1, %v432_v0  ;;  %7206 = vmatmul.msk.f32.gmra.mxu1 %vm438_vm1, %v432_v0 }
 0x107   : > { %v601_v3 = vpop.f32.mrf.mxu0  ;;  %v722_v4 = vpop.f32.mrf.mxu1 }
 0x108   : > { %v723_v6 = vadd.f32 %v8256_v1, %v722_v4  ;;  %v602_v7 = vadd.f32 %v8261_v2, %v601_v3 }
 0x10a   : > { %7172 = vmatmul.msk.f32.gmra.mxu0 %vm438_vm1, %v433_v5  ;;  %7207 = vmatmul.msk.f32.gmra.mxu1 %vm438_vm1, %v433_v5 }
 0x10b   : > { %1607 = vmatpush.msrb.mxu0 %v723_v6  ;;  %971 = vmatpush.msra.mxu2 %v602_v7 }
 0x10d   : > { %1608 = vmatpush.msrb.mxu0 %v720_v8  ;;  %972 = vmatpush.msra.mxu2 %v599_v9 }
 0x10f   : > { %1609 = vmatpush.msrb.mxu0 %v717_v10  ;;  %v8272_v12 = vpop.f32.mrf.mxu0  ;;  %v8274_v13 = vpop.f32.mrf.mxu1  ;;  %973 = vmatpush.msra.mxu2 %v596_v11  ;;  %v773_v10 = vld [vmem:[#allocation2] sm:$0xff] }
 0x111   : > { %1610 = vmatpush.msrb.mxu0 %v714_v14  ;;  %974 = vmatpush.msra.mxu2 %v593_v15 }
 0x113   : > { %1611 = vmatpush.msrb.mxu0 %v711_v16  ;;  %975 = vmatpush.msra.mxu2 %v590_v17 }
 0x115   : > { %1612 = vmatpush.msrb.mxu0 %v708_v18  ;;  %976 = vmatpush.msra.mxu2 %v587_v19  ;;  %v775_v19 = vld [vmem:[#allocation2 + $0x10] sm:$0xff] }
 0x117   : > { %1613 = vmatpush.msrb.mxu0 %v705_v22  ;;  %v8285_v28 = vpop.f32.mrf.mxu0  ;;  %v8287_v31 = vpop.f32.mrf.mxu1  ;;  %977 = vmatpush.msra.mxu2 %v584_v25 }
 0x119   : > { %1614 = vmatpush.msrb.mxu0 %v702_v34  ;;  %978 = vmatpush.msra.mxu2 %v581_v37 }
 0x11b   : > { %1615 = vmatpush.msrb.mxu0 %v699_v40  ;;  %979 = vmatpush.msra.mxu2 %v578_v43 }
 0x11d   : > { %1616 = vmatpush.msrb.mxu0 %v696_v46  ;;  %980 = vmatpush.msra.mxu2 %v575_v45 }
 0x11f   : > { %1617 = vmatpush.msrb.mxu0 %v693_v44  ;;  %v8305_v47 = vpop.f32.mrf.mxu0  ;;  %v8307_v41 = vpop.f32.mrf.mxu1  ;;  %981 = vmatpush.msra.mxu2 %v572_v42  ;;  %v777_v44 = vld [vmem:[#allocation2 + $0x20] sm:$0xff] }
 0x121   : > { %1618 = vmatpush.msrb.mxu0 %v690_v39  ;;  %982 = vmatpush.msra.mxu2 %v569_v38 }
 0x123   : > { %1619 = vmatpush.msrb.mxu0 %v687_v36  ;;  %983 = vmatpush.msra.mxu2 %v566_v35 }
 0x125   : > { %1620 = vmatpush.msrb.mxu0 %v684_v48  ;;  %984 = vmatpush.msra.mxu2 %v563_v33 }
 0x127   : > { %1621 = vmatpush.msrb.mxu0 %v681_v32  ;;  %v8325_v49 = vpop.f32.mrf.mxu0  ;;  %v8327_v29 = vpop.f32.mrf.mxu1  ;;  %985 = vmatpush.msra.mxu2 %v560_v30  ;;  %v779_v30 = vld [vmem:[#allocation2 + $0x30] sm:$0xff] }
 0x129   : > { %1622 = vmatpush.msrb.mxu0 %v678_v27  ;;  %986 = vmatpush.msra.mxu2 %v557_v26  ;;  %v614_v27 = vadd.f32 %v8261_v2, %v8325_v49  ;;  %v735_v26 = vadd.f32 %v8256_v1, %v8327_v29  ;;  %v729_v49 = vadd.f32 %v8256_v1, %v8287_v31  ;;  %v778_v31 = vld [vmem:[#allocation2 + $0x28] sm:$0xff] }
 0x12a   : > { %987 = vmatmul.f32.vlgmr.msra.gmra.mxu2 %v773_v10  ;;  %1623 = vmatmul.f32.vlgmr.msrb.gmra.mxu0 %v773_v10  ;;  %v605_v29 = vadd.f32 %v8261_v2, %v8272_v12  ;;  %v782_v12 = vld [vmem:[#allocation2 + $0x48] sm:$0xff]  ;;  %v807_v10 = vld [vmem:[#allocation2 + $0x110] sm:$0xff] }
 0x12f   : > { %v8333_v50 = vpop.f32.mrf.mxu0  ;;  %v8335_v24 = vpop.f32.mrf.mxu1 }
 0x130   : > { %v617_v33 = vadd.f32 %v8261_v2, %v8333_v50  ;;  %v738_v32 = vadd.f32 %v8256_v1, %v8335_v24  ;;  %v732_v50 = vadd.f32 %v8256_v1, %v8307_v41  ;;  %v608_v24 = vadd.f32 %v8261_v2, %v8285_v28  ;;  %v776_v28 = vld [vmem:[#allocation2 + $0x18] sm:$0xff]  ;;  %v783_v41 = vld [vmem:[#allocation2 + $0x50] sm:$0xff] }
 0x132   : > { %990 = vmatmul.f32.gmra.mxu2 %v775_v19  ;;  %1626 = vmatmul.f32.gmra.mxu0 %v775_v19 }
 0x137   : > { %v8337_v51 = vpop.f32.mrf.mxu0  ;;  %v8339_v23 = vpop.f32.mrf.mxu1 }
 0x138   : > { %v620_v35 = vadd.f32 %v8261_v2, %v8337_v51  ;;  %v741_v48 = vadd.f32 %v8256_v1, %v8339_v23  ;;  %v611_v51 = vadd.f32 %v8261_v2, %v8305_v47  ;;  %v726_v23 = vadd.f32 %v8256_v1, %v8274_v13  ;;  %v774_v47 = vld [vmem:[#allocation2 + $0x8] sm:$0xff]  ;;  %v789_v13 = vld [vmem:[#allocation2 + $0x80] sm:$0xff] }
 0x13a   : > { %993 = vmatmul.f32.gmra.mxu2 %v777_v44  ;;  %1629 = vmatmul.f32.gmra.mxu0 %v777_v44 }
 0x13f   : > { %v8341_v52 = vpop.f32.mrf.mxu0  ;;  %v8343_v53 = vpop.f32.mrf.mxu1 }
 0x140   : > { %v623_v38 = vadd.f32 %v8261_v2, %v8341_v52  ;;  %v744_v36 = vadd.f32 %v8256_v1, %v8343_v53  ;;  %v781_v52 = vld [vmem:[#allocation2 + $0x40] sm:$0xff] }
 0x141   : > { %v785_v53 = vld [vmem:[#allocation2 + $0x60] sm:$0xff] }
 0x142   : > { %996 = vmatmul.f32.gmra.mxu2 %v779_v30  ;;  %1632 = vmatmul.f32.gmra.mxu0 %v779_v30  ;;  %v810_v30 = vld [vmem:[#allocation2 + $0x128] sm:$0xff] }
 0x147   : > { %v625_v54 = vpop.f32.mrf.mxu0  ;;  %v746_v21 = vpop.f32.mrf.mxu1 }
 0x148   : > { %v626_v42 = vadd.f32 %v8261_v2, %v625_v54  ;;  %v747_v39 = vadd.f32 %v8256_v1, %v746_v21  ;;  %v784_v54 = vld [vmem:[#allocation2 + $0x58] sm:$0xff]  ;;  %v791_v21 = vld [vmem:[#allocation2 + $0x90] sm:$0xff] }
 0x14a   : > { %999 = vmatmul.f32.gmra.mxu2 %v781_v52  ;;  %1635 = vmatmul.f32.gmra.mxu0 %v781_v52 }
 0x14f   : > { %v628_v55 = vpop.f32.mrf.mxu0  ;;  %v749_v56 = vpop.f32.mrf.mxu1 }
 0x150   : > { %v629_v46 = vadd.f32 %v8261_v2, %v628_v55  ;;  %v750_v45 = vadd.f32 %v8256_v1, %v749_v56  ;;  %v786_v55 = vld [vmem:[#allocation2 + $0x68] sm:$0xff]  ;;  %v793_v56 = vld [vmem:[#allocation2 + $0xa0] sm:$0xff] }
 0x152   : > { %1002 = vmatmul.f32.gmra.mxu2 %v783_v41  ;;  %1638 = vmatmul.f32.gmra.mxu0 %v783_v41 }
 0x157   : > { %v631_v57 = vpop.f32.mrf.mxu0  ;;  %v752_v20 = vpop.f32.mrf.mxu1 }
 0x158   : > { %v632_v40 = vadd.f32 %v8261_v2, %v631_v57  ;;  %v753_v43 = vadd.f32 %v8256_v1, %v752_v20  ;;  %v788_v57 = vld [vmem:[#allocation2 + $0x78] sm:$0xff]  ;;  %v795_v20 = vld [vmem:[#allocation2 + $0xb0] sm:$0xff] }
 0x15a   : > { %1005 = vmatmul.f32.gmra.mxu2 %v785_v53  ;;  %1641 = vmatmul.f32.gmra.mxu0 %v785_v53  ;;  %v814_v53 = vld [vmem:[#allocation2 + $0x148] sm:$0xff] }
 0x15f   : > { %v634_v58 = vpop.f32.mrf.mxu0  ;;  %v755_v59 = vpop.f32.mrf.mxu1 }
 0x160   : > { %v635_v34 = vadd.f32 %v8261_v2, %v634_v58  ;;  %v756_v37 = vadd.f32 %v8256_v1, %v755_v59  ;;  %v790_v58 = vld [vmem:[#allocation2 + $0x88] sm:$0xff]  ;;  %v797_v59 = vld [vmem:[#allocation2 + $0xc0] sm:$0xff] }
 0x167   : > { %v637_v60 = vpop.f32.mrf.mxu0  ;;  %v758_v61 = vpop.f32.mrf.mxu1 }
 0x168   : > { %v638_v22 = vadd.f32 %v8261_v2, %v637_v60  ;;  %v759_v25 = vadd.f32 %v8256_v1, %v758_v61  ;;  %v792_v60 = vld [vmem:[#allocation2 + $0x98] sm:$0xff]  ;;  %v799_v61 = vld [vmem:[#allocation2 + $0xd0] sm:$0xff] }
 0x16f   : > { %v640_v62 = vpop.f32.mrf.mxu0  ;;  %v761_v63 = vpop.f32.mrf.mxu1 }
 0x170   : > { %v641_v17 = vadd.f32 %v8261_v2, %v640_v62  ;;  %v762_v18 = vadd.f32 %v8256_v1, %v761_v63  ;;  %v794_v62 = vld [vmem:[#allocation2 + $0xa8] sm:$0xff]  ;;  %v801_v63 = vld [vmem:[#allocation2 + $0xe0] sm:$0xff] }
 0x177   : > { %v643_v0 = vpop.f32.mrf.mxu0  ;;  %v764_v3 = vpop.f32.mrf.mxu1 }
 0x178   : > { %v644_v15 = vadd.f32 %v8261_v2, %v643_v0  ;;  %v765_v16 = vadd.f32 %v8256_v1, %v764_v3  ;;  %v796_v0 = vld [vmem:[#allocation2 + $0xb8] sm:$0xff]  ;;  %v803_v3 = vld [vmem:[#allocation2 + $0xf0] sm:$0xff] }
 0x17f   : > { %v646_v4 = vpop.f32.mrf.mxu0  ;;  %v767_v5 = vpop.f32.mrf.mxu1 }
 0x180   : > { %v647_v11 = vadd.f32 %v8261_v2, %v646_v4  ;;  %v768_v14 = vadd.f32 %v8256_v1, %v767_v5  ;;  %v798_v4 = vld [vmem:[#allocation2 + $0xc8] sm:$0xff] }
 0x187   : > { %v649_v6 = vpop.f32.mrf.mxu0  ;;  %v770_v7 = vpop.f32.mrf.mxu1 }
 0x188   : > { %v650_v8 = vadd.f32 %v8261_v2, %v649_v6  ;;  %v771_v9 = vadd.f32 %v8256_v1, %v770_v7  ;;  %v780_v1 = vld [vmem:[#allocation2 + $0x38] sm:$0xff]  ;;  %v787_v2 = vld [vmem:[#allocation2 + $0x70] sm:$0xff]  ;;  %v805_v6 = vld [vmem:[#allocation2 + $0x100] sm:$0xff] }
 0x189   : > { %1008 = vmatmul.f32.gmra.mxu2 %v787_v2  ;;  %1644 = vmatmul.f32.gmra.mxu0 %v787_v2  ;;  %v821_v2 = vld [vmem:[#allocation2 + $0x180] sm:$0xff] }
 0x18a   : > { %1204 = vmatpush.msra.mxu3 %v650_v8  ;;  %1840 = vmatpush.msrb.mxu1 %v771_v9  ;;  %v800_v8 = vld [vmem:[#allocation2 + $0xd8] sm:$0xff] }
 0x18c   : > { %1205 = vmatpush.msra.mxu3 %v647_v11  ;;  %1841 = vmatpush.msrb.mxu1 %v768_v14  ;;  %v802_v14 = vld [vmem:[#allocation2 + $0xe8] sm:$0xff] }
 0x18e   : > { %1206 = vmatpush.msra.mxu3 %v644_v15  ;;  %1842 = vmatpush.msrb.mxu1 %v765_v16  ;;  %v809_v16 = vld [vmem:[#allocation2 + $0x120] sm:$0xff] }
 0x190   : > { %1207 = vmatpush.msra.mxu3 %v641_v17  ;;  %1843 = vmatpush.msrb.mxu1 %v762_v18  ;;  %v804_v18 = vld [vmem:[#allocation2 + $0xf8] sm:$0xff] }
 0x191   : > { %1011 = vmatmul.f32.gmra.mxu2 %v789_v13  ;;  %1647 = vmatmul.f32.gmra.mxu0 %v789_v13 }
 0x192   : > { %1208 = vmatpush.msra.mxu3 %v638_v22  ;;  %1844 = vmatpush.msrb.mxu1 %v759_v25  ;;  %v811_v22 = vld [vmem:[#allocation2 + $0x130] sm:$0xff] }
 0x194   : > { %1209 = vmatpush.msra.mxu3 %v635_v34  ;;  %1845 = vmatpush.msrb.mxu1 %v756_v37  ;;  %v806_v37 = vld [vmem:[#allocation2 + $0x108] sm:$0xff] }
 0x196   : > { %1210 = vmatpush.msra.mxu3 %v632_v40  ;;  %1846 = vmatpush.msrb.mxu1 %v753_v43  ;;  %v813_v43 = vld [vmem:[#allocation2 + $0x140] sm:$0xff] }
 0x198   : > { %1211 = vmatpush.msra.mxu3 %v629_v46  ;;  %1847 = vmatpush.msrb.mxu1 %v750_v45 }
 0x199   : > { %1014 = vmatmul.f32.gmra.mxu2 %v791_v21  ;;  %1650 = vmatmul.f32.gmra.mxu0 %v791_v21 }
 0x19a   : > { %1212 = vmatpush.msra.mxu3 %v626_v42  ;;  %1848 = vmatpush.msrb.mxu1 %v747_v39  ;;  %v808_v39 = vld [vmem:[#allocation2 + $0x118] sm:$0xff] }
 0x19c   : > { %1213 = vmatpush.msra.mxu3 %v623_v38  ;;  %1849 = vmatpush.msrb.mxu1 %v744_v36  ;;  %v815_v36 = vld [vmem:[#allocation2 + $0x150] sm:$0xff] }
 0x19e   : > { %1214 = vmatpush.msra.mxu3 %v620_v35  ;;  %1850 = vmatpush.msrb.mxu1 %v741_v48 }
 0x1a0   : > { %1215 = vmatpush.msra.mxu3 %v617_v33  ;;  %1851 = vmatpush.msrb.mxu1 %v738_v32 }
 0x1a1   : > { %1017 = vmatmul.f32.gmra.mxu2 %v793_v56  ;;  %1653 = vmatmul.f32.gmra.mxu0 %v793_v56 }
 0x1a2   : > { %1216 = vmatpush.msra.mxu3 %v614_v27  ;;  %1852 = vmatpush.msrb.mxu1 %v735_v26  ;;  %v817_v26 = vld [vmem:[#allocation2 + $0x160] sm:$0xff] }
 0x1a4   : > { %1217 = vmatpush.msra.mxu3 %v611_v51  ;;  %1853 = vmatpush.msrb.mxu1 %v732_v50 }
 0x1a6   : > { %1218 = vmatpush.msra.mxu3 %v608_v24  ;;  %1854 = vmatpush.msrb.mxu1 %v729_v49 }
 0x1a7   : > { %v8391_v5 = vpop.f32.mrf.mxu0 }
 0x1a8   : > { %1219 = vmatpush.msra.mxu3 %v605_v29  ;;  %1855 = vmatpush.msrb.mxu1 %v726_v23  ;;  %v812_v29 = vld [vmem:[#allocation2 + $0x138] sm:$0xff] }
 0x1a9   : > { %1220 = vmatmul.f32.vlgmr.msra.gmra.mxu3 %v774_v47  ;;  %1856 = vmatmul.f32.vlgmr.msrb.gmra.mxu1 %v774_v47  ;;  %v819_v47 = vld [vmem:[#allocation2 + $0x170] sm:$0xff] }
 0x1aa   : > { %1020 = vmatmul.f32.gmra.mxu2 %v795_v20  ;;  %1656 = vmatmul.f32.gmra.mxu0 %v795_v20 }
 0x1ad   : > { %v988_v7 = vpop.f32.mrf.mxu2 }
 0x1af   : > { %v8393_v9 = vpop.f32.mrf.mxu0 }
 0x1b1   : > { %1223 = vmatmul.f32.gmra.mxu3 %v776_v28  ;;  %1859 = vmatmul.f32.gmra.mxu1 %v776_v28 }
 0x1b2   : > { %1023 = vmatmul.f32.gmra.mxu2 %v797_v59  ;;  %1659 = vmatmul.f32.gmra.mxu0 %v797_v59 }
 0x1b5   : > { %v991_v11 = vpop.f32.mrf.mxu2 }
 0x1b7   : > { %v8395_v15 = vpop.f32.mrf.mxu0 }
 0x1b9   : > { %1226 = vmatmul.f32.gmra.mxu3 %v778_v31  ;;  %1862 = vmatmul.f32.gmra.mxu1 %v778_v31 }
 0x1ba   : > { %1026 = vmatmul.f32.gmra.mxu2 %v799_v61  ;;  %1662 = vmatmul.f32.gmra.mxu0 %v799_v61  ;;  %v818_v61 = vld [vmem:[#allocation2 + $0x168] sm:$0xff] }
 0x1bd   : > { %v994_v17 = vpop.f32.mrf.mxu2 }
 0x1bf   : > { %v8397_v19 = vpop.f32.mrf.mxu0 }
 0x1c1   : > { %1229 = vmatmul.f32.gmra.mxu3 %v780_v1  ;;  %1865 = vmatmul.f32.gmra.mxu1 %v780_v1 }
 0x1c2   : > { %1029 = vmatmul.f32.gmra.mxu2 %v801_v63  ;;  %1665 = vmatmul.f32.gmra.mxu0 %v801_v63  ;;  %v825_v63 = vld [vmem:[#allocation2 + $0x1a0] sm:$0xff] }
 0x1c5   : > { %v997_v25 = vpop.f32.mrf.mxu2 }
 0x1c7   : > { %v8401_v40 = vpop.f32.mrf.mxu0 }
 0x1c9   : > { %1232 = vmatmul.f32.gmra.mxu3 %v782_v12  ;;  %1868 = vmatmul.f32.gmra.mxu1 %v782_v12 }
 0x1ca   : > { %1032 = vmatmul.f32.gmra.mxu2 %v803_v3  ;;  %1668 = vmatmul.f32.gmra.mxu0 %v803_v3 }
 0x1cd   : > { %v1000_v44 = vpop.f32.mrf.mxu2 }
 0x1cf   : > { %v8407_v38 = vpop.f32.mrf.mxu0 }
 0x1d1   : > { %1235 = vmatmul.f32.gmra.mxu3 %v784_v54  ;;  %1871 = vmatmul.f32.gmra.mxu1 %v784_v54 }
 0x1d2   : > { %1035 = vmatmul.f32.gmra.mxu2 %v805_v6  ;;  %1671 = vmatmul.f32.gmra.mxu0 %v805_v6 }
 0x1d5   : > { %v1003_v33 = vpop.f32.mrf.mxu2 }
 0x1d7   : > { %v8413_v27 = vpop.f32.mrf.mxu0 }
 0x1d9   : > { %1238 = vmatmul.f32.gmra.mxu3 %v786_v55  ;;  %1874 = vmatmul.f32.gmra.mxu1 %v786_v55  ;;  %v816_v55 = vld [vmem:[#allocation2 + $0x158] sm:$0xff] }
 0x1da   : > { %1038 = vmatmul.f32.gmra.mxu2 %v807_v10  ;;  %1674 = vmatmul.f32.gmra.mxu0 %v807_v10  ;;  %v827_v10 = vld [vmem:[#allocation2 + $0x1b0] sm:$0xff] }
 0x1dd   : > { %v1006_v24 = vpop.f32.mrf.mxu2 }
 0x1e1   : > { %1241 = vmatmul.f32.gmra.mxu3 %v788_v57  ;;  %1877 = vmatmul.f32.gmra.mxu1 %v788_v57  ;;  %v823_v57 = vld [vmem:[#allocation2 + $0x190] sm:$0xff] }
 0x1e2   : > { %1041 = vmatmul.f32.gmra.mxu2 %v809_v16  ;;  %1677 = vmatmul.f32.gmra.mxu0 %v809_v16 }
 0x1e9   : > { %1244 = vmatmul.f32.gmra.mxu3 %v790_v58  ;;  %1880 = vmatmul.f32.gmra.mxu1 %v790_v58 }
 0x1ea   : > { %1044 = vmatmul.f32.gmra.mxu2 %v811_v22  ;;  %1680 = vmatmul.f32.gmra.mxu0 %v811_v22 }
 0x1f1   : > { %1247 = vmatmul.f32.gmra.mxu3 %v792_v60  ;;  %1883 = vmatmul.f32.gmra.mxu1 %v792_v60 }
 0x1f2   : > { %1047 = vmatmul.f32.gmra.mxu2 %v813_v43  ;;  %1683 = vmatmul.f32.gmra.mxu0 %v813_v43  ;;  %v822_v43 = vld [vmem:[#allocation2 + $0x188] sm:$0xff] }
 0x1f9   : > { %1250 = vmatmul.f32.gmra.mxu3 %v794_v62  ;;  %1886 = vmatmul.f32.gmra.mxu1 %v794_v62 }
 0x1fa   : > { %1050 = vmatmul.f32.gmra.mxu2 %v815_v36  ;;  %1686 = vmatmul.f32.gmra.mxu0 %v815_v36  ;;  %v829_v36 = vld [vmem:[#allocation2 + $0x1c0] sm:$0xff] }
 0x201   : > { %1253 = vmatmul.f32.gmra.mxu3 %v796_v0  ;;  %1889 = vmatmul.f32.gmra.mxu1 %v796_v0 }
 0x202   : > { %1053 = vmatmul.f32.gmra.mxu2 %v817_v26  ;;  %1689 = vmatmul.f32.gmra.mxu0 %v817_v26 }
 0x206   : > { %v8419_v23 = vpop.f32.mrf.mxu0 }
 0x209   : > { %1256 = vmatmul.f32.gmra.mxu3 %v798_v4  ;;  %1892 = vmatmul.f32.gmra.mxu1 %v798_v4 }
 0x20a   : > { %1056 = vmatmul.f32.gmra.mxu2 %v819_v47  ;;  %1692 = vmatmul.f32.gmra.mxu0 %v819_v47 }
 0x20c   : > { %v1009_v41 = vpop.f32.mrf.mxu2 }
 0x20e   : > { %v1648_v1 = vpop.f32.mrf.mxu0 }
 0x211   : > { %1259 = vmatmul.f32.gmra.mxu3 %v800_v8  ;;  %1895 = vmatmul.f32.gmra.mxu1 %v800_v8 }
 0x212   : > { %1059 = vmatmul.f32.gmra.mxu2 %v821_v2  ;;  %1695 = vmatmul.f32.gmra.mxu0 %v821_v2 }
 0x214   : > { %v1012_v54 = vpop.f32.mrf.mxu2 }
 0x216   : > { %v1651_v56 = vpop.f32.mrf.mxu0 }
 0x219   : > { %1262 = vmatmul.f32.gmra.mxu3 %v802_v14  ;;  %1898 = vmatmul.f32.gmra.mxu1 %v802_v14 }
 0x21a   : > { %1062 = vmatmul.f32.gmra.mxu2 %v823_v57  ;;  %1698 = vmatmul.f32.gmra.mxu0 %v823_v57 }
 0x21c   : > { %v8431_v59 = vpop.f32.mrf.mxu2 }
 0x21e   : > { %v8435_v62 = vpop.f32.mrf.mxu0 }
 0x221   : > { %1265 = vmatmul.f32.gmra.mxu3 %v804_v18  ;;  %1901 = vmatmul.f32.gmra.mxu1 %v804_v18 }
 0x222   : > { %1065 = vmatmul.f32.gmra.mxu2 %v825_v63  ;;  %1701 = vmatmul.f32.gmra.mxu0 %v825_v63  ;;  %v826_v63 = vld [vmem:[#allocation2 + $0x1a8] sm:$0xff] }
 0x224   : > { %v8439_v4 = vpop.f32.mrf.mxu2 }
 0x226   : > { %v8399_v34 = vpop.f32.mrf.mxu1 }
 0x227   : > { %v8443_v8 = vpop.f32.mrf.mxu0  ;;  %v1858_v16 = vadd.f32 %v8399_v34, %v8391_v5 }
 0x229   : > { %1268 = vmatmul.f32.gmra.mxu3 %v806_v37  ;;  %1904 = vmatmul.f32.gmra.mxu1 %v806_v37 }
 0x22a   : > { %1068 = vmatmul.f32.gmra.mxu2 %v827_v10  ;;  %1704 = vmatmul.f32.gmra.mxu0 %v827_v10 }
 0x22c   : > { %v1221_v46 = vpop.f32.mrf.mxu3 }
 0x22d   : > { %v8403_v45 = vadd.f32 %v1221_v46, %v988_v7  ;;  %v820_v7 = vld [vmem:[#allocation2 + $0x178] sm:$0xff] }
 0x22e   : > { %v8405_v42 = vpop.f32.mrf.mxu1 }
 0x231   : > { %1271 = vmatmul.f32.gmra.mxu3 %v808_v39  ;;  %1907 = vmatmul.f32.gmra.mxu1 %v808_v39  ;;  %v8467_v39 = vld [vmem:[%s11665_s5] sm:$0xff] }
 0x232   : > { %1071 = vmatmul.f32.gmra.mxu2 %v829_v36  ;;  %1707 = vmatmul.f32.gmra.mxu0 %v829_v36 }
 0x234   : > { %v1224_v35 = vpop.f32.mrf.mxu3 }
 0x235   : > { %v8409_v48 = vadd.f32 %v1224_v35, %v991_v11  ;;  %v8448_v11 = vld [vmem:[%s11665_s5 + $0x10] sm:$0xff]  ;;  %v8472_v35 = vperm.slane %v8467_v39, 0 }
 0x236   : > { %v8411_v32 = vpop.f32.mrf.mxu1  ;;  %v8458_v22 = vperm.slane %v8448_v11, 1 }
 0x239   : > { %1274 = vmatmul.f32.gmra.mxu3 %v810_v30  ;;  %1910 = vmatmul.f32.gmra.mxu1 %v810_v30  ;;  %v8477_v30 = vperm.slane %v8467_v39, 1 }
 0x23c   : > { %v1227_v51 = vpop.f32.mrf.mxu3 }
 0x23d   : > { %v8415_v50 = vadd.f32 %v1227_v51, %v994_v17  ;;  %v8453_v17 = vperm.slane %v8448_v11, 0  ;;  %v1861_v51 = vadd.f32 %v8405_v42, %v8393_v9  ;;  %v831_v9 = vld [vmem:[#allocation2 + $0x1d0] sm:$0xff] }
 0x23e   : > { %v8417_v49 = vpop.f32.mrf.mxu1  ;;  %1074 = vmatmul.f32.gmra.mxu2 %v831_v9  ;;  %1710 = vmatmul.f32.gmra.mxu0 %v831_v9 }
 0x23f   : > { %v2074_v5 = vmul.f32 %v8453_v17, %v1858_v16  ;;  %v1440_v36 = vmul.f32 %v8472_v35, %v8415_v50 }
 0x241   : > { %1277 = vmatmul.f32.gmra.mxu3 %v812_v29  ;;  %1913 = vmatmul.f32.gmra.mxu1 %v812_v29 }
 0x244   : > { %v1230_v52 = vpop.f32.mrf.mxu3 }
 0x245   : > { %v8421_v28 = vadd.f32 %v1230_v52, %v997_v25  ;;  %v8460_v25 = vpop.f32.mrf.mxu2  ;;  %v824_v52 = vld [vmem:[#allocation2 + $0x198] sm:$0xff] }
 0x246   : > { %v8423_v31 = vpop.f32.mrf.mxu1 }
 0x249   : > { %1280 = vmatmul.f32.gmra.mxu3 %v814_v53  ;;  %1916 = vmatmul.f32.gmra.mxu1 %v814_v53 }
 0x24c   : > { %v1233_v12 = vpop.f32.mrf.mxu3 }
 0x24d   : > { %v8425_v13 = vadd.f32 %v1233_v12, %v1000_v44  ;;  %v8462_v44 = vpop.f32.mrf.mxu0  ;;  %v8481_v29 = vpop.f32.mrf.mxu2  ;;  %v2075_v12 = vmul.f32 %v8453_v17, %v1861_v51 }
 0x24e   : > { %v8427_v21 = vpop.f32.mrf.mxu1 }
 0x251   : > { %1283 = vmatmul.f32.gmra.mxu3 %v816_v55  ;;  %1919 = vmatmul.f32.gmra.mxu1 %v816_v55 }
 0x254   : > { %v1236_v20 = vpop.f32.mrf.mxu3 }
 0x255   : > { %v8429_v58 = vadd.f32 %v1236_v20, %v1003_v33  ;;  %v8486_v2 = vpop.f32.mrf.mxu0  ;;  %v8497_v20 = vpop.f32.mrf.mxu2 }
 0x256   : > { %v8433_v60 = vpop.f32.mrf.mxu1 }
 0x259   : > { %1286 = vmatmul.f32.gmra.mxu3 %v818_v61  ;;  %1922 = vmatmul.f32.gmra.mxu1 %v818_v61 }
 0x25c   : > { %v1239_v0 = vpop.f32.mrf.mxu3 }
 0x25d   : > { %v8437_v3 = vadd.f32 %v1239_v0, %v1006_v24  ;;  %v1439_v0 = vmul.f32 %v8472_v35, %v8409_v48 }
 0x25e   : > { %v8441_v6 = vpop.f32.mrf.mxu1 }
 0x261   : > { %1289 = vmatmul.f32.gmra.mxu3 %v820_v7  ;;  %1925 = vmatmul.f32.gmra.mxu1 %v820_v7 }
 0x264   : > { %v1242_v14 = vpop.f32.mrf.mxu3 }
 0x265   : > { %v8455_v18 = vadd.f32 %v1242_v14, %v1009_v41  ;;  %v1438_v41 = vmul.f32 %v8472_v35, %v8403_v45  ;;  %v1864_v45 = vadd.f32 %v8411_v32, %v8395_v15  ;;  %v8503_v14 = vpop.f32.mrf.mxu0  ;;  %v833_v32 = vld [vmem:[#allocation2 + $0x1e0] sm:$0xff] }
 0x266   : > { %v1881_v37 = vpop.f32.mrf.mxu1  ;;  %1077 = vmatmul.f32.gmra.mxu2 %v833_v32  ;;  %1713 = vmatmul.f32.gmra.mxu0 %v833_v32 }
 0x267   : > { %v1882_v46 = vadd.f32 %v1881_v37, %v1648_v1  ;;  %v2076_v16 = vmul.f32 %v8453_v17, %v1864_v45 }
 0x269   : > { %v2083_v34 = vmul.f32 %v8458_v22, %v1882_v46  ;;  %1292 = vmatmul.f32.gmra.mxu3 %v822_v43  ;;  %1928 = vmatmul.f32.gmra.mxu1 %v822_v43  ;;  %v1867_v43 = vadd.f32 %v8417_v49, %v8397_v19  ;;  %v8514_v46 = vpop.f32.mrf.mxu2  ;;  %v835_v49 = vld [vmem:[#allocation2 + $0x1f0] sm:$0xff] }
 0x26b   : > { %v8474_v33 = vadd.f32 %v2083_v34, %v2074_v5  ;;  %v828_v34 = vld [vmem:[#allocation2 + $0x1b8] sm:$0xff] }
 0x26c   : > { %v1245_v26 = vpop.f32.mrf.mxu3 }
 0x26d   : > { %v1246_v24 = vadd.f32 %v1245_v26, %v1012_v54 }
 0x26e   : > { %v1884_v47 = vpop.f32.mrf.mxu1  ;;  %1080 = vmatmul.f32.gmra.mxu2 %v835_v49  ;;  %1716 = vmatmul.f32.gmra.mxu0 %v835_v49 }
 0x26f   : > { %v1447_v53 = vmul.f32 %v8477_v30, %v1246_v24  ;;  %v1885_v1 = vadd.f32 %v1884_v47, %v1651_v56  ;;  %v8520_v24 = vpop.f32.mrf.mxu0  ;;  %v2077_v47 = vmul.f32 %v8453_v17, %v1867_v43 }
 0x271   : > { %v8489_v55 = vadd.f32 %v1447_v53, %v1438_v41  ;;  %v2084_v57 = vmul.f32 %v8458_v22, %v1885_v1  ;;  %1295 = vmatmul.f32.gmra.mxu3 %v824_v52  ;;  %1931 = vmatmul.f32.gmra.mxu1 %v824_v52  ;;  %v1870_v41 = vadd.f32 %v8423_v31, %v8401_v40  ;;  %v8531_v53 = vpop.f32.mrf.mxu2  ;;  %v837_v31 = vld [vmem:[#allocation2 + $0x200] sm:$0xff] }
 0x273   : > { %v8492_v42 = vadd.f32 %v2084_v57, %v2075_v12  ;;  %v830_v12 = vld [vmem:[#allocation2 + $0x1c8] sm:$0xff]  ;;  %v1441_v57 = vmul.f32 %v8472_v35, %v8421_v28 }
 0x274   : > { %v1248_v54 = vpop.f32.mrf.mxu3 }
 0x275   : > { %v1249_v56 = vadd.f32 %v1248_v54, %v8431_v59 }
 0x276   : > { %v1887_v61 = vpop.f32.mrf.mxu1  ;;  %1083 = vmatmul.f32.gmra.mxu2 %v837_v31  ;;  %1719 = vmatmul.f32.gmra.mxu0 %v837_v31 }
 0x277   : > { %v1448_v7 = vmul.f32 %v8477_v30, %v1249_v56  ;;  %v1888_v10 = vadd.f32 %v1887_v61, %v8435_v62  ;;  %v8537_v45 = vpop.f32.mrf.mxu0  ;;  %v2078_v56 = vmul.f32 %v8453_v17, %v1870_v41 }
 0x279   : > { %v8506_v37 = vadd.f32 %v1448_v7, %v1439_v0  ;;  %v2085_v15 = vmul.f32 %v8458_v22, %v1888_v10  ;;  %1298 = vmatmul.f32.gmra.mxu3 %v826_v63  ;;  %1934 = vmatmul.f32.gmra.mxu1 %v826_v63  ;;  %v1873_v63 = vadd.f32 %v8427_v21, %v8407_v38  ;;  %v8548_v0 = vpop.f32.mrf.mxu2  ;;  %v832_v10 = vld [vmem:[#allocation2 + $0x1d8] sm:$0xff]  ;;  %v839_v21 = vld [vmem:[#allocation2 + $0x210] sm:$0xff] }
 0x27b   : > { %v8509_v59 = vadd.f32 %v2085_v15, %v2076_v16  ;;  %v1442_v16 = vmul.f32 %v8472_v35, %v8425_v13  ;;  %v2079_v43 = vmul.f32 %v8453_v17, %v1873_v63 }
 0x27c   : > { %v1251_v48 = vpop.f32.mrf.mxu3 }
 0x27d   : > { %v1252_v62 = vadd.f32 %v1251_v48, %v8439_v4 }
 0x27e   : > { %v1890_v5 = vpop.f32.mrf.mxu1  ;;  %1086 = vmatmul.f32.gmra.mxu2 %v839_v21  ;;  %1722 = vmatmul.f32.gmra.mxu0 %v839_v21 }
 0x27f   : > { %v1449_v26 = vmul.f32 %v8477_v30, %v1252_v62  ;;  %v1891_v51 = vadd.f32 %v1890_v5, %v8443_v8  ;;  %v8554_v48 = vpop.f32.mrf.mxu0  ;;  %v1876_v5 = vadd.f32 %v8433_v60, %v8413_v27  ;;  %v841_v60 = vld [vmem:[#allocation2 + $0x220] sm:$0xff] }
 0x281   : > { %v8523_v52 = vadd.f32 %v1449_v26, %v1440_v36  ;;  %v2086_v19 = vmul.f32 %v8458_v22, %v1891_v51  ;;  %1301 = vmatmul.f32.gmra.mxu3 %v828_v34  ;;  %1937 = vmatmul.f32.gmra.mxu1 %v828_v34  ;;  %v8565_v34 = vpop.f32.mrf.mxu2  ;;  %v834_v26 = vld [vmem:[#allocation2 + $0x1e8] sm:$0xff]  ;;  %v1443_v51 = vmul.f32 %v8472_v35, %v8429_v58 }
 0x283   : > { %v8526_v4 = vadd.f32 %v2086_v19, %v2077_v47 }
 0x284   : > { %v1254_v50 = vpop.f32.mrf.mxu3 }
 0x285   : > { %v1255_v8 = vadd.f32 %v1254_v50, %v8460_v25  ;;  %v2080_v50 = vmul.f32 %v8453_v17, %v1876_v5 }
 0x286   : > { %v1893_v1 = vpop.f32.mrf.mxu1  ;;  %1089 = vmatmul.f32.gmra.mxu2 %v841_v60  ;;  %1725 = vmatmul.f32.gmra.mxu0 %v841_v60 }
 0x287   : > { %v1450_v9 = vmul.f32 %v8477_v30, %v1255_v8  ;;  %v1894_v54 = vadd.f32 %v1893_v1, %v8462_v44  ;;  %v8571_v49 = vpop.f32.mrf.mxu0  ;;  %v1879_v8 = vadd.f32 %v8441_v6, %v8419_v23  ;;  %v843_v6 = vld [vmem:[#allocation2 + $0x230] sm:$0xff] }
 0x289   : > { %v8540_v61 = vadd.f32 %v1450_v9, %v1441_v57  ;;  %v2087_v40 = vmul.f32 %v8458_v22, %v1894_v54  ;;  %1304 = vmatmul.f32.gmra.mxu3 %v830_v12  ;;  %1940 = vmatmul.f32.gmra.mxu1 %v830_v12  ;;  %v8582_v1 = vpop.f32.mrf.mxu2  ;;  %v836_v57 = vld [vmem:[#allocation2 + $0x1f8] sm:$0xff]  ;;  %v1444_v9 = vmul.f32 %v8472_v35, %v8437_v3 }
 0x28a   : > { %v2081_v31 = vmul.f32 %v8453_v17, %v1879_v8 }
 0x28b   : > { %v8543_v25 = vadd.f32 %v2087_v40, %v2078_v56 }
 0x28c   : > { %v1257_v28 = vpop.f32.mrf.mxu3 }
 0x28d   : > { %v1258_v44 = vadd.f32 %v1257_v28, %v8481_v29 }
 0x28e   : > { %v1896_v7 = vpop.f32.mrf.mxu1  ;;  %1092 = vmatmul.f32.gmra.mxu2 %v843_v6  ;;  %1728 = vmatmul.f32.gmra.mxu0 %v843_v6 }
 0x28f   : > { %v1451_v15 = vmul.f32 %v8477_v30, %v1258_v44  ;;  %v1897_v32 = vadd.f32 %v1896_v7, %v8486_v2  ;;  %v8588_v40 = vpop.f32.mrf.mxu0  ;;  %v838_v7 = vld [vmem:[#allocation2 + $0x208] sm:$0xff] }
 0x291   : > { %v8557_v62 = vadd.f32 %v1451_v15, %v1442_v16  ;;  %v2088_v38 = vmul.f32 %v8458_v22, %v1897_v32  ;;  %1307 = vmatmul.f32.gmra.mxu3 %v832_v10  ;;  %1943 = vmatmul.f32.gmra.mxu1 %v832_v10  ;;  %v8600_v44 = vpop.f32.mrf.mxu2 }
 0x293   : > { %v8560_v29 = vadd.f32 %v2088_v38, %v2079_v43  ;;  %v845_v43 = vld [vmem:[#allocation2 + $0x240] sm:$0xff] }
 0x294   : > { %v1260_v13 = vpop.f32.mrf.mxu3 }
 0x295   : > { %v1261_v2 = vadd.f32 %v1260_v13, %v8497_v20  ;;  %v840_v13 = vld [vmem:[#allocation2 + $0x218] sm:$0xff] }
 0x296   : > { %v1899_v36 = vpop.f32.mrf.mxu1  ;;  %1095 = vmatmul.f32.gmra.mxu2 %v845_v43  ;;  %1731 = vmatmul.f32.gmra.mxu0 %v845_v43 }
 0x297   : > { %v1452_v47 = vmul.f32 %v8477_v30, %v1261_v2  ;;  %v1900_v19 = vadd.f32 %v1899_v36, %v8503_v14  ;;  %v8606_v15 = vpop.f32.mrf.mxu0 }
 0x299   : > { %v8574_v41 = vadd.f32 %v1452_v47, %v1443_v51  ;;  %v2089_v27 = vmul.f32 %v8458_v22, %v1900_v19  ;;  %1310 = vmatmul.f32.gmra.mxu3 %v834_v26  ;;  %1946 = vmatmul.f32.gmra.mxu1 %v834_v26  ;;  %v847_v51 = vld [vmem:[#allocation2 + $0x250] sm:$0xff] }
 0x29b   : > { %v8577_v20 = vadd.f32 %v2089_v27, %v2080_v50  ;;  %v842_v27 = vld [vmem:[#allocation2 + $0x228] sm:$0xff] }
 0x29c   : > { %v1263_v58 = vpop.f32.mrf.mxu3 }
 0x29d   : > { %v1264_v14 = vadd.f32 %v1263_v58, %v8514_v46 }
 0x29e   : > { %v1902_v12 = vpop.f32.mrf.mxu1  ;;  %1098 = vmatmul.f32.gmra.mxu2 %v847_v51  ;;  %1734 = vmatmul.f32.gmra.mxu0 %v847_v51 }
 0x29f   : > { %v1453_v54 = vmul.f32 %v8477_v30, %v1264_v14  ;;  %v1903_v56 = vadd.f32 %v1902_v12, %v8520_v24  ;;  %v8598_v24 = vperm.slane %v8448_v11, 2  ;;  %v8622_v36 = vpop.f32.mrf.mxu0  ;;  %v849_v12 = vld [vmem:[#allocation2 + $0x260] sm:$0xff] }
 0x2a1   : > { %v8591_v28 = vadd.f32 %v1453_v54, %v1444_v9  ;;  %v2090_v23 = vmul.f32 %v8458_v22, %v1903_v56  ;;  %1313 = vmatmul.f32.gmra.mxu3 %v836_v57  ;;  %1949 = vmatmul.f32.gmra.mxu1 %v836_v57  ;;  %v1445_v22 = vmul.f32 %v8472_v35, %v8455_v18  ;;  %v8615_v18 = vperm.slane %v8467_v39, 2  ;;  %v844_v56 = vld [vmem:[#allocation2 + $0x238] sm:$0xff] }
 0x2a3   : > { %v8594_v46 = vadd.f32 %v2090_v23, %v2081_v31 }
 0x2a4   : > { %v1266_v3 = vpop.f32.mrf.mxu3 }
 0x2a5   : > { %v1267_v63 = vadd.f32 %v1266_v3, %v8531_v53 }
 0x2a6   : > { %v1905_v17 = vpop.f32.mrf.mxu1  ;;  %1101 = vmatmul.f32.gmra.mxu2 %v849_v12  ;;  %1737 = vmatmul.f32.gmra.mxu0 %v849_v12 }
 0x2a7   : > { %v1454_v10 = vmul.f32 %v8477_v30, %v1267_v63  ;;  %v1906_v16 = vadd.f32 %v1905_v17, %v8537_v45  ;;  %v8618_v45 = vpop.f32.mrf.mxu2  ;;  %v8636_v58 = vpop.f32.mrf.mxu0  ;;  %v851_v63 = vld [vmem:[#allocation2 + $0x270] sm:$0xff] }
 0x2a9   : > { %v8608_v32 = vadd.f32 %v1454_v10, %v1445_v22  ;;  %v2100_v53 = vmul.f32 %v8598_v24, %v1906_v16  ;;  %1316 = vmatmul.f32.gmra.mxu3 %v838_v7  ;;  %1952 = vmatmul.f32.gmra.mxu1 %v838_v7  ;;  %v846_v10 = vld [vmem:[#allocation2 + $0x248] sm:$0xff] }
 0x2ab   : > { %v8612_v38 = vadd.f32 %v2100_v53, %v8474_v33 }
 0x2ac   : > { %v1269_v35 = vpop.f32.mrf.mxu3 }
 0x2ad   : > { %v1270_v30 = vadd.f32 %v1269_v35, %v8548_v0  ;;  %v853_v35 = vld [vmem:[#allocation2 + $0x280] sm:$0xff] }
 0x2ae   : > { %v1908_v21 = vpop.f32.mrf.mxu1  ;;  %1104 = vmatmul.f32.gmra.mxu2 %v851_v63  ;;  %1740 = vmatmul.f32.gmra.mxu0 %v851_v63 }
 0x2af   : > { %v1464_v5 = vmul.f32 %v8615_v18, %v1270_v30  ;;  %v1909_v2 = vadd.f32 %v1908_v21, %v8554_v48  ;;  %v8632_v50 = vpop.f32.mrf.mxu2  ;;  %v8656_v6 = vpop.f32.mrf.mxu0 }
 0x2b1   : > { %v8625_v26 = vadd.f32 %v1464_v5, %v8489_v55  ;;  %v2101_v33 = vmul.f32 %v8598_v24, %v1909_v2  ;;  %1319 = vmatmul.f32.gmra.mxu3 %v840_v13  ;;  %1955 = vmatmul.f32.gmra.mxu1 %v840_v13  ;;  %v848_v5 = vld [vmem:[#allocation2 + $0x258] sm:$0xff] }
 0x2b3   : > { %v8629_v0 = vadd.f32 %v2101_v33, %v8492_v42  ;;  %v2246_v42 = vld [vmem:[%s11663_s3 + $0x18] sm:$0xff] }
 0x2b4   : > { %v1272_v47 = vpop.f32.mrf.mxu3  ;;  %2293 = vmatpush.msrb.mxu2 %v2246_v42 }
 0x2b5   : > { %v1273_v19 = vadd.f32 %v1272_v47, %v8565_v34  ;;  %v2244_v34 = vld [vmem:[%s11663_s3 + $0x8] sm:$0xff]  ;;  %v855_v47 = vld [vmem:[#allocation2 + $0x290] sm:$0xff] }
 0x2b6   : > { %v1911_v48 = vpop.f32.mrf.mxu1  ;;  %2358 = vmatpush.msrb.mxu3 %v2244_v34  ;;  %1107 = vmatmul.f32.gmra.mxu2 %v853_v35  ;;  %v857_v34 = vld [vmem:[#allocation2 + $0x2a0] sm:$0xff] }
 0x2b7   : > { %v1465_v55 = vmul.f32 %v8615_v18, %v1273_v19  ;;  %v1912_v60 = vadd.f32 %v1911_v48, %v8571_v49  ;;  %v8652_v9 = vpop.f32.mrf.mxu2  ;;  %v8670_v53 = vpop.f32.mrf.mxu0  ;;  %1743 = vmatmul.f32.gmra.mxu0 %v853_v35  ;;  %v8739_v35 = vperm.slane %v8467_v39, 3 }
 0x2b9   : > { %v8639_v8 = vadd.f32 %v1465_v55, %v8506_v37  ;;  %v2102_v14 = vmul.f32 %v8598_v24, %v1912_v60  ;;  %1322 = vmatmul.f32.gmra.mxu3 %v842_v27  ;;  %1958 = vmatmul.f32.gmra.mxu1 %v842_v27  ;;  %v850_v55 = vld [vmem:[#allocation2 + $0x268] sm:$0xff] }
 0x2bb   : > { %v8649_v49 = vadd.f32 %v2102_v14, %v8509_v59 }
 0x2bc   : > { %v1275_v37 = vpop.f32.mrf.mxu3 }
 0x2bd   : > { %v1276_v57 = vadd.f32 %v1275_v37, %v8582_v1 }
 0x2be   : > { %v1914_v54 = vpop.f32.mrf.mxu1  ;;  %1110 = vmatmul.f32.gmra.mxu2 %v855_v47 }
 0x2bf   : > { %v1466_v31 = vmul.f32 %v8615_v18, %v1276_v57  ;;  %v1915_v23 = vadd.f32 %v1914_v54, %v8588_v40  ;;  %v8666_v22 = vpop.f32.mrf.mxu2  ;;  %v8684_v33 = vpop.f32.mrf.mxu0  ;;  %1746 = vmatmul.f32.gmra.mxu0 %v855_v47  ;;  %v852_v54 = vld [vmem:[#allocation2 + $0x278] sm:$0xff] }
 0x2c1   : > { %v8659_v3 = vadd.f32 %v1466_v31, %v8523_v52  ;;  %v2103_v59 = vmul.f32 %v8598_v24, %v1915_v23  ;;  %1325 = vmatmul.f32.gmra.mxu3 %v844_v56  ;;  %1961 = vmatmul.f32.gmra.mxu1 %v844_v56 }
 0x2c3   : > { %v8663_v1 = vadd.f32 %v2103_v59, %v8526_v4  ;;  %v859_v59 = vld [vmem:[#allocation2 + $0x2b0] sm:$0xff] }
 0x2c4   : > { %v1278_v17 = vpop.f32.mrf.mxu3 }
 0x2c5   : > { %v1279_v7 = vadd.f32 %v1278_v17, %v8600_v44 }
 0x2c6   : > { %v1917_v40 = vpop.f32.mrf.mxu1  ;;  %1113 = vmatmul.f32.gmra.mxu2 %v857_v34 }
 0x2c7   : > { %v1467_v52 = vmul.f32 %v8615_v18, %v1279_v7  ;;  %v1918_v16 = vadd.f32 %v1917_v40, %v8606_v15  ;;  %v8680_v13 = vpop.f32.mrf.mxu2  ;;  %v8698_v14 = vpop.f32.mrf.mxu0  ;;  %1749 = vmatmul.f32.gmra.mxu0 %v857_v34  ;;  %v854_v40 = vld [vmem:[#allocation2 + $0x288] sm:$0xff] }
 0x2c9   : > { %v8673_v43 = vadd.f32 %v1467_v52, %v8540_v61  ;;  %v2104_v4 = vmul.f32 %v8598_v24, %v1918_v16  ;;  %1328 = vmatmul.f32.gmra.mxu3 %v846_v10  ;;  %1964 = vmatmul.f32.gmra.mxu1 %v846_v10 }
 0x2cb   : > { %v8677_v44 = vadd.f32 %v2104_v4, %v8543_v25 }
 0x2cc   : > { %v1281_v30 = vpop.f32.mrf.mxu3 }
 0x2cd   : > { %v1282_v21 = vadd.f32 %v1281_v30, %v8618_v45 }
 0x2ce   : > { %v1920_v15 = vpop.f32.mrf.mxu1  ;;  %1116 = vmatmul.f32.gmra.mxu2 %v859_v59 }
 0x2cf   : > { %v1468_v61 = vmul.f32 %v8615_v18, %v1282_v21  ;;  %v1921_v2 = vadd.f32 %v1920_v15, %v8622_v36  ;;  %v8694_v27 = vpop.f32.mrf.mxu2  ;;  %v8712_v31 = vpop.f32.mrf.mxu0  ;;  %1752 = vmatmul.f32.gmra.mxu0 %v859_v59  ;;  %v856_v21 = vld [vmem:[#allocation2 + $0x298] sm:$0xff] }
 0x2d1   : > { %v8687_v51 = vadd.f32 %v1468_v61, %v8557_v62  ;;  %v2105_v25 = vmul.f32 %v8598_v24, %v1921_v2  ;;  %1331 = vmatmul.f32.gmra.mxu3 %v848_v5  ;;  %1967 = vmatmul.f32.gmra.mxu1 %v848_v5 }
 0x2d3   : > { %v8691_v45 = vadd.f32 %v2105_v25, %v8560_v29  ;;  %v863_v25 = vld [vmem:[#allocation2 + $0x2d0] sm:$0xff] }
 0x2d4   : > { %v1284_v19 = vpop.f32.mrf.mxu3 }
 0x2d5   : > { %v1285_v48 = vadd.f32 %v1284_v19, %v8632_v50 }
 0x2d6   : > { %v1923_v36 = vpop.f32.mrf.mxu1 }
 0x2d7   : > { %v1469_v62 = vmul.f32 %v8615_v18, %v1285_v48  ;;  %v1924_v60 = vadd.f32 %v1923_v36, %v8636_v58  ;;  %v8708_v57 = vpop.f32.mrf.mxu2  ;;  %v8729_v52 = vpop.f32.mrf.mxu0  ;;  %v858_v36 = vld [vmem:[#allocation2 + $0x2a8] sm:$0xff] }
 0x2d9   : > { %v8701_v42 = vadd.f32 %v1469_v62, %v8574_v41  ;;  %v2106_v29 = vmul.f32 %v8598_v24, %v1924_v60  ;;  %1334 = vmatmul.f32.gmra.mxu3 %v850_v55  ;;  %1970 = vmatmul.f32.gmra.mxu1 %v850_v55 }
 0x2db   : > { %v8705_v50 = vadd.f32 %v2106_v29, %v8577_v20  ;;  %v865_v29 = vld [vmem:[#allocation2 + $0x2e0] sm:$0xff] }
 0x2dc   : > { %v1287_v12 = vpop.f32.mrf.mxu3 }
 0x2dd   : > { %v1288_v37 = vadd.f32 %v1287_v12, %v8652_v9 }
 0x2de   : > { %v1926_v58 = vpop.f32.mrf.mxu1 }
 0x2df   : > { %v1470_v41 = vmul.f32 %v8615_v18, %v1288_v37  ;;  %v1927_v56 = vadd.f32 %v1926_v58, %v8656_v6  ;;  %v8723_v6 = vperm.slane %v8448_v11, 3  ;;  %v8725_v7 = vpop.f32.mrf.mxu2  ;;  %v8746_v61 = vpop.f32.mrf.mxu0  ;;  %v860_v58 = vld [vmem:[#allocation2 + $0x2b8] sm:$0xff] }
 0x2e1   : > { %v8715_v23 = vadd.f32 %v1470_v41, %v8591_v28  ;;  %v2107_v20 = vmul.f32 %v8598_v24, %v1927_v56  ;;  %1337 = vmatmul.f32.gmra.mxu3 %v852_v54  ;;  %1973 = vmatmul.f32.gmra.mxu1 %v852_v54 }
 0x2e3   : > { %v8719_v9 = vadd.f32 %v2107_v20, %v8594_v46  ;;  %v867_v20 = vld [vmem:[#allocation2 + $0x2f0] sm:$0xff] }
 0x2e4   : > { %v1290_v63 = vpop.f32.mrf.mxu3 }
 0x2e5   : > { %v1291_v17 = vadd.f32 %v1290_v63, %v8666_v22  ;;  %v861_v22 = vld [vmem:[#allocation2 + $0x2c0] sm:$0xff] }
 0x2e6   : > { %v1929_v28 = vpop.f32.mrf.mxu1  ;;  %1119 = vmatmul.f32.gmra.mxu2 %v861_v22  ;;  %1755 = vmatmul.f32.gmra.mxu0 %v861_v22 }
 0x2e7   : > { %v1471_v24 = vmul.f32 %v8615_v18, %v1291_v17  ;;  %v1930_v10 = vadd.f32 %v1929_v28, %v8670_v53  ;;  %v8742_v30 = vpop.f32.mrf.mxu2  ;;  %v8760_v62 = vpop.f32.mrf.mxu0  ;;  %v862_v28 = vld [vmem:[#allocation2 + $0x2c8] sm:$0xff] }
 0x2e9   : > { %v8732_v46 = vadd.f32 %v1471_v24, %v8608_v32  ;;  %v2117_v16 = vmul.f32 %v8723_v6, %v1930_v10  ;;  %1340 = vmatmul.f32.gmra.mxu3 %v854_v40  ;;  %1976 = vmatmul.f32.gmra.mxu1 %v854_v40 }
 0x2eb   : > { %v8736_v4 = vadd.f32 %v2117_v16, %v8612_v38  ;;  %v869_v16 = vld [vmem:[#allocation2 + $0x300] sm:$0xff] }
 0x2ec   : > { %v1293_v18 = vpop.f32.mrf.mxu3 }
 0x2ed   : > { %v1294_v53 = vadd.f32 %v1293_v18, %v8680_v13 }
 0x2ee   : > { %v1932_v32 = vpop.f32.mrf.mxu1  ;;  %1122 = vmatmul.f32.gmra.mxu2 %v863_v25  ;;  %1758 = vmatmul.f32.gmra.mxu0 %v863_v25 }
 0x2ef   : > { %v1481_v15 = vmul.f32 %v8739_v35, %v1294_v53  ;;  %v1933_v5 = vadd.f32 %v1932_v32, %v8684_v33  ;;  %v8756_v48 = vpop.f32.mrf.mxu2  ;;  %v8774_v41 = vpop.f32.mrf.mxu0  ;;  %v864_v32 = vld [vmem:[#allocation2 + $0x2d8] sm:$0xff] }
 0x2f1   : > { %v8749_v38 = vadd.f32 %v1481_v15, %v8625_v26  ;;  %v2118_v2 = vmul.f32 %v8723_v6, %v1933_v5  ;;  %1343 = vmatmul.f32.gmra.mxu3 %v856_v21  ;;  %1979 = vmatmul.f32.gmra.mxu1 %v856_v21 }
 0x2f3   : > { %v8753_v13 = vadd.f32 %v2118_v2, %v8629_v0  ;;  %v871_v2 = vld [vmem:[#allocation2 + $0x310] sm:$0xff] }
 0x2f4   : > { %v1296_v47 = vpop.f32.mrf.mxu3 }
 0x2f5   : > { %v1297_v19 = vadd.f32 %v1296_v47, %v8694_v27 }
 0x2f6   : > { %v1935_v33 = vpop.f32.mrf.mxu1  ;;  %1125 = vmatmul.f32.gmra.mxu2 %v865_v29  ;;  %1761 = vmatmul.f32.gmra.mxu0 %v865_v29 }
 0x2f7   : > { %v1482_v26 = vmul.f32 %v8739_v35, %v1297_v19  ;;  %v1936_v55 = vadd.f32 %v1935_v33, %v8698_v14  ;;  %v8770_v37 = vpop.f32.mrf.mxu2  ;;  %v8788_v24 = vpop.f32.mrf.mxu0  ;;  %v866_v33 = vld [vmem:[#allocation2 + $0x2e8] sm:$0xff] }
 0x2f9   : > { %v8763_v60 = vadd.f32 %v1482_v26, %v8639_v8  ;;  %v2119_v0 = vmul.f32 %v8723_v6, %v1936_v55  ;;  %1346 = vmatmul.f32.gmra.mxu3 %v858_v36  ;;  %1982 = vmatmul.f32.gmra.mxu1 %v858_v36 }
 0x2fb   : > { %v8767_v27 = vadd.f32 %v2119_v0, %v8649_v49  ;;  %v873_v0 = vld [vmem:[#allocation2 + $0x320] sm:$0xff] }
 0x2fc   : > { %v1299_v34 = vpop.f32.mrf.mxu3 }
 0x2fd   : > { %v1300_v12 = vadd.f32 %v1299_v34, %v8708_v57 }
 0x2fe   : > { %v1938_v14 = vpop.f32.mrf.mxu1  ;;  %1128 = vmatmul.f32.gmra.mxu2 %v867_v20  ;;  %1764 = vmatmul.f32.gmra.mxu0 %v867_v20 }
 0x2ff   : > { %v1483_v8 = vmul.f32 %v8739_v35, %v1300_v12  ;;  %v1939_v54 = vadd.f32 %v1938_v14, %v8712_v31  ;;  %v8784_v17 = vpop.f32.mrf.mxu2  ;;  %v8802_v15 = vpop.f32.mrf.mxu0  ;;  %v868_v14 = vld [vmem:[#allocation2 + $0x2f8] sm:$0xff] }
 0x301   : > { %v8777_v56 = vadd.f32 %v1483_v8, %v8659_v3  ;;  %v2120_v49 = vmul.f32 %v8723_v6, %v1939_v54  ;;  %1349 = vmatmul.f32.gmra.mxu3 %v860_v58  ;;  %1985 = vmatmul.f32.gmra.mxu1 %v860_v58 }
 0x303   : > { %v8781_v57 = vadd.f32 %v2120_v49, %v8663_v1  ;;  %v875_v49 = vld [vmem:[#allocation2 + $0x330] sm:$0xff] }
 0x304   : > { %v1302_v59 = vpop.f32.mrf.mxu3 }
 0x305   : > { %v1303_v63 = vadd.f32 %v1302_v59, %v8725_v7 }
 0x306   : > { %v1941_v31 = vpop.f32.mrf.mxu1  ;;  %1131 = vmatmul.f32.gmra.mxu2 %v869_v16  ;;  %1767 = vmatmul.f32.gmra.mxu0 %v869_v16 }
 0x307   : > { %v1484_v3 = vmul.f32 %v8739_v35, %v1303_v63  ;;  %v1942_v40 = vadd.f32 %v1941_v31, %v8729_v52  ;;  %v8798_v53 = vpop.f32.mrf.mxu2  ;;  %v8816_v26 = vpop.f32.mrf.mxu0  ;;  %v870_v31 = vld [vmem:[#allocation2 + $0x308] sm:$0xff] }
 0x309   : > { %v8791_v10 = vadd.f32 %v1484_v3, %v8673_v43  ;;  %v2121_v1 = vmul.f32 %v8723_v6, %v1942_v40  ;;  %1352 = vmatmul.f32.gmra.mxu3 %v862_v28  ;;  %1988 = vmatmul.f32.gmra.mxu1 %v862_v28 }
 0x30b   : > { %v8795_v7 = vadd.f32 %v2121_v1, %v8677_v44  ;;  %v8857_v1 = vperm.slane %v8467_v39, 4 }
 0x30c   : > { %v1305_v22 = vpop.f32.mrf.mxu3 }
 0x30d   : > { %v1306_v18 = vadd.f32 %v1305_v22, %v8742_v30  ;;  %v872_v22 = vld [vmem:[#allocation2 + $0x318] sm:$0xff] }
 0x30e   : > { %v1944_v52 = vpop.f32.mrf.mxu1  ;;  %1134 = vmatmul.f32.gmra.mxu2 %v871_v2  ;;  %1770 = vmatmul.f32.gmra.mxu0 %v871_v2 }
 0x30f   : > { %v1485_v43 = vmul.f32 %v8739_v35, %v1306_v18  ;;  %v1945_v21 = vadd.f32 %v1944_v52, %v8746_v61  ;;  %v8812_v19 = vpop.f32.mrf.mxu2  ;;  %v8830_v8 = vpop.f32.mrf.mxu0 }
 0x311   : > { %v8805_v5 = vadd.f32 %v1485_v43, %v8687_v51  ;;  %v2122_v44 = vmul.f32 %v8723_v6, %v1945_v21  ;;  %1355 = vmatmul.f32.gmra.mxu3 %v864_v32  ;;  %1991 = vmatmul.f32.gmra.mxu1 %v864_v32  ;;  %v879_v43 = vld [vmem:[#allocation2 + $0x350] sm:$0xff] }
 0x313   : > { %v8809_v30 = vadd.f32 %v2122_v44, %v8691_v45 }
 0x314   : > { %v1308_v25 = vpop.f32.mrf.mxu3 }
 0x315   : > { %v1309_v47 = vadd.f32 %v1308_v25, %v8756_v48  ;;  %v874_v25 = vld [vmem:[#allocation2 + $0x328] sm:$0xff] }
 0x316   : > { %v1947_v61 = vpop.f32.mrf.mxu1  ;;  %1137 = vmatmul.f32.gmra.mxu2 %v873_v0  ;;  %1773 = vmatmul.f32.gmra.mxu0 %v873_v0 }
 0x317   : > { %v1486_v51 = vmul.f32 %v8739_v35, %v1309_v47  ;;  %v1948_v36 = vadd.f32 %v1947_v61, %v8760_v62  ;;  %v8826_v12 = vpop.f32.mrf.mxu2  ;;  %v8847_v3 = vpop.f32.mrf.mxu0 }
 0x319   : > { %v8819_v55 = vadd.f32 %v1486_v51, %v8701_v42  ;;  %v2123_v45 = vmul.f32 %v8723_v6, %v1948_v36  ;;  %1358 = vmatmul.f32.gmra.mxu3 %v866_v33  ;;  %1994 = vmatmul.f32.gmra.mxu1 %v866_v33  ;;  %v881_v51 = vld [vmem:[#allocation2 + $0x360] sm:$0xff] }
 0x31b   : > { %v8823_v48 = vadd.f32 %v2123_v45, %v8705_v50 }
 0x31c   : > { %v1311_v29 = vpop.f32.mrf.mxu3 }
 0x31d   : > { %v1312_v34 = vadd.f32 %v1311_v29, %v8770_v37 }
 0x31e   : > { %v1950_v62 = vpop.f32.mrf.mxu1  ;;  %1140 = vmatmul.f32.gmra.mxu2 %v875_v49  ;;  %1776 = vmatmul.f32.gmra.mxu0 %v875_v49 }
 0x31f   : > { %v1487_v42 = vmul.f32 %v8739_v35, %v1312_v34  ;;  %v1951_v58 = vadd.f32 %v1950_v62, %v8774_v41  ;;  %v8841_v41 = vperm.slane %v8448_v11, 4  ;;  %v8843_v63 = vpop.f32.mrf.mxu2  ;;  %v8864_v32 = vpop.f32.mrf.mxu0 }
 0x321   : > { %v8833_v54 = vadd.f32 %v1487_v42, %v8715_v23  ;;  %v2124_v50 = vmul.f32 %v8723_v6, %v1951_v58  ;;  %1361 = vmatmul.f32.gmra.mxu3 %v868_v14  ;;  %1997 = vmatmul.f32.gmra.mxu1 %v868_v14  ;;  %v883_v42 = vld [vmem:[#allocation2 + $0x370] sm:$0xff] }
 0x323   : > { %v8837_v37 = vadd.f32 %v2124_v50, %v8719_v9 }
 0x324   : > { %v1314_v20 = vpop.f32.mrf.mxu3 }
 0x325   : > { %v1315_v59 = vadd.f32 %v1314_v20, %v8784_v17  ;;  %v877_v17 = vld [vmem:[#allocation2 + $0x340] sm:$0xff] }
 0x326   : > { %v1953_v23 = vpop.f32.mrf.mxu1  ;;  %1143 = vmatmul.f32.gmra.mxu2 %v877_v17  ;;  %1779 = vmatmul.f32.gmra.mxu0 %v877_v17 }
 0x327   : > { %v1488_v6 = vmul.f32 %v8739_v35, %v1315_v59  ;;  %v1954_v28 = vadd.f32 %v1953_v23, %v8788_v24  ;;  %v8860_v16 = vpop.f32.mrf.mxu2  ;;  %v8878_v61 = vpop.f32.mrf.mxu0 }
 0x329   : > { %v8850_v9 = vadd.f32 %v1488_v6, %v8732_v46  ;;  %v2134_v40 = vmul.f32 %v8841_v41, %v1954_v28  ;;  %1364 = vmatmul.f32.gmra.mxu3 %v870_v31  ;;  %2000 = vmatmul.f32.gmra.mxu1 %v870_v31  ;;  %v885_v6 = vld [vmem:[#allocation2 + $0x380] sm:$0xff] }
 0x32b   : > { %v8854_v11 = vadd.f32 %v2134_v40, %v8736_v4 }
 0x32c   : > { %v1317_v35 = vpop.f32.mrf.mxu3 }
 0x32d   : > { %v1318_v24 = vadd.f32 %v1317_v35, %v8798_v53 }
 0x32e   : > { %v1956_v46 = vpop.f32.mrf.mxu1  ;;  %1146 = vmatmul.f32.gmra.mxu2 %v879_v43  ;;  %1782 = vmatmul.f32.gmra.mxu0 %v879_v43 }
 0x32f   : > { %v1498_v18 = vmul.f32 %v8857_v1, %v1318_v24  ;;  %v1957_v52 = vadd.f32 %v1956_v46, %v8802_v15  ;;  %v8874_v2 = vpop.f32.mrf.mxu2  ;;  %v8890_v62 = vpop.f32.mrf.mxu0 }
 0x331   : > { %v8867_v4 = vadd.f32 %v1498_v18, %v8749_v38  ;;  %v2135_v39 = vmul.f32 %v8841_v41, %v1957_v52  ;;  %1367 = vmatmul.f32.gmra.mxu3 %v872_v22  ;;  %2003 = vmatmul.f32.gmra.mxu1 %v872_v22  ;;  %v887_v18 = vld [vmem:[#allocation2 + $0x390] sm:$0xff] }
 0x333   : > { %v8871_v53 = vadd.f32 %v2135_v39, %v8753_v13 }
 0x334   : > { %v1320_v21 = vpop.f32.mrf.mxu3 }
 0x335   : > { %v1321_v44 = vadd.f32 %v1320_v21, %v8812_v19 }
 0x336   : > { %v1959_v15 = vpop.f32.mrf.mxu1  ;;  %1149 = vmatmul.f32.gmra.mxu2 %v881_v51  ;;  %1785 = vmatmul.f32.gmra.mxu0 %v881_v51 }
 0x337   : > { %v1499_v38 = vmul.f32 %v8857_v1, %v1321_v44  ;;  %v1960_v47 = vadd.f32 %v1959_v15, %v8816_v26  ;;  %v876_v26 = vld [vmem:[#allocation2 + $0x338] sm:$0xff]  ;;  %v1102_v29 = vpop.f32.mrf.mxu2  ;;  %v8902_v23 = vpop.f32.mrf.mxu0 }
 0x339   : > { %v8881_v33 = vadd.f32 %v1499_v38, %v8763_v60  ;;  %v2136_v13 = vmul.f32 %v8841_v41, %v1960_v47  ;;  %1370 = vmatmul.f32.gmra.mxu3 %v874_v25  ;;  %2006 = vmatmul.f32.gmra.mxu1 %v874_v25  ;;  %v889_v38 = vld [vmem:[#allocation2 + $0x3a0] sm:$0xff] }
 0x33b   : > { %v8885_v19 = vadd.f32 %v2136_v13, %v8767_v27 }
 0x33c   : > { %v1323_v36 = vpop.f32.mrf.mxu3 }
 0x33d   : > { %v1324_v45 = vadd.f32 %v1323_v36, %v8826_v12  ;;  %v884_v36 = vld [vmem:[#allocation2 + $0x378] sm:$0xff] }
 0x33e   : > { %v1962_v0 = vpop.f32.mrf.mxu1  ;;  %1152 = vmatmul.f32.gmra.mxu2 %v883_v42  ;;  %1788 = vmatmul.f32.gmra.mxu0 %v883_v42 }
 0x33f   : > { %v1500_v34 = vmul.f32 %v8857_v1, %v1324_v45  ;;  %v1963_v60 = vadd.f32 %v1962_v0, %v8830_v8  ;;  %v878_v8 = vld [vmem:[#allocation2 + $0x348] sm:$0xff]  ;;  %v1105_v20 = vpop.f32.mrf.mxu2  ;;  %v8916_v46 = vpop.f32.mrf.mxu0 }
 0x341   : > { %v8893_v14 = vadd.f32 %v1500_v34, %v8777_v56  ;;  %v2137_v27 = vmul.f32 %v8841_v41, %v1963_v60  ;;  %1373 = vmatmul.f32.gmra.mxu3 %v876_v26  ;;  %2009 = vmatmul.f32.gmra.mxu1 %v876_v26  ;;  %v891_v34 = vld [vmem:[#allocation2 + $0x3b0] sm:$0xff] }
 0x343   : > { %v8897_v58 = vadd.f32 %v2137_v27, %v8781_v57 }
 0x344   : > { %v1326_v12 = vpop.f32.mrf.mxu3 }
 0x345   : > { %v1327_v50 = vadd.f32 %v1326_v12, %v8843_v63 }
 0x346   : > { %v1965_v49 = vpop.f32.mrf.mxu1  ;;  %1155 = vmatmul.f32.gmra.mxu2 %v885_v6  ;;  %1791 = vmatmul.f32.gmra.mxu0 %v885_v6 }
 0x347   : > { %v1501_v59 = vmul.f32 %v8857_v1, %v1327_v50  ;;  %v1966_v56 = vadd.f32 %v1965_v49, %v8847_v3  ;;  %v880_v3 = vld [vmem:[#allocation2 + $0x358] sm:$0xff]  ;;  %v8912_v35 = vpop.f32.mrf.mxu2  ;;  %v8930_v15 = vpop.f32.mrf.mxu0 }
 0x349   : > { %v8905_v31 = vadd.f32 %v1501_v59, %v8791_v10  ;;  %v2138_v57 = vmul.f32 %v8841_v41, %v1966_v56  ;;  %1376 = vmatmul.f32.gmra.mxu3 %v878_v8  ;;  %2012 = vmatmul.f32.gmra.mxu1 %v878_v8  ;;  %v893_v59 = vld [vmem:[#allocation2 + $0x3c0] sm:$0xff] }
 0x34b   : > { %v8909_v28 = vadd.f32 %v2138_v57, %v8795_v7  ;;  %v8976_v57 = vld [vmem:[%s11665_s5] sm:$0xff] }
 0x34c   : > { %v1329_v63 = vpop.f32.mrf.mxu3 }
 0x34d   : > { %v1330_v40 = vadd.f32 %v1329_v63, %v8860_v16  ;;  %v888_v63 = vld [vmem:[#allocation2 + $0x398] sm:$0xff] }
 0x34e   : > { %v1968_v17 = vpop.f32.mrf.mxu1  ;;  %1158 = vmatmul.f32.gmra.mxu2 %v887_v18  ;;  %1794 = vmatmul.f32.gmra.mxu0 %v887_v18 }
 0x34f   : > { %v1502_v10 = vmul.f32 %v8857_v1, %v1330_v40  ;;  %v1969_v24 = vadd.f32 %v1968_v17, %v8864_v32  ;;  %v882_v32 = vld [vmem:[#allocation2 + $0x368] sm:$0xff]  ;;  %v8926_v21 = vpop.f32.mrf.mxu2  ;;  %v8943_v0 = vpop.f32.mrf.mxu0 }
 0x351   : > { %v8919_v22 = vadd.f32 %v1502_v10, %v8805_v5  ;;  %v2139_v7 = vmul.f32 %v8841_v41, %v1969_v24  ;;  %1379 = vmatmul.f32.gmra.mxu3 %v880_v3  ;;  %2015 = vmatmul.f32.gmra.mxu1 %v880_v3 }
 0x353   : > { %v8923_v16 = vadd.f32 %v2139_v7, %v8809_v30  ;;  %v895_v7 = vld [vmem:[#allocation2 + $0x3d0] sm:$0xff] }
 0x354   : > { %v1332_v52 = vpop.f32.mrf.mxu3 }
 0x355   : > { %v1333_v39 = vadd.f32 %v1332_v52, %v8874_v2 }
 0x356   : > { %v1971_v43 = vpop.f32.mrf.mxu1  ;;  %1161 = vmatmul.f32.gmra.mxu2 %v889_v38  ;;  %1797 = vmatmul.f32.gmra.mxu0 %v889_v38 }
 0x357   : > { %v1503_v5 = vmul.f32 %v8857_v1, %v1333_v39  ;;  %v1972_v44 = vadd.f32 %v1971_v43, %v8878_v61  ;;  %v8939_v61 = vpop.f32.mrf.mxu2 }
 0x359   : > { %v8933_v25 = vadd.f32 %v1503_v5, %v8819_v55  ;;  %v2140_v30 = vmul.f32 %v8841_v41, %v1972_v44  ;;  %1382 = vmatmul.f32.gmra.mxu3 %v882_v32  ;;  %2018 = vmatmul.f32.gmra.mxu1 %v882_v32 }
 0x35b   : > { %v8937_v2 = vadd.f32 %v2140_v30, %v8823_v48  ;;  %v897_v30 = vld [vmem:[#allocation2 + $0x3e0] sm:$0xff] }
 0x35c   : > { %v1335_v47 = vpop.f32.mrf.mxu3 }
 0x35d   : > { %v1336_v13 = vadd.f32 %v1335_v47, %v1102_v29 }
 0x35e   : > { %v1974_v51 = vpop.f32.mrf.mxu1  ;;  %1164 = vmatmul.f32.gmra.mxu2 %v891_v34  ;;  %1800 = vmatmul.f32.gmra.mxu0 %v891_v34 }
 0x35f   : > { %v1504_v45 = vmul.f32 %v8857_v1, %v1336_v13  ;;  %v1975_v55 = vadd.f32 %v1974_v51, %v8890_v62  ;;  %v8955_v62 = vld [vmem:[%s11665_s5 + $0x10] sm:$0xff]  ;;  %v8960_v12 = vpop.f32.mrf.mxu2 }
 0x361   : > { %v8946_v26 = vadd.f32 %v1504_v45, %v8833_v54  ;;  %v2141_v48 = vmul.f32 %v8841_v41, %v1975_v55  ;;  %1385 = vmatmul.f32.gmra.mxu3 %v884_v36  ;;  %2021 = vmatmul.f32.gmra.mxu1 %v884_v36  ;;  %v8958_v54 = vperm.slane %v8955_v62, 5  ;;  %v886_v41 = vld [vmem:[#allocation2 + $0x388] sm:$0xff] }
 0x363   : > { %v8950_v29 = vadd.f32 %v2141_v48, %v8837_v37  ;;  %v8964_v49 = vpop.f32.mrf.mxu0  ;;  %v899_v48 = vld [vmem:[#allocation2 + $0x3f0] sm:$0xff] }
 0x364   : > { %v1338_v60 = vpop.f32.mrf.mxu3 }
 0x365   : > { %v1339_v27 = vadd.f32 %v1338_v60, %v1105_v20 }
 0x366   : > { %v1977_v42 = vpop.f32.mrf.mxu1  ;;  %1167 = vmatmul.f32.gmra.mxu2 %v893_v59  ;;  %1803 = vmatmul.f32.gmra.mxu0 %v893_v59 }
 0x367   : > { %v1505_v50 = vmul.f32 %v8857_v1, %v1339_v27  ;;  %v1978_v37 = vadd.f32 %v1977_v42, %v8902_v23  ;;  %v8979_v1 = vperm.slane %v8976_v57, 5 }
 0x369   : > { %v8967_v8 = vadd.f32 %v1505_v50, %v8850_v9  ;;  %v2151_v20 = vmul.f32 %v8958_v54, %v1978_v37  ;;  %1388 = vmatmul.f32.gmra.mxu3 %v886_v41  ;;  %2024 = vmatmul.f32.gmra.mxu1 %v886_v41  ;;  %v1120_v40 = vpop.f32.mrf.mxu2 }
 0x36b   : > { %v8971_v56 = vadd.f32 %v2151_v20, %v8854_v11  ;;  %v8984_v3 = vpop.f32.mrf.mxu0  ;;  %v901_v20 = vld [vmem:[#allocation2 + $0x400] sm:$0xff] }
 0x36c   : > { %v1341_v9 = vpop.f32.mrf.mxu3 }
 0x36d   : > { %v1342_v23 = vadd.f32 %v1341_v9, %v8912_v35 }
 0x36e   : > { %v1980_v6 = vpop.f32.mrf.mxu1  ;;  %1170 = vmatmul.f32.gmra.mxu2 %v895_v7  ;;  %1806 = vmatmul.f32.gmra.mxu0 %v895_v7 }
 0x36f   : > { %v1515_v17 = vmul.f32 %v8979_v1, %v1342_v23  ;;  %v1981_v11 = vadd.f32 %v1980_v6, %v8916_v46  ;;  %v890_v46 = vld [vmem:[#allocation2 + $0x3a8] sm:$0xff]  ;;  %v896_v6 = vld [vmem:[#allocation2 + $0x3d8] sm:$0xff] }
 0x371   : > { %v8987_v10 = vadd.f32 %v1515_v17, %v8867_v4  ;;  %v2152_v24 = vmul.f32 %v8958_v54, %v1981_v11  ;;  %1391 = vmatmul.f32.gmra.mxu3 %v888_v63  ;;  %2027 = vmatmul.f32.gmra.mxu1 %v888_v63  ;;  %v1123_v43 = vpop.f32.mrf.mxu2 }
 0x373   : > { %v8991_v18 = vadd.f32 %v2152_v24, %v8871_v53  ;;  %v8996_v5 = vpop.f32.mrf.mxu0  ;;  %v903_v24 = vld [vmem:[#allocation2 + $0x410] sm:$0xff] }
 0x374   : > { %v1344_v35 = vpop.f32.mrf.mxu3 }
 0x375   : > { %v1345_v52 = vadd.f32 %v1344_v35, %v8926_v21 }
 0x376   : > { %v1983_v39 = vpop.f32.mrf.mxu1  ;;  %1173 = vmatmul.f32.gmra.mxu2 %v897_v30  ;;  %1809 = vmatmul.f32.gmra.mxu0 %v897_v30 }
 0x377   : > { %v1516_v32 = vmul.f32 %v8979_v1, %v1345_v52  ;;  %v1984_v4 = vadd.f32 %v1983_v39, %v8930_v15  ;;  %v892_v15 = vld [vmem:[#allocation2 + $0x3b8] sm:$0xff]  ;;  %v898_v39 = vld [vmem:[#allocation2 + $0x3e8] sm:$0xff] }
 0x379   : > { %v8999_v44 = vadd.f32 %v1516_v32, %v8881_v33  ;;  %v2153_v53 = vmul.f32 %v8958_v54, %v1984_v4  ;;  %1394 = vmatmul.f32.gmra.mxu3 %v890_v46  ;;  %2030 = vmatmul.f32.gmra.mxu1 %v890_v46  ;;  %v1126_v51 = vpop.f32.mrf.mxu2 }
 0x37b   : > { %v9003_v38 = vadd.f32 %v2153_v53, %v8885_v19  ;;  %v9008_v45 = vpop.f32.mrf.mxu0  ;;  %v905_v53 = vld [vmem:[#allocation2 + $0x420] sm:$0xff] }
 0x37c   : > { %v1347_v21 = vpop.f32.mrf.mxu3 }
 0x37d   : > { %v1348_v47 = vadd.f32 %v1347_v21, %v8939_v61 }
 0x37e   : > { %v1986_v13 = vpop.f32.mrf.mxu1  ;;  %1176 = vmatmul.f32.gmra.mxu2 %v899_v48  ;;  %1812 = vmatmul.f32.gmra.mxu0 %v899_v48 }
 0x37f   : > { %v1517_v36 = vmul.f32 %v8979_v1, %v1348_v47  ;;  %v1987_v33 = vadd.f32 %v1986_v13, %v8943_v0  ;;  %v894_v0 = vld [vmem:[#allocation2 + $0x3c8] sm:$0xff]  ;;  %v900_v13 = vld [vmem:[#allocation2 + $0x3f8] sm:$0xff] }
 0x381   : > { %v9011_v55 = vadd.f32 %v1517_v36, %v8893_v14  ;;  %v2154_v19 = vmul.f32 %v8958_v54, %v1987_v33  ;;  %1397 = vmatmul.f32.gmra.mxu3 %v892_v15  ;;  %2033 = vmatmul.f32.gmra.mxu1 %v892_v15  ;;  %v1129_v42 = vpop.f32.mrf.mxu2 }
 0x383   : > { %v9015_v34 = vadd.f32 %v2154_v19, %v8897_v58  ;;  %v9020_v50 = vpop.f32.mrf.mxu0  ;;  %v907_v19 = vld [vmem:[#allocation2 + $0x430] sm:$0xff] }
 0x384   : > { %v1350_v61 = vpop.f32.mrf.mxu3 }
 0x385   : > { %v1351_v60 = vadd.f32 %v1350_v61, %v8960_v12 }
 0x386   : > { %v1989_v27 = vpop.f32.mrf.mxu1  ;;  %1179 = vmatmul.f32.gmra.mxu2 %v901_v20  ;;  %1815 = vmatmul.f32.gmra.mxu0 %v901_v20 }
 0x387   : > { %v1518_v41 = vmul.f32 %v8979_v1, %v1351_v60  ;;  %v1990_v14 = vadd.f32 %v1989_v27, %v8964_v49 }
 0x389   : > { %v9023_v37 = vadd.f32 %v1518_v41, %v8905_v31  ;;  %v2155_v58 = vmul.f32 %v8958_v54, %v1990_v14  ;;  %1400 = vmatmul.f32.gmra.mxu3 %v894_v0  ;;  %2036 = vmatmul.f32.gmra.mxu1 %v894_v0  ;;  %v9029_v49 = vpop.f32.mrf.mxu2  ;;  %v904_v14 = vld [vmem:[#allocation2 + $0x418] sm:$0xff] }
 0x38b   : > { %v9027_v59 = vadd.f32 %v2155_v58, %v8909_v28  ;;  %v9033_v17 = vpop.f32.mrf.mxu0 }
 0x38c   : > { %v1353_v12 = vpop.f32.mrf.mxu3 }
 0x38d   : > { %v1354_v9 = vadd.f32 %v1353_v12, %v1120_v40 }
 0x38e   : > { %v1992_v23 = vpop.f32.mrf.mxu1  ;;  %1182 = vmatmul.f32.gmra.mxu2 %v903_v24  ;;  %1818 = vmatmul.f32.gmra.mxu0 %v903_v24  ;;  %v908_v24 = vld [vmem:[#allocation2 + $0x438] sm:$0xff] }
 0x38f   : > { %v1519_v63 = vmul.f32 %v8979_v1, %v1354_v9  ;;  %v1993_v31 = vadd.f32 %v1992_v23, %v8984_v3  ;;  %v906_v9 = vld [vmem:[#allocation2 + $0x428] sm:$0xff] }
 0x391   : > { %v9036_v11 = vadd.f32 %v1519_v63, %v8919_v22  ;;  %v2156_v28 = vmul.f32 %v8958_v54, %v1993_v31  ;;  %1403 = vmatmul.f32.gmra.mxu3 %v896_v6  ;;  %2039 = vmatmul.f32.gmra.mxu1 %v896_v6  ;;  %v9042_v3 = vpop.f32.mrf.mxu2  ;;  %v913_v63 = vld [vmem:[#allocation2 + $0x460] sm:$0xff] }
 0x393   : > { %11672 = vst [vmem:[#allocation5_spill] sm:$0xff] %v9036_v11  ;;  %v9040_v40 = vadd.f32 %v2156_v28, %v8923_v16  ;;  %v9046_v32 = vpop.f32.mrf.mxu0 }
 0x394   : > { %v1356_v7 = vpop.f32.mrf.mxu3 }
 0x395   : > { %11673 = vst [vmem:[#allocation6_spill] sm:$0xff] %v9040_v40  ;;  %v1357_v35 = vadd.f32 %v1356_v7, %v1123_v43 }
 0x396   : > { %v1995_v52 = vpop.f32.mrf.mxu1  ;;  %1185 = vmatmul.f32.gmra.mxu2 %v905_v53  ;;  %1821 = vmatmul.f32.gmra.mxu0 %v905_v53 }
 0x397   : > { %v1520_v46 = vmul.f32 %v8979_v1, %v1357_v35  ;;  %v1996_v22 = vadd.f32 %v1995_v52, %v8996_v5  ;;  %v915_v52 = vld [vmem:[#allocation2 + $0x470] sm:$0xff] }
 0x399   : > { %v9049_v4 = vadd.f32 %v1520_v46, %v8933_v25  ;;  %v2157_v16 = vmul.f32 %v8958_v54, %v1996_v22  ;;  %1406 = vmatmul.f32.gmra.mxu3 %v898_v39  ;;  %2042 = vmatmul.f32.gmra.mxu1 %v898_v39  ;;  %v9055_v5 = vpop.f32.mrf.mxu2  ;;  %v910_v22 = vld [vmem:[#allocation2 + $0x448] sm:$0xff] }
 0x39b   : > { %11674 = vst [vmem:[#allocation7_spill] sm:$0xff] %v9049_v4  ;;  %v9053_v43 = vadd.f32 %v2157_v16, %v8937_v2  ;;  %v9059_v36 = vpop.f32.mrf.mxu0 }
 0x39c   : > { %v1359_v30 = vpop.f32.mrf.mxu3 }
 0x39d   : > { %11675 = vst [vmem:[#allocation8_spill] sm:$0xff] %v9053_v43  ;;  %v1360_v21 = vadd.f32 %v1359_v30, %v1126_v51 }
 0x39e   : > { %v1998_v47 = vpop.f32.mrf.mxu1  ;;  %1188 = vmatmul.f32.gmra.mxu2 %v907_v19  ;;  %1824 = vmatmul.f32.gmra.mxu0 %v907_v19  ;;  %v914_v19 = vld [vmem:[#allocation2 + $0x468] sm:$0xff] }
 0x39f   : > { %v1521_v15 = vmul.f32 %v8979_v1, %v1360_v21  ;;  %v1999_v25 = vadd.f32 %v1998_v47, %v9008_v45  ;;  %v902_v45 = vld [vmem:[#allocation2 + $0x408] sm:$0xff]  ;;  %v912_v47 = vld [vmem:[#allocation2 + $0x458] sm:$0xff] }
 0x3a1   : > { %v9062_v33 = vadd.f32 %v1521_v15, %v8946_v26  ;;  %v2158_v2 = vmul.f32 %v8958_v54, %v1999_v25  ;;  %1409 = vmatmul.f32.gmra.mxu3 %v900_v13  ;;  %2045 = vmatmul.f32.gmra.mxu1 %v900_v13  ;;  %v9070_v27 = vpop.f32.mrf.mxu2 }
 0x3a3   : > { %11676 = vst [vmem:[#allocation9_spill] sm:$0xff] %v9062_v33  ;;  %v9066_v51 = vadd.f32 %v2158_v2, %v8950_v29  ;;  %v9073_v0 = vpop.f32.mrf.mxu0  ;;  %v909_v29 = vld [vmem:[#allocation2 + $0x440] sm:$0xff] }
 0x3a4   : > { %v1362_v48 = vpop.f32.mrf.mxu3 }
 0x3a5   : > { %11677 = vst [vmem:[#allocation10_spill] sm:$0xff] %v9066_v51  ;;  %v1363_v61 = vadd.f32 %v1362_v48, %v1129_v42 }
 0x3a6   : > { %v9068_v60 = vpop.f32.mrf.mxu1  ;;  %1191 = vmatmul.f32.gmra.mxu2 %v909_v29  ;;  %1827 = vmatmul.f32.gmra.mxu0 %v909_v29 }
 0x3a7   : > { %v1522_v26 = vmul.f32 %v8979_v1, %v1363_v61  ;;  %v911_v1 = vld [vmem:[#allocation2 + $0x450] sm:$0xff] }
 0x3a8   : > { %v2245_v61 = vld [vmem:[%s11663_s3 + $0x10] sm:$0xff] }
 0x3a9   : > { %v9076_v54 = vadd.f32 %v1522_v26, %v8967_v8  ;;  %1412 = vmatmul.f32.gmra.mxu3 %v902_v45  ;;  %2048 = vmatmul.f32.gmra.mxu1 %v902_v45  ;;  %v9082_v58 = vpop.f32.mrf.mxu2  ;;  %v2243_v45 = vld [vmem:[%s11663_s3] sm:$0xff] }
 0x3aa   : > { %2294 = vmatpush.msrb.mxu2 %v2245_v61  ;;  %2359 = vmatpush.msrb.mxu3 %v2243_v45 }
 0x3ab   : > { %11678 = vst [vmem:[#allocation11_spill] sm:$0xff] %v9076_v54  ;;  %v9084_v20 = vpop.f32.mrf.mxu0 }
 0x3ac   : > { %v9078_v41 = vpop.f32.mrf.mxu3 }
 0x3ae   : > { %v9080_v42 = vpop.f32.mrf.mxu1  ;;  %1194 = vmatmul.f32.gmra.mxu2 %v911_v1  ;;  %1830 = vmatmul.f32.gmra.mxu0 %v911_v1  ;;  %v916_v1 = vld [vmem:[#allocation2 + $0x478] sm:$0xff] }
 0x3b1   : > { %1415 = vmatmul.f32.gmra.mxu3 %v904_v14  ;;  %2051 = vmatmul.f32.gmra.mxu1 %v904_v14  ;;  %v9090_v23 = vpop.f32.mrf.mxu2 }
 0x3b2   : > { %11679 = vst [vmem:[#allocation12_spill] sm:$0xff] %v9090_v23 }
 0x3b3   : > { %v9092_v6 = vpop.f32.mrf.mxu0 }
 0x3b4   : > { %v9086_v8 = vpop.f32.mrf.mxu3  ;;  %11680 = vst [vmem:[#allocation13_spill] sm:$0xff] %v9092_v6 }
 0x3b6   : > { %v9088_v12 = vpop.f32.mrf.mxu1  ;;  %1197 = vmatmul.f32.gmra.mxu2 %v913_v63  ;;  %1833 = vmatmul.f32.gmra.mxu0 %v913_v63 }
 0x3b9   : > { %1418 = vmatmul.f32.gmra.mxu3 %v906_v9  ;;  %2054 = vmatmul.f32.gmra.mxu1 %v906_v9  ;;  %v9098_v7 = vpop.f32.mrf.mxu2 }
 0x3ba   : > { %11681 = vst [vmem:[#allocation14_spill] sm:$0xff] %v9098_v7 }
 0x3bb   : > { %v9100_v35 = vpop.f32.mrf.mxu0 }
 0x3bc   : > { %v9094_v31 = vpop.f32.mrf.mxu3  ;;  %11682 = vst [vmem:[#allocation15_spill] sm:$0xff] %v9100_v35 }
 0x3be   : > { %v9096_v28 = vpop.f32.mrf.mxu1  ;;  %1200 = vmatmul.f32.gmra.mxu2 %v915_v52  ;;  %1836 = vmatmul.f32.gmra.mxu0 %v915_v52 }
 0x3c1   : > { %1421 = vmatmul.f32.gmra.mxu3 %v908_v24  ;;  %2057 = vmatmul.f32.gmra.mxu1 %v908_v24  ;;  %v9106_v16 = vpop.f32.mrf.mxu2 }
 0x3c2   : > { %11683 = vst [vmem:[#allocation16_spill] sm:$0xff] %v9106_v16 }
 0x3c3   : > { %v1792_v53 = vpop.f32.mrf.mxu0 }
 0x3c4   : > { %v9102_v39 = vpop.f32.mrf.mxu3 }
 0x3c6   : > { %v9104_v46 = vpop.f32.mrf.mxu1 }
 0x3c9   : > { %1424 = vmatmul.f32.gmra.mxu3 %v910_v22  ;;  %2060 = vmatmul.f32.gmra.mxu1 %v910_v22  ;;  %v9112_v13 = vpop.f32.mrf.mxu2 }
 0x3cb   : > { %v9114_v15 = vpop.f32.mrf.mxu0 }
 0x3cc   : > { %v9108_v30 = vpop.f32.mrf.mxu3 }
 0x3ce   : > { %v9110_v21 = vpop.f32.mrf.mxu1 }
 0x3cf   : > { %11684 = vst [vmem:[#allocation17_spill] sm:$0xff] %v9110_v21 }
 0x3d1   : > { %1427 = vmatmul.f32.gmra.mxu3 %v912_v47  ;;  %2063 = vmatmul.f32.gmra.mxu1 %v912_v47  ;;  %v9120_v48 = vpop.f32.mrf.mxu2 }
 0x3d3   : > { %v9128_v26 = vpop.f32.mrf.mxu0 }
 0x3d4   : > { %v9116_v25 = vpop.f32.mrf.mxu3 }
 0x3d5   : > { %11685 = vst [vmem:[#allocation18_spill] sm:$0xff] %v9116_v25 }
 0x3d6   : > { %v9118_v2 = vpop.f32.mrf.mxu1 }
 0x3d7   : > { %11686 = vst [vmem:[#allocation19_spill] sm:$0xff] %v9118_v2 }
 0x3d9   : > { %1430 = vmatmul.f32.gmra.mxu3 %v914_v19  ;;  %2066 = vmatmul.f32.gmra.mxu1 %v914_v19  ;;  %v9134_v9 = vpop.f32.mrf.mxu2 }
 0x3db   : > { %v9138_v24 = vpop.f32.mrf.mxu0 }
 0x3dc   : > { %v9130_v29 = vpop.f32.mrf.mxu3 }
 0x3dd   : > { %11687 = vst [vmem:[#allocation20_spill] sm:$0xff] %v9130_v29 }
 0x3de   : > { %v9132_v14 = vpop.f32.mrf.mxu1 }
 0x3df   : > { %11688 = vst [vmem:[#allocation21_spill] sm:$0xff] %v9132_v14 }
 0x3e1   : > { %1433 = vmatmul.f32.gmra.mxu3 %v916_v1  ;;  %2069 = vmatmul.f32.gmra.mxu1 %v916_v1  ;;  %v9140_v22 = vpop.f32.mrf.mxu2 }
 0x3e3   : > { %v9142_v61 = vpop.f32.mrf.mxu0 }
 0x3e4   : > { %v9136_v63 = vpop.f32.mrf.mxu3 }
 0x3e5   : > { %11689 = vst [vmem:[#allocation22_spill] sm:$0xff] %v9136_v63 }
 0x3e6   : > { %v2025_v52 = vpop.f32.mrf.mxu1 }
 0x3e9   : > { %v9144_v54 = vpop.f32.mrf.mxu2 }
 0x3ea   : > { %11690 = vst [vmem:[#allocation23_spill] sm:$0xff] %v9144_v54 }
 0x3eb   : > { %v9148_v16 = vpop.f32.mrf.mxu0 }
 0x3ec   : > { %v1389_v47 = vpop.f32.mrf.mxu3  ;;  %11691 = vst [vmem:[#allocation24_spill] sm:$0xff] %v9148_v16  ;;  %v9183_v16 = vperm.slane %v8955_v62, 6 }
 0x3ee   : > { %v2028_v19 = vpop.f32.mrf.mxu1 }
 0x3ef   : > { %v2029_v21 = vadd.f32 %v2028_v19, %v9114_v15 }
 0x3f1   : > { %v9154_v63 = vpop.f32.mrf.mxu2 }
 0x3f2   : > { %11692 = vst [vmem:[#allocation25_spill] sm:$0xff] %v9154_v63 }
 0x3f3   : > { %v9156_v14 = vpop.f32.mrf.mxu0 }
 0x3f4   : > { %v1392_v45 = vpop.f32.mrf.mxu3  ;;  %11693 = vst [vmem:[#allocation26_spill] sm:$0xff] %v9156_v14 }
 0x3f6   : > { %v9146_v51 = vpop.f32.mrf.mxu1 }
 0x3f9   : > { %v9162_v29 = vpop.f32.mrf.mxu2 }
 0x3fa   : > { %11694 = vst [vmem:[#allocation27_spill] sm:$0xff] %v9162_v29  ;;  %v2002_v29 = vadd.f32 %v9068_v60, %v9020_v50  ;;  %v9197_v50 = vperm.slane %v8976_v57, 6 }
 0x3fb   : > { %v9166_v4 = vpop.f32.mrf.mxu0 }
 0x3fc   : > { %v9150_v33 = vpop.f32.mrf.mxu3  ;;  %11696 = vst [vmem:[#allocation29_spill] sm:$0xff] %v9166_v4 }
 0x3fe   : > { %v9152_v1 = vpop.f32.mrf.mxu1 }
 0x401   : > { %v9170_v6 = vpop.f32.mrf.mxu2 }
 0x402   : > { %11698 = vst [vmem:[#allocation31_spill] sm:$0xff] %v9170_v6  ;;  %v9186_v6 = vperm.slane %v8955_v62, 7  ;;  %v2005_v62 = vadd.f32 %v9080_v42, %v9033_v17 }
 0x403   : > { %v1816_v63 = vpop.f32.mrf.mxu0 }
 0x404   : > { %v9158_v35 = vpop.f32.mrf.mxu3 }
 0x406   : > { %v9160_v43 = vpop.f32.mrf.mxu1 }
 0x409   : > { %v1180_v23 = vpop.f32.mrf.mxu2 }
 0x40b   : > { %v1819_v4 = vpop.f32.mrf.mxu0 }
 0x40c   : > { %v9164_v7 = vpop.f32.mrf.mxu3 }
 0x40d   : > { %11695 = vst [vmem:[#allocation28_spill] sm:$0xff] %v9164_v7 }
 0x40e   : > { %v9168_v2 = vpop.f32.mrf.mxu1 }
 0x40f   : > { %11697 = vst [vmem:[#allocation30_spill] sm:$0xff] %v9168_v2  ;;  %v2026_v2 = vadd.f32 %v2025_v52, %v1792_v53 }
 0x411   : > { %v2185_v60 = vmul.f32 %v9186_v6, %v2026_v2  ;;  %v1183_v7 = vpop.f32.mrf.mxu2 }
 0x413   : > { %v1822_v42 = vpop.f32.mrf.mxu0 }
 0x414   : > { %v9172_v40 = vpop.f32.mrf.mxu3 }
 0x415   : > { %11699 = vst [vmem:[#allocation32_spill] sm:$0xff] %v9172_v40 }
 0x416   : > { %v9174_v25 = vpop.f32.mrf.mxu1 }
 0x417   : > { %11700 = vst [vmem:[#allocation33_spill] sm:$0xff] %v9174_v25  ;;  %v969_v25 = vld [vmem:[%s11665_s5 + $0x18] sm:$0xff] }
 0x418   : > { %v9200_v53 = vperm.slane %v969_v25, 0 }
 0x41c   : > { %v9176_v14 = vpop.f32.mrf.mxu3 }
 0x41d   : > { %11701 = vst [vmem:[#allocation34_spill] sm:$0xff] %v9176_v14  ;;  %v2168_v14 = vmul.f32 %v9183_v16, %v2002_v29  ;;  %v1390_v29 = vadd.f32 %v1389_v47, %v9112_v13  ;;  %v2186_v47 = vmul.f32 %v9186_v6, %v2029_v21 }
 0x41e   : > { %v9178_v11 = vpop.f32.mrf.mxu1 }
 0x41f   : > { %11702 = vst [vmem:[#allocation35_spill] sm:$0xff] %v9178_v11  ;;  %v1366_v11 = vadd.f32 %v9078_v41, %v9029_v49  ;;  %v2176_v54 = vadd.f32 %v2168_v14, %v8971_v56  ;;  %v966_v41 = vld [vmem:[%s11665_s5 + $0x8] sm:$0xff]  ;;  %v9218_v56 = vld [vmem:[%s11662_s2 + $0x3] ss:$0 sm:$0xff] }
 0x421   : > { %v1532_v25 = vmul.f32 %v9197_v50, %v1366_v11  ;;  %v2193_v2 = vadd.f32 %v2185_v60, %v2176_v54  ;;  %v1369_v11 = vadd.f32 %v9086_v8, %v9042_v3 }
 0x423   : > { %v1540_v15 = vadd.f32 %v1532_v25, %v8987_v10  ;;  %v9237_v10 = vld [vmem:[%s11662_s2 + $0x2] ss:$0 sm:$0xff] }
 0x424   : > { %v9192_v40 = vpop.f32.mrf.mxu3 }
 0x425   : > { %11703 = vst [vmem:[#allocation36_spill] sm:$0xff] %v9192_v40  ;;  %v9207_v40 = vperm.slane %v8976_v57, 7  ;;  %v2169_v57 = vmul.f32 %v9183_v16, %v2005_v62  ;;  %v2008_v62 = vadd.f32 %v9088_v12, %v9046_v32  ;;  %v1186_v32 = vpop.f32.mrf.mxu2 }
 0x426   : > { %v2049_v52 = vpop.f32.mrf.mxu1 }
 0x427   : > { %v2050_v49 = vadd.f32 %v2049_v52, %v1816_v63  ;;  %v1549_v13 = vmul.f32 %v9207_v40, %v1390_v29  ;;  %v9222_v63 = vperm.slane %v966_v41, 0  ;;  %v2177_v52 = vadd.f32 %v2169_v57, %v8991_v18 }
 0x428   : > { %v1393_v29 = vadd.f32 %v1392_v45, %v9120_v48  ;;  %v2032_v18 = vadd.f32 %v9146_v51, %v9128_v26  ;;  %v2170_v25 = vmul.f32 %v9183_v16, %v2008_v62  ;;  %v1372_v26 = vadd.f32 %v9094_v31, %v9055_v5 }
 0x429   : > { %v2202_v17 = vmul.f32 %v9200_v53, %v2050_v49  ;;  %v1557_v41 = vadd.f32 %v1549_v13, %v1540_v15  ;;  %v2194_v12 = vadd.f32 %v2186_v47, %v2177_v52 }
 0x42a   : > { %v2187_v13 = vmul.f32 %v9186_v6, %v2032_v18 }
 0x42b   : > { %v2210_v14 = vadd.f32 %v2202_v17, %v2193_v2  ;;  %v1550_v17 = vmul.f32 %v9207_v40, %v1393_v29 }
 0x42c   : > { %v1413_v54 = vpop.f32.mrf.mxu3 }
 0x42d   : > { %v2219_v19 = vadd.f32 %v9218_v56, %v2210_v14  ;;  %v1414_v60 = vadd.f32 %v1413_v54, %v1180_v23  ;;  %v1533_v23 = vmul.f32 %v9197_v50, %v1369_v11  ;;  %v1825_v11 = vpop.f32.mrf.mxu0 }
 0x42e   : > { %v2052_v49 = vpop.f32.mrf.mxu1 }
 0x42f   : > { %v2227_v2 = vmax.f32 %v2219_v19, 0.0  ;;  %v1566_v3 = vmul.f32 %v9222_v63, %v1414_v60  ;;  %v2053_v8 = vadd.f32 %v2052_v49, %v1819_v4  ;;  %v1541_v51 = vadd.f32 %v1533_v23, %v8999_v44 }
 0x430   : > { %v2178_v19 = vadd.f32 %v2170_v25, %v9003_v38  ;;  %v2011_v60 = vadd.f32 %v9096_v28, %v9059_v36  ;;  %v1396_v44 = vadd.f32 %v9150_v33, %v9134_v9  ;;  %v2035_v38 = vadd.f32 %v9152_v1, %v9138_v24 }
 0x431   : > { %v9242_v21 = vmin.f32 %v2227_v2, 3.0  ;;  %v1574_v48 = vadd.f32 %v1566_v3, %v1557_v41  ;;  %v2203_v45 = vmul.f32 %v9200_v53, %v2053_v8  ;;  %v1558_v52 = vadd.f32 %v1550_v17, %v1541_v51 }
 0x432   : > { %v1534_v41 = vmul.f32 %v9197_v50, %v1372_v26  ;;  %v2195_v2 = vadd.f32 %v2187_v13, %v2178_v19  ;;  %v2171_v28 = vmul.f32 %v9183_v16, %v2011_v60  ;;  %v1551_v9 = vmul.f32 %v9207_v40, %v1396_v44 }
 0x433   : > { %v1583_v57 = vadd.f32 %v9237_v10, %v1574_v48  ;;  %v2211_v4 = vadd.f32 %v2203_v45, %v2194_v12  ;;  %7212 = vmatmul.msk.f32.vlgmr.msrb.gmra.mxu2 %vm2254_vm2, %v9242_v21  ;;  %v1375_v1 = vadd.f32 %v9102_v39, %v9070_v27  ;;  %v2188_v18 = vmul.f32 %v9186_v6, %v2035_v38  ;;  %v11706_v38 = vld [vmem:[#allocation28_spill] sm:$0xff] }
 0x434   : > { %v1416_v14 = vpop.f32.mrf.mxu3  ;;  %v1542_v24 = vadd.f32 %v1534_v41, %v9011_v55  ;;  %v2179_v25 = vadd.f32 %v2171_v28, %v9015_v34  ;;  %v2014_v17 = vadd.f32 %v9104_v46, %v9073_v0  ;;  %v2038_v34 = vadd.f32 %v9160_v43, %v9142_v61 }
 0x435   : > { %v1591_v54 = vmax.f32 %v1583_v57, 0.0  ;;  %v2220_v15 = vadd.f32 %v9218_v56, %v2211_v4  ;;  %v1417_v47 = vadd.f32 %v1416_v14, %v1183_v7  ;;  %v1399_v4 = vadd.f32 %v9158_v35, %v9140_v22  ;;  %v1828_v51 = vpop.f32.mrf.mxu0 }
 0x436   : > { %v2055_v62 = vpop.f32.mrf.mxu1  ;;  %v1559_v57 = vadd.f32 %v1551_v9, %v1542_v24  ;;  %v2196_v14 = vadd.f32 %v2188_v18, %v2179_v25  ;;  %v2172_v46 = vmul.f32 %v9183_v16, %v2014_v17  ;;  %v1378_v61 = vadd.f32 %v9108_v30, %v9082_v58  ;;  %v7211_v25 = vld [vmem:[%s11663_s3 + $0x38] sm:$0xff]  ;;  %v11709_v17 = vld [vmem:[#allocation5_spill] sm:$0xff] }
 0x437   : > { %v9260_v29 = vmin.f32 %v1591_v54, 3.0  ;;  %v1567_v5 = vmul.f32 %v9222_v63, %v1417_v47  ;;  %v2056_v31 = vadd.f32 %v2055_v62, %v1822_v42  ;;  %v2228_v49 = vmax.f32 %v2220_v15, 0.0  ;;  %v1189_v42 = vpop.f32.mrf.mxu2  ;;  %2416 = vmatpush.msra.mxu2 %v7211_v25 }
 0x438   : > { %v1552_v22 = vmul.f32 %v9207_v40, %v1399_v4  ;;  %v2189_v47 = vmul.f32 %v9186_v6, %v2038_v34  ;;  %v1536_v9 = vmul.f32 %v9197_v50, %v1378_v61  ;;  %v11710_v4 = vld [vmem:[#allocation12_spill] sm:$0xff] }
 0x439   : > { %v1575_v7 = vadd.f32 %v1567_v5, %v1558_v52  ;;  %v2204_v36 = vmul.f32 %v9200_v53, %v2056_v31  ;;  %7220 = vmatmul.msk.f32.vlgmr.msrb.gmra.mxu3 %vm2254_vm2, %v9260_v29  ;;  %v9269_v33 = vmin.f32 %v2228_v49, 3.0  ;;  %v2180_v5 = vadd.f32 %v2172_v46, %v9027_v59  ;;  %v11704_v31 = vld [vmem:[#allocation17_spill] sm:$0xff]  ;;  %v11708_v59 = vld [vmem:[#allocation30_spill] sm:$0xff]  ;;  %v11714_v46 = vld [vmem:[#allocation19_spill] sm:$0xff] }
 0x43a   : > { %v2017_v49 = vadd.f32 %v11704_v31, %v9084_v20  ;;  %v11717_v31 = vld [vmem:[#allocation26_spill] sm:$0xff] }
 0x43b   : > { %v1584_v3 = vadd.f32 %v9237_v10, %v1575_v7  ;;  %v2212_v8 = vadd.f32 %v2204_v36, %v2195_v2  ;;  %7213 = vmatmul.msk.f32.gmra.mxu2 %vm2254_vm2, %v9269_v33  ;;  %v11705_v2 = vld [vmem:[#allocation23_spill] sm:$0xff] }
 0x43c   : > { %v1419_v23 = vpop.f32.mrf.mxu3  ;;  %v2173_v18 = vmul.f32 %v9183_v16, %v2017_v49  ;;  %v11718_v49 = vld [vmem:[#allocation33_spill] sm:$0xff] }
 0x43d   : > { %v2221_v12 = vadd.f32 %v9218_v56, %v2212_v8  ;;  %v1420_v48 = vadd.f32 %v1419_v23, %v1186_v32  ;;  %v1592_v45 = vmax.f32 %v1584_v3, 0.0  ;;  %v1535_v32 = vmul.f32 %v9197_v50, %v1375_v1  ;;  %v1831_v3 = vpop.f32.mrf.mxu0  ;;  %v11707_v8 = vld [vmem:[#allocation24_spill] sm:$0xff] }
 0x43e   : > { %v2058_v55 = vpop.f32.mrf.mxu1  ;;  %v2041_v24 = vadd.f32 %v11708_v59, %v11707_v8  ;;  %v7209_v8 = vld [vmem:[%s11663_s3 + $0x28] sm:$0xff]  ;;  %v7208_v59 = vld [vmem:[%s11663_s3 + $0x20] sm:$0xff] }
 0x43f   : > { %v1568_v27 = vmul.f32 %v9222_v63, %v1420_v48  ;;  %v2059_v39 = vadd.f32 %v2058_v55, %v1825_v11  ;;  %v9287_v26 = vmin.f32 %v1592_v45, 3.0  ;;  %v2229_v13 = vmax.f32 %v2221_v12, 0.0  ;;  %v1192_v60 = vpop.f32.mrf.mxu2  ;;  %v11711_v55 = vld [vmem:[#allocation18_spill] sm:$0xff]  ;;  %2457 = vmatpush.msra.mxu3 %v7209_v8 }
 0x440   : > { %v1543_v43 = vadd.f32 %v1535_v32, %v9023_v37  ;;  %v1402_v37 = vadd.f32 %v11706_v38, %v11705_v2 }
 0x441   : > { %v1576_v54 = vadd.f32 %v1568_v27, %v1559_v57  ;;  %v2205_v0 = vmul.f32 %v9200_v53, %v2059_v39  ;;  %7221 = vmatmul.msk.f32.gmra.mxu3 %vm2254_vm2, %v9287_v26  ;;  %v9295_v35 = vmin.f32 %v2229_v13, 3.0  ;;  %v1544_v57 = vadd.f32 %v1536_v9, %v11709_v17 }
 0x442   : > { %v1560_v41 = vadd.f32 %v1552_v22, %v1543_v43  ;;  %v1553_v12 = vmul.f32 %v9207_v40, %v1402_v37  ;;  %v2190_v39 = vmul.f32 %v9186_v6, %v2041_v24  ;;  %v11716_v43 = vld [vmem:[#allocation32_spill] sm:$0xff]  ;;  %v11719_v24 = vld [vmem:[#allocation7_spill] sm:$0xff]  ;;  %2458 = vmatpush.msra.mxu3 %v7208_v59 }
 0x443   : > { %v1585_v11 = vadd.f32 %v9237_v10, %v1576_v54  ;;  %v2213_v15 = vadd.f32 %v2205_v0, %v2196_v14  ;;  %7214 = vmatmul.msk.f32.gmra.mxu2 %vm2254_vm2, %v9295_v35  ;;  %v11712_v14 = vld [vmem:[#allocation6_spill] sm:$0xff]  ;;  %v11713_v0 = vld [vmem:[#allocation13_spill] sm:$0xff] }
 0x444   : > { %v1422_v19 = vpop.f32.mrf.mxu3  ;;  %v2181_v54 = vadd.f32 %v2173_v18, %v11712_v14  ;;  %v2020_v22 = vadd.f32 %v11714_v46, %v11713_v0  ;;  %v11721_v18 = vld [vmem:[#allocation20_spill] sm:$0xff] }
 0x445   : > { %v2222_v52 = vadd.f32 %v9218_v56, %v2213_v15  ;;  %v1423_v44 = vadd.f32 %v1422_v19, %v1189_v42  ;;  %v1593_v62 = vmax.f32 %v1585_v11, 0.0  ;;  %v2197_v42 = vadd.f32 %v2189_v47, %v2180_v5  ;;  %v11715_v15 = vld [vmem:[#allocation25_spill] sm:$0xff]  ;;  %v1834_v9 = vpop.f32.mrf.mxu0 }
 0x446   : > { %v2061_v7 = vpop.f32.mrf.mxu1  ;;  %v1561_v11 = vadd.f32 %v1553_v12, %v1544_v57  ;;  %v1405_v61 = vadd.f32 %v11716_v43, %v11715_v15  ;;  %v2198_v2 = vadd.f32 %v2190_v39, %v2181_v54 }
 0x447   : > { %v1569_v58 = vmul.f32 %v9222_v63, %v1423_v44  ;;  %v2062_v30 = vadd.f32 %v2061_v7, %v1828_v51  ;;  %v9313_v36 = vmin.f32 %v1593_v62, 3.0  ;;  %v2230_v28 = vmax.f32 %v2222_v52, 0.0  ;;  %v1195_v19 = vpop.f32.mrf.mxu2 }
 0x448   : > { %v1381_v51 = vadd.f32 %v11711_v55, %v11710_v4  ;;  %v11722_v4 = vld [vmem:[#allocation8_spill] sm:$0xff] }
 0x449   : > { %v1577_v1 = vadd.f32 %v1569_v58, %v1560_v41  ;;  %v2206_v20 = vmul.f32 %v9200_v53, %v2062_v30  ;;  %7222 = vmatmul.msk.f32.gmra.mxu3 %vm2254_vm2, %v9313_v36  ;;  %v9321_v23 = vmin.f32 %v2230_v28, 3.0  ;;  %v2044_v41 = vadd.f32 %v11718_v49, %v11717_v31  ;;  %v7210_v58 = vld [vmem:[%s11663_s3 + $0x30] sm:$0xff] }
 0x44a   : > { %v2174_v30 = vmul.f32 %v9183_v16, %v2020_v22  ;;  %v1554_v28 = vmul.f32 %v9207_v40, %v1405_v61  ;;  %2417 = vmatpush.msra.mxu2 %v7210_v58  ;;  %v11730_v58 = vld [vmem:[#allocation16_spill] sm:$0xff] }
 0x44b   : > { %v1586_v48 = vadd.f32 %v9237_v10, %v1577_v1  ;;  %v2214_v45 = vadd.f32 %v2206_v20, %v2197_v42  ;;  %7215 = vmatmul.msk.f32.gmra.mxu2 %vm2254_vm2, %v9321_v23  ;;  %v11720_v20 = vld [vmem:[#allocation14_spill] sm:$0xff] }
 0x44c   : > { %v1425_v27 = vpop.f32.mrf.mxu3  ;;  %v1384_v12 = vadd.f32 %v11721_v18, %v11720_v20  ;;  %v2182_v55 = vadd.f32 %v2174_v30, %v11722_v4  ;;  %v11731_v30 = vld [vmem:[#allocation22_spill] sm:$0xff]  ;;  %v11733_v18 = vld [vmem:[#allocation31_spill] sm:$0xff] }
 0x44d   : > { %v2223_v13 = vadd.f32 %v9218_v56, %v2214_v45  ;;  %v1426_v32 = vadd.f32 %v1425_v27, %v1192_v60  ;;  %v1594_v34 = vmax.f32 %v1586_v48, 0.0  ;;  %v1537_v60 = vmul.f32 %v9197_v50, %v1381_v51  ;;  %v11723_v51 = vld [vmem:[#allocation15_spill] sm:$0xff]  ;;  %v11724_v27 = vld [vmem:[#allocation21_spill] sm:$0xff] }
 0x44e   : > { %v2064_v47 = vpop.f32.mrf.mxu1  ;;  %v2191_v48 = vmul.f32 %v9186_v6, %v2044_v41  ;;  %v2023_v39 = vadd.f32 %v11724_v27, %v11723_v51  ;;  %v1538_v15 = vmul.f32 %v9197_v50, %v1384_v12  ;;  %v11734_v12 = vld [vmem:[#allocation36_spill] sm:$0xff] }
 0x44f   : > { %v1570_v52 = vmul.f32 %v9222_v63, %v1426_v32  ;;  %v2065_v44 = vadd.f32 %v2064_v47, %v1831_v3  ;;  %v9342_v62 = vmin.f32 %v1594_v34, 3.0  ;;  %v2231_v5 = vmax.f32 %v2223_v13, 0.0  ;;  %v11725_v32 = vld [vmem:[#allocation27_spill] sm:$0xff]  ;;  %v11726_v34 = vld [vmem:[#allocation34_spill] sm:$0xff]  ;;  %v1198_v61 = vpop.f32.mrf.mxu2  ;;  %v11727_v47 = vld [vmem:[#allocation29_spill] sm:$0xff] }
 0x450   : > { %v1545_v1 = vadd.f32 %v1537_v60, %v11719_v24  ;;  %v1408_v14 = vadd.f32 %v11726_v34, %v11725_v32  ;;  %v2199_v43 = vadd.f32 %v2191_v48, %v2182_v55  ;;  %v2175_v31 = vmul.f32 %v9183_v16, %v2023_v39  ;;  %v11732_v24 = vld [vmem:[#allocation10_spill] sm:$0xff] }
 0x451   : > { %v1578_v38 = vadd.f32 %v1570_v52, %v1561_v11  ;;  %v2207_v37 = vmul.f32 %v9200_v53, %v2065_v44  ;;  %7223 = vmatmul.msk.f32.gmra.mxu3 %vm2254_vm2, %v9342_v62  ;;  %v9350_v7 = vmin.f32 %v2231_v5, 3.0  ;;  %v1411_v48 = vadd.f32 %v11734_v12, %v11733_v18 }
 0x452   : > { %v1562_v13 = vadd.f32 %v1554_v28, %v1545_v1  ;;  %v1555_v49 = vmul.f32 %v9207_v40, %v1408_v14  ;;  %v1387_v28 = vadd.f32 %v11731_v30, %v11730_v58  ;;  %v2183_v1 = vadd.f32 %v2175_v31, %v11732_v24 }
 0x453   : > { %v1587_v42 = vadd.f32 %v9237_v10, %v1578_v38  ;;  %v2215_v3 = vadd.f32 %v2207_v37, %v2198_v2  ;;  %7216 = vmatmul.msk.f32.gmra.mxu2 %vm2254_vm2, %v9350_v7  ;;  %v11729_v38 = vld [vmem:[#allocation9_spill] sm:$0xff]  ;;  %v1556_v32 = vmul.f32 %v9207_v40, %v1411_v48 }
 0x454   : > { %v1428_v45 = vpop.f32.mrf.mxu3  ;;  %v1546_v37 = vadd.f32 %v1538_v15, %v11729_v38  ;;  %v1539_v55 = vmul.f32 %v9197_v50, %v1387_v28  ;;  %v11735_v50 = vld [vmem:[#allocation11_spill] sm:$0xff] }
 0x455   : > { %v2224_v25 = vadd.f32 %v9218_v56, %v2215_v3  ;;  %v1429_v17 = vadd.f32 %v1428_v45, %v1195_v19  ;;  %v1595_v57 = vmax.f32 %v1587_v42, 0.0  ;;  %v11728_v19 = vld [vmem:[#allocation35_spill] sm:$0xff]  ;;  %v1837_v42 = vpop.f32.mrf.mxu0 }
 0x456   : > { %v2067_v54 = vpop.f32.mrf.mxu1  ;;  %v2047_v52 = vadd.f32 %v11728_v19, %v11727_v47  ;;  %v1563_v20 = vadd.f32 %v1555_v49, %v1546_v37 }
 0x457   : > { %v1571_v0 = vmul.f32 %v9222_v63, %v1429_v17  ;;  %v2068_v46 = vadd.f32 %v2067_v54, %v1834_v9  ;;  %v9377_v22 = vmin.f32 %v1595_v57, 3.0  ;;  %v2232_v11 = vmax.f32 %v2224_v25, 0.0 }
 0x458   : > { %v2192_v3 = vmul.f32 %v9186_v6, %v2047_v52 }
 0x459   : > { %v1579_v44 = vadd.f32 %v1571_v0, %v1562_v13  ;;  %v2208_v5 = vmul.f32 %v9200_v53, %v2068_v46  ;;  %7224 = vmatmul.msk.f32.gmra.mxu3 %vm2254_vm2, %v9377_v22  ;;  %v9385_v60 = vmin.f32 %v2232_v11, 3.0  ;;  %v1201_v13 = vpop.f32.mrf.mxu2  ;;  %v1547_v0 = vadd.f32 %v1539_v55, %v11735_v50 }
 0x45a   : > { %v2200_v6 = vadd.f32 %v2192_v3, %v2183_v1 }
 0x45b   : > { %v1588_v41 = vadd.f32 %v9237_v10, %v1579_v44  ;;  %v2216_v2 = vadd.f32 %v2208_v5, %v2199_v43  ;;  %7217 = vmatmul.msk.f32.gmra.mxu2 %vm2254_vm2, %v9385_v60  ;;  %v1564_v15 = vadd.f32 %v1556_v32, %v1547_v0 }
 0x45c   : > { %v1431_v9 = vpop.f32.mrf.mxu3 }
 0x45d   : > { %v2225_v8 = vadd.f32 %v9218_v56, %v2216_v2  ;;  %v1432_v16 = vadd.f32 %v1431_v9, %v1198_v61  ;;  %v1596_v59 = vmax.f32 %v1588_v41, 0.0 }
 0x45e   : > { %v2070_v45 = vpop.f32.mrf.mxu1 }
 0x45f   : > { %v1572_v25 = vmul.f32 %v9222_v63, %v1432_v16  ;;  %v2071_v17 = vadd.f32 %v2070_v45, %v1837_v42  ;;  %v9401_v57 = vmin.f32 %v1596_v59, 3.0  ;;  %v2233_v4 = vmax.f32 %v2225_v8, 0.0  ;;  %v7902_v59 = vld [vmem:[%s11662_s2 + $0x4] ss:$0 sm:$0xff] }
 0x461   : > { %v1580_v51 = vadd.f32 %v1572_v25, %v1563_v20  ;;  %v2209_v27 = vmul.f32 %v9200_v53, %v2071_v17  ;;  %7225 = vmatmul.msk.f32.gmra.mxu3 %vm2254_vm2, %v9401_v57  ;;  %v9407_v39 = vmin.f32 %v2233_v4, 3.0 }
 0x463   : > { %v1589_v34 = vadd.f32 %v9237_v10, %v1580_v51  ;;  %v2217_v14 = vadd.f32 %v2209_v27, %v2200_v6  ;;  %7218 = vmatmul.msk.f32.gmra.mxu2 %vm2254_vm2, %v9407_v39 }
 0x464   : > { %v1434_v54 = vpop.f32.mrf.mxu3 }
 0x465   : > { %v2226_v46 = vadd.f32 %v9218_v56, %v2217_v14  ;;  %v1435_v53 = vadd.f32 %v1434_v54, %v1201_v13  ;;  %v1597_v11 = vmax.f32 %v1589_v34, 0.0 }
 0x467   : > { %v1573_v43 = vmul.f32 %v9222_v63, %v1435_v53  ;;  %v9416_v61 = vmin.f32 %v1597_v11, 3.0  ;;  %v2234_v47 = vmax.f32 %v2226_v46, 0.0 }
 0x469   : > { %v1581_v40 = vadd.f32 %v1573_v43, %v1564_v15  ;;  %7226 = vmatmul.msk.f32.gmra.mxu3 %vm2254_vm2, %v9416_v61  ;;  %v9420_v19 = vmin.f32 %v2234_v47, 3.0 }
 0x46b   : > { %v1590_v52 = vadd.f32 %v9237_v10, %v1581_v40  ;;  %7219 = vmatmul.msk.f32.gmra.mxu2 %vm2254_vm2, %v9420_v19 }
 0x46d   : > { %v1598_v56 = vmax.f32 %v1590_v52, 0.0  ;;  %v7341_v52 = vld [vmem:[%s11664_s4 + $0x18] sm:$0xff] }
 0x46e   : > { %3152 = vmatpush.msra.mxu0 %v7341_v52  ;;  %v927_v52 = vld [vmem:[%s11667_s7 + $0x50] sm:$0xff] }
 0x46f   : > { %v9425_v44 = vmin.f32 %v1598_v56, 3.0  ;;  %v3110_v56 = vld [vmem:[%s11664_s4 + $0x8] sm:$0xff] }
 0x470   : > { %3217 = vmatpush.msra.mxu1 %v3110_v56  ;;  %v928_v56 = vld [vmem:[%s11667_s7 + $0x58] sm:$0xff] }
 0x471   : > { %7227 = vmatmul.msk.f32.gmra.mxu3 %vm2254_vm2, %v9425_v44 }
 0x473   : > { %7228 = vmatmul.msk.f32.vlgmr.msra.gmra.mxu2 %vm2254_vm2, %v9242_v21 }
 0x479   : > { %7236 = vmatmul.msk.f32.vlgmr.msra.gmra.mxu3 %vm2254_vm2, %v9260_v29 }
 0x47b   : > { %7229 = vmatmul.msk.f32.gmra.mxu2 %vm2254_vm2, %v9269_v33 }
 0x481   : > { %7237 = vmatmul.msk.f32.gmra.mxu3 %vm2254_vm2, %v9287_v26 }
 0x483   : > { %7230 = vmatmul.msk.f32.gmra.mxu2 %vm2254_vm2, %v9295_v35 }
 0x489   : > { %7238 = vmatmul.msk.f32.gmra.mxu3 %vm2254_vm2, %v9313_v36 }
 0x48b   : > { %7231 = vmatmul.msk.f32.gmra.mxu2 %vm2254_vm2, %v9321_v23 }
 0x491   : > { %7239 = vmatmul.msk.f32.gmra.mxu3 %vm2254_vm2, %v9342_v62 }
 0x493   : > { %7232 = vmatmul.msk.f32.gmra.mxu2 %vm2254_vm2, %v9350_v7 }
 0x499   : > { %7240 = vmatmul.msk.f32.gmra.mxu3 %vm2254_vm2, %v9377_v22 }
 0x49b   : > { %7233 = vmatmul.msk.f32.gmra.mxu2 %vm2254_vm2, %v9385_v60 }
 0x4a1   : > { %7241 = vmatmul.msk.f32.gmra.mxu3 %vm2254_vm2, %v9401_v57 }
 0x4a3   : > { %7234 = vmatmul.msk.f32.gmra.mxu2 %vm2254_vm2, %v9407_v39 }
 0x4a9   : > { %7242 = vmatmul.msk.f32.gmra.mxu3 %vm2254_vm2, %v9416_v61 }
 0x4ab   : > { %7235 = vmatmul.msk.f32.gmra.mxu2 %vm2254_vm2, %v9420_v19 }
 0x4b1   : > { %7243 = vmatmul.msk.f32.gmra.mxu3 %vm2254_vm2, %v9425_v44 }
 0x4b6   : > { %v2296_v63 = vpop.f32.mrf.mxu2 }
 0x4bc   : > { %v2361_v10 = vpop.f32.mrf.mxu3 }
 0x4bd   : > { %v2362_v14 = vadd.f32 %v2361_v10, %v2296_v63  ;;  %v9477_v63 = vld [vmem:[%s11667_s7] sm:$0xff] }
 0x4be   : > { %v2299_v5 = vpop.f32.mrf.mxu2 }
 0x4bf   : > { %v2386_v53 = vadd.f32 %v7902_v59, %v2362_v14 }
 0x4c1   : > { %v2394_v40 = vmax.f32 %v2386_v53, 0.0  ;;  %v924_v53 = vld [vmem:[%s11667_s7 + $0x38] sm:$0xff] }
 0x4c4   : > { %v2364_v31 = vpop.f32.mrf.mxu3 }
 0x4c5   : > { %v2365_v27 = vadd.f32 %v2364_v31, %v2299_v5  ;;  %v918_v31 = vld [vmem:[%s11667_s7 + $0x8] sm:$0xff] }
 0x4c6   : > { %v2302_v49 = vpop.f32.mrf.mxu2 }
 0x4c7   : > { %v2387_v0 = vadd.f32 %v7902_v59, %v2365_v27 }
 0x4c9   : > { %v2395_v43 = vmax.f32 %v2387_v0, 0.0 }
 0x4cc   : > { %v2367_v41 = vpop.f32.mrf.mxu3 }
 0x4cd   : > { %v2368_v4 = vadd.f32 %v2367_v41, %v2302_v49 }
 0x4ce   : > { %v2305_v2 = vpop.f32.mrf.mxu2 }
 0x4cf   : > { %v2388_v54 = vadd.f32 %v7902_v59, %v2368_v4 }
 0x4d1   : > { %v2396_v11 = vmax.f32 %v2388_v54, 0.0 }
 0x4d4   : > { %v2370_v38 = vpop.f32.mrf.mxu3 }
 0x4d5   : > { %v2371_v45 = vadd.f32 %v2370_v38, %v2305_v2  ;;  %v919_v2 = vld [vmem:[%s11667_s7 + $0x10] sm:$0xff] }
 0x4d6   : > { %v2308_v37 = vpop.f32.mrf.mxu2 }
 0x4d7   : > { %v2389_v13 = vadd.f32 %v7902_v59, %v2371_v45 }
 0x4d9   : > { %v2397_v46 = vmax.f32 %v2389_v13, 0.0 }
 0x4dc   : > { %v2373_v58 = vpop.f32.mrf.mxu3 }
 0x4dd   : > { %v2374_v18 = vadd.f32 %v2373_v58, %v2308_v37  ;;  %v920_v37 = vld [vmem:[%s11667_s7 + $0x18] sm:$0xff] }
 0x4de   : > { %v2311_v30 = vpop.f32.mrf.mxu2 }
 0x4df   : > { %v2390_v55 = vadd.f32 %v7902_v59, %v2374_v18 }
 0x4e1   : > { %v2398_v50 = vmax.f32 %v2390_v55, 0.0 }
 0x4e4   : > { %v2376_v28 = vpop.f32.mrf.mxu3 }
 0x4e5   : > { %v2377_v24 = vadd.f32 %v2376_v28, %v2311_v30  ;;  %v921_v28 = vld [vmem:[%s11667_s7 + $0x20] sm:$0xff] }
 0x4e6   : > { %v2314_v9 = vpop.f32.mrf.mxu2 }
 0x4e7   : > { %v2391_v25 = vadd.f32 %v7902_v59, %v2377_v24  ;;  %v7903_v24 = vld [vmem:[%s11662_s2 + $0x5] ss:$0 sm:$0xff] }
 0x4e9   : > { %v2399_v32 = vmax.f32 %v2391_v25, 0.0  ;;  %v923_v25 = vld [vmem:[%s11667_s7 + $0x30] sm:$0xff] }
 0x4ec   : > { %v2379_v42 = vpop.f32.mrf.mxu3 }
 0x4ed   : > { %v2380_v8 = vadd.f32 %v2379_v42, %v2314_v9 }
 0x4ee   : > { %v2317_v3 = vpop.f32.mrf.mxu2 }
 0x4ef   : > { %v2392_v12 = vadd.f32 %v7902_v59, %v2380_v8 }
 0x4f1   : > { %v2400_v6 = vmax.f32 %v2392_v12, 0.0 }
 0x4f4   : > { %v2382_v16 = vpop.f32.mrf.mxu3 }
 0x4f5   : > { %v2383_v1 = vadd.f32 %v2382_v16, %v2317_v3  ;;  %v922_v3 = vld [vmem:[%s11667_s7 + $0x28] sm:$0xff] }
 0x4f6   : > { %v9464_v20 = vpop.f32.mrf.mxu2 }
 0x4f7   : > { %v2393_v48 = vadd.f32 %v7902_v59, %v2383_v1 }
 0x4f9   : > { %v2401_v17 = vmax.f32 %v2393_v48, 0.0 }
 0x4fb   : > { %2654 = vmatpush.msrb.mxu2 %v2401_v17 }
 0x4fc   : > { %v9466_v51 = vpop.f32.mrf.mxu3 }
 0x4fd   : > { %2655 = vmatpush.msrb.mxu2 %v2400_v6 }
 0x4fe   : > { %v2422_v34 = vpop.f32.mrf.mxu2 }
 0x4ff   : > { %2656 = vmatpush.msrb.mxu2 %v2399_v32 }
 0x501   : > { %2657 = vmatpush.msrb.mxu2 %v2398_v50  ;;  %v2461_v50 = vadd.f32 %v9466_v51, %v9464_v20  ;;  %v925_v20 = vld [vmem:[%s11667_s7 + $0x40] sm:$0xff]  ;;  %v926_v51 = vld [vmem:[%s11667_s7 + $0x48] sm:$0xff] }
 0x503   : > { %2658 = vmatpush.msrb.mxu2 %v2397_v46 }
 0x504   : > { %v2463_v15 = vpop.f32.mrf.mxu3 }
 0x505   : > { %2659 = vmatpush.msrb.mxu2 %v2396_v11  ;;  %v2464_v32 = vadd.f32 %v2463_v15, %v2422_v34 }
 0x506   : > { %v2425_v47 = vpop.f32.mrf.mxu2 }
 0x507   : > { %2660 = vmatpush.msrb.mxu2 %v2395_v43  ;;  %v2486_v11 = vadd.f32 %v7903_v24, %v2464_v32 }
 0x509   : > { %2661 = vmatpush.msrb.mxu2 %v2394_v40  ;;  %v2494_v15 = vmax.f32 %v2486_v11, 0.0 }
 0x50a   : > { %7244 = vmatmul.msk.f32.vlgmr.msrb.gmra.mxu2 %vm2501_vm3, %v9477_v63 }
 0x50c   : > { %v2466_v10 = vpop.f32.mrf.mxu3 }
 0x50d   : > { %v2467_v6 = vadd.f32 %v2466_v10, %v2425_v47  ;;  %v2485_v47 = vadd.f32 %v7903_v24, %v2461_v50  ;;  %v930_v10 = vld [vmem:[%s11667_s7 + $0x68] sm:$0xff] }
 0x50e   : > { %v2428_v5 = vpop.f32.mrf.mxu2 }
 0x50f   : > { %v2487_v0 = vadd.f32 %v7903_v24, %v2467_v6  ;;  %v2493_v40 = vmax.f32 %v2485_v47, 0.0  ;;  %v9676_v47 = vld [vmem:[%s11667_s7 + $0xf0] sm:$0xff] }
 0x511   : > { %v2495_v34 = vmax.f32 %v2487_v0, 0.0  ;;  %v7340_v0 = vld [vmem:[%s11664_s4 + $0x10] sm:$0xff] }
 0x512   : > { %7245 = vmatmul.msk.f32.gmra.mxu2 %vm2501_vm3, %v918_v31  ;;  %3153 = vmatpush.msra.mxu0 %v7340_v0 }
 0x514   : > { %v2469_v49 = vpop.f32.mrf.mxu3 }
 0x515   : > { %v2470_v17 = vadd.f32 %v2469_v49, %v2428_v5  ;;  %v931_v5 = vld [vmem:[%s11667_s7 + $0x70] sm:$0xff]  ;;  %v933_v49 = vld [vmem:[%s11667_s7 + $0x80] sm:$0xff] }
 0x516   : > { %v2431_v41 = vpop.f32.mrf.mxu2 }
 0x517   : > { %v2488_v14 = vadd.f32 %v7903_v24, %v2470_v17 }
 0x519   : > { %v2496_v43 = vmax.f32 %v2488_v14, 0.0 }
 0x51a   : > { %7246 = vmatmul.msk.f32.gmra.mxu2 %vm2501_vm3, %v919_v2 }
 0x51c   : > { %v2472_v38 = vpop.f32.mrf.mxu3 }
 0x51d   : > { %v2473_v12 = vadd.f32 %v2472_v38, %v2431_v41 }
 0x51e   : > { %v2434_v58 = vpop.f32.mrf.mxu2 }
 0x51f   : > { %v2489_v27 = vadd.f32 %v7903_v24, %v2473_v12  ;;  %v941_v12 = vld [vmem:[%s11667_s7 + $0xc0] sm:$0xff] }
 0x521   : > { %v2497_v46 = vmax.f32 %v2489_v27, 0.0 }
 0x522   : > { %7247 = vmatmul.msk.f32.gmra.mxu2 %vm2501_vm3, %v920_v37 }
 0x524   : > { %v2475_v30 = vpop.f32.mrf.mxu3 }
 0x525   : > { %v2476_v1 = vadd.f32 %v2475_v30, %v2434_v58  ;;  %v936_v30 = vld [vmem:[%s11667_s7 + $0x98] sm:$0xff] }
 0x526   : > { %v2437_v9 = vpop.f32.mrf.mxu2 }
 0x527   : > { %v2490_v4 = vadd.f32 %v7903_v24, %v2476_v1  ;;  %v940_v1 = vld [vmem:[%s11667_s7 + $0xb8] sm:$0xff] }
 0x529   : > { %v2498_v54 = vmax.f32 %v2490_v4, 0.0 }
 0x52a   : > { %7248 = vmatmul.msk.f32.gmra.mxu2 %vm2501_vm3, %v921_v28 }
 0x52c   : > { %v2478_v42 = vpop.f32.mrf.mxu3 }
 0x52d   : > { %v2479_v8 = vadd.f32 %v2478_v42, %v2437_v9  ;;  %v937_v9 = vld [vmem:[%s11667_s7 + $0xa0] sm:$0xff] }
 0x52e   : > { %v2440_v16 = vpop.f32.mrf.mxu2 }
 0x52f   : > { %v2491_v48 = vadd.f32 %v7903_v24, %v2479_v8  ;;  %v938_v8 = vld [vmem:[%s11667_s7 + $0xa8] sm:$0xff] }
 0x531   : > { %v2499_v13 = vmax.f32 %v2491_v48, 0.0 }
 0x532   : > { %7249 = vmatmul.msk.f32.gmra.mxu2 %vm2501_vm3, %v922_v3 }
 0x534   : > { %v2481_v59 = vpop.f32.mrf.mxu3 }
 0x535   : > { %v2482_v18 = vadd.f32 %v2481_v59, %v2440_v16  ;;  %v939_v59 = vld [vmem:[%s11667_s7 + $0xb0] sm:$0xff] }
 0x537   : > { %v2492_v45 = vadd.f32 %v7903_v24, %v2482_v18 }
 0x539   : > { %v2500_v55 = vmax.f32 %v2492_v45, 0.0 }
 0x53a   : > { %7250 = vmatmul.msk.f32.gmra.mxu2 %vm2501_vm3, %v923_v25 }
 0x53b   : > { %2815 = vmatpush.msrb.mxu3 %v2500_v55  ;;  %v9629_v55 = vld [vmem:[%s11667_s7 + $0xd0] sm:$0xff] }
 0x53d   : > { %2816 = vmatpush.msrb.mxu3 %v2499_v13  ;;  %v9640_v13 = vld [vmem:[%s11667_s7 + $0xd8] sm:$0xff] }
 0x53f   : > { %2817 = vmatpush.msrb.mxu3 %v2498_v54  ;;  %v9651_v54 = vld [vmem:[%s11667_s7 + $0xe0] sm:$0xff] }
 0x541   : > { %2818 = vmatpush.msrb.mxu3 %v2497_v46 }
 0x542   : > { %7251 = vmatmul.msk.f32.gmra.mxu2 %vm2501_vm3, %v924_v53 }
 0x543   : > { %2819 = vmatpush.msrb.mxu3 %v2496_v43 }
 0x545   : > { %2820 = vmatpush.msrb.mxu3 %v2495_v34 }
 0x547   : > { %2821 = vmatpush.msrb.mxu3 %v2494_v15 }
 0x549   : > { %2822 = vmatpush.msrb.mxu3 %v2493_v40  ;;  %v9687_v40 = vld [vmem:[%s11667_s7 + $0xf8] sm:$0xff] }
 0x54a   : > { %7292 = vmatmul.msk.f32.vlgmr.msrb.gmra.mxu3 %vm2501_vm3, %v9477_v63  ;;  %7252 = vmatmul.msk.f32.gmra.mxu2 %vm2501_vm3, %v925_v20  ;;  %v929_v63 = vld [vmem:[%s11667_s7 + $0x60] sm:$0xff] }
 0x552   : > { %7293 = vmatmul.msk.f32.gmra.mxu3 %vm2501_vm3, %v918_v31  ;;  %7253 = vmatmul.msk.f32.gmra.mxu2 %vm2501_vm3, %v926_v51  ;;  %v932_v31 = vld [vmem:[%s11667_s7 + $0x78] sm:$0xff] }
 0x55a   : > { %7294 = vmatmul.msk.f32.gmra.mxu3 %vm2501_vm3, %v919_v2  ;;  %7254 = vmatmul.msk.f32.gmra.mxu2 %vm2501_vm3, %v927_v52  ;;  %v934_v2 = vld [vmem:[%s11667_s7 + $0x88] sm:$0xff] }
 0x562   : > { %7295 = vmatmul.msk.f32.gmra.mxu3 %vm2501_vm3, %v920_v37  ;;  %7255 = vmatmul.msk.f32.gmra.mxu2 %vm2501_vm3, %v928_v56  ;;  %v935_v37 = vld [vmem:[%s11667_s7 + $0x90] sm:$0xff] }
 0x56a   : > { %7296 = vmatmul.msk.f32.gmra.mxu3 %vm2501_vm3, %v921_v28  ;;  %7256 = vmatmul.msk.f32.gmra.mxu2 %vm2501_vm3, %v929_v63 }
 0x572   : > { %7297 = vmatmul.msk.f32.gmra.mxu3 %vm2501_vm3, %v922_v3  ;;  %7257 = vmatmul.msk.f32.gmra.mxu2 %vm2501_vm3, %v930_v10  ;;  %v3109_v3 = vld [vmem:[%s11664_s4] sm:$0xff] }
 0x573   : > { %3218 = vmatpush.msra.mxu1 %v3109_v3 }
 0x57a   : > { %7298 = vmatmul.msk.f32.gmra.mxu3 %vm2501_vm3, %v923_v25  ;;  %7258 = vmatmul.msk.f32.gmra.mxu2 %vm2501_vm3, %v931_v5  ;;  %v942_v25 = vld [vmem:[%s11667_s7 + $0xc8] sm:$0xff] }
 0x582   : > { %7299 = vmatmul.msk.f32.gmra.mxu3 %vm2501_vm3, %v924_v53  ;;  %7259 = vmatmul.msk.f32.gmra.mxu2 %vm2501_vm3, %v932_v31  ;;  %v9665_v53 = vld [vmem:[%s11667_s7 + $0xe8] sm:$0xff] }
 0x58a   : > { %7300 = vmatmul.msk.f32.gmra.mxu3 %vm2501_vm3, %v925_v20  ;;  %7260 = vmatmul.msk.f32.gmra.mxu2 %vm2501_vm3, %v933_v49  ;;  %v2968_v20 = vld [vmem:[%s11665_s5 + $0x20] sm:$0xff] }
 0x58d   : > { %v9560_v41 = vpop.f32.mrf.mxu2 }
 0x592   : > { %7301 = vmatmul.msk.f32.gmra.mxu3 %vm2501_vm3, %v926_v51  ;;  %7261 = vmatmul.msk.f32.gmra.mxu2 %vm2501_vm3, %v934_v2 }
 0x595   : > { %v9567_v38 = vpop.f32.mrf.mxu2 }
 0x59a   : > { %7302 = vmatmul.msk.f32.gmra.mxu3 %vm2501_vm3, %v927_v52  ;;  %7262 = vmatmul.msk.f32.gmra.mxu2 %vm2501_vm3, %v935_v37 }
 0x59d   : > { %v9574_v58 = vpop.f32.mrf.mxu2 }
 0x5a2   : > { %7303 = vmatmul.msk.f32.gmra.mxu3 %vm2501_vm3, %v928_v56  ;;  %7263 = vmatmul.msk.f32.gmra.mxu2 %vm2501_vm3, %v936_v30  ;;  %v9697_v56 = vperm.slane %v2968_v20, 0 }
 0x5a5   : > { %v9581_v28 = vpop.f32.mrf.mxu2 }
 0x5aa   : > { %7304 = vmatmul.msk.f32.gmra.mxu3 %vm2501_vm3, %v929_v63  ;;  %7264 = vmatmul.msk.f32.gmra.mxu2 %vm2501_vm3, %v937_v9  ;;  %v9699_v63 = vperm.slane %v2968_v20, 1 }
 0x5ad   : > { %v9588_v42 = vpop.f32.mrf.mxu2 }
 0x5b2   : > { %7305 = vmatmul.msk.f32.gmra.mxu3 %vm2501_vm3, %v930_v10  ;;  %7265 = vmatmul.msk.f32.gmra.mxu2 %vm2501_vm3, %v938_v8  ;;  %v9705_v10 = vld [vmem:[%s11667_s7 + $0x100] sm:$0xff] }
 0x5b5   : > { %v9598_v16 = vpop.f32.mrf.mxu2 }
 0x5ba   : > { %7306 = vmatmul.msk.f32.gmra.mxu3 %vm2501_vm3, %v931_v5  ;;  %7266 = vmatmul.msk.f32.gmra.mxu2 %vm2501_vm3, %v939_v59  ;;  %v2971_v5 = vmul.f32 %v9697_v56, %v9560_v41  ;;  %v9720_v41 = vld [vmem:[%s11667_s7 + $0x108] sm:$0xff] }
 0x5bd   : > { %v9605_v24 = vpop.f32.mrf.mxu2 }
 0x5c2   : > { %7307 = vmatmul.msk.f32.gmra.mxu3 %vm2501_vm3, %v932_v31  ;;  %7267 = vmatmul.msk.f32.gmra.mxu2 %vm2501_vm3, %v940_v1 }
 0x5c5   : > { %v9612_v18 = vpop.f32.mrf.mxu2 }
 0x5ca   : > { %7308 = vmatmul.msk.f32.gmra.mxu3 %vm2501_vm3, %v933_v49  ;;  %7268 = vmatmul.msk.f32.gmra.mxu2 %vm2501_vm3, %v941_v12  ;;  %v9713_v49 = vperm.slane %v2968_v20, 2 }
 0x5cd   : > { %v2824_v48 = vpop.f32.mrf.mxu3  ;;  %v2687_v45 = vpop.f32.mrf.mxu2 }
 0x5ce   : > { %7350 = vmatmul.msk.f32.vlgmr.msra.gmra.mxu1 %vm2254_vm2, %v2824_v48  ;;  %v2980_v31 = vmul.f32 %v9699_v63, %v2687_v45 }
 0x5d2   : > { %7309 = vmatmul.msk.f32.gmra.mxu3 %vm2501_vm3, %v934_v2  ;;  %7269 = vmatmul.msk.f32.gmra.mxu2 %vm2501_vm3, %v942_v25 }
 0x5d5   : > { %v2827_v17 = vpop.f32.mrf.mxu3  ;;  %v2690_v4 = vpop.f32.mrf.mxu2 }
 0x5d6   : > { %7351 = vmatmul.msk.f32.gmra.mxu1 %vm2254_vm2, %v2827_v17  ;;  %v9735_v17 = vld [vmem:[%s11667_s7 + $0x110] sm:$0xff] }
 0x5da   : > { %7310 = vmatmul.msk.f32.gmra.mxu3 %vm2501_vm3, %v935_v37  ;;  %7270 = vmatmul.msk.f32.gmra.mxu2 %vm2501_vm3, %v9629_v55 }
 0x5dd   : > { %v2830_v6 = vpop.f32.mrf.mxu3  ;;  %v9634_v27 = vpop.f32.mrf.mxu2 }
 0x5de   : > { %7352 = vmatmul.msk.f32.gmra.mxu1 %vm2254_vm2, %v2830_v6 }
 0x5e2   : > { %7311 = vmatmul.msk.f32.gmra.mxu3 %vm2501_vm3, %v936_v30  ;;  %7271 = vmatmul.msk.f32.gmra.mxu2 %vm2501_vm3, %v9640_v13  ;;  %v2988_v30 = vadd.f32 %v2980_v31, %v2971_v5 }
 0x5e5   : > { %v2833_v32 = vpop.f32.mrf.mxu3  ;;  %v9645_v14 = vpop.f32.mrf.mxu2 }
 0x5e6   : > { %7353 = vmatmul.msk.f32.gmra.mxu1 %vm2254_vm2, %v2833_v32 }
 0x5ea   : > { %7312 = vmatmul.msk.f32.gmra.mxu3 %vm2501_vm3, %v937_v9  ;;  %7272 = vmatmul.msk.f32.gmra.mxu2 %vm2501_vm3, %v9651_v54 }
 0x5ed   : > { %v2836_v50 = vpop.f32.mrf.mxu3  ;;  %v9659_v46 = vpop.f32.mrf.mxu2 }
 0x5ee   : > { %7354 = vmatmul.msk.f32.gmra.mxu1 %vm2254_vm2, %v2836_v50 }
 0x5f2   : > { %7313 = vmatmul.msk.f32.gmra.mxu3 %vm2501_vm3, %v938_v8  ;;  %7273 = vmatmul.msk.f32.gmra.mxu2 %vm2501_vm3, %v9665_v53  ;;  %v2972_v8 = vmul.f32 %v9697_v56, %v9567_v38 }
 0x5f5   : > { %v2839_v11 = vpop.f32.mrf.mxu3  ;;  %v9670_v43 = vpop.f32.mrf.mxu2 }
 0x5f6   : > { %7355 = vmatmul.msk.f32.gmra.mxu1 %vm2254_vm2, %v2839_v11 }
 0x5fa   : > { %7314 = vmatmul.msk.f32.gmra.mxu3 %vm2501_vm3, %v939_v59  ;;  %7274 = vmatmul.msk.f32.gmra.mxu2 %vm2501_vm3, %v9676_v47  ;;  %v2981_v59 = vmul.f32 %v9699_v63, %v2690_v4  ;;  %v2982_v4 = vmul.f32 %v9699_v63, %v9634_v27  ;;  %v2983_v27 = vmul.f32 %v9699_v63, %v9645_v14 }
 0x5fb   : > { %v2984_v14 = vmul.f32 %v9699_v63, %v9659_v46  ;;  %v9792_v46 = vld [vmem:[%s11667_s7 + $0x128] sm:$0xff] }
 0x5fc   : > { %v2989_v48 = vadd.f32 %v2981_v59, %v2972_v8  ;;  %v2976_v59 = vmul.f32 %v9697_v56, %v9598_v16  ;;  %v9809_v16 = vld [vmem:[%s11667_s7 + $0x130] sm:$0xff] }
 0x5fd   : > { %v2842_v34 = vpop.f32.mrf.mxu3  ;;  %v9681_v15 = vpop.f32.mrf.mxu2 }
 0x5fe   : > { %7356 = vmatmul.msk.f32.gmra.mxu1 %vm2254_vm2, %v2842_v34 }
 0x602   : > { %7315 = vmatmul.msk.f32.gmra.mxu3 %vm2501_vm3, %v940_v1  ;;  %7275 = vmatmul.msk.f32.gmra.mxu2 %vm2501_vm3, %v9687_v40 }
 0x605   : > { %v2845_v51 = vpop.f32.mrf.mxu3  ;;  %v9695_v52 = vpop.f32.mrf.mxu2 }
 0x606   : > { %7357 = vmatmul.msk.f32.gmra.mxu1 %vm2254_vm2, %v2845_v51 }
 0x60a   : > { %7316 = vmatmul.msk.f32.gmra.mxu3 %vm2501_vm3, %v941_v12  ;;  %7276 = vmatmul.msk.f32.gmra.mxu2 %vm2501_vm3, %v9705_v10 }
 0x60d   : > { %v2848_v2 = vpop.f32.mrf.mxu3  ;;  %v2711_v37 = vpop.f32.mrf.mxu2 }
 0x60e   : > { %7342 = vmatmul.msk.f32.vlgmr.msra.gmra.mxu0 %vm2254_vm2, %v2848_v2  ;;  %v2997_v9 = vmul.f32 %v9713_v49, %v2711_v37  ;;  %v7359_v2 = vld [vmem:[%s11664_s4 + $0x28] sm:$0xff] }
 0x60f   : > { %3285 = vmatpush.msrb.mxu0 %v7359_v2 }
 0x610   : > { %v9722_v3 = vadd.f32 %v2997_v9, %v2988_v30  ;;  %v7358_v30 = vld [vmem:[%s11664_s4 + $0x20] sm:$0xff] }
 0x611   : > { %3286 = vmatpush.msrb.mxu0 %v7358_v30 }
 0x612   : > { %7317 = vmatmul.msk.f32.gmra.mxu3 %vm2501_vm3, %v942_v25  ;;  %7277 = vmatmul.msk.f32.gmra.mxu2 %vm2501_vm3, %v9720_v41  ;;  %v2973_v25 = vmul.f32 %v9697_v56, %v9574_v58  ;;  %v9752_v58 = vld [vmem:[%s11667_s7 + $0x118] sm:$0xff] }
 0x614   : > { %v2990_v50 = vadd.f32 %v2982_v4, %v2973_v25 }
 0x615   : > { %v2851_v1 = vpop.f32.mrf.mxu3  ;;  %v2714_v12 = vpop.f32.mrf.mxu2 }
 0x616   : > { %7343 = vmatmul.msk.f32.gmra.mxu0 %vm2254_vm2, %v2851_v1  ;;  %v2998_v45 = vmul.f32 %v9713_v49, %v2714_v12  ;;  %v2985_v1 = vmul.f32 %v9699_v63, %v9670_v43  ;;  %v2986_v43 = vmul.f32 %v9699_v63, %v9681_v15  ;;  %v2987_v15 = vmul.f32 %v9699_v63, %v9695_v52 }
 0x618   : > { %v9737_v38 = vadd.f32 %v2998_v45, %v2989_v48  ;;  %v2993_v45 = vadd.f32 %v2985_v1, %v2976_v59  ;;  %v963_v1 = vld [vmem:[%s11667_s7 + $0x170] sm:$0xff] }
 0x61a   : > { %7318 = vmatmul.msk.f32.gmra.mxu3 %vm2501_vm3, %v9629_v55  ;;  %7278 = vmatmul.msk.f32.gmra.mxu2 %vm2501_vm3, %v9735_v17  ;;  %v2974_v55 = vmul.f32 %v9697_v56, %v9581_v28  ;;  %v9769_v28 = vld [vmem:[%s11667_s7 + $0x120] sm:$0xff] }
 0x61c   : > { %v2991_v51 = vadd.f32 %v2983_v27, %v2974_v55 }
 0x61d   : > { %v2854_v6 = vpop.f32.mrf.mxu3  ;;  %v2717_v32 = vpop.f32.mrf.mxu2 }
 0x61e   : > { %7344 = vmatmul.msk.f32.gmra.mxu0 %vm2254_vm2, %v2854_v6  ;;  %v2999_v0 = vmul.f32 %v9713_v49, %v2717_v32 }
 0x620   : > { %v9754_v11 = vadd.f32 %v2999_v0, %v2990_v50 }
 0x622   : > { %7319 = vmatmul.msk.f32.gmra.mxu3 %vm2501_vm3, %v9640_v13  ;;  %7279 = vmatmul.msk.f32.gmra.mxu2 %vm2501_vm3, %v9752_v58  ;;  %v2975_v13 = vmul.f32 %v9697_v56, %v9588_v42 }
 0x625   : > { %v2857_v34 = vpop.f32.mrf.mxu3  ;;  %v2720_v20 = vpop.f32.mrf.mxu2 }
 0x626   : > { %7345 = vmatmul.msk.f32.gmra.mxu0 %vm2254_vm2, %v2857_v34  ;;  %v3000_v5 = vmul.f32 %v9713_v49, %v2720_v20 }
 0x628   : > { %v9771_v31 = vadd.f32 %v3000_v5, %v2991_v51  ;;  %v957_v5 = vld [vmem:[%s11667_s7 + $0x140] sm:$0xff] }
 0x62a   : > { %7320 = vmatmul.msk.f32.gmra.mxu3 %vm2501_vm3, %v9651_v54  ;;  %7280 = vmatmul.msk.f32.gmra.mxu2 %vm2501_vm3, %v9769_v28  ;;  %v2992_v54 = vadd.f32 %v2984_v14, %v2975_v13 }
 0x62d   : > { %v2860_v37 = vpop.f32.mrf.mxu3  ;;  %v2723_v42 = vpop.f32.mrf.mxu2 }
 0x62e   : > { %7346 = vmatmul.msk.f32.gmra.mxu0 %vm2254_vm2, %v2860_v37  ;;  %v3001_v9 = vmul.f32 %v9713_v49, %v2723_v42 }
 0x630   : > { %v9794_v8 = vadd.f32 %v3001_v9, %v2992_v54  ;;  %v7368_v54 = vld [vmem:[%s11664_s4 + $0x30] sm:$0xff] }
 0x632   : > { %7321 = vmatmul.msk.f32.gmra.mxu3 %vm2501_vm3, %v9665_v53  ;;  %7281 = vmatmul.msk.f32.gmra.mxu2 %vm2501_vm3, %v9792_v46  ;;  %v2977_v53 = vmul.f32 %v9697_v56, %v9605_v24  ;;  %v956_v24 = vld [vmem:[%s11667_s7 + $0x138] sm:$0xff] }
 0x634   : > { %v2994_v50 = vadd.f32 %v2986_v43, %v2977_v53 }
 0x635   : > { %v2863_v12 = vpop.f32.mrf.mxu3  ;;  %v2726_v48 = vpop.f32.mrf.mxu2 }
 0x636   : > { %7347 = vmatmul.msk.f32.gmra.mxu0 %vm2254_vm2, %v2863_v12  ;;  %v3002_v25 = vmul.f32 %v9713_v49, %v2726_v48 }
 0x638   : > { %v9811_v4 = vadd.f32 %v3002_v25, %v2993_v45 }
 0x63a   : > { %7322 = vmatmul.msk.f32.gmra.mxu3 %vm2501_vm3, %v9676_v47  ;;  %7282 = vmatmul.msk.f32.gmra.mxu2 %vm2501_vm3, %v9809_v16  ;;  %v2978_v47 = vmul.f32 %v9697_v56, %v9612_v18  ;;  %v958_v56 = vld [vmem:[%s11667_s7 + $0x148] sm:$0xff] }
 0x63c   : > { %v2995_v20 = vadd.f32 %v2987_v15, %v2978_v47 }
 0x63d   : > { %v2866_v6 = vpop.f32.mrf.mxu3  ;;  %v2729_v32 = vpop.f32.mrf.mxu2 }
 0x63e   : > { %7348 = vmatmul.msk.f32.gmra.mxu0 %vm2254_vm2, %v2866_v6  ;;  %v3003_v0 = vmul.f32 %v9713_v49, %v2729_v32 }
 0x640   : > { %v9826_v55 = vadd.f32 %v3003_v0, %v2994_v50 }
 0x642   : > { %7323 = vmatmul.msk.f32.gmra.mxu3 %vm2501_vm3, %v9687_v40  ;;  %7283 = vmatmul.msk.f32.gmra.mxu2 %vm2501_vm3, %v956_v24 }
 0x645   : > { %v2869_v27 = vpop.f32.mrf.mxu3  ;;  %v2732_v34 = vpop.f32.mrf.mxu2 }
 0x646   : > { %7349 = vmatmul.msk.f32.gmra.mxu0 %vm2254_vm2, %v2869_v27  ;;  %v3004_v51 = vmul.f32 %v9713_v49, %v2732_v34  ;;  %v7370_v27 = vld [vmem:[%s11664_s4 + $0x40] sm:$0xff] }
 0x648   : > { %v9840_v18 = vadd.f32 %v3004_v51, %v2995_v20 }
 0x64a   : > { %7324 = vmatmul.msk.f32.gmra.mxu3 %vm2501_vm3, %v9705_v10  ;;  %7284 = vmatmul.msk.f32.gmra.mxu2 %vm2501_vm3, %v957_v5  ;;  %v959_v10 = vld [vmem:[%s11667_s7 + $0x150] sm:$0xff] }
 0x64d   : > { %v2872_v40 = vpop.f32.mrf.mxu3  ;;  %v9845_v52 = vpop.f32.mrf.mxu2 }
 0x64e   : > { %7360 = vmatmul.msk.f32.vlgmr.msrb.gmra.mxu0 %vm2254_vm2, %v2872_v40  ;;  %v7400_v40 = vld [vmem:[%s11663_s3 + $0x50] sm:$0xff] }
 0x652   : > { %7325 = vmatmul.msk.f32.gmra.mxu3 %vm2501_vm3, %v9720_v41  ;;  %7285 = vmatmul.msk.f32.gmra.mxu2 %vm2501_vm3, %v958_v56  ;;  %v960_v41 = vld [vmem:[%s11667_s7 + $0x158] sm:$0xff] }
 0x655   : > { %v2875_v63 = vpop.f32.mrf.mxu3  ;;  %v9854_v49 = vpop.f32.mrf.mxu2 }
 0x656   : > { %7361 = vmatmul.msk.f32.gmra.mxu0 %vm2254_vm2, %v2875_v63 }
 0x65a   : > { %7326 = vmatmul.msk.f32.gmra.mxu3 %vm2501_vm3, %v9735_v17  ;;  %7286 = vmatmul.msk.f32.gmra.mxu2 %vm2501_vm3, %v959_v10  ;;  %v961_v17 = vld [vmem:[%s11667_s7 + $0x160] sm:$0xff] }
 0x65d   : > { %v2878_v13 = vpop.f32.mrf.mxu3  ;;  %v9863_v14 = vpop.f32.mrf.mxu2 }
 0x65e   : > { %7362 = vmatmul.msk.f32.gmra.mxu0 %vm2254_vm2, %v2878_v13 }
 0x662   : > { %7327 = vmatmul.msk.f32.gmra.mxu3 %vm2501_vm3, %v9752_v58  ;;  %7287 = vmatmul.msk.f32.gmra.mxu2 %vm2501_vm3, %v960_v41  ;;  %v7369_v58 = vld [vmem:[%s11664_s4 + $0x38] sm:$0xff] }
 0x663   : > { %3447 = vmatpush.msra.mxu0 %v7369_v58 }
 0x665   : > { %v2881_v2 = vpop.f32.mrf.mxu3  ;;  %v9872_v37 = vpop.f32.mrf.mxu2  ;;  %3448 = vmatpush.msra.mxu0 %v7368_v54 }
 0x666   : > { %7363 = vmatmul.msk.f32.gmra.mxu0 %vm2254_vm2, %v2881_v2 }
 0x66a   : > { %7328 = vmatmul.msk.f32.gmra.mxu3 %vm2501_vm3, %v9769_v28  ;;  %7288 = vmatmul.msk.f32.gmra.mxu2 %vm2501_vm3, %v961_v17  ;;  %v962_v28 = vld [vmem:[%s11667_s7 + $0x168] sm:$0xff] }
 0x66d   : > { %v2884_v30 = vpop.f32.mrf.mxu3  ;;  %v9884_v42 = vpop.f32.mrf.mxu2 }
 0x66e   : > { %7364 = vmatmul.msk.f32.gmra.mxu0 %vm2254_vm2, %v2884_v30 }
 0x672   : > { %7329 = vmatmul.msk.f32.gmra.mxu3 %vm2501_vm3, %v9792_v46  ;;  %7289 = vmatmul.msk.f32.gmra.mxu2 %vm2501_vm3, %v962_v28  ;;  %v964_v46 = vld [vmem:[%s11667_s7 + $0x178] sm:$0xff] }
 0x675   : > { %v2887_v9 = vpop.f32.mrf.mxu3  ;;  %v9896_v59 = vpop.f32.mrf.mxu2 }
 0x676   : > { %7365 = vmatmul.msk.f32.gmra.mxu0 %vm2254_vm2, %v2887_v9 }
 0x67a   : > { %7330 = vmatmul.msk.f32.gmra.mxu3 %vm2501_vm3, %v9809_v16  ;;  %7290 = vmatmul.msk.f32.gmra.mxu2 %vm2501_vm3, %v963_v1 }
 0x67d   : > { %v2890_v12 = vpop.f32.mrf.mxu3  ;;  %v9905_v48 = vpop.f32.mrf.mxu2 }
 0x67e   : > { %7366 = vmatmul.msk.f32.gmra.mxu0 %vm2254_vm2, %v2890_v12 }
 0x682   : > { %7331 = vmatmul.msk.f32.gmra.mxu3 %vm2501_vm3, %v956_v24  ;;  %7291 = vmatmul.msk.f32.gmra.mxu2 %vm2501_vm3, %v964_v46  ;;  %v7371_v24 = vld [vmem:[%s11664_s4 + $0x48] sm:$0xff] }
 0x683   : > { %3382 = vmatpush.msrb.mxu1 %v7371_v24 }
 0x685   : > { %v2893_v45 = vpop.f32.mrf.mxu3  ;;  %v9913_v25 = vpop.f32.mrf.mxu2  ;;  %3383 = vmatpush.msrb.mxu1 %v7370_v27 }
 0x686   : > { %7367 = vmatmul.msk.f32.gmra.mxu0 %vm2254_vm2, %v2893_v45  ;;  %v9973_v45 = vld [vmem:[%s11662_s2 + $0x7] ss:$0 sm:$0xff] }
 0x68a   : > { %7332 = vmatmul.msk.f32.gmra.mxu3 %vm2501_vm3, %v957_v5  ;;  %v7401_v5 = vld [vmem:[%s11663_s3 + $0x58] sm:$0xff] }
 0x68b   : > { %3617 = vmatpush.msrb.mxu0 %v7401_v5  ;;  %v9961_v58 = vpop.f32.mrf.mxu0 }
 0x68d   : > { %v2896_v16 = vpop.f32.mrf.mxu3  ;;  %v2759_v53 = vpop.f32.mrf.mxu2  ;;  %3618 = vmatpush.msrb.mxu0 %v7400_v40 }
 0x68e   : > { %7380 = vmatmul.msk.f32.vlgmr.msra.gmra.mxu0 %vm2254_vm2, %v2896_v16 }
 0x692   : > { %7333 = vmatmul.msk.f32.gmra.mxu3 %vm2501_vm3, %v958_v56 }
 0x695   : > { %v2899_v43 = vpop.f32.mrf.mxu3  ;;  %v2762_v6 = vpop.f32.mrf.mxu2 }
 0x696   : > { %7381 = vmatmul.msk.f32.gmra.mxu0 %vm2254_vm2, %v2899_v43 }
 0x69a   : > { %7334 = vmatmul.msk.f32.gmra.mxu3 %vm2501_vm3, %v959_v10  ;;  %v3038_v10 = vld [vmem:[%s11665_s5 + $0x28] sm:$0xff] }
 0x69b   : > { %v9956_v2 = vperm.slane %v3038_v10, 0 }
 0x69d   : > { %v2902_v32 = vpop.f32.mrf.mxu3  ;;  %v2765_v50 = vpop.f32.mrf.mxu2  ;;  %v3041_v30 = vmul.f32 %v9956_v2, %v9845_v52  ;;  %v3042_v52 = vmul.f32 %v9956_v2, %v9854_v49  ;;  %v3043_v49 = vmul.f32 %v9956_v2, %v9863_v14  ;;  %v3044_v14 = vmul.f32 %v9956_v2, %v9872_v37 }
 0x69e   : > { %7382 = vmatmul.msk.f32.gmra.mxu0 %vm2254_vm2, %v2902_v32  ;;  %v9979_v32 = vpop.f32.mrf.mxu0 }
 0x6a2   : > { %7335 = vmatmul.msk.f32.gmra.mxu3 %vm2501_vm3, %v960_v41 }
 0x6a5   : > { %v2905_v0 = vpop.f32.mrf.mxu3  ;;  %v9926_v47 = vpop.f32.mrf.mxu2 }
 0x6a6   : > { %7383 = vmatmul.msk.f32.gmra.mxu0 %vm2254_vm2, %v2905_v0 }
 0x6aa   : > { %7336 = vmatmul.msk.f32.gmra.mxu3 %vm2501_vm3, %v961_v17  ;;  %v9958_v17 = vperm.slane %v3038_v10, 1 }
 0x6ac   : > { %v3050_v54 = vmul.f32 %v9958_v17, %v2759_v53  ;;  %v3051_v53 = vmul.f32 %v9958_v17, %v2762_v6  ;;  %v3052_v6 = vmul.f32 %v9958_v17, %v2765_v50  ;;  %v3053_v50 = vmul.f32 %v9958_v17, %v9926_v47 }
 0x6ad   : > { %v2908_v15 = vpop.f32.mrf.mxu3  ;;  %v9933_v34 = vpop.f32.mrf.mxu2  ;;  %v3045_v47 = vmul.f32 %v9956_v2, %v9884_v42 }
 0x6ae   : > { %7384 = vmatmul.msk.f32.gmra.mxu0 %vm2254_vm2, %v2908_v15  ;;  %v3058_v12 = vadd.f32 %v3050_v54, %v3041_v30  ;;  %v3059_v27 = vadd.f32 %v3051_v53, %v3042_v52  ;;  %v9988_v54 = vpop.f32.mrf.mxu0 }
 0x6b2   : > { %7337 = vmatmul.msk.f32.gmra.mxu3 %vm2501_vm3, %v962_v28  ;;  %v9966_v28 = vperm.slane %v3038_v10, 2 }
 0x6b5   : > { %v2911_v20 = vpop.f32.mrf.mxu3  ;;  %v9937_v51 = vpop.f32.mrf.mxu2 }
 0x6b6   : > { %7385 = vmatmul.msk.f32.gmra.mxu0 %vm2254_vm2, %v2911_v20  ;;  %v10003_v37 = vpop.f32.mrf.mxu0 }
 0x6ba   : > { %7338 = vmatmul.msk.f32.gmra.mxu3 %vm2501_vm3, %v963_v1 }
 0x6bd   : > { %v2914_v56 = vpop.f32.mrf.mxu3  ;;  %v9947_v63 = vpop.f32.mrf.mxu2 }
 0x6be   : > { %7386 = vmatmul.msk.f32.gmra.mxu0 %vm2254_vm2, %v2914_v56 }
 0x6c2   : > { %7339 = vmatmul.msk.f32.gmra.mxu3 %vm2501_vm3, %v964_v46 }
 0x6c5   : > { %v2917_v13 = vpop.f32.mrf.mxu3  ;;  %v9954_v41 = vpop.f32.mrf.mxu2 }
 0x6c6   : > { %7387 = vmatmul.msk.f32.gmra.mxu0 %vm2254_vm2, %v2917_v13 }
 0x6cd   : > { %v2920_v9 = vpop.f32.mrf.mxu3  ;;  %v2783_v1 = vpop.f32.mrf.mxu2 }
 0x6ce   : > { %7372 = vmatmul.msk.f32.vlgmr.msrb.gmra.mxu1 %vm2254_vm2, %v2920_v9  ;;  %v3067_v46 = vmul.f32 %v9966_v28, %v2783_v1  ;;  %v3060_v9 = vadd.f32 %v3052_v6, %v3043_v49 }
 0x6d0   : > { %v3075_v16 = vadd.f32 %v3067_v46, %v3058_v12 }
 0x6d2   : > { %v3084_v43 = vadd.f32 %v9973_v45, %v3075_v16 }
 0x6d4   : > { %v3092_v0 = vmax.f32 %v3084_v43, 0.0 }
 0x6d5   : > { %v2923_v24 = vpop.f32.mrf.mxu3  ;;  %v2786_v15 = vpop.f32.mrf.mxu2 }
 0x6d6   : > { %7373 = vmatmul.msk.f32.gmra.mxu1 %vm2254_vm2, %v2923_v24  ;;  %v3100_v20 = vmin.f32 %v3092_v0, 3.0  ;;  %v3068_v5 = vmul.f32 %v9966_v28, %v2786_v15  ;;  %v7389_v0 = vld [vmem:[%s11664_s4 + $0x58] sm:$0xff]  ;;  %v3061_v24 = vadd.f32 %v3053_v50, %v3044_v14 }
 0x6d7   : > { %3515 = vmatpush.msra.mxu1 %v7389_v0 }
 0x6d8   : > { %v3076_v40 = vadd.f32 %v3068_v5, %v3059_v27  ;;  %7406 = vmatmul.msk.f32.vlgmr.msrb.gmra.mxu0 %vm2254_vm2, %v3100_v20  ;;  %v3054_v5 = vmul.f32 %v9958_v17, %v9933_v34  ;;  %v10017_v34 = vpop.f32.mrf.mxu0 }
 0x6da   : > { %v3085_v56 = vadd.f32 %v9973_v45, %v3076_v40 }
 0x6dc   : > { %v3093_v10 = vmax.f32 %v3085_v56, 0.0  ;;  %v7388_v56 = vld [vmem:[%s11664_s4 + $0x50] sm:$0xff] }
 0x6dd   : > { %v2926_v13 = vpop.f32.mrf.mxu3  ;;  %v2789_v30 = vpop.f32.mrf.mxu2  ;;  %3516 = vmatpush.msra.mxu1 %v7388_v56 }
 0x6de   : > { %7374 = vmatmul.msk.f32.gmra.mxu1 %vm2254_vm2, %v2926_v13  ;;  %v3101_v1 = vmin.f32 %v3093_v10, 3.0  ;;  %v3069_v12 = vmul.f32 %v9966_v28, %v2789_v30  ;;  %v3062_v13 = vadd.f32 %v3054_v5, %v3045_v47 }
 0x6e0   : > { %v3077_v46 = vadd.f32 %v3069_v12, %v3060_v9  ;;  %7407 = vmatmul.msk.f32.gmra.mxu0 %vm2254_vm2, %v3101_v1  ;;  %v3046_v1 = vmul.f32 %v9956_v2, %v9896_v59  ;;  %v3055_v12 = vmul.f32 %v9958_v17, %v9937_v51  ;;  %v3047_v59 = vmul.f32 %v9956_v2, %v9905_v48 }
 0x6e1   : > { %v3056_v51 = vmul.f32 %v9958_v17, %v9947_v63  ;;  %v3048_v48 = vmul.f32 %v9956_v2, %v9913_v25  ;;  %v3057_v63 = vmul.f32 %v9958_v17, %v9954_v41 }
 0x6e2   : > { %v3086_v16 = vadd.f32 %v9973_v45, %v3077_v46 }
 0x6e4   : > { %v3094_v52 = vmax.f32 %v3086_v16, 0.0 }
 0x6e5   : > { %v2929_v53 = vpop.f32.mrf.mxu3  ;;  %v2792_v43 = vpop.f32.mrf.mxu2 }
 0x6e6   : > { %7375 = vmatmul.msk.f32.gmra.mxu1 %vm2254_vm2, %v2929_v53  ;;  %v3102_v15 = vmin.f32 %v3094_v52, 3.0  ;;  %v3070_v27 = vmul.f32 %v9966_v28, %v2792_v43  ;;  %v3063_v52 = vadd.f32 %v3055_v12, %v3046_v1  ;;  %v3065_v1 = vadd.f32 %v3057_v63, %v3048_v48  ;;  %v7904_v63 = vld [vmem:[%s11662_s2 + $0x6] ss:$0 sm:$0xff] }
 0x6e8   : > { %v3078_v20 = vadd.f32 %v3070_v27, %v3061_v24  ;;  %7408 = vmatmul.msk.f32.gmra.mxu0 %vm2254_vm2, %v3102_v15  ;;  %v10032_v15 = vpop.f32.mrf.mxu0  ;;  %v10034_v27 = vpop.f32.mrf.mxu1 }
 0x6ea   : > { %v3087_v40 = vadd.f32 %v9973_v45, %v3078_v20 }
 0x6ec   : > { %v3095_v49 = vmax.f32 %v3087_v40, 0.0  ;;  %v3064_v40 = vadd.f32 %v3056_v51, %v3047_v59 }
 0x6ed   : > { %v2932_v6 = vpop.f32.mrf.mxu3  ;;  %v2795_v10 = vpop.f32.mrf.mxu2 }
 0x6ee   : > { %7376 = vmatmul.msk.f32.gmra.mxu1 %vm2254_vm2, %v2932_v6  ;;  %v3103_v30 = vmin.f32 %v3095_v49, 3.0  ;;  %v3071_v9 = vmul.f32 %v9966_v28, %v2795_v10 }
 0x6f0   : > { %v3079_v42 = vadd.f32 %v3071_v9, %v3062_v13  ;;  %7409 = vmatmul.msk.f32.gmra.mxu0 %vm2254_vm2, %v3103_v30 }
 0x6f2   : > { %v3088_v46 = vadd.f32 %v9973_v45, %v3079_v42  ;;  %v10044_v42 = vpop.f32.mrf.mxu0 }
 0x6f4   : > { %v3096_v14 = vmax.f32 %v3088_v46, 0.0 }
 0x6f5   : > { %v2935_v50 = vpop.f32.mrf.mxu3  ;;  %v2798_v16 = vpop.f32.mrf.mxu2 }
 0x6f6   : > { %7377 = vmatmul.msk.f32.gmra.mxu1 %vm2254_vm2, %v2935_v50  ;;  %v3104_v53 = vmin.f32 %v3096_v14, 3.0  ;;  %v3072_v43 = vmul.f32 %v9966_v28, %v2798_v16  ;;  %v10048_v14 = vpop.f32.mrf.mxu1 }
 0x6f8   : > { %v3080_v0 = vadd.f32 %v3072_v43, %v3063_v52  ;;  %7410 = vmatmul.msk.f32.gmra.mxu0 %vm2254_vm2, %v3104_v53 }
 0x6fa   : > { %v3089_v24 = vadd.f32 %v9973_v45, %v3080_v0  ;;  %v10053_v16 = vpop.f32.mrf.mxu0 }
 0x6fc   : > { %v3097_v20 = vmax.f32 %v3089_v24, 0.0  ;;  %v7399_v24 = vld [vmem:[%s11663_s3 + $0x48] sm:$0xff] }
 0x6fd   : > { %v2938_v47 = vpop.f32.mrf.mxu3  ;;  %v2801_v5 = vpop.f32.mrf.mxu2  ;;  %3682 = vmatpush.msrb.mxu1 %v7399_v24 }
 0x6fe   : > { %7378 = vmatmul.msk.f32.gmra.mxu1 %vm2254_vm2, %v2938_v47  ;;  %v3105_v49 = vmin.f32 %v3097_v20, 3.0  ;;  %v3073_v6 = vmul.f32 %v9966_v28, %v2801_v5  ;;  %v10056_v52 = vpop.f32.mrf.mxu1  ;;  %v7398_v20 = vld [vmem:[%s11663_s3 + $0x40] sm:$0xff] }
 0x6ff   : > { %3683 = vmatpush.msrb.mxu1 %v7398_v20 }
 0x700   : > { %v3081_v56 = vadd.f32 %v3073_v6, %v3064_v40  ;;  %7411 = vmatmul.msk.f32.gmra.mxu0 %vm2254_vm2, %v3105_v49 }
 0x702   : > { %v3090_v10 = vadd.f32 %v9973_v45, %v3081_v56 }
 0x704   : > { %v3098_v13 = vmax.f32 %v3090_v10, 0.0 }
 0x705   : > { %v2941_v30 = vpop.f32.mrf.mxu3  ;;  %v2804_v9 = vpop.f32.mrf.mxu2 }
 0x706   : > { %7379 = vmatmul.msk.f32.gmra.mxu1 %vm2254_vm2, %v2941_v30  ;;  %v3106_v12 = vmin.f32 %v3098_v13, 3.0  ;;  %v3074_v46 = vmul.f32 %v9966_v28, %v2804_v9  ;;  %v10059_v28 = vpop.f32.mrf.mxu1  ;;  %v3014_v13 = vadd.f32 %v7904_v63, %v9722_v3  ;;  %v3016_v3 = vadd.f32 %v7904_v63, %v9754_v11 }
 0x708   : > { %v3082_v50 = vadd.f32 %v3074_v46, %v3065_v1  ;;  %7412 = vmatmul.msk.f32.gmra.mxu0 %vm2254_vm2, %v3106_v12  ;;  %v3022_v1 = vmax.f32 %v3014_v13, 0.0 }
 0x70a   : > { %v3091_v25 = vadd.f32 %v9973_v45, %v3082_v50  ;;  %v10062_v45 = vpop.f32.mrf.mxu0  ;;  %v3030_v46 = vmin.f32 %v3022_v1, 3.0  ;;  %v3015_v50 = vadd.f32 %v7904_v63, %v9737_v38  ;;  %v3017_v38 = vadd.f32 %v7904_v63, %v9771_v31  ;;  %v7403_v1 = vld [vmem:[%s11663_s3 + $0x68] sm:$0xff] }
 0x70c   : > { %v3099_v41 = vmax.f32 %v3091_v25, 0.0  ;;  %v3023_v25 = vmax.f32 %v3015_v50, 0.0  ;;  %v3025_v20 = vmax.f32 %v3017_v38, 0.0  ;;  %v7402_v50 = vld [vmem:[%s11663_s3 + $0x60] sm:$0xff] }
 0x70d   : > { %v2944_v2 = vpop.f32.mrf.mxu3 }
 0x70e   : > { %7390 = vmatmul.msk.f32.vlgmr.msra.gmra.mxu1 %vm2254_vm2, %v2944_v2  ;;  %v3107_v17 = vmin.f32 %v3099_v41, 3.0  ;;  %v10064_v0 = vpop.f32.mrf.mxu1 }
 0x70f   : > { %3829 = vmatpush.msra.mxu1 %v7403_v1 }
 0x710   : > { %7413 = vmatmul.msk.f32.gmra.mxu0 %vm2254_vm2, %v3107_v17  ;;  %v3031_v17 = vmin.f32 %v3023_v25, 3.0  ;;  %v7405_v25 = vld [vmem:[%s11663_s3 + $0x78] sm:$0xff] }
 0x711   : > { %3830 = vmatpush.msra.mxu1 %v7402_v50  ;;  %3764 = vmatpush.msra.mxu0 %v7405_v25 }
 0x712   : > { %v10067_v51 = vpop.f32.mrf.mxu0 }
 0x715   : > { %v2947_v53 = vpop.f32.mrf.mxu3 }
 0x716   : > { %7391 = vmatmul.msk.f32.gmra.mxu1 %vm2254_vm2, %v2947_v53  ;;  %v10076_v5 = vpop.f32.mrf.mxu1  ;;  %v3024_v53 = vmax.f32 %v3016_v3, 0.0  ;;  %v7404_v3 = vld [vmem:[%s11663_s3 + $0x70] sm:$0xff] }
 0x717   : > { %3765 = vmatpush.msra.mxu0 %v7404_v3  ;;  %v10162_v3 = vld [vmem:[%s11662_s2 + $0x9] ss:$0 sm:$0xff] }
 0x718   : > { %v3032_v24 = vmin.f32 %v3024_v53, 3.0 }
 0x71a   : > { %v10078_v40 = vpop.f32.mrf.mxu0 }
 0x71d   : > { %v2950_v43 = vpop.f32.mrf.mxu3 }
 0x71e   : > { %7392 = vmatmul.msk.f32.gmra.mxu1 %vm2254_vm2, %v2950_v43  ;;  %v10081_v6 = vpop.f32.mrf.mxu1 }
 0x722   : > { %v10083_v56 = vpop.f32.mrf.mxu0 }
 0x725   : > { %v2953_v59 = vpop.f32.mrf.mxu3 }
 0x726   : > { %7393 = vmatmul.msk.f32.gmra.mxu1 %vm2254_vm2, %v2953_v59  ;;  %v10089_v10 = vpop.f32.mrf.mxu1 }
 0x72a   : > { %v10093_v9 = vpop.f32.mrf.mxu0 }
 0x72d   : > { %v2956_v47 = vpop.f32.mrf.mxu3 }
 0x72e   : > { %7394 = vmatmul.msk.f32.gmra.mxu1 %vm2254_vm2, %v2956_v47 }
 0x732   : > { %v10097_v41 = vpop.f32.mrf.mxu0 }
 0x735   : > { %v2959_v49 = vpop.f32.mrf.mxu3 }
 0x736   : > { %7395 = vmatmul.msk.f32.gmra.mxu1 %vm2254_vm2, %v2959_v49  ;;  %v3033_v49 = vmin.f32 %v3025_v20, 3.0 }
 0x73a   : > { %v10103_v43 = vpop.f32.mrf.mxu0 }
 0x73d   : > { %v2962_v48 = vpop.f32.mrf.mxu3 }
 0x73e   : > { %7396 = vmatmul.msk.f32.gmra.mxu1 %vm2254_vm2, %v2962_v48  ;;  %v3018_v48 = vadd.f32 %v7904_v63, %v9794_v8 }
 0x740   : > { %v3026_v11 = vmax.f32 %v3018_v48, 0.0 }
 0x742   : > { %v10112_v13 = vpop.f32.mrf.mxu0  ;;  %v3034_v31 = vmin.f32 %v3026_v11, 3.0  ;;  %v3021_v11 = vadd.f32 %v7904_v63, %v9840_v18 }
 0x744   : > { %v3029_v1 = vmax.f32 %v3021_v11, 0.0 }
 0x745   : > { %v2965_v30 = vpop.f32.mrf.mxu3 }
 0x746   : > { %7397 = vmatmul.msk.f32.gmra.mxu1 %vm2254_vm2, %v2965_v30  ;;  %v3037_v25 = vmin.f32 %v3029_v1, 3.0 }
 0x74a   : > { %v3450_v8 = vpop.f32.mrf.mxu0 }
 0x74b   : > { %v3385_v12 = vpop.f32.mrf.mxu1 }
 0x74e   : > { %7414 = vmatmul.msk.f32.vlgmr.msrb.gmra.mxu1 %vm2254_vm2, %v3030_v46  ;;  %v3019_v46 = vadd.f32 %v7904_v63, %v9811_v4 }
 0x752   : > { %v3453_v20 = vpop.f32.mrf.mxu0 }
 0x753   : > { %v10099_v2 = vpop.f32.mrf.mxu1 }
 0x756   : > { %7415 = vmatmul.msk.f32.gmra.mxu1 %vm2254_vm2, %v3031_v17  ;;  %v3027_v17 = vmax.f32 %v3019_v46, 0.0 }
 0x758   : > { %v3035_v53 = vmin.f32 %v3027_v17, 3.0  ;;  %v10147_v17 = vld [vmem:[%s11662_s2 + $0x8] ss:$0 sm:$0xff] }
 0x75a   : > { %v3456_v50 = vpop.f32.mrf.mxu0 }
 0x75b   : > { %v10105_v59 = vpop.f32.mrf.mxu1 }
 0x75e   : > { %7416 = vmatmul.msk.f32.gmra.mxu1 %vm2254_vm2, %v3032_v24  ;;  %v3020_v24 = vadd.f32 %v7904_v63, %v9826_v55  ;;  %v7441_v63 = vld [vmem:[%s11663_s3 + $0x98] sm:$0xff] }
 0x75f   : > { %3939 = vmatpush.msra.mxu2 %v7441_v63 }
 0x760   : > { %v3028_v38 = vmax.f32 %v3020_v24, 0.0 }
 0x762   : > { %v3036_v48 = vmin.f32 %v3028_v38, 3.0  ;;  %v3459_v11 = vpop.f32.mrf.mxu0 }
 0x763   : > { %v10109_v47 = vpop.f32.mrf.mxu1 }
 0x766   : > { %7417 = vmatmul.msk.f32.gmra.mxu1 %vm2254_vm2, %v3033_v49 }
 0x76a   : > { %v3462_v63 = vpop.f32.mrf.mxu0 }
 0x76b   : > { %v10115_v30 = vpop.f32.mrf.mxu1 }
 0x76e   : > { %7418 = vmatmul.msk.f32.gmra.mxu1 %vm2254_vm2, %v3034_v31  ;;  %v3221_v31 = vadd.f32 %v10034_v27, %v9961_v58  ;;  %v7439_v58 = vld [vmem:[%s11663_s3 + $0x88] sm:$0xff]  ;;  %v3224_v27 = vadd.f32 %v10048_v14, %v9979_v32  ;;  %v3227_v32 = vadd.f32 %v10056_v52, %v9988_v54  ;;  %v3454_v14 = vadd.f32 %v3453_v20, %v10099_v2 }
 0x76f   : > { %4004 = vmatpush.msra.mxu3 %v7439_v58  ;;  %v3230_v54 = vadd.f32 %v10059_v28, %v10003_v37  ;;  %v3457_v52 = vadd.f32 %v3456_v50, %v10105_v59  ;;  %v3233_v37 = vadd.f32 %v10064_v0, %v10017_v34  ;;  %v3460_v28 = vadd.f32 %v3459_v11, %v10109_v47 }
 0x770   : > { %v3312_v55 = vadd.f32 %v10062_v45, %v3221_v31  ;;  %v3451_v45 = vadd.f32 %v3450_v8, %v3385_v12  ;;  %v3313_v38 = vadd.f32 %v10067_v51, %v3224_v27  ;;  %v3314_v51 = vadd.f32 %v10078_v40, %v3227_v32 }
 0x771   : > { %v3315_v40 = vadd.f32 %v10083_v56, %v3230_v54  ;;  %v3316_v56 = vadd.f32 %v10093_v9, %v3233_v37  ;;  %v3463_v34 = vadd.f32 %v3462_v63, %v10115_v30  ;;  %v7442_v63 = vld [vmem:[%s11663_s3 + $0xa0] sm:$0xff] }
 0x772   : > { %v3321_v18 = vadd.f32 %v10147_v17, %v3312_v55  ;;  %v3322_v31 = vadd.f32 %v10147_v17, %v3313_v38  ;;  %v3323_v58 = vadd.f32 %v10147_v17, %v3314_v51 }
 0x773   : > { %v10131_v4 = vpop.f32.mrf.mxu1 }
 0x774   : > { %v3329_v24 = vmax.f32 %v3321_v18, 0.0  ;;  %v3330_v8 = vmax.f32 %v3322_v31, 0.0  ;;  %v3331_v20 = vmax.f32 %v3323_v58, 0.0 }
 0x776   : > { %7419 = vmatmul.msk.f32.gmra.mxu1 %vm2254_vm2, %v3035_v53 }
 0x77b   : > { %v10135_v49 = vpop.f32.mrf.mxu1 }
 0x77e   : > { %7420 = vmatmul.msk.f32.gmra.mxu1 %vm2254_vm2, %v3036_v48 }
 0x783   : > { %v10141_v46 = vpop.f32.mrf.mxu1 }
 0x786   : > { %7421 = vmatmul.msk.f32.gmra.mxu1 %vm2254_vm2, %v3037_v25 }
 0x78b   : > { %v3518_v53 = vpop.f32.mrf.mxu1 }
 0x78c   : > { %v3542_v48 = vadd.f32 %v3518_v53, %v3451_v45 }
 0x78e   : > { %v3551_v1 = vadd.f32 %v10162_v3, %v3542_v48  ;;  %7430 = vmatmul.msk.f32.vlgmr.msra.gmra.mxu1 %vm2254_vm2, %v3329_v24  ;;  %v3324_v24 = vadd.f32 %v10147_v17, %v3315_v40  ;;  %v3465_v48 = vpop.f32.mrf.mxu0 }
 0x78f   : > { %v3466_v30 = vadd.f32 %v3465_v48, %v10131_v4 }
 0x790   : > { %v3559_v25 = vmax.f32 %v3551_v1, 0.0  ;;  %v3332_v50 = vmax.f32 %v3324_v24, 0.0 }
 0x792   : > { %7422 = vmatmul.msk.f32.vlgmr.msra.gmra.mxu0 %vm2254_vm2, %v3559_v25  ;;  %v3325_v25 = vadd.f32 %v10147_v17, %v3316_v56 }
 0x793   : > { %v3521_v12 = vpop.f32.mrf.mxu1 }
 0x794   : > { %v3543_v55 = vadd.f32 %v3521_v12, %v3454_v14  ;;  %v3236_v14 = vadd.f32 %v10076_v5, %v10032_v15  ;;  %v3333_v11 = vmax.f32 %v3325_v25, 0.0  ;;  %v7443_v15 = vld [vmem:[%s11663_s3 + $0xa8] sm:$0xff]  ;;  %v3239_v5 = vadd.f32 %v10081_v6, %v10044_v42 }
 0x795   : > { %4103 = vmatpush.msrb.mxu1 %v7443_v15 }
 0x796   : > { %v3552_v18 = vadd.f32 %v10162_v3, %v3543_v55  ;;  %7431 = vmatmul.msk.f32.gmra.mxu1 %vm2254_vm2, %v3330_v8  ;;  %v3468_v47 = vpop.f32.mrf.mxu0  ;;  %v3317_v9 = vadd.f32 %v10097_v41, %v3236_v14 }
 0x797   : > { %4104 = vmatpush.msrb.mxu1 %v7442_v63 }
 0x798   : > { %v3560_v27 = vmax.f32 %v3552_v18, 0.0  ;;  %v3326_v51 = vadd.f32 %v10147_v17, %v3317_v9  ;;  %v7438_v18 = vld [vmem:[%s11663_s3 + $0x80] sm:$0xff] }
 0x799   : > { %4005 = vmatpush.msra.mxu3 %v7438_v18 }
 0x79a   : > { %7423 = vmatmul.msk.f32.gmra.mxu0 %vm2254_vm2, %v3560_v27  ;;  %v3334_v58 = vmax.f32 %v3326_v51, 0.0  ;;  %v3318_v27 = vadd.f32 %v10103_v43, %v3239_v5 }
 0x79b   : > { %v3524_v2 = vpop.f32.mrf.mxu1 }
 0x79c   : > { %v3544_v45 = vadd.f32 %v3524_v2, %v3457_v52  ;;  %v3327_v4 = vadd.f32 %v10147_v17, %v3318_v27  ;;  %v3242_v2 = vadd.f32 %v10089_v10, %v10053_v16 }
 0x79e   : > { %v3553_v53 = vadd.f32 %v10162_v3, %v3544_v45  ;;  %7432 = vmatmul.msk.f32.gmra.mxu1 %vm2254_vm2, %v3331_v20  ;;  %v3471_v42 = vpop.f32.mrf.mxu0  ;;  %v3469_v20 = vadd.f32 %v3468_v47, %v10135_v49  ;;  %v3335_v43 = vmax.f32 %v3327_v4, 0.0  ;;  %v3319_v45 = vadd.f32 %v10112_v13, %v3242_v2 }
 0x7a0   : > { %v3561_v38 = vmax.f32 %v3553_v53, 0.0  ;;  %v3328_v48 = vadd.f32 %v10147_v17, %v3319_v45  ;;  %v10233_v17 = vld [vmem:[%s11662_s2 + $0xa] ss:$0 sm:$0xff] }
 0x7a2   : > { %7424 = vmatmul.msk.f32.gmra.mxu0 %vm2254_vm2, %v3561_v38  ;;  %v3336_v10 = vmax.f32 %v3328_v48, 0.0 }
 0x7a3   : > { %v3527_v59 = vpop.f32.mrf.mxu1 }
 0x7a4   : > { %v3545_v1 = vadd.f32 %v3527_v59, %v3460_v28  ;;  %v3472_v28 = vadd.f32 %v3471_v42, %v10141_v46 }
 0x7a6   : > { %v3554_v31 = vadd.f32 %v10162_v3, %v3545_v1  ;;  %7433 = vmatmul.msk.f32.gmra.mxu1 %vm2254_vm2, %v3332_v50  ;;  %v3620_v24 = vpop.f32.mrf.mxu0 }
 0x7a8   : > { %v3562_v32 = vmax.f32 %v3554_v31, 0.0 }
 0x7aa   : > { %7425 = vmatmul.msk.f32.gmra.mxu0 %vm2254_vm2, %v3562_v32 }
 0x7ab   : > { %v3530_v0 = vpop.f32.mrf.mxu1 }
 0x7ac   : > { %v3546_v12 = vadd.f32 %v3530_v0, %v3463_v34 }
 0x7ae   : > { %v3555_v8 = vadd.f32 %v10162_v3, %v3546_v12  ;;  %7434 = vmatmul.msk.f32.gmra.mxu1 %vm2254_vm2, %v3333_v11  ;;  %v3623_v13 = vpop.f32.mrf.mxu0 }
 0x7b0   : > { %v3563_v55 = vmax.f32 %v3555_v8, 0.0 }
 0x7b2   : > { %7426 = vmatmul.msk.f32.gmra.mxu0 %vm2254_vm2, %v3563_v55 }
 0x7b3   : > { %v3533_v41 = vpop.f32.mrf.mxu1 }
 0x7b4   : > { %v3547_v54 = vadd.f32 %v3533_v41, %v3466_v30 }
 0x7b6   : > { %v3556_v6 = vadd.f32 %v10162_v3, %v3547_v54  ;;  %7435 = vmatmul.msk.f32.gmra.mxu1 %vm2254_vm2, %v3334_v58  ;;  %v3626_v25 = vpop.f32.mrf.mxu0 }
 0x7b8   : > { %v3564_v52 = vmax.f32 %v3556_v6, 0.0 }
 0x7ba   : > { %7427 = vmatmul.msk.f32.gmra.mxu0 %vm2254_vm2, %v3564_v52  ;;  %v7440_v52 = vld [vmem:[%s11663_s3 + $0x90] sm:$0xff] }
 0x7bb   : > { %v3536_v40 = vpop.f32.mrf.mxu1  ;;  %3940 = vmatpush.msra.mxu2 %v7440_v52 }
 0x7bc   : > { %v3548_v53 = vadd.f32 %v3536_v40, %v3469_v20 }
 0x7be   : > { %v3557_v38 = vadd.f32 %v10162_v3, %v3548_v53  ;;  %7436 = vmatmul.msk.f32.gmra.mxu1 %vm2254_vm2, %v3335_v43  ;;  %v3629_v9 = vpop.f32.mrf.mxu0 }
 0x7c0   : > { %v3565_v37 = vmax.f32 %v3557_v38, 0.0 }
 0x7c2   : > { %7428 = vmatmul.msk.f32.gmra.mxu0 %vm2254_vm2, %v3565_v37 }
 0x7c3   : > { %v3539_v16 = vpop.f32.mrf.mxu1 }
 0x7c4   : > { %v3549_v49 = vadd.f32 %v3539_v16, %v3472_v28 }
 0x7c6   : > { %v3558_v59 = vadd.f32 %v10162_v3, %v3549_v49  ;;  %7437 = vmatmul.msk.f32.gmra.mxu1 %vm2254_vm2, %v3336_v10  ;;  %v3632_v5 = vpop.f32.mrf.mxu0 }
 0x7c8   : > { %v3566_v50 = vmax.f32 %v3558_v59, 0.0 }
 0x7ca   : > { %7429 = vmatmul.msk.f32.gmra.mxu0 %vm2254_vm2, %v3566_v50 }
 0x7cb   : > { %v3685_v56 = vpop.f32.mrf.mxu1 }
 0x7cc   : > { %v3686_v46 = vadd.f32 %v3685_v56, %v3620_v24 }
 0x7ce   : > { %v3710_v1 = vadd.f32 %v10233_v17, %v3686_v46  ;;  %v3635_v58 = vpop.f32.mrf.mxu0 }
 0x7d0   : > { %v3718_v31 = vmax.f32 %v3710_v1, 0.0 }
 0x7d2   : > { %v3873_v32 = vadd.f32 %v3718_v31, %v9260_v29 }
 0x7d3   : > { %v3688_v3 = vpop.f32.mrf.mxu1 }
 0x7d4   : > { %v3689_v14 = vadd.f32 %v3688_v3, %v3623_v13  ;;  %7454 = vmatmul.msk.f32.vlgmr.msra.gmra.mxu3 %vm2254_vm2, %v3873_v32  ;;  %7470 = vmatmul.msk.f32.vlgmr.msrb.gmra.mxu1 %vm2254_vm2, %v3873_v32 }
 0x7d6   : > { %v3711_v34 = vadd.f32 %v10233_v17, %v3689_v14  ;;  %v3638_v20 = vpop.f32.mrf.mxu0 }
 0x7d8   : > { %v3719_v0 = vmax.f32 %v3711_v34, 0.0 }
 0x7da   : > { %v3874_v47 = vadd.f32 %v3719_v0, %v9287_v26 }
 0x7db   : > { %v3691_v11 = vpop.f32.mrf.mxu1 }
 0x7dc   : > { %v3692_v12 = vadd.f32 %v3691_v11, %v3626_v25  ;;  %7455 = vmatmul.msk.f32.gmra.mxu3 %vm2254_vm2, %v3874_v47  ;;  %7471 = vmatmul.msk.f32.gmra.mxu1 %vm2254_vm2, %v3874_v47 }
 0x7de   : > { %v3712_v29 = vadd.f32 %v10233_v17, %v3692_v12  ;;  %v3641_v48 = vpop.f32.mrf.mxu0 }
 0x7e0   : > { %v3720_v8 = vmax.f32 %v3712_v29, 0.0 }
 0x7e2   : > { %v3875_v51 = vadd.f32 %v3720_v8, %v9313_v36 }
 0x7e3   : > { %v3694_v55 = vpop.f32.mrf.mxu1 }
 0x7e4   : > { %v3695_v15 = vadd.f32 %v3694_v55, %v3629_v9  ;;  %7456 = vmatmul.msk.f32.gmra.mxu3 %vm2254_vm2, %v3875_v51  ;;  %7472 = vmatmul.msk.f32.gmra.mxu1 %vm2254_vm2, %v3875_v51 }
 0x7e6   : > { %v3713_v26 = vadd.f32 %v10233_v17, %v3695_v15 }
 0x7e8   : > { %v3721_v30 = vmax.f32 %v3713_v26, 0.0 }
 0x7ea   : > { %v3876_v41 = vadd.f32 %v3721_v30, %v9342_v62  ;;  %v7445_v62 = vld [vmem:[%s11663_s3 + $0xb8] sm:$0xff] }
 0x7eb   : > { %v3697_v18 = vpop.f32.mrf.mxu1  ;;  %4062 = vmatpush.msrb.mxu0 %v7445_v62 }
 0x7ec   : > { %v3698_v63 = vadd.f32 %v3697_v18, %v3632_v5  ;;  %7457 = vmatmul.msk.f32.gmra.mxu3 %vm2254_vm2, %v3876_v41  ;;  %7473 = vmatmul.msk.f32.gmra.mxu1 %vm2254_vm2, %v3876_v41 }
 0x7ee   : > { %v3714_v36 = vadd.f32 %v10233_v17, %v3698_v63 }
 0x7f0   : > { %v3722_v27 = vmax.f32 %v3714_v36, 0.0 }
 0x7f2   : > { %v3877_v54 = vadd.f32 %v3722_v27, %v9377_v22  ;;  %v7444_v22 = vld [vmem:[%s11663_s3 + $0xb0] sm:$0xff] }
 0x7f3   : > { %v3700_v42 = vpop.f32.mrf.mxu1  ;;  %4063 = vmatpush.msrb.mxu0 %v7444_v22 }
 0x7f4   : > { %v3701_v6 = vadd.f32 %v3700_v42, %v3635_v58  ;;  %7458 = vmatmul.msk.f32.gmra.mxu3 %vm2254_vm2, %v3877_v54  ;;  %7474 = vmatmul.msk.f32.gmra.mxu1 %vm2254_vm2, %v3877_v54 }
 0x7f6   : > { %v3715_v4 = vadd.f32 %v10233_v17, %v3701_v6 }
 0x7f8   : > { %v3723_v2 = vmax.f32 %v3715_v4, 0.0 }
 0x7fa   : > { %v3878_v40 = vadd.f32 %v3723_v2, %v9401_v57 }
 0x7fb   : > { %v3703_v43 = vpop.f32.mrf.mxu1 }
 0x7fc   : > { %v3704_v45 = vadd.f32 %v3703_v43, %v3638_v20  ;;  %7459 = vmatmul.msk.f32.gmra.mxu3 %vm2254_vm2, %v3878_v40  ;;  %7475 = vmatmul.msk.f32.gmra.mxu1 %vm2254_vm2, %v3878_v40 }
 0x7fe   : > { %v3716_v53 = vadd.f32 %v10233_v17, %v3704_v45 }
 0x800   : > { %v3724_v24 = vmax.f32 %v3716_v53, 0.0 }
 0x802   : > { %v3879_v38 = vadd.f32 %v3724_v24, %v9416_v61  ;;  %v7909_v61 = vld [vmem:[%s11662_s2 + $0xb] ss:$0 sm:$0xff] }
 0x803   : > { %v3706_v37 = vpop.f32.mrf.mxu1 }
 0x804   : > { %v3707_v28 = vadd.f32 %v3706_v37, %v3641_v48  ;;  %7460 = vmatmul.msk.f32.gmra.mxu3 %vm2254_vm2, %v3879_v38  ;;  %7476 = vmatmul.msk.f32.gmra.mxu1 %vm2254_vm2, %v3879_v38 }
 0x806   : > { %v3717_v57 = vadd.f32 %v10233_v17, %v3707_v28 }
 0x808   : > { %v3725_v16 = vmax.f32 %v3717_v57, 0.0 }
 0x80a   : > { %v3880_v10 = vadd.f32 %v3725_v16, %v9425_v44 }
 0x80b   : > { %v3832_v49 = vpop.f32.mrf.mxu1 }
 0x80c   : > { %7461 = vmatmul.msk.f32.gmra.mxu3 %vm2254_vm2, %v3880_v10  ;;  %7477 = vmatmul.msk.f32.gmra.mxu1 %vm2254_vm2, %v3880_v10 }
 0x80f   : > { %v3767_v59 = vpop.f32.mrf.mxu0 }
 0x810   : > { %v3833_v13 = vadd.f32 %v3832_v49, %v3767_v59 }
 0x812   : > { %v3857_v50 = vadd.f32 %v7909_v61, %v3833_v13 }
 0x813   : > { %v3835_v56 = vpop.f32.mrf.mxu1 }
 0x814   : > { %v3865_v46 = vmax.f32 %v3857_v50, 0.0 }
 0x816   : > { %v3881_v1 = vadd.f32 %v3865_v46, %v9242_v21 }
 0x817   : > { %v3770_v17 = vpop.f32.mrf.mxu0 }
 0x818   : > { %v3836_v31 = vadd.f32 %v3835_v56, %v3770_v17  ;;  %7446 = vmatmul.msk.f32.vlgmr.msra.gmra.mxu2 %vm2254_vm2, %v3881_v1  ;;  %7462 = vmatmul.msk.f32.vlgmr.msrb.gmra.mxu0 %vm2254_vm2, %v3881_v1 }
 0x81a   : > { %v3858_v44 = vadd.f32 %v7909_v61, %v3836_v31 }
 0x81b   : > { %v3838_v25 = vpop.f32.mrf.mxu1 }
 0x81c   : > { %v3866_v32 = vmax.f32 %v3858_v44, 0.0 }
 0x81e   : > { %v3882_v3 = vadd.f32 %v3866_v32, %v9269_v33 }
 0x81f   : > { %v3773_v14 = vpop.f32.mrf.mxu0 }
 0x820   : > { %v3839_v34 = vadd.f32 %v3838_v25, %v3773_v14  ;;  %7447 = vmatmul.msk.f32.gmra.mxu2 %vm2254_vm2, %v3882_v3  ;;  %7463 = vmatmul.msk.f32.gmra.mxu0 %vm2254_vm2, %v3882_v3 }
 0x822   : > { %v3859_v0 = vadd.f32 %v7909_v61, %v3839_v34 }
 0x823   : > { %v3841_v47 = vpop.f32.mrf.mxu1 }
 0x824   : > { %v3867_v21 = vmax.f32 %v3859_v0, 0.0  ;;  %v7910_v0 = vld [vmem:[%s11662_s2 + $0xd] ss:$0 sm:$0xff] }
 0x826   : > { %v3883_v11 = vadd.f32 %v3867_v21, %v9295_v35 }
 0x827   : > { %v3776_v9 = vpop.f32.mrf.mxu0 }
 0x828   : > { %v3842_v12 = vadd.f32 %v3841_v47, %v3776_v9  ;;  %7448 = vmatmul.msk.f32.gmra.mxu2 %vm2254_vm2, %v3883_v11  ;;  %7464 = vmatmul.msk.f32.gmra.mxu0 %vm2254_vm2, %v3883_v11 }
 0x82a   : > { %v3860_v29 = vadd.f32 %v7909_v61, %v3842_v12 }
 0x82b   : > { %v3844_v8 = vpop.f32.mrf.mxu1 }
 0x82c   : > { %v3868_v33 = vmax.f32 %v3860_v29, 0.0 }
 0x82e   : > { %v3884_v51 = vadd.f32 %v3868_v33, %v9321_v23 }
 0x82f   : > { %v3779_v55 = vpop.f32.mrf.mxu0 }
 0x830   : > { %v3845_v15 = vadd.f32 %v3844_v8, %v3779_v55  ;;  %7449 = vmatmul.msk.f32.gmra.mxu2 %vm2254_vm2, %v3884_v51  ;;  %7465 = vmatmul.msk.f32.gmra.mxu0 %vm2254_vm2, %v3884_v51 }
 0x832   : > { %v3861_v5 = vadd.f32 %v7909_v61, %v3845_v15 }
 0x833   : > { %v3847_v26 = vpop.f32.mrf.mxu1 }
 0x834   : > { %v3869_v35 = vmax.f32 %v3861_v5, 0.0 }
 0x836   : > { %v3885_v30 = vadd.f32 %v3869_v35, %v9350_v7 }
 0x837   : > { %v3782_v41 = vpop.f32.mrf.mxu0 }
 0x838   : > { %v3848_v18 = vadd.f32 %v3847_v26, %v3782_v41  ;;  %7450 = vmatmul.msk.f32.gmra.mxu2 %vm2254_vm2, %v3885_v30  ;;  %7466 = vmatmul.msk.f32.gmra.mxu0 %vm2254_vm2, %v3885_v30  ;;  %v7911_v26 = vld [vmem:[%s11662_s2 + $0xc] ss:$0 sm:$0xff] }
 0x83a   : > { %v3862_v63 = vadd.f32 %v7909_v61, %v3848_v18 }
 0x83b   : > { %v3850_v23 = vpop.f32.mrf.mxu1 }
 0x83c   : > { %v3870_v36 = vmax.f32 %v3862_v63, 0.0 }
 0x83e   : > { %v3886_v58 = vadd.f32 %v3870_v36, %v9385_v60 }
 0x83f   : > { %v3785_v27 = vpop.f32.mrf.mxu0 }
 0x840   : > { %v3851_v54 = vadd.f32 %v3850_v23, %v3785_v27  ;;  %7451 = vmatmul.msk.f32.gmra.mxu2 %vm2254_vm2, %v3886_v58  ;;  %7467 = vmatmul.msk.f32.gmra.mxu0 %vm2254_vm2, %v3886_v58 }
 0x842   : > { %v3863_v42 = vadd.f32 %v7909_v61, %v3851_v54 }
 0x843   : > { %v3853_v62 = vpop.f32.mrf.mxu1 }
 0x844   : > { %v3871_v6 = vmax.f32 %v3863_v42, 0.0 }
 0x846   : > { %v3887_v7 = vadd.f32 %v3871_v6, %v9407_v39 }
 0x847   : > { %v3788_v4 = vpop.f32.mrf.mxu0 }
 0x848   : > { %v3854_v52 = vadd.f32 %v3853_v62, %v3788_v4  ;;  %7452 = vmatmul.msk.f32.gmra.mxu2 %vm2254_vm2, %v3887_v7  ;;  %7468 = vmatmul.msk.f32.gmra.mxu0 %vm2254_vm2, %v3887_v7 }
 0x84a   : > { %v3864_v22 = vadd.f32 %v7909_v61, %v3854_v52 }
 0x84c   : > { %v3872_v2 = vmax.f32 %v3864_v22, 0.0 }
 0x84e   : > { %v3888_v60 = vadd.f32 %v3872_v2, %v9420_v19 }
 0x850   : > { %7453 = vmatmul.msk.f32.gmra.mxu2 %vm2254_vm2, %v3888_v60  ;;  %7469 = vmatmul.msk.f32.gmra.mxu0 %vm2254_vm2, %v3888_v60 }
 0x851   : > { %v4106_v20 = vpop.f32.mrf.mxu1 }
 0x857   : > { %v10303_v40 = vpop.f32.mrf.mxu3 }
 0x859   : > { %v4109_v43 = vpop.f32.mrf.mxu1 }
 0x85f   : > { %v10305_v45 = vpop.f32.mrf.mxu3 }
 0x861   : > { %v4112_v53 = vpop.f32.mrf.mxu1 }
 0x867   : > { %v4013_v48 = vpop.f32.mrf.mxu3 }
 0x869   : > { %v4115_v28 = vpop.f32.mrf.mxu1 }
 0x86f   : > { %v4016_v57 = vpop.f32.mrf.mxu3 }
 0x871   : > { %v4118_v49 = vpop.f32.mrf.mxu1 }
 0x877   : > { %v4019_v59 = vpop.f32.mrf.mxu3 }
 0x879   : > { %v4121_v50 = vpop.f32.mrf.mxu1 }
 0x87f   : > { %v4022_v1 = vpop.f32.mrf.mxu3 }
 0x881   : > { %v4124_v17 = vpop.f32.mrf.mxu1 }
 0x887   : > { %v4025_v25 = vpop.f32.mrf.mxu3 }
 0x889   : > { %v4127_v14 = vpop.f32.mrf.mxu1 }
 0x88f   : > { %v4028_v55 = vpop.f32.mrf.mxu3 }
 0x895   : > { %v4065_v39 = vpop.f32.mrf.mxu0 }
 0x896   : > { %v4107_v42 = vadd.f32 %v4106_v20, %v4065_v39 }
 0x89b   : > { %v10307_v24 = vpop.f32.mrf.mxu2 }
 0x89d   : > { %v4068_v38 = vpop.f32.mrf.mxu0 }
 0x89e   : > { %v4110_v63 = vadd.f32 %v4109_v43, %v4068_v38  ;;  %v4131_v38 = vadd.f32 %v7910_v0, %v4107_v42  ;;  %v7960_v42 = vld [vmem:[%s11667_s7 + $0xb0] sm:$0xff] }
 0x8a0   : > { %v4132_v22 = vadd.f32 %v7910_v0, %v4110_v63  ;;  %v7577_v63 = vld [vmem:[%s11664_s4 + $0x78] sm:$0xff] }
 0x8a1   : > { %4654 = vmatpush.msra.mxu0 %v7577_v63 }
 0x8a3   : > { %v10309_v37 = vpop.f32.mrf.mxu2 }
 0x8a5   : > { %v4071_v19 = vpop.f32.mrf.mxu0 }
 0x8a6   : > { %v4113_v15 = vadd.f32 %v4112_v53, %v4071_v19 }
 0x8a8   : > { %v4133_v6 = vadd.f32 %v7910_v0, %v4113_v15 }
 0x8aa   : > { %v4141_v39 = vmax.f32 %v4133_v6, 0.0 }
 0x8ab   : > { %v3948_v16 = vpop.f32.mrf.mxu2 }
 0x8ac   : > { %v4014_v2 = vadd.f32 %v4013_v48, %v3948_v16  ;;  %v4140_v16 = vmax.f32 %v4132_v22, 0.0  ;;  %v7962_v22 = vld [vmem:[%s11667_s7 + $0xc0] sm:$0xff] }
 0x8ad   : > { %v4074_v10 = vpop.f32.mrf.mxu0 }
 0x8ae   : > { %v4116_v29 = vadd.f32 %v4115_v28, %v4074_v10  ;;  %v4011_v28 = vadd.f32 %v10305_v45, %v10309_v37  ;;  %v4034_v10 = vadd.f32 %v7911_v26, %v4014_v2  ;;  %v7938_v37 = vld [vmem:[%s11667_s7] sm:$0xff] }
 0x8b0   : > { %v4134_v36 = vadd.f32 %v7910_v0, %v4116_v29  ;;  %v4042_v45 = vmax.f32 %v4034_v10, 0.0 }
 0x8b2   : > { %v4142_v43 = vmax.f32 %v4134_v36, 0.0 }
 0x8b3   : > { %v3951_v61 = vpop.f32.mrf.mxu2 }
 0x8b4   : > { %v4017_v7 = vadd.f32 %v4016_v57, %v3951_v61  ;;  %v4008_v57 = vadd.f32 %v10303_v40, %v10307_v24 }
 0x8b5   : > { %v4077_v13 = vpop.f32.mrf.mxu0 }
 0x8b6   : > { %v4119_v11 = vadd.f32 %v4118_v49, %v4077_v13  ;;  %v4035_v19 = vadd.f32 %v7911_v26, %v4017_v7  ;;  %v4033_v49 = vadd.f32 %v7911_v26, %v4011_v28  ;;  %v4032_v13 = vadd.f32 %v7911_v26, %v4008_v57  ;;  %v7963_v28 = vld [vmem:[%s11667_s7 + $0xc8] sm:$0xff] }
 0x8b8   : > { %v4135_v35 = vadd.f32 %v7910_v0, %v4119_v11  ;;  %v4043_v61 = vmax.f32 %v4035_v19, 0.0  ;;  %v4041_v40 = vmax.f32 %v4033_v49, 0.0  ;;  %v4040_v24 = vmax.f32 %v4032_v13, 0.0  ;;  %v7952_v11 = vld [vmem:[%s11667_s7 + $0x70] sm:$0xff] }
 0x8ba   : > { %v4143_v52 = vmax.f32 %v4135_v35, 0.0 }
 0x8bb   : > { %v3954_v56 = vpop.f32.mrf.mxu2 }
 0x8bc   : > { %v4020_v23 = vadd.f32 %v4019_v59, %v3954_v56  ;;  %v4139_v59 = vmax.f32 %v4131_v38, 0.0  ;;  %v7940_v56 = vld [vmem:[%s11667_s7 + $0x10] sm:$0xff] }
 0x8bd   : > { %v4080_v46 = vpop.f32.mrf.mxu0 }
 0x8be   : > { %v4122_v47 = vadd.f32 %v4121_v50, %v4080_v46  ;;  %v4036_v60 = vadd.f32 %v7911_v26, %v4020_v23  ;;  %v7939_v50 = vld [vmem:[%s11667_s7 + $0x8] sm:$0xff]  ;;  %v7941_v46 = vld [vmem:[%s11667_s7 + $0x18] sm:$0xff]  ;;  %v7576_v23 = vld [vmem:[%s11664_s4 + $0x70] sm:$0xff] }
 0x8bf   : > { %4655 = vmatpush.msra.mxu0 %v7576_v23 }
 0x8c0   : > { %v4136_v8 = vadd.f32 %v7910_v0, %v4122_v47  ;;  %v4044_v48 = vmax.f32 %v4036_v60, 0.0  ;;  %v7574_v47 = vld [vmem:[%s11664_s4 + $0x60] sm:$0xff]  ;;  %v10478_v60 = vld [vmem:[%s11665_s5 + $0x30] sm:$0xff] }
 0x8c1   : > { %v10486_v38 = vperm.slane %v10478_v60, 1 }
 0x8c2   : > { %v4144_v54 = vmax.f32 %v4136_v8, 0.0  ;;  %v7955_v8 = vld [vmem:[%s11667_s7 + $0x88] sm:$0xff] }
 0x8c3   : > { %v3957_v31 = vpop.f32.mrf.mxu2 }
 0x8c4   : > { %v4023_v30 = vadd.f32 %v4022_v1, %v3957_v31  ;;  %v7942_v1 = vld [vmem:[%s11667_s7 + $0x20] sm:$0xff]  ;;  %v7944_v31 = vld [vmem:[%s11667_s7 + $0x30] sm:$0xff] }
 0x8c5   : > { %v4083_v44 = vpop.f32.mrf.mxu0 }
 0x8c6   : > { %v4125_v3 = vadd.f32 %v4124_v17, %v4083_v44  ;;  %v4037_v62 = vadd.f32 %v7911_v26, %v4023_v30  ;;  %v7943_v17 = vld [vmem:[%s11667_s7 + $0x28] sm:$0xff]  ;;  %v7945_v44 = vld [vmem:[%s11667_s7 + $0x38] sm:$0xff] }
 0x8c8   : > { %v4137_v9 = vadd.f32 %v7910_v0, %v4125_v3  ;;  %v4045_v20 = vmax.f32 %v4037_v62, 0.0  ;;  %v7948_v3 = vld [vmem:[%s11667_s7 + $0x50] sm:$0xff]  ;;  %v7961_v62 = vld [vmem:[%s11667_s7 + $0xb8] sm:$0xff] }
 0x8ca   : > { %v4145_v18 = vmax.f32 %v4137_v9, 0.0  ;;  %v7953_v9 = vld [vmem:[%s11667_s7 + $0x78] sm:$0xff] }
 0x8cb   : > { %v3960_v32 = vpop.f32.mrf.mxu2 }
 0x8cc   : > { %v4026_v33 = vadd.f32 %v4025_v25, %v3960_v32  ;;  %v7946_v25 = vld [vmem:[%s11667_s7 + $0x40] sm:$0xff]  ;;  %v7947_v32 = vld [vmem:[%s11667_s7 + $0x48] sm:$0xff] }
 0x8cd   : > { %v4086_v34 = vpop.f32.mrf.mxu0 }
 0x8ce   : > { %v4128_v21 = vadd.f32 %v4127_v14, %v4086_v34  ;;  %v4038_v58 = vadd.f32 %v7911_v26, %v4026_v33  ;;  %v7949_v14 = vld [vmem:[%s11667_s7 + $0x58] sm:$0xff]  ;;  %v7950_v34 = vld [vmem:[%s11667_s7 + $0x60] sm:$0xff] }
 0x8d0   : > { %v4138_v12 = vadd.f32 %v7910_v0, %v4128_v21  ;;  %v4046_v53 = vmax.f32 %v4038_v58, 0.0  ;;  %v7575_v0 = vld [vmem:[%s11664_s4 + $0x68] sm:$0xff] }
 0x8d1   : > { %4719 = vmatpush.msra.mxu1 %v7575_v0  ;;  %v7951_v21 = vld [vmem:[%s11667_s7 + $0x68] sm:$0xff] }
 0x8d2   : > { %v4146_v51 = vmax.f32 %v4138_v12, 0.0  ;;  %v7954_v12 = vld [vmem:[%s11667_s7 + $0x80] sm:$0xff]  ;;  %v7959_v58 = vld [vmem:[%s11667_s7 + $0xa8] sm:$0xff] }
 0x8d3   : > { %v3963_v5 = vpop.f32.mrf.mxu2  ;;  %4720 = vmatpush.msra.mxu1 %v7574_v47 }
 0x8d4   : > { %v4029_v41 = vadd.f32 %v4028_v55, %v3963_v5  ;;  %4316 = vmatpush.msrb.mxu3 %v4146_v51  ;;  %v7956_v55 = vld [vmem:[%s11667_s7 + $0x90] sm:$0xff] }
 0x8d6   : > { %v4039_v27 = vadd.f32 %v7911_v26, %v4029_v41  ;;  %4317 = vmatpush.msrb.mxu3 %v4145_v18  ;;  %v7957_v26 = vld [vmem:[%s11667_s7 + $0x98] sm:$0xff]  ;;  %v7958_v41 = vld [vmem:[%s11667_s7 + $0xa0] sm:$0xff] }
 0x8d8   : > { %v4047_v4 = vmax.f32 %v4039_v27, 0.0  ;;  %4318 = vmatpush.msrb.mxu3 %v4144_v54 }
 0x8da   : > { %4155 = vmatpush.msrb.mxu2 %v4047_v4  ;;  %4319 = vmatpush.msrb.mxu3 %v4143_v52 }
 0x8dc   : > { %4156 = vmatpush.msrb.mxu2 %v4046_v53  ;;  %4320 = vmatpush.msrb.mxu3 %v4142_v43  ;;  %v10482_v43 = vperm.slane %v10478_v60, 0 }
 0x8de   : > { %4157 = vmatpush.msrb.mxu2 %v4045_v20  ;;  %4321 = vmatpush.msrb.mxu3 %v4141_v39 }
 0x8e0   : > { %4158 = vmatpush.msrb.mxu2 %v4044_v48  ;;  %4322 = vmatpush.msrb.mxu3 %v4140_v16  ;;  %v7964_v48 = vld [vmem:[%s11667_s7 + $0xd0] sm:$0xff] }
 0x8e2   : > { %4159 = vmatpush.msrb.mxu2 %v4043_v61  ;;  %4323 = vmatpush.msrb.mxu3 %v4139_v59 }
 0x8e3   : > { %7526 = vmatmul.msk.f32.vlgmr.msrb.gmra.mxu3 %vm2501_vm3, %v7938_v37 }
 0x8e4   : > { %4160 = vmatpush.msrb.mxu2 %v4042_v45  ;;  %v7965_v45 = vld [vmem:[%s11667_s7 + $0xd8] sm:$0xff] }
 0x8e6   : > { %4161 = vmatpush.msrb.mxu2 %v4041_v40 }
 0x8e8   : > { %4162 = vmatpush.msrb.mxu2 %v4040_v24 }
 0x8e9   : > { %7478 = vmatmul.msk.f32.vlgmr.msrb.gmra.mxu2 %vm2501_vm3, %v7938_v37 }
 0x8eb   : > { %7527 = vmatmul.msk.f32.gmra.mxu3 %vm2501_vm3, %v7939_v50 }
 0x8f1   : > { %7479 = vmatmul.msk.f32.gmra.mxu2 %vm2501_vm3, %v7939_v50 }
 0x8f3   : > { %7528 = vmatmul.msk.f32.gmra.mxu3 %vm2501_vm3, %v7940_v56 }
 0x8f9   : > { %7480 = vmatmul.msk.f32.gmra.mxu2 %vm2501_vm3, %v7940_v56 }
 0x8fb   : > { %7529 = vmatmul.msk.f32.gmra.mxu3 %vm2501_vm3, %v7941_v46 }
 0x901   : > { %7481 = vmatmul.msk.f32.gmra.mxu2 %vm2501_vm3, %v7941_v46  ;;  %v7966_v46 = vld [vmem:[%s11667_s7 + $0xe0] sm:$0xff] }
 0x903   : > { %7530 = vmatmul.msk.f32.gmra.mxu3 %vm2501_vm3, %v7942_v1 }
 0x909   : > { %7482 = vmatmul.msk.f32.gmra.mxu2 %vm2501_vm3, %v7942_v1 }
 0x90b   : > { %7531 = vmatmul.msk.f32.gmra.mxu3 %vm2501_vm3, %v7943_v17 }
 0x911   : > { %7483 = vmatmul.msk.f32.gmra.mxu2 %vm2501_vm3, %v7943_v17  ;;  %v7595_v17 = vld [vmem:[%s11664_s4 + $0x88] sm:$0xff] }
 0x912   : > { %4787 = vmatpush.msrb.mxu0 %v7595_v17 }
 0x913   : > { %7532 = vmatmul.msk.f32.gmra.mxu3 %vm2501_vm3, %v7944_v31 }
 0x919   : > { %7484 = vmatmul.msk.f32.gmra.mxu2 %vm2501_vm3, %v7944_v31 }
 0x91b   : > { %7533 = vmatmul.msk.f32.gmra.mxu3 %vm2501_vm3, %v7945_v44 }
 0x921   : > { %7485 = vmatmul.msk.f32.gmra.mxu2 %vm2501_vm3, %v7945_v44 }
 0x923   : > { %7534 = vmatmul.msk.f32.gmra.mxu3 %vm2501_vm3, %v7946_v25 }
 0x929   : > { %7486 = vmatmul.msk.f32.gmra.mxu2 %vm2501_vm3, %v7946_v25 }
 0x92b   : > { %7535 = vmatmul.msk.f32.gmra.mxu3 %vm2501_vm3, %v7947_v32 }
 0x931   : > { %7487 = vmatmul.msk.f32.gmra.mxu2 %vm2501_vm3, %v7947_v32  ;;  %v7594_v32 = vld [vmem:[%s11664_s4 + $0x80] sm:$0xff] }
 0x932   : > { %4788 = vmatpush.msrb.mxu0 %v7594_v32  ;;  %v7978_v32 = vld [vmem:[%s11667_s7 + $0x140] sm:$0xff] }
 0x933   : > { %7536 = vmatmul.msk.f32.gmra.mxu3 %vm2501_vm3, %v7948_v3 }
 0x939   : > { %7488 = vmatmul.msk.f32.gmra.mxu2 %vm2501_vm3, %v7948_v3 }
 0x93b   : > { %7537 = vmatmul.msk.f32.gmra.mxu3 %vm2501_vm3, %v7949_v14 }
 0x941   : > { %7489 = vmatmul.msk.f32.gmra.mxu2 %vm2501_vm3, %v7949_v14  ;;  %v7967_v14 = vld [vmem:[%s11667_s7 + $0xe8] sm:$0xff] }
 0x943   : > { %7538 = vmatmul.msk.f32.gmra.mxu3 %vm2501_vm3, %v7950_v34 }
 0x949   : > { %7490 = vmatmul.msk.f32.gmra.mxu2 %vm2501_vm3, %v7950_v34 }
 0x94b   : > { %7539 = vmatmul.msk.f32.gmra.mxu3 %vm2501_vm3, %v7951_v21 }
 0x951   : > { %7491 = vmatmul.msk.f32.gmra.mxu2 %vm2501_vm3, %v7951_v21 }
 0x953   : > { %7540 = vmatmul.msk.f32.gmra.mxu3 %vm2501_vm3, %v7952_v11 }
 0x959   : > { %7492 = vmatmul.msk.f32.gmra.mxu2 %vm2501_vm3, %v7952_v11 }
 0x95b   : > { %7541 = vmatmul.msk.f32.gmra.mxu3 %vm2501_vm3, %v7953_v9 }
 0x961   : > { %7493 = vmatmul.msk.f32.gmra.mxu2 %vm2501_vm3, %v7953_v9  ;;  %v7968_v9 = vld [vmem:[%s11667_s7 + $0xf0] sm:$0xff] }
 0x963   : > { %7542 = vmatmul.msk.f32.gmra.mxu3 %vm2501_vm3, %v7954_v12 }
 0x966   : > { %v4325_v29 = vpop.f32.mrf.mxu3 }
 0x967   : > { %7586 = vmatmul.msk.f32.vlgmr.msra.gmra.mxu1 %vm2254_vm2, %v4325_v29 }
 0x969   : > { %7494 = vmatmul.msk.f32.gmra.mxu2 %vm2501_vm3, %v7954_v12 }
 0x96b   : > { %7543 = vmatmul.msk.f32.gmra.mxu3 %vm2501_vm3, %v7955_v8 }
 0x96c   : > { %v4164_v33 = vpop.f32.mrf.mxu2 }
 0x96d   : > { %v4472_v20 = vmul.f32 %v10482_v43, %v4164_v33 }
 0x96e   : > { %v4328_v51 = vpop.f32.mrf.mxu3 }
 0x96f   : > { %7587 = vmatmul.msk.f32.gmra.mxu1 %vm2254_vm2, %v4328_v51 }
 0x971   : > { %7495 = vmatmul.msk.f32.gmra.mxu2 %vm2501_vm3, %v7955_v8 }
 0x973   : > { %7544 = vmatmul.msk.f32.gmra.mxu3 %vm2501_vm3, %v7956_v55 }
 0x974   : > { %v4167_v15 = vpop.f32.mrf.mxu2 }
 0x975   : > { %v4473_v49 = vmul.f32 %v10482_v43, %v4167_v15 }
 0x976   : > { %v4331_v5 = vpop.f32.mrf.mxu3 }
 0x977   : > { %7588 = vmatmul.msk.f32.gmra.mxu1 %vm2254_vm2, %v4331_v5 }
 0x979   : > { %7496 = vmatmul.msk.f32.gmra.mxu2 %vm2501_vm3, %v7956_v55  ;;  %v7969_v55 = vld [vmem:[%s11667_s7 + $0xf8] sm:$0xff] }
 0x97b   : > { %7545 = vmatmul.msk.f32.gmra.mxu3 %vm2501_vm3, %v7957_v26 }
 0x97c   : > { %v4170_v35 = vpop.f32.mrf.mxu2 }
 0x97d   : > { %v4474_v40 = vmul.f32 %v10482_v43, %v4170_v35 }
 0x97e   : > { %v4334_v30 = vpop.f32.mrf.mxu3 }
 0x97f   : > { %7589 = vmatmul.msk.f32.gmra.mxu1 %vm2254_vm2, %v4334_v30 }
 0x981   : > { %7497 = vmatmul.msk.f32.gmra.mxu2 %vm2501_vm3, %v7957_v26 }
 0x983   : > { %7546 = vmatmul.msk.f32.gmra.mxu3 %vm2501_vm3, %v7958_v41 }
 0x984   : > { %v10435_v18 = vpop.f32.mrf.mxu2 }
 0x985   : > { %v4475_v31 = vmul.f32 %v10482_v43, %v10435_v18 }
 0x986   : > { %v4337_v36 = vpop.f32.mrf.mxu3 }
 0x987   : > { %7590 = vmatmul.msk.f32.gmra.mxu1 %vm2254_vm2, %v4337_v36 }
 0x989   : > { %7498 = vmatmul.msk.f32.gmra.mxu2 %vm2501_vm3, %v7958_v41  ;;  %v7970_v41 = vld [vmem:[%s11667_s7 + $0x100] sm:$0xff] }
 0x98b   : > { %7547 = vmatmul.msk.f32.gmra.mxu3 %vm2501_vm3, %v7959_v58 }
 0x98c   : > { %v10449_v27 = vpop.f32.mrf.mxu2 }
 0x98d   : > { %v4476_v0 = vmul.f32 %v10482_v43, %v10449_v27  ;;  %v10580_v27 = vperm.slane %v10478_v60, 2 }
 0x98e   : > { %v4340_v54 = vpop.f32.mrf.mxu3 }
 0x98f   : > { %7591 = vmatmul.msk.f32.gmra.mxu1 %vm2254_vm2, %v4340_v54  ;;  %v7971_v54 = vld [vmem:[%s11667_s7 + $0x108] sm:$0xff] }
 0x991   : > { %7499 = vmatmul.msk.f32.gmra.mxu2 %vm2501_vm3, %v7959_v58 }
 0x993   : > { %7548 = vmatmul.msk.f32.gmra.mxu3 %vm2501_vm3, %v7960_v42 }
 0x994   : > { %v10457_v6 = vpop.f32.mrf.mxu2 }
 0x995   : > { %v4477_v29 = vmul.f32 %v10482_v43, %v10457_v6 }
 0x996   : > { %v4343_v7 = vpop.f32.mrf.mxu3 }
 0x997   : > { %7592 = vmatmul.msk.f32.gmra.mxu1 %vm2254_vm2, %v4343_v7 }
 0x999   : > { %7500 = vmatmul.msk.f32.gmra.mxu2 %vm2501_vm3, %v7960_v42 }
 0x99b   : > { %7549 = vmatmul.msk.f32.gmra.mxu3 %vm2501_vm3, %v7961_v62 }
 0x99c   : > { %v10465_v4 = vpop.f32.mrf.mxu2 }
 0x99d   : > { %v4478_v5 = vmul.f32 %v10482_v43, %v10465_v4  ;;  %v7972_v4 = vld [vmem:[%s11667_s7 + $0x110] sm:$0xff] }
 0x99e   : > { %v4346_v52 = vpop.f32.mrf.mxu3 }
 0x99f   : > { %7593 = vmatmul.msk.f32.gmra.mxu1 %vm2254_vm2, %v4346_v52 }
 0x9a1   : > { %7501 = vmatmul.msk.f32.gmra.mxu2 %vm2501_vm3, %v7961_v62 }
 0x9a3   : > { %7550 = vmatmul.msk.f32.gmra.mxu3 %vm2501_vm3, %v7962_v22 }
 0x9a4   : > { %v10473_v2 = vpop.f32.mrf.mxu2 }
 0x9a5   : > { %v4479_v63 = vmul.f32 %v10482_v43, %v10473_v2 }
 0x9a6   : > { %v4349_v53 = vpop.f32.mrf.mxu3 }
 0x9a7   : > { %7578 = vmatmul.msk.f32.vlgmr.msra.gmra.mxu0 %vm2254_vm2, %v4349_v53  ;;  %v7973_v53 = vld [vmem:[%s11667_s7 + $0x118] sm:$0xff] }
 0x9a9   : > { %7502 = vmatmul.msk.f32.gmra.mxu2 %vm2501_vm3, %v7962_v22 }
 0x9ab   : > { %7551 = vmatmul.msk.f32.gmra.mxu3 %vm2501_vm3, %v7963_v28 }
 0x9ac   : > { %v4188_v19 = vpop.f32.mrf.mxu2 }
 0x9ad   : > { %v4481_v39 = vmul.f32 %v10486_v38, %v4188_v19 }
 0x9ae   : > { %v4352_v57 = vpop.f32.mrf.mxu3 }
 0x9af   : > { %7579 = vmatmul.msk.f32.gmra.mxu0 %vm2254_vm2, %v4352_v57  ;;  %v10495_v10 = vadd.f32 %v4481_v39, %v4472_v20  ;;  %v7974_v20 = vld [vmem:[%s11667_s7 + $0x120] sm:$0xff]  ;;  %v7605_v57 = vld [vmem:[%s11664_s4 + $0x98] sm:$0xff] }
 0x9b0   : > { %4949 = vmatpush.msra.mxu0 %v7605_v57 }
 0x9b1   : > { %7503 = vmatmul.msk.f32.gmra.mxu2 %vm2501_vm3, %v7963_v28 }
 0x9b3   : > { %7552 = vmatmul.msk.f32.gmra.mxu3 %vm2501_vm3, %v7964_v48 }
 0x9b4   : > { %v4191_v16 = vpop.f32.mrf.mxu2 }
 0x9b5   : > { %v4482_v61 = vmul.f32 %v10486_v38, %v4191_v16  ;;  %v7604_v16 = vld [vmem:[%s11664_s4 + $0x90] sm:$0xff] }
 0x9b6   : > { %v4355_v59 = vpop.f32.mrf.mxu3  ;;  %4950 = vmatpush.msra.mxu0 %v7604_v16 }
 0x9b7   : > { %7580 = vmatmul.msk.f32.gmra.mxu0 %vm2254_vm2, %v4355_v59  ;;  %v10505_v13 = vadd.f32 %v4482_v61, %v4473_v49  ;;  %v7975_v61 = vld [vmem:[%s11667_s7 + $0x128] sm:$0xff] }
 0x9b9   : > { %7504 = vmatmul.msk.f32.gmra.mxu2 %vm2501_vm3, %v7964_v48 }
 0x9bb   : > { %7553 = vmatmul.msk.f32.gmra.mxu3 %vm2501_vm3, %v7965_v45 }
 0x9bc   : > { %v4194_v37 = vpop.f32.mrf.mxu2 }
 0x9bd   : > { %v4483_v24 = vmul.f32 %v10486_v38, %v4194_v37 }
 0x9be   : > { %v4358_v50 = vpop.f32.mrf.mxu3 }
 0x9bf   : > { %7581 = vmatmul.msk.f32.gmra.mxu0 %vm2254_vm2, %v4358_v50  ;;  %v10515_v56 = vadd.f32 %v4483_v24, %v4474_v40  ;;  %v7976_v40 = vld [vmem:[%s11667_s7 + $0x130] sm:$0xff] }
 0x9c1   : > { %7505 = vmatmul.msk.f32.gmra.mxu2 %vm2501_vm3, %v7965_v45 }
 0x9c3   : > { %7554 = vmatmul.msk.f32.gmra.mxu3 %vm2501_vm3, %v7966_v46 }
 0x9c4   : > { %v4197_v1 = vpop.f32.mrf.mxu2 }
 0x9c5   : > { %v4484_v44 = vmul.f32 %v10486_v38, %v4197_v1  ;;  %v7977_v1 = vld [vmem:[%s11667_s7 + $0x138] sm:$0xff] }
 0x9c6   : > { %v4361_v25 = vpop.f32.mrf.mxu3 }
 0x9c7   : > { %7582 = vmatmul.msk.f32.gmra.mxu0 %vm2254_vm2, %v4361_v25  ;;  %v10532_v3 = vadd.f32 %v4484_v44, %v4475_v31 }
 0x9c9   : > { %7506 = vmatmul.msk.f32.gmra.mxu2 %vm2501_vm3, %v7966_v46 }
 0x9cb   : > { %7555 = vmatmul.msk.f32.gmra.mxu3 %vm2501_vm3, %v7967_v14 }
 0x9cc   : > { %v4200_v34 = vpop.f32.mrf.mxu2 }
 0x9cd   : > { %v4485_v47 = vmul.f32 %v10486_v38, %v4200_v34 }
 0x9ce   : > { %v4364_v21 = vpop.f32.mrf.mxu3 }
 0x9cf   : > { %7583 = vmatmul.msk.f32.gmra.mxu0 %vm2254_vm2, %v4364_v21  ;;  %v10543_v11 = vadd.f32 %v4485_v47, %v4476_v0  ;;  %v7979_v47 = vld [vmem:[%s11667_s7 + $0x148] sm:$0xff] }
 0x9d1   : > { %7507 = vmatmul.msk.f32.gmra.mxu2 %vm2501_vm3, %v7967_v14 }
 0x9d3   : > { %7556 = vmatmul.msk.f32.gmra.mxu3 %vm2501_vm3, %v7968_v9 }
 0x9d4   : > { %v4203_v12 = vpop.f32.mrf.mxu2 }
 0x9d5   : > { %v4486_v8 = vmul.f32 %v10486_v38, %v4203_v12 }
 0x9d6   : > { %v4367_v33 = vpop.f32.mrf.mxu3 }
 0x9d7   : > { %7584 = vmatmul.msk.f32.gmra.mxu0 %vm2254_vm2, %v4367_v33  ;;  %v10554_v51 = vadd.f32 %v4486_v8, %v4477_v29  ;;  %v7981_v8 = vld [vmem:[%s11667_s7 + $0x158] sm:$0xff] }
 0x9d9   : > { %7508 = vmatmul.msk.f32.gmra.mxu2 %vm2501_vm3, %v7968_v9  ;;  %v7980_v9 = vld [vmem:[%s11667_s7 + $0x150] sm:$0xff] }
 0x9db   : > { %7557 = vmatmul.msk.f32.gmra.mxu3 %vm2501_vm3, %v7969_v55 }
 0x9dc   : > { %v4206_v15 = vpop.f32.mrf.mxu2 }
 0x9dd   : > { %v4487_v26 = vmul.f32 %v10486_v38, %v4206_v15  ;;  %v7982_v15 = vld [vmem:[%s11667_s7 + $0x160] sm:$0xff] }
 0x9de   : > { %v4370_v35 = vpop.f32.mrf.mxu3 }
 0x9df   : > { %7585 = vmatmul.msk.f32.gmra.mxu0 %vm2254_vm2, %v4370_v35  ;;  %v10565_v30 = vadd.f32 %v4487_v26, %v4478_v5  ;;  %v7606_v35 = vld [vmem:[%s11664_s4 + $0xa0] sm:$0xff] }
 0x9e1   : > { %7509 = vmatmul.msk.f32.gmra.mxu2 %vm2501_vm3, %v7969_v55  ;;  %v7607_v55 = vld [vmem:[%s11664_s4 + $0xa8] sm:$0xff] }
 0x9e2   : > { %4884 = vmatpush.msrb.mxu1 %v7607_v55 }
 0x9e3   : > { %7558 = vmatmul.msk.f32.gmra.mxu3 %vm2501_vm3, %v7970_v41 }
 0x9e4   : > { %v4209_v18 = vpop.f32.mrf.mxu2  ;;  %4885 = vmatpush.msrb.mxu1 %v7606_v35 }
 0x9e5   : > { %v4488_v36 = vmul.f32 %v10486_v38, %v4209_v18 }
 0x9e6   : > { %v4373_v23 = vpop.f32.mrf.mxu3 }
 0x9e7   : > { %7596 = vmatmul.msk.f32.vlgmr.msrb.gmra.mxu0 %vm2254_vm2, %v4373_v23  ;;  %v10576_v58 = vadd.f32 %v4488_v36, %v4479_v63  ;;  %v7984_v63 = vld [vmem:[%s11667_s7 + $0x170] sm:$0xff] }
 0x9e9   : > { %7510 = vmatmul.msk.f32.gmra.mxu2 %vm2501_vm3, %v7970_v41 }
 0x9eb   : > { %7559 = vmatmul.msk.f32.gmra.mxu3 %vm2501_vm3, %v7971_v54 }
 0x9ec   : > { %v4212_v42 = vpop.f32.mrf.mxu2 }
 0x9ed   : > { %v4498_v6 = vmul.f32 %v10580_v27, %v4212_v42 }
 0x9ee   : > { %v4376_v7 = vpop.f32.mrf.mxu3 }
 0x9ef   : > { %7597 = vmatmul.msk.f32.gmra.mxu0 %vm2254_vm2, %v4376_v7  ;;  %v10589_v62 = vadd.f32 %v4498_v6, %v10495_v10 }
 0x9f1   : > { %7511 = vmatmul.msk.f32.gmra.mxu2 %vm2501_vm3, %v7971_v54 }
 0x9f3   : > { %7560 = vmatmul.msk.f32.gmra.mxu3 %vm2501_vm3, %v7972_v4 }
 0x9f4   : > { %v4215_v52 = vpop.f32.mrf.mxu2 }
 0x9f5   : > { %v4499_v22 = vmul.f32 %v10580_v27, %v4215_v52 }
 0x9f6   : > { %v4379_v2 = vpop.f32.mrf.mxu3 }
 0x9f7   : > { %7598 = vmatmul.msk.f32.gmra.mxu0 %vm2254_vm2, %v4379_v2  ;;  %v10599_v60 = vadd.f32 %v4499_v22, %v10505_v13 }
 0x9f9   : > { %7512 = vmatmul.msk.f32.gmra.mxu2 %vm2501_vm3, %v7972_v4 }
 0x9fb   : > { %7561 = vmatmul.msk.f32.gmra.mxu3 %vm2501_vm3, %v7973_v53 }
 0x9fc   : > { %v4218_v43 = vpop.f32.mrf.mxu2 }
 0x9fd   : > { %v4500_v38 = vmul.f32 %v10580_v27, %v4218_v43 }
 0x9fe   : > { %v4382_v28 = vpop.f32.mrf.mxu3 }
 0x9ff   : > { %7599 = vmatmul.msk.f32.gmra.mxu0 %vm2254_vm2, %v4382_v28  ;;  %v10609_v19 = vadd.f32 %v4500_v38, %v10515_v56 }
 0xa01   : > { %7513 = vmatmul.msk.f32.gmra.mxu2 %vm2501_vm3, %v7973_v53 }
 0xa03   : > { %7562 = vmatmul.msk.f32.gmra.mxu3 %vm2501_vm3, %v7974_v20 }
 0xa04   : > { %v4221_v39 = vpop.f32.mrf.mxu2 }
 0xa05   : > { %v4501_v10 = vmul.f32 %v10580_v27, %v4221_v39 }
 0xa06   : > { %v4385_v48 = vpop.f32.mrf.mxu3 }
 0xa07   : > { %7600 = vmatmul.msk.f32.gmra.mxu0 %vm2254_vm2, %v4385_v48  ;;  %v10625_v49 = vadd.f32 %v4501_v10, %v10532_v3  ;;  %v7624_v48 = vld [vmem:[%s11664_s4 + $0xb0] sm:$0xff] }
 0xa09   : > { %7514 = vmatmul.msk.f32.gmra.mxu2 %vm2501_vm3, %v7974_v20  ;;  %v7625_v20 = vld [vmem:[%s11664_s4 + $0xb8] sm:$0xff] }
 0xa0a   : > { %5017 = vmatpush.msra.mxu1 %v7625_v20 }
 0xa0b   : > { %7563 = vmatmul.msk.f32.gmra.mxu3 %vm2501_vm3, %v7975_v61 }
 0xa0c   : > { %v4224_v59 = vpop.f32.mrf.mxu2  ;;  %5018 = vmatpush.msra.mxu1 %v7624_v48 }
 0xa0d   : > { %v4502_v13 = vmul.f32 %v10580_v27, %v4224_v59 }
 0xa0e   : > { %v4388_v45 = vpop.f32.mrf.mxu3 }
 0xa0f   : > { %7601 = vmatmul.msk.f32.gmra.mxu0 %vm2254_vm2, %v4388_v45  ;;  %v10635_v37 = vadd.f32 %v4502_v13, %v10543_v11  ;;  %v7637_v45 = vld [vmem:[%s11663_s3 + $0xd8] sm:$0xff] }
 0xa10   : > { %5119 = vmatpush.msrb.mxu0 %v7637_v45 }
 0xa11   : > { %7515 = vmatmul.msk.f32.gmra.mxu2 %vm2501_vm3, %v7975_v61 }
 0xa13   : > { %7564 = vmatmul.msk.f32.gmra.mxu3 %vm2501_vm3, %v7976_v40 }
 0xa14   : > { %v4227_v24 = vpop.f32.mrf.mxu2 }
 0xa15   : > { %v4503_v50 = vmul.f32 %v10580_v27, %v4227_v24 }
 0xa16   : > { %v4391_v56 = vpop.f32.mrf.mxu3 }
 0xa17   : > { %7602 = vmatmul.msk.f32.gmra.mxu0 %vm2254_vm2, %v4391_v56  ;;  %v10645_v46 = vadd.f32 %v4503_v50, %v10554_v51  ;;  %v7636_v50 = vld [vmem:[%s11663_s3 + $0xd0] sm:$0xff] }
 0xa18   : > { %5120 = vmatpush.msrb.mxu0 %v7636_v50 }
 0xa19   : > { %7516 = vmatmul.msk.f32.gmra.mxu2 %vm2501_vm3, %v7976_v40  ;;  %v10763_v40 = vpop.f32.mrf.mxu1 }
 0xa1b   : > { %7565 = vmatmul.msk.f32.gmra.mxu3 %vm2501_vm3, %v7977_v1 }
 0xa1c   : > { %v4230_v17 = vpop.f32.mrf.mxu2 }
 0xa1d   : > { %v4504_v31 = vmul.f32 %v10580_v27, %v4230_v17 }
 0xa1e   : > { %v4394_v44 = vpop.f32.mrf.mxu3 }
 0xa1f   : > { %7603 = vmatmul.msk.f32.gmra.mxu0 %vm2254_vm2, %v4394_v44  ;;  %v10655_v25 = vadd.f32 %v4504_v31, %v10565_v30  ;;  %v7983_v30 = vld [vmem:[%s11667_s7 + $0x168] sm:$0xff]  ;;  %v4539_v44 = vld [vmem:[%s11665_s5 + $0x38] sm:$0xff] }
 0xa21   : > { %7517 = vmatmul.msk.f32.gmra.mxu2 %vm2501_vm3, %v7977_v1  ;;  %v10774_v31 = vpop.f32.mrf.mxu1 }
 0xa23   : > { %7566 = vmatmul.msk.f32.gmra.mxu3 %vm2501_vm3, %v7978_v32 }
 0xa24   : > { %v4233_v3 = vpop.f32.mrf.mxu2  ;;  %v10733_v7 = vpop.f32.mrf.mxu0 }
 0xa25   : > { %v4505_v14 = vmul.f32 %v10580_v27, %v4233_v3 }
 0xa26   : > { %v4397_v34 = vpop.f32.mrf.mxu3 }
 0xa27   : > { %v10664_v0 = vadd.f32 %v4505_v14, %v10576_v58  ;;  %7616 = vmatmul.msk.f32.vlgmr.msra.gmra.mxu0 %vm2254_vm2, %v4397_v34  ;;  %v7985_v58 = vld [vmem:[%s11667_s7 + $0x178] sm:$0xff]  ;;  %v10783_v14 = vperm.slane %v4539_v44, 1 }
 0xa29   : > { %7518 = vmatmul.msk.f32.gmra.mxu2 %vm2501_vm3, %v7978_v32 }
 0xa2b   : > { %7567 = vmatmul.msk.f32.gmra.mxu3 %vm2501_vm3, %v7979_v47 }
 0xa2c   : > { %v10672_v21 = vpop.f32.mrf.mxu2  ;;  %v10736_v22 = vpop.f32.mrf.mxu0 }
 0xa2e   : > { %v4400_v11 = vpop.f32.mrf.mxu3 }
 0xa2f   : > { %7617 = vmatmul.msk.f32.gmra.mxu0 %vm2254_vm2, %v4400_v11 }
 0xa31   : > { %7519 = vmatmul.msk.f32.gmra.mxu2 %vm2501_vm3, %v7979_v47  ;;  %v10785_v47 = vperm.slane %v4539_v44, 0 }
 0xa33   : > { %7568 = vmatmul.msk.f32.gmra.mxu3 %vm2501_vm3, %v7980_v9 }
 0xa34   : > { %v10680_v12 = vpop.f32.mrf.mxu2  ;;  %v10739_v43 = vpop.f32.mrf.mxu0 }
 0xa36   : > { %v4403_v29 = vpop.f32.mrf.mxu3 }
 0xa37   : > { %7618 = vmatmul.msk.f32.gmra.mxu0 %vm2254_vm2, %v4403_v29  ;;  %v10791_v29 = vpop.f32.mrf.mxu1 }
 0xa39   : > { %7520 = vmatmul.msk.f32.gmra.mxu2 %vm2501_vm3, %v7980_v9  ;;  %v10789_v9 = vperm.slane %v4539_v44, 2 }
 0xa3b   : > { %7569 = vmatmul.msk.f32.gmra.mxu3 %vm2501_vm3, %v7981_v8 }
 0xa3c   : > { %v10688_v33 = vpop.f32.mrf.mxu2  ;;  %v10747_v57 = vpop.f32.mrf.mxu0 }
 0xa3d   : > { %v4544_v48 = vmul.f32 %v10785_v47, %v10688_v33 }
 0xa3e   : > { %v4406_v51 = vpop.f32.mrf.mxu3 }
 0xa3f   : > { %7619 = vmatmul.msk.f32.gmra.mxu0 %vm2254_vm2, %v4406_v51 }
 0xa41   : > { %7521 = vmatmul.msk.f32.gmra.mxu2 %vm2501_vm3, %v7981_v8  ;;  %v4542_v8 = vmul.f32 %v10785_v47, %v10672_v21  ;;  %v4543_v21 = vmul.f32 %v10785_v47, %v10680_v12 }
 0xa43   : > { %7570 = vmatmul.msk.f32.gmra.mxu3 %vm2501_vm3, %v7982_v15 }
 0xa44   : > { %v10699_v5 = vpop.f32.mrf.mxu2  ;;  %v10756_v59 = vpop.f32.mrf.mxu0 }
 0xa46   : > { %v4409_v26 = vpop.f32.mrf.mxu3 }
 0xa47   : > { %7620 = vmatmul.msk.f32.gmra.mxu0 %vm2254_vm2, %v4409_v26  ;;  %v10799_v26 = vld [vmem:[%s11662_s2 + $0xf] ss:$0 sm:$0xff] }
 0xa49   : > { %7522 = vmatmul.msk.f32.gmra.mxu2 %vm2501_vm3, %v7982_v15 }
 0xa4b   : > { %7571 = vmatmul.msk.f32.gmra.mxu3 %vm2501_vm3, %v7983_v30 }
 0xa4c   : > { %v10710_v41 = vpop.f32.mrf.mxu2  ;;  %v10769_v56 = vpop.f32.mrf.mxu0 }
 0xa4e   : > { %v4412_v18 = vpop.f32.mrf.mxu3 }
 0xa4f   : > { %7621 = vmatmul.msk.f32.gmra.mxu0 %vm2254_vm2, %v4412_v18 }
 0xa51   : > { %7523 = vmatmul.msk.f32.gmra.mxu2 %vm2501_vm3, %v7983_v30 }
 0xa53   : > { %7572 = vmatmul.msk.f32.gmra.mxu3 %vm2501_vm3, %v7984_v63 }
 0xa54   : > { %v10718_v36 = vpop.f32.mrf.mxu2  ;;  %v10779_v32 = vpop.f32.mrf.mxu0 }
 0xa56   : > { %v4415_v23 = vpop.f32.mrf.mxu3 }
 0xa57   : > { %7622 = vmatmul.msk.f32.gmra.mxu0 %vm2254_vm2, %v4415_v23 }
 0xa59   : > { %7524 = vmatmul.msk.f32.gmra.mxu2 %vm2501_vm3, %v7984_v63 }
 0xa5b   : > { %7573 = vmatmul.msk.f32.gmra.mxu3 %vm2501_vm3, %v7985_v58 }
 0xa5c   : > { %v10726_v27 = vpop.f32.mrf.mxu2  ;;  %v10801_v35 = vpop.f32.mrf.mxu0 }
 0xa5e   : > { %v4418_v54 = vpop.f32.mrf.mxu3 }
 0xa5f   : > { %7623 = vmatmul.msk.f32.gmra.mxu0 %vm2254_vm2, %v4418_v54  ;;  %v10808_v54 = vpop.f32.mrf.mxu1 }
 0xa61   : > { %7525 = vmatmul.msk.f32.gmra.mxu2 %vm2501_vm3, %v7985_v58 }
 0xa64   : > { %v10730_v42 = vpop.f32.mrf.mxu2 }
 0xa66   : > { %v4421_v6 = vpop.f32.mrf.mxu3 }
 0xa67   : > { %7608 = vmatmul.msk.f32.vlgmr.msrb.gmra.mxu1 %vm2254_vm2, %v4421_v6  ;;  %v10820_v44 = vpop.f32.mrf.mxu1 }
 0xa6c   : > { %v4260_v4 = vpop.f32.mrf.mxu2 }
 0xa6d   : > { %v4551_v11 = vmul.f32 %v10783_v14, %v4260_v4 }
 0xa6e   : > { %v4424_v52 = vpop.f32.mrf.mxu3 }
 0xa6f   : > { %7609 = vmatmul.msk.f32.gmra.mxu1 %vm2254_vm2, %v4424_v52  ;;  %v4559_v55 = vadd.f32 %v4551_v11, %v4542_v8 }
 0xa74   : > { %v4263_v2 = vpop.f32.mrf.mxu2 }
 0xa75   : > { %v4552_v63 = vmul.f32 %v10783_v14, %v4263_v2  ;;  %v10813_v2 = vpop.f32.mrf.mxu0 }
 0xa76   : > { %v4427_v53 = vpop.f32.mrf.mxu3 }
 0xa77   : > { %7610 = vmatmul.msk.f32.gmra.mxu1 %vm2254_vm2, %v4427_v53  ;;  %v4560_v4 = vadd.f32 %v4552_v63, %v4543_v21  ;;  %v7634_v63 = vld [vmem:[%s11663_s3 + $0xc0] sm:$0xff] }
 0xa7c   : > { %v4266_v38 = vpop.f32.mrf.mxu2 }
 0xa7d   : > { %v10827_v33 = vpop.f32.mrf.mxu0 }
 0xa7e   : > { %v4430_v28 = vpop.f32.mrf.mxu3 }
 0xa7f   : > { %7611 = vmatmul.msk.f32.gmra.mxu1 %vm2254_vm2, %v4430_v28 }
 0xa84   : > { %v10745_v39 = vpop.f32.mrf.mxu2 }
 0xa86   : > { %v4433_v10 = vpop.f32.mrf.mxu3 }
 0xa87   : > { %7612 = vmatmul.msk.f32.gmra.mxu1 %vm2254_vm2, %v4433_v10  ;;  %v4553_v10 = vmul.f32 %v10783_v14, %v4266_v38  ;;  %v4554_v38 = vmul.f32 %v10783_v14, %v10745_v39 }
 0xa8c   : > { %v10753_v16 = vpop.f32.mrf.mxu2 }
 0xa8e   : > { %v4436_v61 = vpop.f32.mrf.mxu3 }
 0xa8f   : > { %7613 = vmatmul.msk.f32.gmra.mxu1 %vm2254_vm2, %v4436_v61 }
 0xa94   : > { %v10758_v13 = vpop.f32.mrf.mxu2 }
 0xa96   : > { %v4439_v24 = vpop.f32.mrf.mxu3 }
 0xa97   : > { %7614 = vmatmul.msk.f32.gmra.mxu1 %vm2254_vm2, %v4439_v24  ;;  %v4561_v24 = vadd.f32 %v4553_v10, %v4544_v48 }
 0xa9c   : > { %v10771_v1 = vpop.f32.mrf.mxu2 }
 0xa9e   : > { %v4442_v17 = vpop.f32.mrf.mxu3 }
 0xa9f   : > { %7615 = vmatmul.msk.f32.gmra.mxu1 %vm2254_vm2, %v4442_v17 }
 0xaa4   : > { %v10781_v3 = vpop.f32.mrf.mxu2 }
 0xaa6   : > { %v4445_v34 = vpop.f32.mrf.mxu3 }
 0xaa7   : > { %7626 = vmatmul.msk.f32.vlgmr.msra.gmra.mxu1 %vm2254_vm2, %v4445_v34 }
 0xaac   : > { %v4284_v51 = vpop.f32.mrf.mxu2 }
 0xaad   : > { %v4568_v15 = vmul.f32 %v10789_v9, %v4284_v51  ;;  %v4545_v51 = vmul.f32 %v10785_v47, %v10699_v5  ;;  %v10840_v5 = vpop.f32.mrf.mxu1 }
 0xaae   : > { %v4448_v30 = vpop.f32.mrf.mxu3 }
 0xaaf   : > { %7627 = vmatmul.msk.f32.gmra.mxu1 %vm2254_vm2, %v4448_v30  ;;  %v4576_v18 = vadd.f32 %v4568_v15, %v4559_v55  ;;  %v7635_v15 = vld [vmem:[%s11663_s3 + $0xc8] sm:$0xff] }
 0xab0   : > { %5184 = vmatpush.msrb.mxu1 %v7635_v15 }
 0xab1   : > { %v4585_v23 = vadd.f32 %v10799_v26, %v4576_v18  ;;  %v4562_v18 = vadd.f32 %v4554_v38, %v4545_v51 }
 0xab2   : > { %5185 = vmatpush.msrb.mxu1 %v7634_v63 }
 0xab3   : > { %v4593_v58 = vmax.f32 %v4585_v23, 0.0 }
 0xab4   : > { %v4287_v6 = vpop.f32.mrf.mxu2 }
 0xab5   : > { %v4601_v52 = vmin.f32 %v4593_v58, 3.0  ;;  %v4569_v53 = vmul.f32 %v10789_v9, %v4287_v6  ;;  %v4555_v6 = vmul.f32 %v10783_v14, %v10753_v16  ;;  %v4556_v16 = vmul.f32 %v10783_v14, %v10758_v13  ;;  %v10867_v13 = vld [vmem:[%s11662_s2 + $0xe] ss:$0 sm:$0xff] }
 0xab6   : > { %v4451_v28 = vpop.f32.mrf.mxu3 }
 0xab7   : > { %7628 = vmatmul.msk.f32.gmra.mxu1 %vm2254_vm2, %v4451_v28  ;;  %v4577_v20 = vadd.f32 %v4569_v53, %v4560_v4  ;;  %7642 = vmatmul.msk.f32.vlgmr.msrb.gmra.mxu0 %vm2254_vm2, %v4601_v52  ;;  %v4546_v52 = vmul.f32 %v10785_v47, %v10710_v41  ;;  %v10847_v28 = vpop.f32.mrf.mxu0  ;;  %v10855_v41 = vpop.f32.mrf.mxu1 }
 0xab9   : > { %v4586_v12 = vadd.f32 %v10799_v26, %v4577_v20  ;;  %v4563_v10 = vadd.f32 %v4555_v6, %v4546_v52 }
 0xabb   : > { %v4594_v61 = vmax.f32 %v4586_v12, 0.0 }
 0xabc   : > { %v4290_v45 = vpop.f32.mrf.mxu2 }
 0xabd   : > { %v4602_v50 = vmin.f32 %v4594_v61, 3.0  ;;  %v4570_v17 = vmul.f32 %v10789_v9, %v4290_v45 }
 0xabe   : > { %v4454_v34 = vpop.f32.mrf.mxu3 }
 0xabf   : > { %7629 = vmatmul.msk.f32.gmra.mxu1 %vm2254_vm2, %v4454_v34  ;;  %v4578_v11 = vadd.f32 %v4570_v17, %v4561_v24  ;;  %7643 = vmatmul.msk.f32.gmra.mxu0 %vm2254_vm2, %v4602_v50  ;;  %v4547_v50 = vmul.f32 %v10785_v47, %v10718_v36  ;;  %v10860_v51 = vpop.f32.mrf.mxu0  ;;  %v4557_v36 = vmul.f32 %v10783_v14, %v10771_v1 }
 0xac1   : > { %v4587_v8 = vadd.f32 %v10799_v26, %v4578_v11  ;;  %v4564_v11 = vadd.f32 %v4556_v16, %v4547_v50  ;;  %v4516_v16 = vadd.f32 %v10867_v13, %v10599_v60  ;;  %v4517_v60 = vadd.f32 %v10867_v13, %v10609_v19 }
 0xac3   : > { %v4595_v55 = vmax.f32 %v4587_v8, 0.0 }
 0xac4   : > { %v4293_v30 = vpop.f32.mrf.mxu2 }
 0xac5   : > { %v4603_v39 = vmin.f32 %v4595_v55, 3.0  ;;  %v4571_v23 = vmul.f32 %v10789_v9, %v4293_v30 }
 0xac6   : > { %v4457_v21 = vpop.f32.mrf.mxu3 }
 0xac7   : > { %7630 = vmatmul.msk.f32.gmra.mxu1 %vm2254_vm2, %v4457_v21  ;;  %v4579_v58 = vadd.f32 %v4571_v23, %v4562_v18  ;;  %7644 = vmatmul.msk.f32.gmra.mxu0 %vm2254_vm2, %v4603_v39  ;;  %v4548_v18 = vmul.f32 %v10785_v47, %v10726_v27  ;;  %v4515_v39 = vadd.f32 %v10867_v13, %v10589_v62  ;;  %v10876_v23 = vpop.f32.mrf.mxu1 }
 0xac8   : > { %v4558_v27 = vmul.f32 %v10783_v14, %v10781_v3  ;;  %v4524_v14 = vmax.f32 %v4516_v16, 0.0 }
 0xac9   : > { %v4588_v4 = vadd.f32 %v10799_v26, %v4579_v58  ;;  %v4565_v58 = vadd.f32 %v4557_v36, %v4548_v18  ;;  %v4518_v36 = vadd.f32 %v10867_v13, %v10625_v49  ;;  %v7639_v49 = vld [vmem:[%s11663_s3 + $0xe8] sm:$0xff] }
 0xaca   : > { %5331 = vmatpush.msra.mxu1 %v7639_v49 }
 0xacb   : > { %v4596_v53 = vmax.f32 %v4588_v4, 0.0 }
 0xacc   : > { %v4296_v20 = vpop.f32.mrf.mxu2 }
 0xacd   : > { %v4604_v12 = vmin.f32 %v4596_v53, 3.0  ;;  %v4572_v48 = vmul.f32 %v10789_v9, %v4296_v20  ;;  %v4523_v53 = vmax.f32 %v4515_v39, 0.0  ;;  %v10881_v20 = vpop.f32.mrf.mxu0 }
 0xace   : > { %v4460_v61 = vpop.f32.mrf.mxu3 }
 0xacf   : > { %7631 = vmatmul.msk.f32.gmra.mxu1 %vm2254_vm2, %v4460_v61  ;;  %v4580_v45 = vadd.f32 %v4572_v48, %v4563_v10  ;;  %7645 = vmatmul.msk.f32.gmra.mxu0 %vm2254_vm2, %v4604_v12  ;;  %v4549_v10 = vmul.f32 %v10785_v47, %v10730_v42  ;;  %v4531_v48 = vmin.f32 %v4523_v53, 3.0 }
 0xad1   : > { %v4589_v24 = vadd.f32 %v10799_v26, %v4580_v45 }
 0xad3   : > { %v4597_v17 = vmax.f32 %v4589_v24, 0.0  ;;  %v4566_v24 = vadd.f32 %v4558_v27, %v4549_v10  ;;  %v7640_v27 = vld [vmem:[%s11663_s3 + $0xf0] sm:$0xff]  ;;  %v4521_v10 = vadd.f32 %v10867_v13, %v10655_v25 }
 0xad4   : > { %v4299_v34 = vpop.f32.mrf.mxu2 }
 0xad5   : > { %v4605_v38 = vmin.f32 %v4597_v17, 3.0  ;;  %v4573_v8 = vmul.f32 %v10789_v9, %v4299_v34  ;;  %v10896_v47 = vpop.f32.mrf.mxu0 }
 0xad6   : > { %v4463_v55 = vpop.f32.mrf.mxu3 }
 0xad7   : > { %7632 = vmatmul.msk.f32.gmra.mxu1 %vm2254_vm2, %v4463_v55  ;;  %v4581_v15 = vadd.f32 %v4573_v8, %v4564_v11  ;;  %7646 = vmatmul.msk.f32.gmra.mxu0 %vm2254_vm2, %v4605_v38  ;;  %v4532_v38 = vmin.f32 %v4524_v14, 3.0 }
 0xad9   : > { %v4590_v30 = vadd.f32 %v10799_v26, %v4581_v15 }
 0xadb   : > { %v4598_v63 = vmax.f32 %v4590_v30, 0.0  ;;  %v4526_v30 = vmax.f32 %v4518_v36, 0.0 }
 0xadc   : > { %v4302_v21 = vpop.f32.mrf.mxu2 }
 0xadd   : > { %v4606_v6 = vmin.f32 %v4598_v63, 3.0  ;;  %v4574_v4 = vmul.f32 %v10789_v9, %v4302_v21  ;;  %v10904_v55 = vpop.f32.mrf.mxu0  ;;  %v4534_v19 = vmin.f32 %v4526_v30, 3.0  ;;  %v4519_v63 = vadd.f32 %v10867_v13, %v10635_v37  ;;  %v7638_v37 = vld [vmem:[%s11663_s3 + $0xe0] sm:$0xff] }
 0xade   : > { %v4466_v52 = vpop.f32.mrf.mxu3  ;;  %5332 = vmatpush.msra.mxu1 %v7638_v37 }
 0xadf   : > { %7633 = vmatmul.msk.f32.gmra.mxu1 %vm2254_vm2, %v4466_v52  ;;  %v4582_v1 = vadd.f32 %v4574_v4, %v4565_v58  ;;  %7647 = vmatmul.msk.f32.gmra.mxu0 %vm2254_vm2, %v4606_v6  ;;  %v4527_v21 = vmax.f32 %v4519_v63, 0.0  ;;  %v4520_v4 = vadd.f32 %v10867_v13, %v10645_v46 }
 0xae1   : > { %v4591_v62 = vadd.f32 %v10799_v26, %v4582_v1  ;;  %v4535_v6 = vmin.f32 %v4527_v21, 3.0  ;;  %v7641_v1 = vld [vmem:[%s11663_s3 + $0xf8] sm:$0xff]  ;;  %v4528_v53 = vmax.f32 %v4520_v4, 0.0 }
 0xae2   : > { %5266 = vmatpush.msra.mxu0 %v7641_v1 }
 0xae3   : > { %v4599_v12 = vmax.f32 %v4591_v62, 0.0  ;;  %v4536_v62 = vmin.f32 %v4528_v53, 3.0 }
 0xae4   : > { %v10888_v61 = vpop.f32.mrf.mxu1  ;;  %v4305_v45 = vpop.f32.mrf.mxu2  ;;  %5267 = vmatpush.msra.mxu0 %v7640_v27 }
 0xae5   : > { %v4607_v50 = vmin.f32 %v4599_v12, 3.0  ;;  %v4575_v17 = vmul.f32 %v10789_v9, %v4305_v45  ;;  %v4525_v9 = vmax.f32 %v4517_v60, 0.0  ;;  %v10915_v39 = vpop.f32.mrf.mxu0  ;;  %v4529_v12 = vmax.f32 %v4521_v10, 0.0 }
 0xae7   : > { %7650 = vmatmul.msk.f32.vlgmr.msrb.gmra.mxu1 %vm2254_vm2, %v4531_v48  ;;  %v4583_v3 = vadd.f32 %v4575_v17, %v4566_v24  ;;  %7648 = vmatmul.msk.f32.gmra.mxu0 %vm2254_vm2, %v4607_v50  ;;  %v4537_v16 = vmin.f32 %v4529_v12, 3.0  ;;  %v4522_v24 = vadd.f32 %v10867_v13, %v10664_v0  ;;  %v4723_v17 = vadd.f32 %v10763_v40, %v10733_v7  ;;  %v10963_v40 = vld [vmem:[%s11662_s2 + $0x11] ss:$0 sm:$0xff] }
 0xae8   : > { %v4726_v13 = vadd.f32 %v10774_v31, %v10736_v22  ;;  %v4729_v31 = vadd.f32 %v10791_v29, %v10739_v43  ;;  %v4732_v43 = vadd.f32 %v10808_v54, %v10747_v57  ;;  %v4735_v57 = vadd.f32 %v10820_v44, %v10756_v59 }
 0xae9   : > { %v4592_v42 = vadd.f32 %v10799_v26, %v4583_v3  ;;  %v4533_v26 = vmin.f32 %v4525_v9, 3.0  ;;  %v4530_v50 = vmax.f32 %v4522_v24, 0.0 }
 0xaea   : > { %v4815_v60 = vadd.f32 %v10827_v33, %v4726_v13  ;;  %v4816_v33 = vadd.f32 %v10847_v28, %v4729_v31  ;;  %v4817_v28 = vadd.f32 %v10860_v51, %v4732_v43  ;;  %v4818_v51 = vadd.f32 %v10881_v20, %v4735_v57 }
 0xaeb   : > { %v4600_v34 = vmax.f32 %v4592_v42, 0.0  ;;  %v4538_v25 = vmin.f32 %v4530_v50, 3.0  ;;  %v4814_v42 = vadd.f32 %v10813_v2, %v4723_v17  ;;  %v4738_v50 = vadd.f32 %v10840_v5, %v10769_v56 }
 0xaec   : > { %v10898_v11 = vpop.f32.mrf.mxu1  ;;  %v4741_v56 = vadd.f32 %v10855_v41, %v10779_v32  ;;  %v4744_v32 = vadd.f32 %v10876_v23, %v10801_v35 }
 0xaed   : > { %v4608_v8 = vmin.f32 %v4600_v34, 3.0  ;;  %v4952_v52 = vpop.f32.mrf.mxu0  ;;  %v10953_v34 = vld [vmem:[%s11662_s2 + $0x10] ss:$0 sm:$0xff]  ;;  %v4819_v20 = vadd.f32 %v10896_v47, %v4738_v50 }
 0xaee   : > { %v4823_v0 = vadd.f32 %v10953_v34, %v4814_v42  ;;  %v4953_v7 = vadd.f32 %v4952_v52, %v10888_v61  ;;  %v4824_v36 = vadd.f32 %v10953_v34, %v4815_v60  ;;  %v4826_v53 = vadd.f32 %v10953_v34, %v4817_v28 }
 0xaef   : > { %7651 = vmatmul.msk.f32.gmra.mxu1 %vm2254_vm2, %v4532_v38  ;;  %7649 = vmatmul.msk.f32.gmra.mxu0 %vm2254_vm2, %v4608_v8  ;;  %v4828_v42 = vadd.f32 %v10953_v34, %v4819_v20 }
 0xaf0   : > { %v4831_v38 = vmax.f32 %v4823_v0, 0.0  ;;  %v4834_v10 = vmax.f32 %v4826_v53, 0.0  ;;  %v7916_v53 = vld [vmem:[%s11662_s2 + $0x12] ss:$0 sm:$0xff] }
 0xaf1   : > { %v4836_v13 = vmax.f32 %v4828_v42, 0.0 }
 0xaf4   : > { %v10906_v15 = vpop.f32.mrf.mxu1 }
 0xaf5   : > { %v4955_v48 = vpop.f32.mrf.mxu0 }
 0xaf6   : > { %v4956_v61 = vadd.f32 %v4955_v48, %v10898_v11 }
 0xaf7   : > { %7652 = vmatmul.msk.f32.gmra.mxu1 %vm2254_vm2, %v4533_v26 }
 0xafc   : > { %v10911_v18 = vpop.f32.mrf.mxu1 }
 0xafd   : > { %v4958_v14 = vpop.f32.mrf.mxu0 }
 0xafe   : > { %v4959_v29 = vadd.f32 %v4958_v14, %v10906_v15 }
 0xaff   : > { %7653 = vmatmul.msk.f32.gmra.mxu1 %vm2254_vm2, %v4534_v19  ;;  %v4832_v19 = vmax.f32 %v4824_v36, 0.0 }
 0xb04   : > { %v10918_v58 = vpop.f32.mrf.mxu1 }
 0xb05   : > { %v4961_v9 = vpop.f32.mrf.mxu0 }
 0xb06   : > { %v4962_v54 = vadd.f32 %v4961_v9, %v10911_v18 }
 0xb07   : > { %7654 = vmatmul.msk.f32.gmra.mxu1 %vm2254_vm2, %v4535_v6  ;;  %v4825_v6 = vadd.f32 %v10953_v34, %v4816_v33 }
 0xb09   : > { %v4833_v37 = vmax.f32 %v4825_v6, 0.0 }
 0xb0c   : > { %v10935_v46 = vpop.f32.mrf.mxu1 }
 0xb0d   : > { %v4964_v49 = vpop.f32.mrf.mxu0 }
 0xb0e   : > { %v4965_v59 = vadd.f32 %v4964_v49, %v10918_v58 }
 0xb0f   : > { %7655 = vmatmul.msk.f32.gmra.mxu1 %vm2254_vm2, %v4536_v62 }
 0xb14   : > { %v10940_v45 = vpop.f32.mrf.mxu1 }
 0xb15   : > { %v4967_v62 = vpop.f32.mrf.mxu0 }
 0xb16   : > { %v4968_v5 = vadd.f32 %v4967_v62, %v10935_v46 }
 0xb17   : > { %7656 = vmatmul.msk.f32.gmra.mxu1 %vm2254_vm2, %v4537_v16  ;;  %v4827_v16 = vadd.f32 %v10953_v34, %v4818_v51 }
 0xb19   : > { %v4835_v17 = vmax.f32 %v4827_v16, 0.0 }
 0xb1c   : > { %v10947_v3 = vpop.f32.mrf.mxu1 }
 0xb1d   : > { %v4970_v18 = vpop.f32.mrf.mxu0 }
 0xb1e   : > { %v4971_v41 = vadd.f32 %v4970_v18, %v10940_v45 }
 0xb1f   : > { %7657 = vmatmul.msk.f32.gmra.mxu1 %vm2254_vm2, %v4538_v25 }
 0xb24   : > { %v5020_v2 = vpop.f32.mrf.mxu1 }
 0xb25   : > { %v5044_v8 = vadd.f32 %v5020_v2, %v4953_v7  ;;  %v4820_v7 = vadd.f32 %v10904_v55, %v4741_v56  ;;  %v4973_v2 = vpop.f32.mrf.mxu0  ;;  %v4821_v55 = vadd.f32 %v10915_v39, %v4744_v32 }
 0xb27   : > { %v5053_v26 = vadd.f32 %v10963_v40, %v5044_v8  ;;  %7666 = vmatmul.msk.f32.vlgmr.msra.gmra.mxu1 %vm2254_vm2, %v4831_v38  ;;  %v4829_v60 = vadd.f32 %v10953_v34, %v4820_v7  ;;  %v4830_v31 = vadd.f32 %v10953_v34, %v4821_v55  ;;  %v5378_v55 = vld [vmem:[%s11668_s8 + $0x18] sm:$0xff] }
 0xb29   : > { %v5061_v22 = vmax.f32 %v5053_v26, 0.0  ;;  %v4837_v9 = vmax.f32 %v4829_v60, 0.0  ;;  %v4838_v23 = vmax.f32 %v4830_v31, 0.0  ;;  %v11037_v60 = vld [vmem:[%s11668_s8 + $0x8] sm:$0xff] }
 0xb2b   : > { %7658 = vmatmul.msk.f32.vlgmr.msra.gmra.mxu0 %vm2254_vm2, %v5061_v22 }
 0xb2c   : > { %v5023_v30 = vpop.f32.mrf.mxu1 }
 0xb2d   : > { %v5045_v63 = vadd.f32 %v5023_v30, %v4956_v61  ;;  %v4974_v30 = vadd.f32 %v4973_v2, %v10947_v3 }
 0xb2f   : > { %v5054_v21 = vadd.f32 %v10963_v40, %v5045_v63  ;;  %7667 = vmatmul.msk.f32.gmra.mxu1 %vm2254_vm2, %v4832_v19 }
 0xb31   : > { %v5062_v4 = vmax.f32 %v5054_v21, 0.0 }
 0xb33   : > { %7659 = vmatmul.msk.f32.gmra.mxu0 %vm2254_vm2, %v5062_v4 }
 0xb34   : > { %v5026_v11 = vpop.f32.mrf.mxu1  ;;  %v5122_v36 = vpop.f32.mrf.mxu0 }
 0xb35   : > { %v5046_v52 = vadd.f32 %v5026_v11, %v4959_v29 }
 0xb37   : > { %v5055_v1 = vadd.f32 %v10963_v40, %v5046_v52  ;;  %7668 = vmatmul.msk.f32.gmra.mxu1 %vm2254_vm2, %v4833_v37 }
 0xb39   : > { %v5063_v27 = vmax.f32 %v5055_v1, 0.0 }
 0xb3b   : > { %7660 = vmatmul.msk.f32.gmra.mxu0 %vm2254_vm2, %v5063_v27 }
 0xb3c   : > { %v5029_v15 = vpop.f32.mrf.mxu1  ;;  %v5125_v39 = vpop.f32.mrf.mxu0 }
 0xb3d   : > { %v5047_v12 = vadd.f32 %v5029_v15, %v4962_v54 }
 0xb3f   : > { %v5056_v48 = vadd.f32 %v10963_v40, %v5047_v12  ;;  %7669 = vmatmul.msk.f32.gmra.mxu1 %vm2254_vm2, %v4834_v10 }
 0xb41   : > { %v5064_v24 = vmax.f32 %v5056_v48, 0.0 }
 0xb43   : > { %7661 = vmatmul.msk.f32.gmra.mxu0 %vm2254_vm2, %v5064_v24 }
 0xb44   : > { %v5032_v44 = vpop.f32.mrf.mxu1  ;;  %v5128_v21 = vpop.f32.mrf.mxu0 }
 0xb45   : > { %v5048_v14 = vadd.f32 %v5032_v44, %v4965_v59 }
 0xb47   : > { %v5057_v25 = vadd.f32 %v10963_v40, %v5048_v14  ;;  %7670 = vmatmul.msk.f32.gmra.mxu1 %vm2254_vm2, %v4835_v17 }
 0xb49   : > { %v5065_v0 = vmax.f32 %v5057_v25, 0.0 }
 0xb4b   : > { %7662 = vmatmul.msk.f32.gmra.mxu0 %vm2254_vm2, %v5065_v0 }
 0xb4c   : > { %v5035_v58 = vpop.f32.mrf.mxu1  ;;  %v5131_v6 = vpop.f32.mrf.mxu0 }
 0xb4d   : > { %v5049_v47 = vadd.f32 %v5035_v58, %v4968_v5 }
 0xb4f   : > { %v5058_v38 = vadd.f32 %v10963_v40, %v5049_v47  ;;  %7671 = vmatmul.msk.f32.gmra.mxu1 %vm2254_vm2, %v4836_v13  ;;  %v11030_v47 = vld [vmem:[%s11668_s8] sm:$0xff] }
 0xb51   : > { %v5066_v8 = vmax.f32 %v5058_v38, 0.0 }
 0xb53   : > { %7663 = vmatmul.msk.f32.gmra.mxu0 %vm2254_vm2, %v5066_v8 }
 0xb54   : > { %v5038_v46 = vpop.f32.mrf.mxu1  ;;  %v5134_v3 = vpop.f32.mrf.mxu0 }
 0xb55   : > { %v5050_v26 = vadd.f32 %v5038_v46, %v4971_v41  ;;  %v5377_v41 = vld [vmem:[%s11668_s8 + $0x10] sm:$0xff] }
 0xb57   : > { %v5059_v22 = vadd.f32 %v10963_v40, %v5050_v26  ;;  %7672 = vmatmul.msk.f32.gmra.mxu1 %vm2254_vm2, %v4837_v9 }
 0xb59   : > { %v5067_v61 = vmax.f32 %v5059_v22, 0.0  ;;  %v5379_v22 = vld [vmem:[%s11668_s8 + $0x20] sm:$0xff] }
 0xb5b   : > { %7664 = vmatmul.msk.f32.gmra.mxu0 %vm2254_vm2, %v5067_v61 }
 0xb5c   : > { %v5041_v35 = vpop.f32.mrf.mxu1  ;;  %v5137_v29 = vpop.f32.mrf.mxu0 }
 0xb5d   : > { %v5051_v45 = vadd.f32 %v5041_v35, %v4974_v30  ;;  %v5380_v30 = vld [vmem:[%s11668_s8 + $0x28] sm:$0xff] }
 0xb5f   : > { %v5060_v19 = vadd.f32 %v10963_v40, %v5051_v45  ;;  %7673 = vmatmul.msk.f32.gmra.mxu1 %vm2254_vm2, %v4838_v23  ;;  %v5381_v45 = vld [vmem:[%s11668_s8 + $0x30] sm:$0xff] }
 0xb61   : > { %v5068_v33 = vmax.f32 %v5060_v19, 0.0 }
 0xb63   : > { %7665 = vmatmul.msk.f32.gmra.mxu0 %vm2254_vm2, %v5068_v33  ;;  %v7917_v33 = vld [vmem:[%s11662_s2 + $0x13] ss:$0 sm:$0xff] }
 0xb64   : > { %v5187_v63 = vpop.f32.mrf.mxu1  ;;  %v5140_v37 = vpop.f32.mrf.mxu0 }
 0xb65   : > { %v5188_v17 = vadd.f32 %v5187_v63, %v5122_v36 }
 0xb67   : > { %v5212_v56 = vadd.f32 %v7916_v53, %v5188_v17  ;;  %v5390_v17 = vld [vmem:[%s11668_s8 + $0x78] sm:$0xff] }
 0xb69   : > { %v5220_v7 = vmax.f32 %v5212_v56, 0.0  ;;  %v5392_v56 = vld [vmem:[%s11668_s8 + $0x88] sm:$0xff] }
 0xb6c   : > { %v5190_v49 = vpop.f32.mrf.mxu1  ;;  %v5143_v40 = vpop.f32.mrf.mxu0 }
 0xb6d   : > { %v5191_v59 = vadd.f32 %v5190_v49, %v5125_v39 }
 0xb6f   : > { %v5213_v42 = vadd.f32 %v7916_v53, %v5191_v59  ;;  %v5387_v59 = vld [vmem:[%s11668_s8 + $0x60] sm:$0xff] }
 0xb71   : > { %v5221_v13 = vmax.f32 %v5213_v42, 0.0  ;;  %v7711_v42 = vld [vmem:[%s11663_s3 + $0x108] sm:$0xff] }
 0xb72   : > { %5768 = vmatpush.msra.mxu3 %v7711_v42 }
 0xb74   : > { %v5193_v34 = vpop.f32.mrf.mxu1 }
 0xb75   : > { %v5194_v48 = vadd.f32 %v5193_v34, %v5128_v21 }
 0xb77   : > { %v5214_v20 = vadd.f32 %v7916_v53, %v5194_v48 }
 0xb79   : > { %v5222_v5 = vmax.f32 %v5214_v20, 0.0 }
 0xb7c   : > { %v5196_v4 = vpop.f32.mrf.mxu1 }
 0xb7d   : > { %v5197_v10 = vadd.f32 %v5196_v4, %v5131_v6 }
 0xb7f   : > { %v5215_v44 = vadd.f32 %v7916_v53, %v5197_v10 }
 0xb81   : > { %v5223_v0 = vmax.f32 %v5215_v44, 0.0  ;;  %v5388_v44 = vld [vmem:[%s11668_s8 + $0x68] sm:$0xff] }
 0xb84   : > { %v5199_v43 = vpop.f32.mrf.mxu1 }
 0xb85   : > { %v5200_v57 = vadd.f32 %v5199_v43, %v5134_v3 }
 0xb87   : > { %v5216_v16 = vadd.f32 %v7916_v53, %v5200_v57 }
 0xb89   : > { %v5224_v14 = vmax.f32 %v5216_v16, 0.0  ;;  %v5384_v16 = vld [vmem:[%s11668_s8 + $0x48] sm:$0xff] }
 0xb8c   : > { %v5202_v11 = vpop.f32.mrf.mxu1 }
 0xb8d   : > { %v5203_v27 = vadd.f32 %v5202_v11, %v5137_v29 }
 0xb8f   : > { %v5217_v51 = vadd.f32 %v7916_v53, %v5203_v27 }
 0xb91   : > { %v5225_v18 = vmax.f32 %v5217_v51, 0.0  ;;  %v5383_v51 = vld [vmem:[%s11668_s8 + $0x40] sm:$0xff] }
 0xb94   : > { %v5205_v28 = vpop.f32.mrf.mxu1 }
 0xb95   : > { %v5206_v52 = vadd.f32 %v5205_v28, %v5140_v37  ;;  %v5382_v28 = vld [vmem:[%s11668_s8 + $0x38] sm:$0xff] }
 0xb97   : > { %v5218_v54 = vadd.f32 %v7916_v53, %v5206_v52 }
 0xb99   : > { %v5226_v24 = vmax.f32 %v5218_v54, 0.0 }
 0xb9c   : > { %v5208_v1 = vpop.f32.mrf.mxu1 }
 0xb9d   : > { %v5209_v62 = vadd.f32 %v5208_v1, %v5143_v40 }
 0xb9f   : > { %v5219_v15 = vadd.f32 %v7916_v53, %v5209_v62 }
 0xba1   : > { %v5227_v12 = vmax.f32 %v5219_v15, 0.0 }
 0xba3   : > { %5473 = vmatpush.msrb.mxu0 %v5227_v12 }
 0xba4   : > { %v11025_v50 = vpop.f32.mrf.mxu1 }
 0xba5   : > { %5474 = vmatpush.msrb.mxu0 %v5226_v24  ;;  %v5385_v24 = vld [vmem:[%s11668_s8 + $0x50] sm:$0xff] }
 0xba7   : > { %5475 = vmatpush.msrb.mxu0 %v5225_v18  ;;  %v5389_v18 = vld [vmem:[%s11668_s8 + $0x70] sm:$0xff] }
 0xba8   : > { %v5269_v25 = vpop.f32.mrf.mxu0 }
 0xba9   : > { %5476 = vmatpush.msrb.mxu0 %v5224_v14  ;;  %v5335_v53 = vadd.f32 %v11025_v50, %v5269_v25  ;;  %v5386_v50 = vld [vmem:[%s11668_s8 + $0x58] sm:$0xff]  ;;  %v5391_v14 = vld [vmem:[%s11668_s8 + $0x80] sm:$0xff] }
 0xbaa   : > { %v7713_v25 = vld [vmem:[%s11663_s3 + $0x118] sm:$0xff] }
 0xbab   : > { %5477 = vmatpush.msrb.mxu0 %v5223_v0  ;;  %v5359_v15 = vadd.f32 %v7917_v33, %v5335_v53  ;;  %5739 = vmatpush.msra.mxu2 %v7713_v25 }
 0xbac   : > { %v5337_v58 = vpop.f32.mrf.mxu1 }
 0xbad   : > { %5478 = vmatpush.msrb.mxu0 %v5222_v5  ;;  %v5367_v48 = vmax.f32 %v5359_v15, 0.0  ;;  %v7714_v15 = vld [vmem:[%s11663_s3 + $0x120] sm:$0xff] }
 0xbaf   : > { %5479 = vmatpush.msrb.mxu0 %v5221_v13 }
 0xbb0   : > { %v5272_v2 = vpop.f32.mrf.mxu0 }
 0xbb1   : > { %5480 = vmatpush.msrb.mxu0 %v5220_v7  ;;  %v5338_v52 = vadd.f32 %v5337_v58, %v5272_v2 }
 0xbb2   : > { %7674 = vmatmul.msk.f32.vlgmr.msrb.gmra.mxu0 %vm2501_vm3, %v11030_v47 }
 0xbb3   : > { %v5360_v57 = vadd.f32 %v7917_v33, %v5338_v52 }
 0xbb4   : > { %v5340_v38 = vpop.f32.mrf.mxu1 }
 0xbb5   : > { %v5368_v12 = vmax.f32 %v5360_v57, 0.0 }
 0xbb8   : > { %v5275_v8 = vpop.f32.mrf.mxu0 }
 0xbb9   : > { %v5341_v29 = vadd.f32 %v5340_v38, %v5275_v8 }
 0xbba   : > { %7675 = vmatmul.msk.f32.gmra.mxu0 %vm2501_vm3, %v11037_v60 }
 0xbbb   : > { %v5361_v27 = vadd.f32 %v7917_v33, %v5341_v29 }
 0xbbc   : > { %v5343_v32 = vpop.f32.mrf.mxu1 }
 0xbbd   : > { %v5369_v10 = vmax.f32 %v5361_v27, 0.0  ;;  %v7715_v27 = vld [vmem:[%s11663_s3 + $0x128] sm:$0xff] }
 0xbc0   : > { %v5278_v46 = vpop.f32.mrf.mxu0 }
 0xbc1   : > { %v5344_v4 = vadd.f32 %v5343_v32, %v5278_v46 }
 0xbc2   : > { %7676 = vmatmul.msk.f32.gmra.mxu0 %vm2501_vm3, %v5377_v41 }
 0xbc3   : > { %v5362_v40 = vadd.f32 %v7917_v33, %v5344_v4 }
 0xbc4   : > { %v5346_v9 = vpop.f32.mrf.mxu1 }
 0xbc5   : > { %v5370_v54 = vmax.f32 %v5362_v40, 0.0 }
 0xbc8   : > { %v5281_v26 = vpop.f32.mrf.mxu0 }
 0xbc9   : > { %v5347_v49 = vadd.f32 %v5346_v9, %v5281_v26 }
 0xbca   : > { %7677 = vmatmul.msk.f32.gmra.mxu0 %vm2501_vm3, %v5378_v55 }
 0xbcb   : > { %v5363_v11 = vadd.f32 %v7917_v33, %v5347_v49 }
 0xbcc   : > { %v5349_v36 = vpop.f32.mrf.mxu1 }
 0xbcd   : > { %v5371_v62 = vmax.f32 %v5363_v11, 0.0 }
 0xbd0   : > { %v5284_v31 = vpop.f32.mrf.mxu0 }
 0xbd1   : > { %v5350_v63 = vadd.f32 %v5349_v36, %v5284_v31  ;;  %v5405_v36 = vld [vmem:[%s11665_s5 + $0x40] sm:$0xff] }
 0xbd2   : > { %7678 = vmatmul.msk.f32.gmra.mxu0 %vm2501_vm3, %v5379_v22  ;;  %v5536_v31 = vperm.slane %v5405_v36, 0  ;;  %v5559_v11 = vperm.slane %v5405_v36, 5  ;;  %v5569_v57 = vperm.slane %v5405_v36, 7 }
 0xbd3   : > { %v5364_v3 = vadd.f32 %v7917_v33, %v5350_v63 }
 0xbd4   : > { %v5352_v61 = vpop.f32.mrf.mxu1 }
 0xbd5   : > { %v5372_v1 = vmax.f32 %v5364_v3, 0.0 }
 0xbd8   : > { %v5287_v35 = vpop.f32.mrf.mxu0 }
 0xbd9   : > { %v5353_v23 = vadd.f32 %v5352_v61, %v5287_v35  ;;  %v5539_v61 = vperm.slane %v5405_v36, 1  ;;  %v7710_v35 = vld [vmem:[%s11663_s3 + $0x100] sm:$0xff] }
 0xbda   : > { %7679 = vmatmul.msk.f32.gmra.mxu0 %vm2501_vm3, %v5380_v30  ;;  %5769 = vmatpush.msra.mxu3 %v7710_v35 }
 0xbdb   : > { %v5365_v34 = vadd.f32 %v7917_v33, %v5353_v23 }
 0xbdc   : > { %v5355_v19 = vpop.f32.mrf.mxu1  ;;  %5819 = vmatpush.msrb.mxu3 %v7715_v27 }
 0xbdd   : > { %v5373_v37 = vmax.f32 %v5365_v34, 0.0 }
 0xbde   : > { %5820 = vmatpush.msrb.mxu3 %v7714_v15 }
 0xbe0   : > { %v5290_v39 = vpop.f32.mrf.mxu0 }
 0xbe1   : > { %v5356_v21 = vadd.f32 %v5355_v19, %v5290_v39  ;;  %v5544_v19 = vperm.slane %v5405_v36, 2 }
 0xbe2   : > { %7680 = vmatmul.msk.f32.gmra.mxu0 %vm2501_vm3, %v5381_v45 }
 0xbe3   : > { %v5366_v6 = vadd.f32 %v7917_v33, %v5356_v21  ;;  %v5549_v21 = vperm.slane %v5405_v36, 3 }
 0xbe5   : > { %v5374_v43 = vmax.f32 %v5366_v6, 0.0 }
 0xbe7   : > { %5594 = vmatpush.msrb.mxu1 %v5374_v43  ;;  %v5554_v43 = vperm.slane %v5405_v36, 4 }
 0xbe9   : > { %5595 = vmatpush.msrb.mxu1 %v5373_v37 }
 0xbea   : > { %7681 = vmatmul.msk.f32.gmra.mxu0 %vm2501_vm3, %v5382_v28 }
 0xbeb   : > { %5596 = vmatpush.msrb.mxu1 %v5372_v1  ;;  %v5564_v1 = vperm.slane %v5405_v36, 6 }
 0xbed   : > { %5597 = vmatpush.msrb.mxu1 %v5371_v62 }
 0xbef   : > { %5598 = vmatpush.msrb.mxu1 %v5370_v54  ;;  %v5406_v54 = vld [vmem:[%s11665_s5 + $0x48] sm:$0xff] }
 0xbf1   : > { %5599 = vmatpush.msrb.mxu1 %v5369_v10 }
 0xbf2   : > { %7682 = vmatmul.msk.f32.gmra.mxu0 %vm2501_vm3, %v5383_v51 }
 0xbf3   : > { %5600 = vmatpush.msrb.mxu1 %v5368_v12 }
 0xbf5   : > { %5601 = vmatpush.msrb.mxu1 %v5367_v48 }
 0xbf6   : > { %7692 = vmatmul.msk.f32.vlgmr.msrb.gmra.mxu1 %vm2501_vm3, %v11030_v47 }
 0xbfa   : > { %7683 = vmatmul.msk.f32.gmra.mxu0 %vm2501_vm3, %v5384_v16 }
 0xbfe   : > { %7693 = vmatmul.msk.f32.gmra.mxu1 %vm2501_vm3, %v11037_v60 }
 0xc02   : > { %7684 = vmatmul.msk.f32.gmra.mxu0 %vm2501_vm3, %v5385_v24 }
 0xc06   : > { %7694 = vmatmul.msk.f32.gmra.mxu1 %vm2501_vm3, %v5377_v41 }
 0xc0a   : > { %7685 = vmatmul.msk.f32.gmra.mxu0 %vm2501_vm3, %v5386_v50 }
 0xc0e   : > { %7695 = vmatmul.msk.f32.gmra.mxu1 %vm2501_vm3, %v5378_v55 }
 0xc12   : > { %7686 = vmatmul.msk.f32.gmra.mxu0 %vm2501_vm3, %v5387_v59 }
 0xc16   : > { %7696 = vmatmul.msk.f32.gmra.mxu1 %vm2501_vm3, %v5379_v22 }
 0xc1a   : > { %7687 = vmatmul.msk.f32.gmra.mxu0 %vm2501_vm3, %v5388_v44 }
 0xc1e   : > { %7697 = vmatmul.msk.f32.gmra.mxu1 %vm2501_vm3, %v5380_v30 }
 0xc22   : > { %7688 = vmatmul.msk.f32.gmra.mxu0 %vm2501_vm3, %v5389_v18 }
 0xc26   : > { %7698 = vmatmul.msk.f32.gmra.mxu1 %vm2501_vm3, %v5381_v45 }
 0xc2a   : > { %7689 = vmatmul.msk.f32.gmra.mxu0 %vm2501_vm3, %v5390_v17 }
 0xc2e   : > { %7699 = vmatmul.msk.f32.gmra.mxu1 %vm2501_vm3, %v5382_v28 }
 0xc2f   : > { %v5482_v20 = vpop.f32.mrf.mxu0 }
 0xc30   : > { %v5537_v23 = vmul.f32 %v5536_v31, %v5482_v20 }
 0xc32   : > { %7690 = vmatmul.msk.f32.gmra.mxu0 %vm2501_vm3, %v5391_v14 }
 0xc36   : > { %7700 = vmatmul.msk.f32.gmra.mxu1 %vm2501_vm3, %v5383_v51 }
 0xc37   : > { %v5485_v0 = vpop.f32.mrf.mxu0 }
 0xc38   : > { %v5538_v34 = vmul.f32 %v5536_v31, %v5485_v0  ;;  %v7918_v0 = vld [vmem:[%s11662_s2 + $0x14] ss:$0 sm:$0xff] }
 0xc3a   : > { %7691 = vmatmul.msk.f32.gmra.mxu0 %vm2501_vm3, %v5392_v56 }
 0xc3e   : > { %7701 = vmatmul.msk.f32.gmra.mxu1 %vm2501_vm3, %v5384_v16 }
 0xc3f   : > { %v5488_v5 = vpop.f32.mrf.mxu0 }
 0xc40   : > { %v5540_v45 = vmul.f32 %v5539_v61, %v5488_v5 }
 0xc42   : > { %v5542_v33 = vadd.f32 %v5540_v45, %v5537_v23 }
 0xc46   : > { %7702 = vmatmul.msk.f32.gmra.mxu1 %vm2501_vm3, %v5385_v24 }
 0xc47   : > { %v5491_v58 = vpop.f32.mrf.mxu0 }
 0xc48   : > { %v5541_v6 = vmul.f32 %v5539_v61, %v5491_v58 }
 0xc4a   : > { %v5543_v37 = vadd.f32 %v5541_v6, %v5538_v34 }
 0xc4e   : > { %7703 = vmatmul.msk.f32.gmra.mxu1 %vm2501_vm3, %v5386_v50 }
 0xc4f   : > { %v5494_v13 = vpop.f32.mrf.mxu0 }
 0xc50   : > { %v5545_v63 = vmul.f32 %v5544_v19, %v5494_v13 }
 0xc52   : > { %v5547_v4 = vadd.f32 %v5545_v63, %v5542_v33 }
 0xc56   : > { %7704 = vmatmul.msk.f32.gmra.mxu1 %vm2501_vm3, %v5387_v59  ;;  %v5574_v59 = vperm.slane %v5406_v54, 0 }
 0xc57   : > { %v5497_v7 = vpop.f32.mrf.mxu0 }
 0xc58   : > { %v5546_v28 = vmul.f32 %v5544_v19, %v5497_v7 }
 0xc5a   : > { %v5548_v10 = vadd.f32 %v5546_v28, %v5543_v37 }
 0xc5e   : > { %7705 = vmatmul.msk.f32.gmra.mxu1 %vm2501_vm3, %v5388_v44 }
 0xc5f   : > { %v5500_v47 = vpop.f32.mrf.mxu0 }
 0xc60   : > { %v5550_v3 = vmul.f32 %v5549_v21, %v5500_v47 }
 0xc62   : > { %v5552_v52 = vadd.f32 %v5550_v3, %v5547_v4 }
 0xc66   : > { %7706 = vmatmul.msk.f32.gmra.mxu1 %vm2501_vm3, %v5389_v18 }
 0xc67   : > { %v5503_v2 = vpop.f32.mrf.mxu0 }
 0xc68   : > { %v5551_v51 = vmul.f32 %v5549_v21, %v5503_v2  ;;  %v7712_v21 = vld [vmem:[%s11663_s3 + $0x110] sm:$0xff] }
 0xc69   : > { %5740 = vmatpush.msra.mxu2 %v7712_v21 }
 0xc6a   : > { %v5553_v44 = vadd.f32 %v5551_v51, %v5548_v10 }
 0xc6e   : > { %7707 = vmatmul.msk.f32.gmra.mxu1 %vm2501_vm3, %v5390_v17 }
 0xc6f   : > { %v5506_v38 = vpop.f32.mrf.mxu0 }
 0xc70   : > { %v5555_v40 = vmul.f32 %v5554_v43, %v5506_v38 }
 0xc72   : > { %v5557_v12 = vadd.f32 %v5555_v40, %v5552_v52  ;;  %v7717_v40 = vld [vmem:[%s11663_s3 + $0x138] sm:$0xff] }
 0xc73   : > { %v11133_v60 = vpop.f32.mrf.mxu1  ;;  %5796 = vmatpush.msrb.mxu2 %v7717_v40 }
 0xc76   : > { %7708 = vmatmul.msk.f32.gmra.mxu1 %vm2501_vm3, %v5391_v14 }
 0xc77   : > { %v5509_v8 = vpop.f32.mrf.mxu0 }
 0xc78   : > { %v5556_v18 = vmul.f32 %v5554_v43, %v5509_v8 }
 0xc7b   : > { %v11136_v32 = vpop.f32.mrf.mxu1 }
 0xc7e   : > { %7709 = vmatmul.msk.f32.gmra.mxu1 %vm2501_vm3, %v5392_v56  ;;  %v5558_v56 = vadd.f32 %v5556_v18, %v5553_v44 }
 0xc7f   : > { %v5512_v41 = vpop.f32.mrf.mxu0 }
 0xc80   : > { %v5560_v62 = vmul.f32 %v5559_v11, %v5512_v41 }
 0xc82   : > { %v5562_v24 = vadd.f32 %v5560_v62, %v5557_v12 }
 0xc83   : > { %v11139_v46 = vpop.f32.mrf.mxu1 }
 0xc87   : > { %v5515_v9 = vpop.f32.mrf.mxu0 }
 0xc88   : > { %v5561_v14 = vmul.f32 %v5559_v11, %v5515_v9 }
 0xc8a   : > { %v5563_v7 = vadd.f32 %v5561_v14, %v5558_v56 }
 0xc8b   : > { %v11141_v55 = vpop.f32.mrf.mxu1 }
 0xc8f   : > { %v5518_v26 = vpop.f32.mrf.mxu0 }
 0xc90   : > { %v5565_v48 = vmul.f32 %v5564_v1, %v5518_v26 }
 0xc92   : > { %v5567_v17 = vadd.f32 %v5565_v48, %v5562_v24  ;;  %v5409_v48 = vld [vmem:[%s11665_s5 + $0x58] sm:$0xff] }
 0xc93   : > { %v11146_v22 = vpop.f32.mrf.mxu1 }
 0xc97   : > { %v5521_v30 = vpop.f32.mrf.mxu0 }
 0xc98   : > { %v5566_v5 = vmul.f32 %v5564_v1, %v5521_v30  ;;  %v7716_v1 = vld [vmem:[%s11663_s3 + $0x130] sm:$0xff] }
 0xc99   : > { %5797 = vmatpush.msrb.mxu2 %v7716_v1  ;;  %v7921_v1 = vld [vmem:[%s11662_s2 + $0x17] ss:$0 sm:$0xff] }
 0xc9a   : > { %v5568_v38 = vadd.f32 %v5566_v5, %v5563_v7 }
 0xc9b   : > { %v11151_v39 = vpop.f32.mrf.mxu1 }
 0xc9f   : > { %v5524_v49 = vpop.f32.mrf.mxu0 }
 0xca0   : > { %v5570_v50 = vmul.f32 %v5569_v57, %v5524_v49  ;;  %v5408_v49 = vld [vmem:[%s11665_s5 + $0x50] sm:$0xff] }
 0xca1   : > { %v5660_v34 = vperm.slane %v5408_v49, 1  ;;  %v5657_v6 = vperm.slane %v5408_v49, 0  ;;  %v5665_v4 = vperm.slane %v5408_v49, 2  ;;  %v5670_v11 = vperm.slane %v5408_v49, 3 }
 0xca2   : > { %v5572_v25 = vadd.f32 %v5570_v50, %v5567_v17  ;;  %v5675_v52 = vperm.slane %v5408_v49, 4  ;;  %v5680_v62 = vperm.slane %v5408_v49, 5  ;;  %v5690_v51 = vperm.slane %v5408_v49, 7 }
 0xca3   : > { %v11153_v29 = vpop.f32.mrf.mxu1  ;;  %v5661_v43 = vmul.f32 %v5660_v34, %v11139_v46  ;;  %v5658_v37 = vmul.f32 %v5657_v6, %v11133_v60  ;;  %v5666_v28 = vmul.f32 %v5665_v4, %v11146_v22  ;;  %v5685_v60 = vperm.slane %v5408_v49, 6  ;;  %v7920_v49 = vld [vmem:[%s11662_s2 + $0x16] ss:$0 sm:$0xff] }
 0xca4   : > { %v5671_v27 = vmul.f32 %v5670_v11, %v11153_v29  ;;  %v5662_v22 = vmul.f32 %v5660_v34, %v11141_v55  ;;  %v5659_v12 = vmul.f32 %v5657_v6, %v11136_v32  ;;  %v5667_v24 = vmul.f32 %v5665_v4, %v11151_v39  ;;  %v7919_v39 = vld [vmem:[%s11662_s2 + $0x15] ss:$0 sm:$0xff] }
 0xca5   : > { %v5695_v55 = vperm.slane %v5409_v48, 0  ;;  %v11278_v48 = vld [vmem:[%s11669_s9 + $0x30] sm:$0xff] }
 0xca7   : > { %v5527_v53 = vpop.f32.mrf.mxu0 }
 0xca8   : > { %v5571_v47 = vmul.f32 %v5569_v57, %v5527_v53  ;;  %v5663_v53 = vadd.f32 %v5661_v43, %v5658_v37 }
 0xcaa   : > { %v5573_v8 = vadd.f32 %v5571_v47, %v5568_v38  ;;  %v5668_v46 = vadd.f32 %v5666_v28, %v5663_v53  ;;  %v11225_v28 = vld [vmem:[%s11669_s9] sm:$0xff]  ;;  %v11235_v53 = vld [vmem:[%s11669_s9 + $0x8] sm:$0xff] }
 0xcab   : > { %v11164_v16 = vpop.f32.mrf.mxu1 }
 0xcac   : > { %v5673_v15 = vadd.f32 %v5671_v27, %v5668_v46  ;;  %v5672_v44 = vmul.f32 %v5670_v11, %v11164_v16 }
 0xcaf   : > { %v5530_v20 = vpop.f32.mrf.mxu0 }
 0xcb0   : > { %v5575_v42 = vmul.f32 %v5574_v59, %v5530_v20 }
 0xcb2   : > { %v5577_v58 = vadd.f32 %v5575_v42, %v5572_v25 }
 0xcb3   : > { %v5627_v13 = vpop.f32.mrf.mxu1 }
 0xcb4   : > { %v5580_v2 = vadd.f32 %v7918_v0, %v5577_v58  ;;  %v5676_v57 = vmul.f32 %v5675_v52, %v5627_v13 }
 0xcb6   : > { %v5582_v41 = vmax.f32 %v5580_v2, 0.0  ;;  %v5678_v29 = vadd.f32 %v5676_v57, %v5673_v15  ;;  %v11242_v15 = vld [vmem:[%s11669_s9 + $0x10] sm:$0xff] }
 0xcb7   : > { %v5533_v26 = vpop.f32.mrf.mxu0 }
 0xcb8   : > { %v11169_v36 = vmin.f32 %v5582_v41, 3.0  ;;  %v5576_v9 = vmul.f32 %v5574_v59, %v5533_v26  ;;  %v5664_v59 = vadd.f32 %v5662_v22, %v5659_v12  ;;  %v11269_v12 = vld [vmem:[%s11669_s9 + $0x28] sm:$0xff] }
 0xcba   : > { %v5578_v31 = vadd.f32 %v5576_v9, %v5573_v8  ;;  %7720 = vmatmul.msk.f32.vlgmr.msra.gmra.mxu3 %vm2254_vm2, %v11169_v36  ;;  %v5669_v20 = vadd.f32 %v5667_v24, %v5664_v59  ;;  %v11287_v24 = vld [vmem:[%s11669_s9 + $0x38] sm:$0xff]  ;;  %v11314_v59 = vld [vmem:[%s11669_s9 + $0x50] sm:$0xff] }
 0xcbb   : > { %v5630_v61 = vpop.f32.mrf.mxu1 }
 0xcbc   : > { %v5581_v35 = vadd.f32 %v7918_v0, %v5578_v31  ;;  %v5677_v14 = vmul.f32 %v5675_v52, %v5630_v61  ;;  %v5674_v0 = vadd.f32 %v5672_v44, %v5669_v20  ;;  %v11323_v44 = vld [vmem:[%s11669_s9 + $0x58] sm:$0xff] }
 0xcbe   : > { %v5583_v23 = vmax.f32 %v5581_v35, 0.0  ;;  %v5679_v58 = vadd.f32 %v5677_v14, %v5674_v0  ;;  %v7752_v14 = vld [vmem:[%s11664_s4 + $0xd0] sm:$0xff] }
 0xcc0   : > { %v11173_v30 = vmin.f32 %v5583_v23, 3.0 }
 0xcc2   : > { %7721 = vmatmul.msk.f32.gmra.mxu3 %vm2254_vm2, %v11173_v30 }
 0xcc3   : > { %v5633_v45 = vpop.f32.mrf.mxu1 }
 0xcc4   : > { %v5681_v10 = vmul.f32 %v5680_v62, %v5633_v45 }
 0xcc6   : > { %v5683_v18 = vadd.f32 %v5681_v10, %v5678_v29  ;;  %v11251_v10 = vld [vmem:[%s11669_s9 + $0x18] sm:$0xff]  ;;  %v11296_v29 = vld [vmem:[%s11669_s9 + $0x40] sm:$0xff] }
 0xcca   : > { %7724 = vmatmul.msk.f32.vlgmr.msrb.gmra.mxu3 %vm2254_vm2, %v11169_v36 }
 0xccb   : > { %v5636_v19 = vpop.f32.mrf.mxu1 }
 0xccc   : > { %v5682_v32 = vmul.f32 %v5680_v62, %v5636_v19 }
 0xcce   : > { %v5684_v47 = vadd.f32 %v5682_v32, %v5679_v58  ;;  %v7763_v58 = vld [vmem:[%s11664_s4 + $0xf8] sm:$0xff] }
 0xcd2   : > { %7725 = vmatmul.msk.f32.gmra.mxu3 %vm2254_vm2, %v11173_v30 }
 0xcd3   : > { %v5639_v33 = vpop.f32.mrf.mxu1 }
 0xcd4   : > { %v5686_v50 = vmul.f32 %v5685_v60, %v5639_v33 }
 0xcd6   : > { %v5688_v25 = vadd.f32 %v5686_v50, %v5683_v18  ;;  %v11305_v50 = vld [vmem:[%s11669_s9 + $0x48] sm:$0xff] }
 0xcd7   : > { %v7751_v18 = vld [vmem:[%s11664_s4 + $0xc8] sm:$0xff] }
 0xcd8   : > { %6075 = vmatpush.msra.mxu1 %v7751_v18 }
 0xcdb   : > { %v5642_v63 = vpop.f32.mrf.mxu1 }
 0xcdc   : > { %v5687_v13 = vmul.f32 %v5685_v60, %v5642_v63 }
 0xcde   : > { %v5689_v38 = vadd.f32 %v5687_v13, %v5684_v47  ;;  %v7762_v47 = vld [vmem:[%s11664_s4 + $0xf0] sm:$0xff] }
 0xce3   : > { %v5645_v3 = vpop.f32.mrf.mxu1 }
 0xce4   : > { %v5691_v17 = vmul.f32 %v5690_v51, %v5645_v3 }
 0xce6   : > { %v5693_v56 = vadd.f32 %v5691_v17, %v5688_v25  ;;  %v7750_v17 = vld [vmem:[%s11664_s4 + $0xc0] sm:$0xff] }
 0xce7   : > { %6076 = vmatpush.msra.mxu1 %v7750_v17 }
 0xceb   : > { %v5648_v54 = vpop.f32.mrf.mxu1 }
 0xcec   : > { %v5692_v16 = vmul.f32 %v5690_v51, %v5648_v54  ;;  %v11260_v51 = vld [vmem:[%s11669_s9 + $0x20] sm:$0xff] }
 0xcee   : > { %v5694_v8 = vadd.f32 %v5692_v16, %v5689_v38  ;;  %v7765_v38 = vld [vmem:[%s11664_s4 + $0x108] sm:$0xff] }
 0xcf3   : > { %v5651_v42 = vpop.f32.mrf.mxu1 }
 0xcf4   : > { %v5696_v5 = vmul.f32 %v5695_v55, %v5651_v42  ;;  %v7759_v42 = vld [vmem:[%s11664_s4 + $0xe8] sm:$0xff] }
 0xcf6   : > { %v5698_v7 = vadd.f32 %v5696_v5, %v5693_v56  ;;  %v7758_v56 = vld [vmem:[%s11664_s4 + $0xe0] sm:$0xff] }
 0xcf8   : > { %v5701_v2 = vadd.f32 %v7919_v39, %v5698_v7 }
 0xcfa   : > { %v5703_v41 = vmax.f32 %v5701_v2, 0.0 }
 0xcfb   : > { %v5654_v26 = vpop.f32.mrf.mxu1 }
 0xcfc   : > { %v11207_v9 = vmin.f32 %v5703_v41, 3.0  ;;  %v5697_v31 = vmul.f32 %v5695_v55, %v5654_v26  ;;  %v7753_v55 = vld [vmem:[%s11664_s4 + $0xd8] sm:$0xff] }
 0xcfd   : > { %6046 = vmatpush.msra.mxu0 %v7753_v55 }
 0xcfe   : > { %v5699_v61 = vadd.f32 %v5697_v31, %v5694_v8  ;;  %7718 = vmatmul.msk.f32.vlgmr.msra.gmra.mxu2 %vm2254_vm2, %v11207_v9  ;;  %v7764_v8 = vld [vmem:[%s11664_s4 + $0x100] sm:$0xff] }
 0xcff   : > { %6047 = vmatpush.msra.mxu0 %v7752_v14 }
 0xd00   : > { %v5702_v35 = vadd.f32 %v7919_v39, %v5699_v61 }
 0xd01   : > { %6179 = vmatpush.msrb.mxu0 %v7763_v58 }
 0xd02   : > { %v5704_v23 = vmax.f32 %v5702_v35, 0.0  ;;  %v7771_v35 = vld [vmem:[%s11664_s4 + $0x118] sm:$0xff] }
 0xd03   : > { %6180 = vmatpush.msrb.mxu0 %v7762_v47  ;;  %6211 = vmatpush.msrb.mxu1 %v7771_v35 }
 0xd04   : > { %v11211_v45 = vmin.f32 %v5704_v23, 3.0  ;;  %v7777_v23 = vld [vmem:[%s11663_s3 + $0x158] sm:$0xff] }
 0xd06   : > { %7719 = vmatmul.msk.f32.gmra.mxu2 %vm2254_vm2, %v11211_v45 }
 0xd0e   : > { %7722 = vmatmul.msk.f32.vlgmr.msrb.gmra.mxu2 %vm2254_vm2, %v11207_v9 }
 0xd16   : > { %7723 = vmatmul.msk.f32.gmra.mxu2 %vm2254_vm2, %v11211_v45 }
 0xd3d   : > { %v5771_v19 = vpop.f32.mrf.mxu3 }
 0xd45   : > { %v5774_v63 = vpop.f32.mrf.mxu3 }
 0xd4d   : > { %v5822_v11 = vpop.f32.mrf.mxu3 }
 0xd55   : > { %v5825_v62 = vpop.f32.mrf.mxu3 }
 0xd81   : > { %v5742_v33 = vpop.f32.mrf.mxu2 }
 0xd82   : > { %v5772_v21 = vadd.f32 %v5771_v19, %v5742_v33  ;;  %v7775_v19 = vld [vmem:[%s11663_s3 + $0x148] sm:$0xff] }
 0xd84   : > { %v5778_v4 = vadd.f32 %v7920_v49, %v5772_v21  ;;  %v7770_v21 = vld [vmem:[%s11664_s4 + $0x110] sm:$0xff] }
 0xd85   : > { %6212 = vmatpush.msrb.mxu1 %v7770_v21 }
 0xd86   : > { %v5780_v37 = vmax.f32 %v5778_v4, 0.0  ;;  %v5997_v4 = vld [vmem:[%s11665_s5 + $0x68] sm:$0xff] }
 0xd89   : > { %v5745_v34 = vpop.f32.mrf.mxu2 }
 0xd8a   : > { %v5775_v6 = vadd.f32 %v5774_v63, %v5745_v34  ;;  %v7774_v34 = vld [vmem:[%s11663_s3 + $0x140] sm:$0xff] }
 0xd8c   : > { %v5779_v3 = vadd.f32 %v7920_v49, %v5775_v6  ;;  %v7776_v49 = vld [vmem:[%s11663_s3 + $0x150] sm:$0xff]  ;;  %v5975_v6 = vld [vmem:[%s11665_s5 + $0x60] sm:$0xff] }
 0xd8e   : > { %v5781_v43 = vmax.f32 %v5779_v3, 0.0  ;;  %v5977_v3 = vperm.slane %v5975_v6, 0 }
 0xd90   : > { %5883 = vmatpush.msra.mxu2 %v5781_v43  ;;  %v5980_v43 = vperm.slane %v5975_v6, 1 }
 0xd91   : > { %v5799_v52 = vpop.f32.mrf.mxu2 }
 0xd92   : > { %5884 = vmatpush.msra.mxu2 %v5780_v37  ;;  %v5823_v40 = vadd.f32 %v5822_v11, %v5799_v52  ;;  %v5999_v11 = vperm.slane %v5997_v4, 0  ;;  %v6002_v37 = vperm.slane %v5997_v4, 1 }
 0xd93   : > { %7726 = vmatmul.msk.f32.vlgmr.msra.gmra.mxu2 %vm2254_vm2, %v11225_v28 }
 0xd94   : > { %v5829_v57 = vadd.f32 %v7921_v1, %v5823_v40  ;;  %6107 = vmatpush.msrb.mxu2 %v7759_v42 }
 0xd96   : > { %v5831_v54 = vmax.f32 %v5829_v57, 0.0  ;;  %6108 = vmatpush.msrb.mxu2 %v7758_v56  ;;  %v7923_v56 = vld [vmem:[%s11662_s2 + $0x19] ss:$0 sm:$0xff] }
 0xd98   : > { %6259 = vmatpush.msra.mxu2 %v7777_v23 }
 0xd99   : > { %v5802_v27 = vpop.f32.mrf.mxu2 }
 0xd9a   : > { %v5826_v46 = vadd.f32 %v5825_v62, %v5802_v27  ;;  %6260 = vmatpush.msra.mxu2 %v7776_v49  ;;  %v5985_v62 = vperm.slane %v5975_v6, 2 }
 0xd9b   : > { %7727 = vmatmul.msk.f32.gmra.mxu2 %vm2254_vm2, %v11235_v53 }
 0xd9c   : > { %v5830_v60 = vadd.f32 %v7921_v1, %v5826_v46 }
 0xd9e   : > { %v5832_v22 = vmax.f32 %v5830_v60, 0.0 }
 0xda0   : > { %5936 = vmatpush.msra.mxu3 %v5832_v22 }
 0xda2   : > { %5937 = vmatpush.msra.mxu3 %v5831_v54  ;;  %v6007_v54 = vperm.slane %v5997_v4, 2 }
 0xda3   : > { %7738 = vmatmul.msk.f32.vlgmr.msra.gmra.mxu3 %vm2254_vm2, %v11225_v28  ;;  %7728 = vmatmul.msk.f32.gmra.mxu2 %vm2254_vm2, %v11242_v15 }
 0xda4   : > { %6150 = vmatpush.msrb.mxu3 %v7765_v38 }
 0xda6   : > { %6151 = vmatpush.msrb.mxu3 %v7764_v8 }
 0xda8   : > { %6288 = vmatpush.msra.mxu3 %v7775_v19 }
 0xdaa   : > { %6289 = vmatpush.msra.mxu3 %v7774_v34 }
 0xdab   : > { %7739 = vmatmul.msk.f32.gmra.mxu3 %vm2254_vm2, %v11235_v53  ;;  %7729 = vmatmul.msk.f32.gmra.mxu2 %vm2254_vm2, %v11251_v10 }
 0xdb3   : > { %7740 = vmatmul.msk.f32.gmra.mxu3 %vm2254_vm2, %v11242_v15  ;;  %7730 = vmatmul.msk.f32.gmra.mxu2 %vm2254_vm2, %v11260_v51 }
 0xdbb   : > { %7741 = vmatmul.msk.f32.gmra.mxu3 %vm2254_vm2, %v11251_v10  ;;  %7731 = vmatmul.msk.f32.gmra.mxu2 %vm2254_vm2, %v11269_v12 }
 0xdc3   : > { %7742 = vmatmul.msk.f32.gmra.mxu3 %vm2254_vm2, %v11260_v51  ;;  %7732 = vmatmul.msk.f32.gmra.mxu2 %vm2254_vm2, %v11278_v48 }
 0xdcb   : > { %7743 = vmatmul.msk.f32.gmra.mxu3 %vm2254_vm2, %v11269_v12  ;;  %7733 = vmatmul.msk.f32.gmra.mxu2 %vm2254_vm2, %v11287_v24 }
 0xdd3   : > { %7744 = vmatmul.msk.f32.gmra.mxu3 %vm2254_vm2, %v11278_v48  ;;  %7734 = vmatmul.msk.f32.gmra.mxu2 %vm2254_vm2, %v11296_v29 }
 0xddb   : > { %7745 = vmatmul.msk.f32.gmra.mxu3 %vm2254_vm2, %v11287_v24  ;;  %7735 = vmatmul.msk.f32.gmra.mxu2 %vm2254_vm2, %v11305_v50 }
 0xde3   : > { %7746 = vmatmul.msk.f32.gmra.mxu3 %vm2254_vm2, %v11296_v29  ;;  %7736 = vmatmul.msk.f32.gmra.mxu2 %vm2254_vm2, %v11314_v59 }
 0xdeb   : > { %7747 = vmatmul.msk.f32.gmra.mxu3 %vm2254_vm2, %v11305_v50  ;;  %7737 = vmatmul.msk.f32.gmra.mxu2 %vm2254_vm2, %v11323_v44 }
 0xdf3   : > { %7748 = vmatmul.msk.f32.gmra.mxu3 %vm2254_vm2, %v11314_v59 }
 0xdfb   : > { %7749 = vmatmul.msk.f32.gmra.mxu3 %vm2254_vm2, %v11323_v44 }
 0xe16   : > { %v5886_v20 = vpop.f32.mrf.mxu2 }
 0xe17   : > { %v5978_v1 = vmul.f32 %v5977_v3, %v5886_v20  ;;  %v7922_v20 = vld [vmem:[%s11662_s2 + $0x18] ss:$0 sm:$0xff] }
 0xe1e   : > { %v11345_v25 = vpop.f32.mrf.mxu2 }
 0xe1f   : > { %v5979_v14 = vmul.f32 %v5977_v3, %v11345_v25  ;;  %v7779_v3 = vld [vmem:[%s11663_s3 + $0x168] sm:$0xff] }
 0xe26   : > { %v5939_v0 = vpop.f32.mrf.mxu3  ;;  %v5892_v32 = vpop.f32.mrf.mxu2 }
 0xe27   : > { %7756 = vmatmul.msk.f32.vlgmr.msra.gmra.mxu1 %vm2254_vm2, %v5939_v0  ;;  %v5981_v27 = vmul.f32 %v5980_v43, %v5892_v32 }
 0xe28   : > { %6351 = vmatpush.msra.mxu1 %v7779_v3 }
 0xe29   : > { %v5983_v60 = vadd.f32 %v5981_v27, %v5978_v1 }
 0xe2e   : > { %v5942_v5 = vpop.f32.mrf.mxu3  ;;  %v5895_v39 = vpop.f32.mrf.mxu2 }
 0xe2f   : > { %7757 = vmatmul.msk.f32.gmra.mxu1 %vm2254_vm2, %v5942_v5  ;;  %v5982_v42 = vmul.f32 %v5980_v43, %v5895_v39  ;;  %v7778_v43 = vld [vmem:[%s11663_s3 + $0x160] sm:$0xff] }
 0xe30   : > { %6352 = vmatpush.msra.mxu1 %v7778_v43 }
 0xe36   : > { %v5945_v13 = vpop.f32.mrf.mxu3  ;;  %v5898_v7 = vpop.f32.mrf.mxu2 }
 0xe37   : > { %7754 = vmatmul.msk.f32.vlgmr.msra.gmra.mxu0 %vm2254_vm2, %v5945_v13  ;;  %v5986_v22 = vmul.f32 %v5985_v62, %v5898_v7  ;;  %v5984_v7 = vadd.f32 %v5982_v42, %v5979_v14  ;;  %v7781_v14 = vld [vmem:[%s11663_s3 + $0x178] sm:$0xff]  ;;  %v7780_v42 = vld [vmem:[%s11663_s3 + $0x170] sm:$0xff] }
 0xe38   : > { %6322 = vmatpush.msra.mxu0 %v7781_v14 }
 0xe39   : > { %v5988_v0 = vadd.f32 %v5986_v22, %v5983_v60 }
 0xe3a   : > { %6323 = vmatpush.msra.mxu0 %v7780_v42 }
 0xe3b   : > { %v5991_v47 = vadd.f32 %v7922_v20, %v5988_v0  ;;  %v7791_v0 = vld [vmem:[%s11663_s3 + $0x188] sm:$0xff] }
 0xe3d   : > { %v5993_v8 = vmax.f32 %v5991_v47, 0.0  ;;  %v7925_v47 = vld [vmem:[%s11662_s2 + $0x1b] ss:$0 sm:$0xff] }
 0xe3e   : > { %v5948_v16 = vpop.f32.mrf.mxu3  ;;  %v5901_v2 = vpop.f32.mrf.mxu2 }
 0xe3f   : > { %7755 = vmatmul.msk.f32.gmra.mxu0 %vm2254_vm2, %v5948_v16  ;;  %v5987_v16 = vmul.f32 %v5985_v62, %v5901_v2 }
 0xe46   : > { %v5951_v41 = vpop.f32.mrf.mxu3  ;;  %v5904_v26 = vpop.f32.mrf.mxu2 }
 0xe47   : > { %7760 = vmatmul.msk.f32.vlgmr.msrb.gmra.mxu2 %vm2254_vm2, %v5951_v41  ;;  %v6000_v46 = vmul.f32 %v5999_v11, %v5904_v26 }
 0xe4e   : > { %v5954_v31 = vpop.f32.mrf.mxu3  ;;  %v5907_v61 = vpop.f32.mrf.mxu2 }
 0xe4f   : > { %7761 = vmatmul.msk.f32.gmra.mxu2 %vm2254_vm2, %v5954_v31  ;;  %v6001_v5 = vmul.f32 %v5999_v11, %v5907_v61  ;;  %v5989_v31 = vadd.f32 %v5987_v16, %v5984_v7  ;;  %v5995_v61 = vmin.f32 %v5993_v8, 3.0 }
 0xe56   : > { %v5957_v33 = vpop.f32.mrf.mxu3  ;;  %v5910_v63 = vpop.f32.mrf.mxu2 }
 0xe57   : > { %7768 = vmatmul.msk.f32.vlgmr.msrb.gmra.mxu0 %vm2254_vm2, %v5957_v33  ;;  %v6003_v57 = vmul.f32 %v6002_v37, %v5910_v63  ;;  %v5992_v33 = vadd.f32 %v7922_v20, %v5989_v31  ;;  %v7795_v20 = vld [vmem:[%s11663_s3 + $0x1a8] sm:$0xff] }
 0xe59   : > { %v6005_v18 = vadd.f32 %v6003_v57, %v6000_v46  ;;  %v5994_v2 = vmax.f32 %v5992_v33, 0.0 }
 0xe5b   : > { %v5996_v6 = vmin.f32 %v5994_v2, 3.0 }
 0xe5e   : > { %v5960_v52 = vpop.f32.mrf.mxu3  ;;  %v5913_v40 = vpop.f32.mrf.mxu2 }
 0xe5f   : > { %7769 = vmatmul.msk.f32.gmra.mxu0 %vm2254_vm2, %v5960_v52  ;;  %v6004_v58 = vmul.f32 %v6002_v37, %v5913_v40  ;;  %v7924_v40 = vld [vmem:[%s11662_s2 + $0x1a] ss:$0 sm:$0xff] }
 0xe61   : > { %v6006_v39 = vadd.f32 %v6004_v58, %v6001_v5 }
 0xe66   : > { %v5963_v17 = vpop.f32.mrf.mxu3  ;;  %v5916_v55 = vpop.f32.mrf.mxu2 }
 0xe67   : > { %7766 = vmatmul.msk.f32.vlgmr.msrb.gmra.mxu3 %vm2254_vm2, %v5963_v17  ;;  %v6008_v32 = vmul.f32 %v6007_v54, %v5916_v55 }
 0xe68   : > { %6430 = vmatpush.msrb.mxu3 %v7791_v0 }
 0xe69   : > { %v6010_v13 = vadd.f32 %v6008_v32, %v6005_v18  ;;  %v7790_v32 = vld [vmem:[%s11663_s3 + $0x180] sm:$0xff] }
 0xe6a   : > { %6431 = vmatpush.msrb.mxu3 %v7790_v32 }
 0xe6b   : > { %v6013_v25 = vadd.f32 %v7923_v56, %v6010_v13 }
 0xe6d   : > { %v6015_v38 = vmax.f32 %v6013_v25, 0.0 }
 0xe6e   : > { %v5966_v41 = vpop.f32.mrf.mxu3  ;;  %v5919_v26 = vpop.f32.mrf.mxu2 }
 0xe6f   : > { %v6017_v35 = vmin.f32 %v6015_v38, 3.0  ;;  %7767 = vmatmul.msk.f32.gmra.mxu3 %vm2254_vm2, %v5966_v41  ;;  %v6009_v23 = vmul.f32 %v6007_v54, %v5919_v26  ;;  %v7926_v26 = vld [vmem:[%s11662_s2 + $0x1c] ss:$0 sm:$0xff] }
 0xe71   : > { %v6011_v19 = vadd.f32 %v6009_v23, %v6006_v39  ;;  %7782 = vmatmul.msk.f32.vlgmr.msra.gmra.mxu2 %vm2254_vm2, %v6017_v35 }
 0xe73   : > { %v6014_v63 = vadd.f32 %v7923_v56, %v6011_v19  ;;  %v7794_v56 = vld [vmem:[%s11663_s3 + $0x1a0] sm:$0xff] }
 0xe75   : > { %v6016_v21 = vmax.f32 %v6014_v63, 0.0 }
 0xe76   : > { %v5969_v49 = vpop.f32.mrf.mxu3 }
 0xe77   : > { %v6018_v34 = vmin.f32 %v6016_v21, 3.0  ;;  %7772 = vmatmul.msk.f32.vlgmr.msrb.gmra.mxu1 %vm2254_vm2, %v5969_v49  ;;  %7784 = vmatmul.msk.f32.vlgmr.msra.gmra.mxu3 %vm2254_vm2, %v5995_v61 }
 0xe78   : > { %6481 = vmatpush.msrb.mxu1 %v7795_v20 }
 0xe79   : > { %7783 = vmatmul.msk.f32.gmra.mxu2 %vm2254_vm2, %v6018_v34 }
 0xe7a   : > { %6482 = vmatpush.msrb.mxu1 %v7794_v56  ;;  %v7928_v56 = vld [vmem:[%s11662_s2 + $0x1f] ss:$0 sm:$0xff] }
 0xe7e   : > { %v5972_v4 = vpop.f32.mrf.mxu3 }
 0xe7f   : > { %7773 = vmatmul.msk.f32.gmra.mxu1 %vm2254_vm2, %v5972_v4  ;;  %7785 = vmatmul.msk.f32.gmra.mxu3 %vm2254_vm2, %v5996_v6 }
 0xea4   : > { %v6078_v37 = vpop.f32.mrf.mxu1 }
 0xeac   : > { %v6081_v60 = vpop.f32.mrf.mxu1 }
 0xeb4   : > { %v6049_v11 = vpop.f32.mrf.mxu0 }
 0xeb5   : > { %v6079_v52 = vadd.f32 %v6078_v37, %v6049_v11  ;;  %v7797_v37 = vld [vmem:[%s11663_s3 + $0x1b8] sm:$0xff] }
 0xeb6   : > { %6458 = vmatpush.msrb.mxu0 %v7797_v37 }
 0xebc   : > { %v6052_v46 = vpop.f32.mrf.mxu0 }
 0xebd   : > { %v6082_v22 = vadd.f32 %v6081_v60, %v6052_v46 }
 0xeca   : > { %v6110_v1 = vpop.f32.mrf.mxu2 }
 0xecb   : > { %v6116_v27 = vadd.f32 %v6110_v1, %v6079_v52  ;;  %v7792_v52 = vld [vmem:[%s11663_s3 + $0x190] sm:$0xff]  ;;  %v7927_v1 = vld [vmem:[%s11662_s2 + $0x1d] ss:$0 sm:$0xff] }
 0xecd   : > { %v6119_v62 = vadd.f32 %v7924_v40, %v6116_v27 }
 0xecf   : > { %v6121_v57 = vmax.f32 %v6119_v62, 0.0 }
 0xed1   : > { %7788 = vmatmul.msk.f32.vlgmr.msra.gmra.mxu1 %vm2254_vm2, %v6121_v57 }
 0xed2   : > { %v6113_v54 = vpop.f32.mrf.mxu2 }
 0xed3   : > { %v6117_v18 = vadd.f32 %v6113_v54, %v6082_v22 }
 0xed4   : > { %v6182_v58 = vpop.f32.mrf.mxu0 }
 0xed5   : > { %v6120_v17 = vadd.f32 %v7924_v40, %v6117_v18 }
 0xed7   : > { %v6122_v55 = vmax.f32 %v6120_v17, 0.0 }
 0xed9   : > { %7789 = vmatmul.msk.f32.gmra.mxu1 %vm2254_vm2, %v6122_v55 }
 0xedc   : > { %v6185_v8 = vpop.f32.mrf.mxu0 }
 0xeea   : > { %v6153_v5 = vpop.f32.mrf.mxu3 }
 0xeeb   : > { %v6183_v7 = vadd.f32 %v6182_v58, %v6153_v5 }
 0xef2   : > { %v6156_v13 = vpop.f32.mrf.mxu3 }
 0xef3   : > { %v6186_v35 = vadd.f32 %v6185_v8, %v6156_v13 }
 0xef4   : > { %v6214_v16 = vpop.f32.mrf.mxu1  ;;  %v6262_v39 = vpop.f32.mrf.mxu2 }
 0xef5   : > { %v6220_v25 = vadd.f32 %v6214_v16, %v6183_v7 }
 0xef7   : > { %v6223_v38 = vadd.f32 %v7925_v47, %v6220_v25 }
 0xef9   : > { %v6225_v41 = vmax.f32 %v6223_v38, 0.0 }
 0xefa   : > { %v6291_v31 = vpop.f32.mrf.mxu3 }
 0xefb   : > { %v6292_v23 = vadd.f32 %v6291_v31, %v6262_v39  ;;  %7786 = vmatmul.msk.f32.vlgmr.msra.gmra.mxu0 %vm2254_vm2, %v6225_v41 }
 0xefc   : > { %v6217_v19 = vpop.f32.mrf.mxu1  ;;  %v6265_v49 = vpop.f32.mrf.mxu2 }
 0xefd   : > { %v6298_v61 = vadd.f32 %v7926_v26, %v6292_v23  ;;  %v6221_v33 = vadd.f32 %v6217_v19, %v6186_v35  ;;  %v7842_v19 = vld [vmem:[%s11664_s4 + $0x150] sm:$0xff] }
 0xeff   : > { %v6300_v63 = vmax.f32 %v6298_v61, 0.0  ;;  %v6224_v21 = vadd.f32 %v7925_v47, %v6221_v33 }
 0xf01   : > { %v6365_v2 = vadd.f32 %v6300_v63, %v11169_v36  ;;  %v6226_v34 = vmax.f32 %v6224_v21, 0.0  ;;  %v7793_v36 = vld [vmem:[%s11663_s3 + $0x198] sm:$0xff]  ;;  %v7845_v63 = vld [vmem:[%s11664_s4 + $0x168] sm:$0xff] }
 0xf02   : > { %v6294_v6 = vpop.f32.mrf.mxu3  ;;  %6401 = vmatpush.msrb.mxu2 %v7793_v36 }
 0xf03   : > { %v6295_v4 = vadd.f32 %v6294_v6, %v6265_v49  ;;  %7787 = vmatmul.msk.f32.gmra.mxu0 %vm2254_vm2, %v6226_v34  ;;  %7800 = vmatmul.msk.f32.vlgmr.msrb.gmra.mxu3 %vm2254_vm2, %v6365_v2 }
 0xf04   : > { %7804 = vmatmul.msk.f32.vlgmr.msrb.gmra.mxu1 %vm2254_vm2, %v6365_v2  ;;  %6402 = vmatpush.msrb.mxu2 %v7792_v52  ;;  %v7844_v2 = vld [vmem:[%s11664_s4 + $0x160] sm:$0xff] }
 0xf05   : > { %v6299_v3 = vadd.f32 %v7926_v26, %v6295_v4  ;;  %v7851_v4 = vld [vmem:[%s11664_s4 + $0x178] sm:$0xff] }
 0xf07   : > { %v6301_v43 = vmax.f32 %v6299_v3, 0.0 }
 0xf09   : > { %v6366_v11 = vadd.f32 %v6301_v43, %v11173_v30  ;;  %v7796_v30 = vld [vmem:[%s11663_s3 + $0x1b0] sm:$0xff] }
 0xf0a   : > { %6459 = vmatpush.msrb.mxu0 %v7796_v30 }
 0xf0b   : > { %7801 = vmatmul.msk.f32.gmra.mxu3 %vm2254_vm2, %v6366_v11 }
 0xf0c   : > { %7805 = vmatmul.msk.f32.gmra.mxu1 %vm2254_vm2, %v6366_v11  ;;  %v7850_v11 = vld [vmem:[%s11664_s4 + $0x170] sm:$0xff] }
 0xf4e   : > { %v6354_v40 = vpop.f32.mrf.mxu1 }
 0xf56   : > { %v6357_v22 = vpop.f32.mrf.mxu1 }
 0xf78   : > { %v6325_v27 = vpop.f32.mrf.mxu0 }
 0xf79   : > { %v6355_v62 = vadd.f32 %v6354_v40, %v6325_v27  ;;  %v6601_v40 = vld [vmem:[%s11665_s5 + $0x70] sm:$0xff] }
 0xf7a   : > { %v6606_v27 = vperm.slane %v6601_v40, 1 }
 0xf7b   : > { %v6361_v46 = vadd.f32 %v7927_v1, %v6355_v62 }
 0xf7d   : > { %v6363_v57 = vmax.f32 %v6361_v46, 0.0 }
 0xf7f   : > { %v6367_v60 = vadd.f32 %v6363_v57, %v11207_v9 }
 0xf80   : > { %v6328_v54 = vpop.f32.mrf.mxu0 }
 0xf81   : > { %v6358_v18 = vadd.f32 %v6357_v22, %v6328_v54  ;;  %7798 = vmatmul.msk.f32.vlgmr.msrb.gmra.mxu2 %vm2254_vm2, %v6367_v60  ;;  %7802 = vmatmul.msk.f32.vlgmr.msrb.gmra.mxu0 %vm2254_vm2, %v6367_v60  ;;  %v6484_v42 = vpop.f32.mrf.mxu1  ;;  %v6611_v22 = vperm.slane %v6601_v40, 2  ;;  %v6623_v54 = vld [vmem:[%s11665_s5 + $0x78] sm:$0xff] }
 0xf83   : > { %v6362_v17 = vadd.f32 %v7927_v1, %v6358_v18  ;;  %v6603_v1 = vperm.slane %v6601_v40, 0 }
 0xf85   : > { %v6364_v55 = vmax.f32 %v6362_v17, 0.0 }
 0xf86   : > { %v6433_v20 = vpop.f32.mrf.mxu3 }
 0xf87   : > { %v6368_v14 = vadd.f32 %v6364_v55, %v11211_v45  ;;  %v7929_v45 = vld [vmem:[%s11662_s2 + $0x1e] ss:$0 sm:$0xff]  ;;  %v6625_v55 = vperm.slane %v6623_v54, 0 }
 0xf89   : > { %7799 = vmatmul.msk.f32.gmra.mxu2 %vm2254_vm2, %v6368_v14  ;;  %7803 = vmatmul.msk.f32.gmra.mxu0 %vm2254_vm2, %v6368_v14  ;;  %v6487_v5 = vpop.f32.mrf.mxu1  ;;  %v6628_v14 = vperm.slane %v6623_v54, 1 }
 0xf8e   : > { %v6436_v39 = vpop.f32.mrf.mxu3 }
 0xffe   : > { %v6461_v0 = vpop.f32.mrf.mxu0 }
 0xfff   : > { %v6485_v9 = vadd.f32 %v6484_v42, %v6461_v0 }
0x1001   : > { %v6491_v7 = vadd.f32 %v7928_v56, %v6485_v9 }
0x1003   : > { %v6493_v41 = vmax.f32 %v6491_v7, 0.0 }
0x1004   : > { %v6404_v32 = vpop.f32.mrf.mxu2 }
0x1005   : > { %v6434_v16 = vadd.f32 %v6433_v20, %v6404_v32 }
0x1006   : > { %v6464_v58 = vpop.f32.mrf.mxu0 }
0x1007   : > { %v6488_v13 = vadd.f32 %v6487_v5, %v6464_v58  ;;  %v6440_v8 = vadd.f32 %v7929_v45, %v6434_v16  ;;  %v7855_v16 = vld [vmem:[%s11663_s3 + $0x1c8] sm:$0xff] }
0x1009   : > { %v6492_v47 = vadd.f32 %v7928_v56, %v6488_v13  ;;  %v6442_v23 = vmax.f32 %v6440_v8, 0.0  ;;  %v7930_v56 = vld [vmem:[%s11662_s2 + $0x20] ss:$0 sm:$0xff]  ;;  %v6633_v13 = vperm.slane %v6623_v54, 2 }
0x100b   : > { %v6494_v25 = vmax.f32 %v6492_v47, 0.0  ;;  %v7857_v47 = vld [vmem:[%s11663_s3 + $0x1d8] sm:$0xff] }
0x100c   : > { %v6407_v38 = vpop.f32.mrf.mxu2 }
0x100d   : > { %v6437_v26 = vadd.f32 %v6436_v39, %v6407_v38  ;;  %6562 = vmatpush.msra.mxu3 %v6494_v25 }
0x100f   : > { %v6441_v31 = vadd.f32 %v7929_v45, %v6437_v26  ;;  %6563 = vmatpush.msra.mxu3 %v6493_v41  ;;  %v7856_v41 = vld [vmem:[%s11663_s3 + $0x1d0] sm:$0xff]  ;;  %v7854_v26 = vld [vmem:[%s11663_s3 + $0x1c0] sm:$0xff] }
0x1010   : > { %7818 = vmatmul.msk.f32.vlgmr.msra.gmra.mxu3 %vm2254_vm2, %v11225_v28 }
0x1011   : > { %v6443_v35 = vmax.f32 %v6441_v31, 0.0  ;;  %v7931_v31 = vld [vmem:[%s11662_s2 + $0x21] ss:$0 sm:$0xff] }
0x1013   : > { %6509 = vmatpush.msra.mxu2 %v6443_v35 }
0x1015   : > { %6510 = vmatpush.msra.mxu2 %v6442_v23 }
0x1016   : > { %7806 = vmatmul.msk.f32.vlgmr.msra.gmra.mxu2 %vm2254_vm2, %v11225_v28  ;;  %v7831_v28 = vld [vmem:[%s11664_s4 + $0x128] sm:$0xff] }
0x1017   : > { %6701 = vmatpush.msra.mxu1 %v7831_v28 }
0x1018   : > { %7819 = vmatmul.msk.f32.gmra.mxu3 %vm2254_vm2, %v11235_v53 }
0x101e   : > { %7807 = vmatmul.msk.f32.gmra.mxu2 %vm2254_vm2, %v11235_v53  ;;  %v7830_v53 = vld [vmem:[%s11664_s4 + $0x120] sm:$0xff] }
0x101f   : > { %6702 = vmatpush.msra.mxu1 %v7830_v53 }
0x1020   : > { %7820 = vmatmul.msk.f32.gmra.mxu3 %vm2254_vm2, %v11242_v15 }
0x1021   : > { %6776 = vmatpush.msrb.mxu1 %v7845_v63 }
0x1023   : > { %6777 = vmatpush.msrb.mxu1 %v7844_v2  ;;  %v7859_v2 = vld [vmem:[%s11663_s3 + $0x1e8] sm:$0xff] }
0x1026   : > { %7808 = vmatmul.msk.f32.gmra.mxu2 %vm2254_vm2, %v11242_v15  ;;  %v7833_v15 = vld [vmem:[%s11664_s4 + $0x138] sm:$0xff] }
0x1027   : > { %6672 = vmatpush.msra.mxu0 %v7833_v15 }
0x1028   : > { %7821 = vmatmul.msk.f32.gmra.mxu3 %vm2254_vm2, %v11251_v10 }
0x102e   : > { %7809 = vmatmul.msk.f32.gmra.mxu2 %vm2254_vm2, %v11251_v10  ;;  %v7832_v10 = vld [vmem:[%s11664_s4 + $0x130] sm:$0xff] }
0x102f   : > { %6673 = vmatpush.msra.mxu0 %v7832_v10 }
0x1030   : > { %7822 = vmatmul.msk.f32.gmra.mxu3 %vm2254_vm2, %v11260_v51 }
0x1036   : > { %7810 = vmatmul.msk.f32.gmra.mxu2 %vm2254_vm2, %v11260_v51  ;;  %v7839_v51 = vld [vmem:[%s11664_s4 + $0x148] sm:$0xff] }
0x1037   : > { %6733 = vmatpush.msrb.mxu0 %v7839_v51 }
0x1038   : > { %7823 = vmatmul.msk.f32.gmra.mxu3 %vm2254_vm2, %v11269_v12 }
0x103e   : > { %7811 = vmatmul.msk.f32.gmra.mxu2 %vm2254_vm2, %v11269_v12 }
0x1040   : > { %7824 = vmatmul.msk.f32.gmra.mxu3 %vm2254_vm2, %v11278_v48 }
0x1046   : > { %7812 = vmatmul.msk.f32.gmra.mxu2 %vm2254_vm2, %v11278_v48  ;;  %v7838_v48 = vld [vmem:[%s11664_s4 + $0x140] sm:$0xff] }
0x1047   : > { %6734 = vmatpush.msrb.mxu0 %v7838_v48 }
0x1048   : > { %7825 = vmatmul.msk.f32.gmra.mxu3 %vm2254_vm2, %v11287_v24 }
0x104e   : > { %7813 = vmatmul.msk.f32.gmra.mxu2 %vm2254_vm2, %v11287_v24 }
0x1050   : > { %7826 = vmatmul.msk.f32.gmra.mxu3 %vm2254_vm2, %v11296_v29 }
0x1056   : > { %7814 = vmatmul.msk.f32.gmra.mxu2 %vm2254_vm2, %v11296_v29 }
0x1058   : > { %7827 = vmatmul.msk.f32.gmra.mxu3 %vm2254_vm2, %v11305_v50 }
0x105e   : > { %7815 = vmatmul.msk.f32.gmra.mxu2 %vm2254_vm2, %v11305_v50 }
0x1060   : > { %7828 = vmatmul.msk.f32.gmra.mxu3 %vm2254_vm2, %v11314_v59 }
0x1066   : > { %7816 = vmatmul.msk.f32.gmra.mxu2 %vm2254_vm2, %v11314_v59  ;;  %v7843_v59 = vld [vmem:[%s11664_s4 + $0x158] sm:$0xff] }
0x1068   : > { %7829 = vmatmul.msk.f32.gmra.mxu3 %vm2254_vm2, %v11323_v44 }
0x106e   : > { %7817 = vmatmul.msk.f32.gmra.mxu2 %vm2254_vm2, %v11323_v44 }
0x1093   : > { %v6565_v12 = vpop.f32.mrf.mxu3 }
0x1094   : > { %7836 = vmatmul.msk.f32.vlgmr.msra.gmra.mxu1 %vm2254_vm2, %v6565_v12 }
0x1095   : > { %6837 = vmatpush.msra.mxu1 %v7851_v4 }
0x1097   : > { %6838 = vmatpush.msra.mxu1 %v7850_v11  ;;  %v7932_v11 = vld [vmem:[%s11662_s2 + $0x22] ss:$0 sm:$0xff] }
0x1099   : > { %v6512_v24 = vpop.f32.mrf.mxu2 }
0x109a   : > { %v6604_v57 = vmul.f32 %v6603_v1, %v6512_v24 }
0x109b   : > { %v6568_v29 = vpop.f32.mrf.mxu3 }
0x109c   : > { %7837 = vmatmul.msk.f32.gmra.mxu1 %vm2254_vm2, %v6568_v29 }
0x10a1   : > { %v6515_v50 = vpop.f32.mrf.mxu2 }
0x10a2   : > { %v6605_v20 = vmul.f32 %v6603_v1, %v6515_v50 }
0x10a3   : > { %v6571_v44 = vpop.f32.mrf.mxu3 }
0x10a4   : > { %7834 = vmatmul.msk.f32.vlgmr.msra.gmra.mxu0 %vm2254_vm2, %v6571_v44 }
0x10a5   : > { %6805 = vmatpush.msra.mxu0 %v7843_v59 }
0x10a7   : > { %6806 = vmatpush.msra.mxu0 %v7842_v19 }
0x10a9   : > { %v6518_v61 = vpop.f32.mrf.mxu2 }
0x10aa   : > { %v6607_v60 = vmul.f32 %v6606_v27, %v6518_v61 }
0x10ab   : > { %v6574_v33 = vpop.f32.mrf.mxu3 }
0x10ac   : > { %7835 = vmatmul.msk.f32.gmra.mxu0 %vm2254_vm2, %v6574_v33  ;;  %v6609_v18 = vadd.f32 %v6607_v60, %v6604_v57  ;;  %v7861_v60 = vld [vmem:[%s11663_s3 + $0x1f8] sm:$0xff] }
0x10b1   : > { %v6521_v21 = vpop.f32.mrf.mxu2 }
0x10b2   : > { %v6608_v32 = vmul.f32 %v6606_v27, %v6521_v21 }
0x10b3   : > { %v6577_v49 = vpop.f32.mrf.mxu3 }
0x10b4   : > { %7840 = vmatmul.msk.f32.vlgmr.msrb.gmra.mxu0 %vm2254_vm2, %v6577_v49  ;;  %v6610_v45 = vadd.f32 %v6608_v32, %v6605_v20 }
0x10b5   : > { %6885 = vmatpush.msrb.mxu0 %v7857_v47  ;;  %v6991_v47 = vld [vmem:[%s11670_s10] sm:$0xff] }
0x10b7   : > { %6886 = vmatpush.msrb.mxu0 %v7856_v41 }
0x10b9   : > { %v6524_v34 = vpop.f32.mrf.mxu2 }
0x10ba   : > { %v6612_v17 = vmul.f32 %v6611_v22, %v6524_v34  ;;  %v7858_v34 = vld [vmem:[%s11663_s3 + $0x1e0] sm:$0xff] }
0x10bb   : > { %v6580_v6 = vpop.f32.mrf.mxu3 }
0x10bc   : > { %7841 = vmatmul.msk.f32.gmra.mxu0 %vm2254_vm2, %v6580_v6  ;;  %v6614_v9 = vadd.f32 %v6612_v17, %v6609_v18 }
0x10be   : > { %v6617_v25 = vadd.f32 %v7930_v56, %v6614_v9 }
0x10c0   : > { %v6619_v28 = vmax.f32 %v6617_v25, 0.0 }
0x10c1   : > { %v6527_v3 = vpop.f32.mrf.mxu2 }
0x10c2   : > { %v6613_v7 = vmul.f32 %v6611_v22, %v6527_v3  ;;  %v6621_v12 = vmin.f32 %v6619_v28, 3.0  ;;  %v7860_v22 = vld [vmem:[%s11663_s3 + $0x1f0] sm:$0xff] }
0x10c3   : > { %v6583_v43 = vpop.f32.mrf.mxu3 }
0x10c4   : > { %7848 = vmatmul.msk.f32.vlgmr.msra.gmra.mxu0 %vm2254_vm2, %v6583_v43  ;;  %v6615_v53 = vadd.f32 %v6613_v7, %v6610_v45  ;;  %v7934_v45 = vld [vmem:[%s11662_s2 + $0x24] ss:$0 sm:$0xff] }
0x10c5   : > { %6948 = vmatpush.msra.mxu0 %v7861_v60 }
0x10c6   : > { %v6618_v48 = vadd.f32 %v7930_v56, %v6615_v53  ;;  %v6994_v53 = vld [vmem:[%s11670_s10 + $0x18] sm:$0xff] }
0x10c7   : > { %6949 = vmatpush.msra.mxu0 %v7860_v22 }
0x10c8   : > { %v6620_v19 = vmax.f32 %v6618_v48, 0.0 }
0x10c9   : > { %v6530_v36 = vpop.f32.mrf.mxu2 }
0x10ca   : > { %v6626_v5 = vmul.f32 %v6625_v55, %v6530_v36  ;;  %v6622_v63 = vmin.f32 %v6620_v19, 3.0 }
0x10cb   : > { %v6586_v37 = vpop.f32.mrf.mxu3 }
0x10cc   : > { %7849 = vmatmul.msk.f32.gmra.mxu0 %vm2254_vm2, %v6586_v37 }
0x10d1   : > { %v6533_v52 = vpop.f32.mrf.mxu2 }
0x10d2   : > { %v6627_v23 = vmul.f32 %v6625_v55, %v6533_v52 }
0x10d3   : > { %v6589_v30 = vpop.f32.mrf.mxu3 }
0x10d4   : > { %7846 = vmatmul.msk.f32.vlgmr.msrb.gmra.mxu1 %vm2254_vm2, %v6589_v30 }
0x10d5   : > { %6914 = vmatpush.msrb.mxu1 %v7855_v16 }
0x10d7   : > { %6915 = vmatpush.msrb.mxu1 %v7854_v26 }
0x10d9   : > { %v6536_v62 = vpop.f32.mrf.mxu2 }
0x10da   : > { %v6629_v58 = vmul.f32 %v6628_v14, %v6536_v62 }
0x10db   : > { %v6592_v46 = vpop.f32.mrf.mxu3 }
0x10dc   : > { %7847 = vmatmul.msk.f32.gmra.mxu1 %vm2254_vm2, %v6592_v46  ;;  %v6631_v39 = vadd.f32 %v6629_v58, %v6626_v5 }
0x10e1   : > { %v6539_v42 = vpop.f32.mrf.mxu2 }
0x10e2   : > { %v6630_v15 = vmul.f32 %v6628_v14, %v6539_v42  ;;  %v7933_v14 = vld [vmem:[%s11662_s2 + $0x23] ss:$0 sm:$0xff] }
0x10e3   : > { %v6595_v0 = vpop.f32.mrf.mxu3 }
0x10e4   : > { %7852 = vmatmul.msk.f32.vlgmr.msra.gmra.mxu1 %vm2254_vm2, %v6595_v0  ;;  %v6632_v24 = vadd.f32 %v6630_v15, %v6627_v23  ;;  %v6993_v15 = vld [vmem:[%s11670_s10 + $0x10] sm:$0xff] }
0x10e5   : > { %6977 = vmatpush.msra.mxu1 %v7859_v2 }
0x10e7   : > { %6978 = vmatpush.msra.mxu1 %v7858_v34 }
0x10e9   : > { %v6542_v38 = vpop.f32.mrf.mxu2 }
0x10ea   : > { %v6634_v8 = vmul.f32 %v6633_v13, %v6542_v38 }
0x10eb   : > { %v6598_v35 = vpop.f32.mrf.mxu3 }
0x10ec   : > { %7853 = vmatmul.msk.f32.gmra.mxu1 %vm2254_vm2, %v6598_v35  ;;  %v6636_v10 = vadd.f32 %v6634_v8, %v6631_v39 }
0x10ee   : > { %v6639_v51 = vadd.f32 %v7931_v31, %v6636_v10 }
0x10f0   : > { %v6641_v29 = vmax.f32 %v6639_v51, 0.0  ;;  %v7935_v51 = vld [vmem:[%s11662_s2 + $0x25] ss:$0 sm:$0xff] }
0x10f1   : > { %v6545_v50 = vpop.f32.mrf.mxu2 }
0x10f2   : > { %v6643_v59 = vmin.f32 %v6641_v29, 3.0  ;;  %v6635_v44 = vmul.f32 %v6633_v13, %v6545_v50  ;;  %v6992_v13 = vld [vmem:[%s11670_s10 + $0x8] sm:$0xff] }
0x10f4   : > { %v6637_v61 = vadd.f32 %v6635_v44, %v6632_v24  ;;  %7862 = vmatmul.msk.f32.vlgmr.msrb.gmra.mxu0 %vm2254_vm2, %v6643_v59  ;;  %7864 = vmatmul.msk.f32.vlgmr.msrb.gmra.mxu1 %vm2254_vm2, %v6621_v12 }
0x10f5   : > { %7045 = vmatpush.msrb.mxu1 %v6992_v13  ;;  %7016 = vmatpush.msrb.mxu0 %v6994_v53 }
0x10f6   : > { %v6640_v33 = vadd.f32 %v7931_v31, %v6637_v61 }
0x10f7   : > { %7046 = vmatpush.msrb.mxu1 %v6991_v47  ;;  %7017 = vmatpush.msrb.mxu0 %v6993_v15 }
0x10f8   : > { %v6642_v21 = vmax.f32 %v6640_v33, 0.0 }
0x10fa   : > { %v6644_v49 = vmin.f32 %v6642_v21, 3.0 }
0x10fc   : > { %7863 = vmatmul.msk.f32.gmra.mxu0 %vm2254_vm2, %v6644_v49  ;;  %7865 = vmatmul.msk.f32.gmra.mxu1 %vm2254_vm2, %v6622_v63 }
0x1111   : > { %v6704_v3 = vpop.f32.mrf.mxu1 }
0x1119   : > { %v6707_v40 = vpop.f32.mrf.mxu1 }
0x1121   : > { %v6675_v6 = vpop.f32.mrf.mxu0 }
0x1122   : > { %v6705_v43 = vadd.f32 %v6704_v3, %v6675_v6 }
0x1129   : > { %v6678_v4 = vpop.f32.mrf.mxu0 }
0x112a   : > { %v6708_v1 = vadd.f32 %v6707_v40, %v6678_v4 }
0x1131   : > { %v6736_v36 = vpop.f32.mrf.mxu0 }
0x1132   : > { %v6742_v37 = vadd.f32 %v6736_v36, %v6705_v43 }
0x1134   : > { %v6745_v52 = vadd.f32 %v7932_v11, %v6742_v37 }
0x1136   : > { %v6747_v30 = vmax.f32 %v6745_v52, 0.0  ;;  %v6995_v52 = vld [vmem:[%s11670_s10 + $0x20] sm:$0x1] }
0x1138   : > { %7868 = vmatmul.msk.f32.vlgmr.msra.gmra.mxu1 %vm2254_vm2, %v6747_v30 }
0x1139   : > { %v6739_v27 = vpop.f32.mrf.mxu0 }
0x113a   : > { %v6743_v62 = vadd.f32 %v6739_v27, %v6708_v1 }
0x113c   : > { %v6746_v46 = vadd.f32 %v7932_v11, %v6743_v62 }
0x113e   : > { %v6748_v57 = vmax.f32 %v6746_v46, 0.0 }
0x1140   : > { %7869 = vmatmul.msk.f32.gmra.mxu1 %vm2254_vm2, %v6748_v57 }
0x1141   : > { %v6808_v17 = vpop.f32.mrf.mxu0 }
0x1149   : > { %v6811_v9 = vpop.f32.mrf.mxu0 }
0x1151   : > { %v6779_v54 = vpop.f32.mrf.mxu1 }
0x1152   : > { %v6809_v55 = vadd.f32 %v6808_v17, %v6779_v54 }
0x1159   : > { %v6782_v18 = vpop.f32.mrf.mxu1 }
0x115a   : > { %v6812_v56 = vadd.f32 %v6811_v9, %v6782_v18 }
0x1161   : > { %v6840_v42 = vpop.f32.mrf.mxu1 }
0x1162   : > { %v6846_v0 = vadd.f32 %v6840_v42, %v6809_v55 }
0x1164   : > { %v6849_v20 = vadd.f32 %v7933_v14, %v6846_v0 }
0x1166   : > { %v6851_v32 = vmax.f32 %v6849_v20, 0.0 }
0x1168   : > { %7866 = vmatmul.msk.f32.vlgmr.msra.gmra.mxu0 %vm2254_vm2, %v6851_v32 }
0x1169   : > { %v6843_v5 = vpop.f32.mrf.mxu1 }
0x116a   : > { %v6847_v58 = vadd.f32 %v6843_v5, %v6812_v56 }
0x116c   : > { %v6850_v7 = vadd.f32 %v7933_v14, %v6847_v58 }
0x116e   : > { %v6852_v16 = vmax.f32 %v6850_v7, 0.0 }
0x1170   : > { %7867 = vmatmul.msk.f32.gmra.mxu0 %vm2254_vm2, %v6852_v16 }
0x1171   : > { %v6888_v25 = vpop.f32.mrf.mxu0  ;;  %v6917_v39 = vpop.f32.mrf.mxu1 }
0x1172   : > { %v6918_v38 = vadd.f32 %v6917_v39, %v6888_v25 }
0x1174   : > { %v6924_v41 = vadd.f32 %v7934_v45, %v6918_v38 }
0x1176   : > { %v6926_v26 = vmax.f32 %v6924_v41, 0.0 }
0x1178   : > { %7872 = vmatmul.msk.f32.vlgmr.msrb.gmra.mxu1 %vm2254_vm2, %v6926_v26 }
0x1179   : > { %v6891_v8 = vpop.f32.mrf.mxu0  ;;  %v6920_v31 = vpop.f32.mrf.mxu1 }
0x117a   : > { %v6921_v35 = vadd.f32 %v6920_v31, %v6891_v8 }
0x117c   : > { %v6925_v23 = vadd.f32 %v7934_v45, %v6921_v35 }
0x117e   : > { %v6927_v28 = vmax.f32 %v6925_v23, 0.0 }
0x1180   : > { %7873 = vmatmul.msk.f32.gmra.mxu1 %vm2254_vm2, %v6927_v28 }
0x11b5   : > { %v6980_v10 = vpop.f32.mrf.mxu1 }
0x11bd   : > { %v6983_v59 = vpop.f32.mrf.mxu1 }
0x11e5   : > { %v6951_v12 = vpop.f32.mrf.mxu0 }
0x11e6   : > { %v6981_v48 = vadd.f32 %v6980_v10, %v6951_v12 }
0x11e8   : > { %v6987_v24 = vadd.f32 %v7935_v51, %v6981_v48 }
0x11ea   : > { %v6989_v29 = vmax.f32 %v6987_v24, 0.0 }
0x11ec   : > { %7870 = vmatmul.msk.f32.vlgmr.msrb.gmra.mxu0 %vm2254_vm2, %v6989_v29 }
0x11ed   : > { %v6954_v50 = vpop.f32.mrf.mxu0 }
0x11ee   : > { %v6984_v44 = vadd.f32 %v6983_v59, %v6954_v50 }
0x11f0   : > { %v6988_v19 = vadd.f32 %v7935_v51, %v6984_v44 }
0x11f2   : > { %v6990_v61 = vmax.f32 %v6988_v19, 0.0 }
0x11f4   : > { %7871 = vmatmul.msk.f32.gmra.mxu0 %vm2254_vm2, %v6990_v61 }
0x11f5   : > { %v7048_v33 = vpop.f32.mrf.mxu1 }
0x11fd   : > { %v7051_v49 = vpop.f32.mrf.mxu1 }
0x1269   : > { %v7019_v63 = vpop.f32.mrf.mxu0 }
0x126a   : > { %v7049_v2 = vadd.f32 %v7048_v33, %v7019_v63 }
0x1271   : > { %v7022_v21 = vpop.f32.mrf.mxu0 }
0x1272   : > { %v7052_v34 = vadd.f32 %v7051_v49, %v7022_v21 }
0x1274   : > { %v7054_v6 = vadd.f32 %v7052_v34, %v7049_v2 }
0x1276   : > { %v7055_v4 = vrot.slane %v7054_v6, 4 }
0x1278   : > { %v7056_v3 = vadd.f32 %v7055_v4, %v7054_v6 }
0x127a   : > { %v7057_v43 = vrot.slane %v7056_v3, 2 }
0x127c   : > { %v7058_v11 = vadd.f32 %v7057_v43, %v7056_v3 }
0x127e   : > { %v7059_v36 = vrot.slane %v7058_v11, 1 }
0x1280   : > { %v7060_v37 = vadd.f32 %v7059_v36, %v7058_v11 }
0x1282   : > { %v7061_v30 = vmul.f32 0.0625, %v7060_v37 }
0x1284   : > { %v7062_v40 = vadd.f32 %v7061_v30, %v6995_v52 }
0x1286   : > { %v7063_v1 = vperm.slane %v7062_v40, 0 }
0x1288   : > { %7064 = vst [vmem:[%s401_s27] sm:$0xff] %v7063_v1 }
0x1289 PF: > { %s22_s17 = sadd.s32 1, %s8026_s17  }
0x128a   : > { %p19_p7 = scmp.ge.s32.totalorder %s22_s17, 4  }
0x128c   :  { %21 = sbr.rel (!%p19_p7) target bundleno = 1 (0x1), region = 138 }
0x1291   :  { %7084 = vsyncpa [#allocation3], 1 }
0x1292   :  { %7086 = vsyncpa [#allocation3 + $0x1], 1 }

</bundles_post_ra>
